<compile_context>
chip_gen: v7x
topology: tpu7x:2x2x1
jax: 0.10.0
libtpu: 0.0.40
codegen_flags: <defaults>
</compile_context>

<pallas_src>
import functools

import numpy as np

import jax
import jax.numpy as jnp
from jax import lax
from jax.experimental import pallas as pl
from jax.experimental.pallas import tpu as pltpu


_GRID = 14                  # pooled spatial grid (14 x 14)
_NPOS = _GRID * _GRID       # 196 output positions
_PAD = 16                   # top padding rows in the shift scratch
_BOT = 20                   # bottom padding rows
_SROWS = _PAD + _NPOS + _BOT  # 232 scratch rows (zeros above/below the data)

_CONV1_TAPS = ((-1, -1), (-1, 0), (0, -1), (0, 0))                   # 2x2 block conv
_CONV2_TAPS = tuple((i, j) for i in (-1, 0, 1) for j in (-1, 0, 1))  # 3x3 block conv


# ---------------------------------------------------------------------------
# Fused kernel: conv1 + ReLU + conv2 + ReLU + 2x2 avg-pool + bridge + mean
# ---------------------------------------------------------------------------
def _encoder_bridge_kernel(x_ref, w1_ref, b1_ref, w2_ref, b2_ref, wpb_ref,
                           bpb_ref, out_ref, hid_ref, sx_ref, sa_ref,
                           *, items_per_step):
    # x_ref   : (Bt, 196, 48)   space-to-depth input rows for this block
    # w1_ref  : (192, 32)       conv1, 4 taps concatenated along K
    # w2_ref  : (288, 64)       conv2, 9 taps concatenated along K
    # wpb_ref : (64, 128)       fused 2x2-avg-pool + bridge Linear
    # out_ref : (Bt, 196, 128)  bridged encoder output (lane dense)
    # hid_ref : (Bt, 1, 128)    encoder_hidden = mean over the 196 positions
    # sx_ref  : (232, 48)       zero-padded scratch holding the input rows
    # sa_ref  : (232, 32)       zero-padded scratch holding conv1 activations

    cx = sx_ref.shape[1]
    ca = sa_ref.shape[1]

    # Zero only the pad bands (the data band is fully overwritten per item).
    # Done every grid step: under "parallel" semantics each core has its own
    # scratch, so gating on program_id would leave one core uninitialised.
    sx_ref[pl.ds(0, _PAD), :] = jnp.zeros((_PAD, cx), jnp.float32)
    sx_ref[pl.ds(_PAD + _NPOS, _BOT), :] = jnp.zeros((_BOT, cx), jnp.float32)
    sa_ref[pl.ds(0, _PAD), :] = jnp.zeros((_PAD, ca), jnp.float32)
    sa_ref[pl.ds(_PAD + _NPOS, _BOT), :] = jnp.zeros((_BOT, ca), jnp.float32)

    # Column-edge masks (function of j = pos % 14 only).  Row-edge (dI) cases
    # are already handled by the zero pad bands of the shift scratches.
    j = lax.broadcasted_iota(jnp.int32, (_NPOS, 1), 0) % _GRID
    m_left = (j >= 1).astype(jnp.float32)           # needed for dJ = -1 taps
    m_right = (j <= _GRID - 2).astype(jnp.float32)  # needed for dJ = +1 taps

    def shifted_conv(src_ref, taps, wcat, bias_row):
        # Stage masked, shifted rows and fuse all taps into ONE wide-K matmul.
        pieces = []
        for dr, dc in taps:
            shift = _GRID * dr + dc                        # static python int
            rows = src_ref[pl.ds(_PAD + shift, _NPOS), :]  # shifted activations
            if dc == -1:
                rows = rows * m_left                       # mask the INPUT rows
            elif dc == 1:
                rows = rows * m_right
            pieces.append(rows)
        wide = jnp.concatenate(pieces, axis=-1)            # (196, taps*Cin)
        acc = jnp.dot(wide, wcat, preferred_element_type=jnp.float32)
        return jnp.maximum(acc + bias_row, 0.0)

    w1 = w1_ref[...]
    w2 = w2_ref[...]
    b1 = b1_ref[...]
    b2 = b2_ref[...]
    wpb = wpb_ref[...]
    bpb = bpb_ref[...]

    for t in range(items_per_step):                        # static unroll
        sx_ref[pl.ds(_PAD, _NPOS), :] = x_ref[t]
        a1 = shifted_conv(sx_ref, _CONV1_TAPS, w1, b1)     # (196, 32)
        sa_ref[pl.ds(_PAD, _NPOS), :] = a1
        a2 = shifted_conv(sa_ref, _CONV2_TAPS, w2, b2)     # (196, 64)

        # encoder_hidden before the bridge: pool+bridge is linear, so
        # mean(a2 @ Wpb + b) == mean(a2) @ Wpb + b (reduces 64, not 128 lanes).
        hid_ref[t] = jnp.dot(jnp.mean(a2, axis=0, keepdims=True), wpb,
                             preferred_element_type=jnp.float32) + bpb
        # pool(2x2 avg) + bridge Linear folded into one lane-dense matmul.
        out_ref[t] = jnp.dot(a2, wpb,
                             preferred_element_type=jnp.float32) + bpb


# ---------------------------------------------------------------------------
# Host-side glue (tiny, runs on the raw input / once on the weights)
# ---------------------------------------------------------------------------
def _block_layout(x_nchw):
    """(B, C, 56, 56) NCHW -> (B, 196, 16*C) space-to-depth rows (pure permute)."""
    B, C, H, W = x_nchw.shape
    assert H == 4 * _GRID and W == 4 * _GRID, "demo backbone expects 56x56 images"
    x = jnp.transpose(x_nchw, (0, 2, 3, 1))               # (B, H, W, C)
    x = x.reshape(B, _GRID, 4, _GRID, 4, C)
    x = jnp.transpose(x, (0, 1, 3, 2, 4, 5))              # (B, 14, 14, 4, 4, C)
    return x.reshape(B, _NPOS, 16 * C).astype(jnp.float32)


def prepare_kernel_params(params, hidden_size):
    """One-off host repack of conv/bridge weights into the wide-K layout."""
    w1 = np.asarray(params["w1"], np.float32)   # (C1, 3, 3, 3)  OIHW
    b1 = np.asarray(params["b1"], np.float32)
    w2 = np.asarray(params["w2"], np.float32)   # (C2, C1, 3, 3) OIHW
    b2 = np.asarray(params["b2"], np.float32)
    wb = np.asarray(params["wb"], np.float32)   # (hidden, C2)   torch Linear
    bb = np.asarray(params["bb"], np.float32)   # (hidden,)
    c1, cin = w1.shape[0], w1.shape[1]
    c2 = w2.shape[0]

    # conv1 (3x3, s2, p1 on 56x56) == 2x2 block conv over the 14x14 grid of
    # 4x4 input blocks; scatter the 3x3 weights into the 4 tap matrices.
    w1l = np.zeros((len(_CONV1_TAPS), 16 * cin, 4 * c1), np.float32)
    for a in range(2):
        for b in range(2):
            for di in range(3):
                for dj in range(3):
                    dI, u = divmod(2 * a + di - 1, 4)
                    dJ, v = divmod(2 * b + dj - 1, 4)
                    t = _CONV1_TAPS.index((dI, dJ))
                    r0 = (4 * u + v) * cin
                    c0 = (2 * a + b) * c1
                    w1l[t, r0:r0 + cin, c0:c0 + c1] = w1[:, :, di, dj].T
    w1cat = w1l.reshape(len(_CONV1_TAPS) * 16 * cin, 4 * c1)     # (192, 32)
    b1l = np.tile(b1, 4).reshape(1, 4 * c1)

    # conv2 (3x3, s1, p1 on 28x28) == 3x3 block conv over 2x2 feature blocks.
    w2l = np.zeros((len(_CONV2_TAPS), 4 * c1, 4 * c2), np.float32)
    for a in range(2):
        for b in range(2):
            for di in range(3):
                for dj in range(3):
                    dI, ap = divmod(a + di - 1, 2)
                    dJ, bp = divmod(b + dj - 1, 2)
                    t = _CONV2_TAPS.index((dI, dJ))
                    r0 = (2 * ap + bp) * c1
                    c0 = (2 * a + b) * c2
                    w2l[t, r0:r0 + c1, c0:c0 + c2] = w2[:, :, di, dj].T
    w2cat = w2l.reshape(len(_CONV2_TAPS) * 4 * c1, 4 * c2)       # (288, 64)
    b2l = np.tile(b2, 4).reshape(1, 4 * c2)

    # Fused 2x2 average pool + bridge Linear (both linear; ReLU sits before).
    wpb = 0.25 * np.tile(wb.T, (4, 1))                    # (4*C2, hidden)
    bpb = bb.reshape(1, hidden_size)

    return {"w1": jnp.asarray(w1cat), "b1": jnp.asarray(b1l),
            "w2": jnp.asarray(w2cat), "b2": jnp.asarray(b2l),
            "wpb": jnp.asarray(wpb), "bpb": jnp.asarray(bpb)}


@functools.partial(jax.jit, static_argnames=("items_per_step",))
def image2caption_forward(x_nchw, kparams, *, items_per_step=2):
    """Encoder -> dropout(p=0) -> bridge -> (encoder_output, encoder_hidden).
    Single fused Pallas kernel; `items_per_step` images per (parallel) grid
    step to amortise the fixed per-step pipeline overhead."""
    xb = _block_layout(x_nchw)                            # (B, 196, 48)
    B = xb.shape[0]
    Bt = items_per_step if B % items_per_step == 0 else 1
    hidden = kparams["wpb"].shape[1]

    kernel = functools.partial(_encoder_bridge_kernel, items_per_step=Bt)
    out, hid = pl.pallas_call(
        kernel,
        out_shape=(jax.ShapeDtypeStruct((B, _NPOS, hidden), jnp.float32),
                   jax.ShapeDtypeStruct((B, 1, hidden), jnp.float32)),
        grid=(B // Bt,),
        in_specs=[
            pl.BlockSpec((Bt, _NPOS, xb.shape[2]), lambda b: (b, 0, 0)),
            pl.BlockSpec(kparams["w1"].shape, lambda b: (0, 0)),
            pl.BlockSpec(kparams["b1"].shape, lambda b: (0, 0)),
            pl.BlockSpec(kparams["w2"].shape, lambda b: (0, 0)),
            pl.BlockSpec(kparams["b2"].shape, lambda b: (0, 0)),
            pl.BlockSpec(kparams["wpb"].shape, lambda b: (0, 0)),
            pl.BlockSpec(kparams["bpb"].shape, lambda b: (0, 0)),
        ],
        out_specs=(
            pl.BlockSpec((Bt, _NPOS, hidden), lambda b: (b, 0, 0)),
            pl.BlockSpec((Bt, 1, hidden), lambda b: (b, 0, 0)),
        ),
        scratch_shapes=[
            pltpu.VMEM((_SROWS, xb.shape[2]), jnp.float32),
            pltpu.VMEM((_SROWS, kparams["b1"].shape[1]), jnp.float32),
        ],
        compiler_params=pltpu.CompilerParams(
            dimension_semantics=("parallel",)),
    )(xb, kparams["w1"], kparams["b1"], kparams["w2"], kparams["b2"],
      kparams["wpb"], kparams["bpb"])
    return out, hid[:, 0, :]


# ---------------------------------------------------------------------------
# Pure-JAX reference (standard convs / pool / Linear) for the correctness check
# ---------------------------------------------------------------------------
def _reference_forward(x_nchw, params):
    dn = ("NCHW", "OIHW", "NCHW")
    hp = jax.lax.Precision.HIGHEST
    y = jax.lax.conv_general_dilated(x_nchw, params["w1"], (2, 2),
                                     ((1, 1), (1, 1)), dimension_numbers=dn,
                                     precision=hp)
    y = jax.nn.relu(y + params["b1"][None, :, None, None])
    y = jax.lax.conv_general_dilated(y, params["w2"], (1, 1),
                                     ((1, 1), (1, 1)), dimension_numbers=dn,
                                     precision=hp)
    y = jax.nn.relu(y + params["b2"][None, :, None, None])
    B, C, H, W = y.shape
    y = y.reshape(B, C, _GRID, H // _GRID, _GRID, W // _GRID).mean(axis=(3, 5))
    feats = y.reshape(B, C, _NPOS).transpose(0, 2, 1)      # encoder out (B,196,C)
    # dropout_after_encoder: p = 0 -> identity
    bridged = jnp.einsum("bpc,hc->bph", feats, params["wb"],
                         precision=hp) + params["bb"]
    return bridged, bridged.mean(axis=1)


if __name__ == "__main__":
    key = jax.random.PRNGKey(0)
    kx, k1, k2, k3, k4, k5, k6 = jax.random.split(key, 7)

    B, IMG, HIDDEN = 4, 56, 128   # small shapes; module default is 224x224 / 512
    x = jax.random.normal(kx, (B, 3, IMG, IMG), jnp.float32)
    params = {
        "w1": 0.1 * jax.random.normal(k1, (8, 3, 3, 3), jnp.float32),    # OIHW
        "b1": 0.1 * jax.random.normal(k2, (8,), jnp.float32),
        "w2": 0.1 * jax.random.normal(k3, (16, 8, 3, 3), jnp.float32),   # OIHW
        "b2": 0.1 * jax.random.normal(k4, (16,), jnp.float32),
        "wb": 0.1 * jax.random.normal(k5, (HIDDEN, 16), jnp.float32),    # Linear
        "bb": 0.1 * jax.random.normal(k6, (HIDDEN,), jnp.float32),
    }
    kparams = prepare_kernel_params(params, HIDDEN)

    enc_out, enc_hidden = image2caption_forward(x, kparams, items_per_step=2)
    jax.block_until_ready((enc_out, enc_hidden))
    assert enc_out.shape == (B, _NPOS, HIDDEN), enc_out.shape
    assert enc_hidden.shape == (B, HIDDEN), enc_hidden.shape

    ref_out, ref_hidden = _reference_forward(x, params)
    np.testing.assert_allclose(np.asarray(enc_out), np.asarray(ref_out),
                               rtol=2e-3, atol=2e-3)
    np.testing.assert_allclose(np.asarray(enc_hidden), np.asarray(ref_hidden),
                               rtol=2e-3, atol=2e-3)

    print("KERNEL_OK")
</pallas_src>

<mosaic_0001>
module attributes {stable_mosaic.version = 11 : i64} {
  func.func @_encoder_bridge_kernel(%arg0: i32, %arg1: memref<2x196x48xf32, #tpu.memory_space<vmem>>, %arg2: memref<192x32xf32, #tpu.memory_space<vmem>>, %arg3: memref<1x32xf32, #tpu.memory_space<vmem>>, %arg4: memref<288x64xf32, #tpu.memory_space<vmem>>, %arg5: memref<1x64xf32, #tpu.memory_space<vmem>>, %arg6: memref<64x128xf32, #tpu.memory_space<vmem>>, %arg7: memref<1x128xf32, #tpu.memory_space<vmem>>, %arg8: memref<2x196x128xf32, #tpu.memory_space<vmem>>, %arg9: memref<2x1x128xf32, #tpu.memory_space<vmem>>, %arg10: memref<232x48xf32, #tpu.memory_space<vmem>>, %arg11: memref<232x32xf32, #tpu.memory_space<vmem>>) attributes {dimension_semantics = [#tpu.dimension_semantics<parallel>], iteration_bounds = array<i64: 2>, scalar_prefetch = 0 : i64, scratch_operands = 2 : i64, tpu.core_type = #tpu.core_type<tc>, window_params = [{transform_indices = @transform_0, window_bounds = array<i64: 2, 196, 48>}, {pipeline_mode = #tpu.pipeline_mode<synchronous>, transform_indices = @transform_1, window_bounds = array<i64: 192, 32>}, {pipeline_mode = #tpu.pipeline_mode<synchronous>, transform_indices = @transform_2, window_bounds = array<i64: 1, 32>}, {pipeline_mode = #tpu.pipeline_mode<synchronous>, transform_indices = @transform_3, window_bounds = array<i64: 288, 64>}, {pipeline_mode = #tpu.pipeline_mode<synchronous>, transform_indices = @transform_4, window_bounds = array<i64: 1, 64>}, {pipeline_mode = #tpu.pipeline_mode<synchronous>, transform_indices = @transform_5, window_bounds = array<i64: 64, 128>}, {pipeline_mode = #tpu.pipeline_mode<synchronous>, transform_indices = @transform_6, window_bounds = array<i64: 1, 128>}, {transform_indices = @transform_7, window_bounds = array<i64: 2, 196, 128>}, {transform_indices = @transform_8, window_bounds = array<i64: 2, 1, 128>}]} {
    %cst = arith.constant 0.000000e+00 : f32
    %0 = vector.broadcast %cst : f32 to vector<16x48xf32>
    %c0 = arith.constant 0 : index
    %c0_0 = arith.constant 0 : index
    %1 = vector.load %arg10[%c0, %c0_0] : memref<232x48xf32, #tpu.memory_space<vmem>>, vector<16x48xf32>
    tpu.vector_store %arg10[%c0, %c0_0], %0 {strides = array<i32>} : memref<232x48xf32, #tpu.memory_space<vmem>>, vector<16x48xf32>,
    %cst_1 = arith.constant 0.000000e+00 : f32
    %2 = vector.broadcast %cst_1 : f32 to vector<20x48xf32>
    %c212 = arith.constant 212 : index
    %c0_2 = arith.constant 0 : index
    %3 = vector.load %arg10[%c212, %c0_2] : memref<232x48xf32, #tpu.memory_space<vmem>>, vector<20x48xf32>
    tpu.vector_store %arg10[%c212, %c0_2], %2 {strides = array<i32>} : memref<232x48xf32, #tpu.memory_space<vmem>>, vector<20x48xf32>,
    %cst_3 = arith.constant 0.000000e+00 : f32
    %4 = vector.broadcast %cst_3 : f32 to vector<16x32xf32>
    %c0_4 = arith.constant 0 : index
    %c0_5 = arith.constant 0 : index
    %5 = vector.load %arg11[%c0_4, %c0_5] : memref<232x32xf32, #tpu.memory_space<vmem>>, vector<16x32xf32>
    tpu.vector_store %arg11[%c0_4, %c0_5], %4 {strides = array<i32>} : memref<232x32xf32, #tpu.memory_space<vmem>>, vector<16x32xf32>,
    %cst_6 = arith.constant 0.000000e+00 : f32
    %6 = vector.broadcast %cst_6 : f32 to vector<20x32xf32>
    %c212_7 = arith.constant 212 : index
    %c0_8 = arith.constant 0 : index
    %7 = vector.load %arg11[%c212_7, %c0_8] : memref<232x32xf32, #tpu.memory_space<vmem>>, vector<20x32xf32>
    tpu.vector_store %arg11[%c212_7, %c0_8], %6 {strides = array<i32>} : memref<232x32xf32, #tpu.memory_space<vmem>>, vector<20x32xf32>,
    %8 = tpu.iota {dimensions = array<i32: 0>} : vector<196x1xi32>
    %c14_i32 = arith.constant 14 : i32
    %c0_i32 = arith.constant 0 : i32
    %9 = arith.cmpi eq, %c14_i32, %c0_i32 : i32
    %c1_i32 = arith.constant 1 : i32
    %10 = arith.select %9, %c1_i32, %c14_i32 : i32
    %11 = vector.broadcast %10 : i32 to vector<196x1xi32>
    %12 = arith.remsi %8, %11 : vector<196x1xi32>
    %c0_i32_9 = arith.constant 0 : i32
    %13 = vector.broadcast %c0_i32_9 : i32 to vector<196x1xi32>
    %14 = arith.cmpi ne, %12, %13 : vector<196x1xi32>
    %c0_i32_10 = arith.constant 0 : i32
    %15 = vector.broadcast %c0_i32_10 : i32 to vector<196x1xi32>
    %16 = arith.cmpi slt, %12, %15 : vector<196x1xi32>
    %c0_i32_11 = arith.constant 0 : i32
    %17 = arith.cmpi slt, %10, %c0_i32_11 : i32
    %18 = vector.broadcast %17 : i1 to vector<196x1xi1>
    %19 = vector.broadcast %18 : vector<196x1xi1> to vector<196x1xi1>
    %20 = arith.xori %16, %19 : vector<196x1xi1>
    %21 = arith.andi %20, %14 : vector<196x1xi1>
    %22 = vector.broadcast %10 : i32 to vector<196x1xi32>
    %23 = arith.addi %12, %22 : vector<196x1xi32>
    %24 = arith.select %21, %23, %12 : vector<196x1xi1>, vector<196x1xi32>
    %c1_i32_12 = arith.constant 1 : i32
    %25 = vector.broadcast %c1_i32_12 : i32 to vector<196x1xi32>
    %26 = arith.cmpi sge, %24, %25 : vector<196x1xi32>
    %27 = arith.extui %26 : vector<196x1xi1> to vector<196x1xi32>
    %28 = arith.sitofp %27 : vector<196x1xi32> to vector<196x1xf32>
    %c12_i32 = arith.constant 12 : i32
    %29 = vector.broadcast %c12_i32 : i32 to vector<196x1xi32>
    %30 = arith.cmpi sle, %24, %29 : vector<196x1xi32>
    %31 = arith.extui %30 : vector<196x1xi1> to vector<196x1xi32>
    %32 = arith.sitofp %31 : vector<196x1xi32> to vector<196x1xf32>
    %c0_13 = arith.constant 0 : index
    %c0_14 = arith.constant 0 : index
    %33 = vector.load %arg2[%c0_13, %c0_14] : memref<192x32xf32, #tpu.memory_space<vmem>>, vector<192x32xf32>
    %c0_15 = arith.constant 0 : index
    %c0_16 = arith.constant 0 : index
    %34 = vector.load %arg4[%c0_15, %c0_16] : memref<288x64xf32, #tpu.memory_space<vmem>>, vector<288x64xf32>
    %c0_17 = arith.constant 0 : index
    %c0_18 = arith.constant 0 : index
    %35 = vector.load %arg3[%c0_17, %c0_18] : memref<1x32xf32, #tpu.memory_space<vmem>>, vector<1x32xf32>
    %c0_19 = arith.constant 0 : index
    %c0_20 = arith.constant 0 : index
    %36 = vector.load %arg5[%c0_19, %c0_20] : memref<1x64xf32, #tpu.memory_space<vmem>>, vector<1x64xf32>
    %c0_21 = arith.constant 0 : index
    %c0_22 = arith.constant 0 : index
    %37 = vector.load %arg6[%c0_21, %c0_22] : memref<64x128xf32, #tpu.memory_space<vmem>>, vector<64x128xf32>
    %c0_23 = arith.constant 0 : index
    %c0_24 = arith.constant 0 : index
    %38 = vector.load %arg7[%c0_23, %c0_24] : memref<1x128xf32, #tpu.memory_space<vmem>>, vector<1x128xf32>
    %c0_25 = arith.constant 0 : index
    %c0_26 = arith.constant 0 : index
    %c0_27 = arith.constant 0 : index
    %39 = vector.load %arg1[%c0_25, %c0_26, %c0_27] : memref<2x196x48xf32, #tpu.memory_space<vmem>>, vector<1x196x48xf32>
    %40 = vector.shape_cast %39 : vector<1x196x48xf32> to vector<196x48xf32>
    %c16 = arith.constant 16 : index
    %c0_28 = arith.constant 0 : index
    %41 = vector.load %arg10[%c16, %c0_28] : memref<232x48xf32, #tpu.memory_space<vmem>>, vector<196x48xf32>
    tpu.vector_store %arg10[%c16, %c0_28], %40 {strides = array<i32>} : memref<232x48xf32, #tpu.memory_space<vmem>>, vector<196x48xf32>,
    %c1 = arith.constant 1 : index
    %c0_29 = arith.constant 0 : index
    %42 = vector.load %arg10[%c1, %c0_29] : memref<232x48xf32, #tpu.memory_space<vmem>>, vector<196x48xf32>
    %43 = vector.broadcast %28 : vector<196x1xf32> to vector<196x48xf32>
    %44 = arith.mulf %42, %43 : vector<196x48xf32>
    %c2 = arith.constant 2 : index
    %c0_30 = arith.constant 0 : index
    %45 = vector.load %arg10[%c2, %c0_30] : memref<232x48xf32, #tpu.memory_space<vmem>>, vector<196x48xf32>
    %c15 = arith.constant 15 : index
    %c0_31 = arith.constant 0 : index
    %46 = vector.load %arg10[%c15, %c0_31] : memref<232x48xf32, #tpu.memory_space<vmem>>, vector<196x48xf32>
    %47 = vector.broadcast %28 : vector<196x1xf32> to vector<196x48xf32>
    %48 = arith.mulf %46, %47 : vector<196x48xf32>
    %c16_32 = arith.constant 16 : index
    %c0_33 = arith.constant 0 : index
    %49 = vector.load %arg10[%c16_32, %c0_33] : memref<232x48xf32, #tpu.memory_space<vmem>>, vector<196x48xf32>
    %50 = tpu.concatenate %44, %45, %48, %49 in 1 : vector<196x48xf32>, vector<196x48xf32>, vector<196x48xf32>, vector<196x48xf32> -> vector<196x192xf32>
    %cst_34 = arith.constant dense<0.000000e+00> : vector<196x32xf32>
    %51 = tpu.matmul %50, %33, %cst_34 {dimension_numbers = #tpu.dot_dimension_numbers<[1], [0], [0], [1], [0, 0, 1, 1], [], []>} : vector<196x192xf32>, vector<192x32xf32>, vector<196x32xf32> -> vector<196x32xf32>
    %52 = vector.broadcast %35 : vector<1x32xf32> to vector<196x32xf32>
    %53 = arith.addf %51, %52 : vector<196x32xf32>
    %cst_35 = arith.constant 0.000000e+00 : f32
    %54 = vector.broadcast %cst_35 : f32 to vector<196x32xf32>
    %55 = arith.maximumf %53, %54 : vector<196x32xf32>
    %c16_36 = arith.constant 16 : index
    %c0_37 = arith.constant 0 : index
    %56 = vector.load %arg11[%c16_36, %c0_37] : memref<232x32xf32, #tpu.memory_space<vmem>>, vector<196x32xf32>
    tpu.vector_store %arg11[%c16_36, %c0_37], %55 {strides = array<i32>} : memref<232x32xf32, #tpu.memory_space<vmem>>, vector<196x32xf32>,
    %c1_38 = arith.constant 1 : index
    %c0_39 = arith.constant 0 : index
    %57 = vector.load %arg11[%c1_38, %c0_39] : memref<232x32xf32, #tpu.memory_space<vmem>>, vector<196x32xf32>
    %58 = vector.broadcast %28 : vector<196x1xf32> to vector<196x32xf32>
    %59 = arith.mulf %57, %58 : vector<196x32xf32>
    %c2_40 = arith.constant 2 : index
    %c0_41 = arith.constant 0 : index
    %60 = vector.load %arg11[%c2_40, %c0_41] : memref<232x32xf32, #tpu.memory_space<vmem>>, vector<196x32xf32>
    %c3 = arith.constant 3 : index
    %c0_42 = arith.constant 0 : index
    %61 = vector.load %arg11[%c3, %c0_42] : memref<232x32xf32, #tpu.memory_space<vmem>>, vector<196x32xf32>
    %62 = vector.broadcast %32 : vector<196x1xf32> to vector<196x32xf32>
    %63 = arith.mulf %61, %62 : vector<196x32xf32>
    %c15_43 = arith.constant 15 : index
    %c0_44 = arith.constant 0 : index
    %64 = vector.load %arg11[%c15_43, %c0_44] : memref<232x32xf32, #tpu.memory_space<vmem>>, vector<196x32xf32>
    %65 = vector.broadcast %28 : vector<196x1xf32> to vector<196x32xf32>
    %66 = arith.mulf %64, %65 : vector<196x32xf32>
    %c16_45 = arith.constant 16 : index
    %c0_46 = arith.constant 0 : index
    %67 = vector.load %arg11[%c16_45, %c0_46] : memref<232x32xf32, #tpu.memory_space<vmem>>, vector<196x32xf32>
    %c17 = arith.constant 17 : index
    %c0_47 = arith.constant 0 : index
    %68 = vector.load %arg11[%c17, %c0_47] : memref<232x32xf32, #tpu.memory_space<vmem>>, vector<196x32xf32>
    %69 = vector.broadcast %32 : vector<196x1xf32> to vector<196x32xf32>
    %70 = arith.mulf %68, %69 : vector<196x32xf32>
    %c29 = arith.constant 29 : index
    %c0_48 = arith.constant 0 : index
    %71 = vector.load %arg11[%c29, %c0_48] : memref<232x32xf32, #tpu.memory_space<vmem>>, vector<196x32xf32>
    %72 = vector.broadcast %28 : vector<196x1xf32> to vector<196x32xf32>
    %73 = arith.mulf %71, %72 : vector<196x32xf32>
    %c30 = arith.constant 30 : index
    %c0_49 = arith.constant 0 : index
    %74 = vector.load %arg11[%c30, %c0_49] : memref<232x32xf32, #tpu.memory_space<vmem>>, vector<196x32xf32>
    %c31 = arith.constant 31 : index
    %c0_50 = arith.constant 0 : index
    %75 = vector.load %arg11[%c31, %c0_50] : memref<232x32xf32, #tpu.memory_space<vmem>>, vector<196x32xf32>
    %76 = vector.broadcast %32 : vector<196x1xf32> to vector<196x32xf32>
    %77 = arith.mulf %75, %76 : vector<196x32xf32>
    %78 = tpu.concatenate %59, %60, %63, %66, %67, %70, %73, %74, %77 in 1 : vector<196x32xf32>, vector<196x32xf32>, vector<196x32xf32>, vector<196x32xf32>, vector<196x32xf32>, vector<196x32xf32>, vector<196x32xf32>, vector<196x32xf32>, vector<196x32xf32> -> vector<196x288xf32>
    %cst_51 = arith.constant dense<0.000000e+00> : vector<196x64xf32>
    %79 = tpu.matmul %78, %34, %cst_51 {dimension_numbers = #tpu.dot_dimension_numbers<[1], [0], [0], [1], [0, 0, 1, 1], [], []>} : vector<196x288xf32>, vector<288x64xf32>, vector<196x64xf32> -> vector<196x64xf32>
    %80 = vector.broadcast %36 : vector<1x64xf32> to vector<196x64xf32>
    %81 = arith.addf %79, %80 : vector<196x64xf32>
    %cst_52 = arith.constant 0.000000e+00 : f32
    %82 = vector.broadcast %cst_52 : f32 to vector<196x64xf32>
    %83 = arith.maximumf %81, %82 : vector<196x64xf32>
    %cst_53 = arith.constant dense<0.000000e+00> : vector<64xf32>
    %84 = vector.multi_reduction <add>, %83, %cst_53 [0] : vector<196x64xf32> to vector<64xf32>
    %85 = vector.shape_cast %84 : vector<64xf32> to vector<1x64xf32>
    %cst_54 = arith.constant 1.960000e+02 : f32
    %86 = vector.broadcast %cst_54 : f32 to vector<1x64xf32>
    %87 = arith.divf %85, %86 : vector<1x64xf32>
    %cst_55 = arith.constant dense<0.000000e+00> : vector<1x128xf32>
    %88 = tpu.matmul %87, %37, %cst_55 {dimension_numbers = #tpu.dot_dimension_numbers<[1], [0], [0], [1], [0, 0, 1, 1], [], []>} : vector<1x64xf32>, vector<64x128xf32>, vector<1x128xf32> -> vector<1x128xf32>
    %89 = arith.addf %88, %38 : vector<1x128xf32>
    %c0_56 = arith.constant 0 : index
    %c0_57 = arith.constant 0 : index
    %c0_58 = arith.constant 0 : index
    %90 = vector.load %arg9[%c0_56, %c0_57, %c0_58] : memref<2x1x128xf32, #tpu.memory_space<vmem>>, vector<1x1x128xf32>
    %91 = vector.shape_cast %90 : vector<1x1x128xf32> to vector<1x128xf32>
    %92 = vector.shape_cast %89 : vector<1x128xf32> to vector<1x1x128xf32>
    tpu.vector_store %arg9[%c0_56, %c0_57, %c0_58], %92 {strides = array<i32>} : memref<2x1x128xf32, #tpu.memory_space<vmem>>, vector<1x1x128xf32>,
    %cst_59 = arith.constant dense<0.000000e+00> : vector<196x128xf32>
    %93 = tpu.matmul %83, %37, %cst_59 {dimension_numbers = #tpu.dot_dimension_numbers<[1], [0], [0], [1], [0, 0, 1, 1], [], []>} : vector<196x64xf32>, vector<64x128xf32>, vector<196x128xf32> -> vector<196x128xf32>
    %94 = vector.broadcast %38 : vector<1x128xf32> to vector<196x128xf32>
    %95 = arith.addf %93, %94 : vector<196x128xf32>
    %c0_60 = arith.constant 0 : index
    %c0_61 = arith.constant 0 : index
    %c0_62 = arith.constant 0 : index
    %96 = vector.load %arg8[%c0_60, %c0_61, %c0_62] : memref<2x196x128xf32, #tpu.memory_space<vmem>>, vector<1x196x128xf32>
    %97 = vector.shape_cast %96 : vector<1x196x128xf32> to vector<196x128xf32>
    %98 = vector.shape_cast %95 : vector<196x128xf32> to vector<1x196x128xf32>
    tpu.vector_store %arg8[%c0_60, %c0_61, %c0_62], %98 {strides = array<i32>} : memref<2x196x128xf32, #tpu.memory_space<vmem>>, vector<1x196x128xf32>,
    %c1_63 = arith.constant 1 : index
    %c0_64 = arith.constant 0 : index
    %c0_65 = arith.constant 0 : index
    %99 = vector.load %arg1[%c1_63, %c0_64, %c0_65] : memref<2x196x48xf32, #tpu.memory_space<vmem>>, vector<1x196x48xf32>
    %100 = vector.shape_cast %99 : vector<1x196x48xf32> to vector<196x48xf32>
    %c16_66 = arith.constant 16 : index
    %c0_67 = arith.constant 0 : index
    %101 = vector.load %arg10[%c16_66, %c0_67] : memref<232x48xf32, #tpu.memory_space<vmem>>, vector<196x48xf32>
    tpu.vector_store %arg10[%c16_66, %c0_67], %100 {strides = array<i32>} : memref<232x48xf32, #tpu.memory_space<vmem>>, vector<196x48xf32>,
    %c1_68 = arith.constant 1 : index
    %c0_69 = arith.constant 0 : index
    %102 = vector.load %arg10[%c1_68, %c0_69] : memref<232x48xf32, #tpu.memory_space<vmem>>, vector<196x48xf32>
    %103 = vector.broadcast %28 : vector<196x1xf32> to vector<196x48xf32>
    %104 = arith.mulf %102, %103 : vector<196x48xf32>
    %c2_70 = arith.constant 2 : index
    %c0_71 = arith.constant 0 : index
    %105 = vector.load %arg10[%c2_70, %c0_71] : memref<232x48xf32, #tpu.memory_space<vmem>>, vector<196x48xf32>
    %c15_72 = arith.constant 15 : index
    %c0_73 = arith.constant 0 : index
    %106 = vector.load %arg10[%c15_72, %c0_73] : memref<232x48xf32, #tpu.memory_space<vmem>>, vector<196x48xf32>
    %107 = vector.broadcast %28 : vector<196x1xf32> to vector<196x48xf32>
    %108 = arith.mulf %106, %107 : vector<196x48xf32>
    %c16_74 = arith.constant 16 : index
    %c0_75 = arith.constant 0 : index
    %109 = vector.load %arg10[%c16_74, %c0_75] : memref<232x48xf32, #tpu.memory_space<vmem>>, vector<196x48xf32>
    %110 = tpu.concatenate %104, %105, %108, %109 in 1 : vector<196x48xf32>, vector<196x48xf32>, vector<196x48xf32>, vector<196x48xf32> -> vector<196x192xf32>
    %cst_76 = arith.constant dense<0.000000e+00> : vector<196x32xf32>
    %111 = tpu.matmul %110, %33, %cst_76 {dimension_numbers = #tpu.dot_dimension_numbers<[1], [0], [0], [1], [0, 0, 1, 1], [], []>} : vector<196x192xf32>, vector<192x32xf32>, vector<196x32xf32> -> vector<196x32xf32>
    %112 = vector.broadcast %35 : vector<1x32xf32> to vector<196x32xf32>
    %113 = arith.addf %111, %112 : vector<196x32xf32>
    %cst_77 = arith.constant 0.000000e+00 : f32
    %114 = vector.broadcast %cst_77 : f32 to vector<196x32xf32>
    %115 = arith.maximumf %113, %114 : vector<196x32xf32>
    %c16_78 = arith.constant 16 : index
    %c0_79 = arith.constant 0 : index
    %116 = vector.load %arg11[%c16_78, %c0_79] : memref<232x32xf32, #tpu.memory_space<vmem>>, vector<196x32xf32>
    tpu.vector_store %arg11[%c16_78, %c0_79], %115 {strides = array<i32>} : memref<232x32xf32, #tpu.memory_space<vmem>>, vector<196x32xf32>,
    %c1_80 = arith.constant 1 : index
    %c0_81 = arith.constant 0 : index
    %117 = vector.load %arg11[%c1_80, %c0_81] : memref<232x32xf32, #tpu.memory_space<vmem>>, vector<196x32xf32>
    %118 = vector.broadcast %28 : vector<196x1xf32> to vector<196x32xf32>
    %119 = arith.mulf %117, %118 : vector<196x32xf32>
    %c2_82 = arith.constant 2 : index
    %c0_83 = arith.constant 0 : index
    %120 = vector.load %arg11[%c2_82, %c0_83] : memref<232x32xf32, #tpu.memory_space<vmem>>, vector<196x32xf32>
    %c3_84 = arith.constant 3 : index
    %c0_85 = arith.constant 0 : index
    %121 = vector.load %arg11[%c3_84, %c0_85] : memref<232x32xf32, #tpu.memory_space<vmem>>, vector<196x32xf32>
    %122 = vector.broadcast %32 : vector<196x1xf32> to vector<196x32xf32>
    %123 = arith.mulf %121, %122 : vector<196x32xf32>
    %c15_86 = arith.constant 15 : index
    %c0_87 = arith.constant 0 : index
    %124 = vector.load %arg11[%c15_86, %c0_87] : memref<232x32xf32, #tpu.memory_space<vmem>>, vector<196x32xf32>
    %125 = vector.broadcast %28 : vector<196x1xf32> to vector<196x32xf32>
    %126 = arith.mulf %124, %125 : vector<196x32xf32>
    %c16_88 = arith.constant 16 : index
    %c0_89 = arith.constant 0 : index
    %127 = vector.load %arg11[%c16_88, %c0_89] : memref<232x32xf32, #tpu.memory_space<vmem>>, vector<196x32xf32>
    %c17_90 = arith.constant 17 : index
    %c0_91 = arith.constant 0 : index
    %128 = vector.load %arg11[%c17_90, %c0_91] : memref<232x32xf32, #tpu.memory_space<vmem>>, vector<196x32xf32>
    %129 = vector.broadcast %32 : vector<196x1xf32> to vector<196x32xf32>
    %130 = arith.mulf %128, %129 : vector<196x32xf32>
    %c29_92 = arith.constant 29 : index
    %c0_93 = arith.constant 0 : index
    %131 = vector.load %arg11[%c29_92, %c0_93] : memref<232x32xf32, #tpu.memory_space<vmem>>, vector<196x32xf32>
    %132 = vector.broadcast %28 : vector<196x1xf32> to vector<196x32xf32>
    %133 = arith.mulf %131, %132 : vector<196x32xf32>
    %c30_94 = arith.constant 30 : index
    %c0_95 = arith.constant 0 : index
    %134 = vector.load %arg11[%c30_94, %c0_95] : memref<232x32xf32, #tpu.memory_space<vmem>>, vector<196x32xf32>
    %c31_96 = arith.constant 31 : index
    %c0_97 = arith.constant 0 : index
    %135 = vector.load %arg11[%c31_96, %c0_97] : memref<232x32xf32, #tpu.memory_space<vmem>>, vector<196x32xf32>
    %136 = vector.broadcast %32 : vector<196x1xf32> to vector<196x32xf32>
    %137 = arith.mulf %135, %136 : vector<196x32xf32>
    %138 = tpu.concatenate %119, %120, %123, %126, %127, %130, %133, %134, %137 in 1 : vector<196x32xf32>, vector<196x32xf32>, vector<196x32xf32>, vector<196x32xf32>, vector<196x32xf32>, vector<196x32xf32>, vector<196x32xf32>, vector<196x32xf32>, vector<196x32xf32> -> vector<196x288xf32>
    %cst_98 = arith.constant dense<0.000000e+00> : vector<196x64xf32>
    %139 = tpu.matmul %138, %34, %cst_98 {dimension_numbers = #tpu.dot_dimension_numbers<[1], [0], [0], [1], [0, 0, 1, 1], [], []>} : vector<196x288xf32>, vector<288x64xf32>, vector<196x64xf32> -> vector<196x64xf32>
    %140 = vector.broadcast %36 : vector<1x64xf32> to vector<196x64xf32>
    %141 = arith.addf %139, %140 : vector<196x64xf32>
    %cst_99 = arith.constant 0.000000e+00 : f32
    %142 = vector.broadcast %cst_99 : f32 to vector<196x64xf32>
    %143 = arith.maximumf %141, %142 : vector<196x64xf32>
    %cst_100 = arith.constant dense<0.000000e+00> : vector<64xf32>
    %144 = vector.multi_reduction <add>, %143, %cst_100 [0] : vector<196x64xf32> to vector<64xf32>
    %145 = vector.shape_cast %144 : vector<64xf32> to vector<1x64xf32>
    %cst_101 = arith.constant 1.960000e+02 : f32
    %146 = vector.broadcast %cst_101 : f32 to vector<1x64xf32>
    %147 = arith.divf %145, %146 : vector<1x64xf32>
    %cst_102 = arith.constant dense<0.000000e+00> : vector<1x128xf32>
    %148 = tpu.matmul %147, %37, %cst_102 {dimension_numbers = #tpu.dot_dimension_numbers<[1], [0], [0], [1], [0, 0, 1, 1], [], []>} : vector<1x64xf32>, vector<64x128xf32>, vector<1x128xf32> -> vector<1x128xf32>
    %149 = arith.addf %148, %38 : vector<1x128xf32>
    %c1_103 = arith.constant 1 : index
    %c0_104 = arith.constant 0 : index
    %c0_105 = arith.constant 0 : index
    %150 = vector.load %arg9[%c1_103, %c0_104, %c0_105] : memref<2x1x128xf32, #tpu.memory_space<vmem>>, vector<1x1x128xf32>
    %151 = vector.shape_cast %150 : vector<1x1x128xf32> to vector<1x128xf32>
    %152 = vector.shape_cast %149 : vector<1x128xf32> to vector<1x1x128xf32>
    tpu.vector_store %arg9[%c1_103, %c0_104, %c0_105], %152 {strides = array<i32>} : memref<2x1x128xf32, #tpu.memory_space<vmem>>, vector<1x1x128xf32>,
    %cst_106 = arith.constant dense<0.000000e+00> : vector<196x128xf32>
    %153 = tpu.matmul %143, %37, %cst_106 {dimension_numbers = #tpu.dot_dimension_numbers<[1], [0], [0], [1], [0, 0, 1, 1], [], []>} : vector<196x64xf32>, vector<64x128xf32>, vector<196x128xf32> -> vector<196x128xf32>
    %154 = vector.broadcast %38 : vector<1x128xf32> to vector<196x128xf32>
    %155 = arith.addf %153, %154 : vector<196x128xf32>
    %c1_107 = arith.constant 1 : index
    %c0_108 = arith.constant 0 : index
    %c0_109 = arith.constant 0 : index
    %156 = vector.load %arg8[%c1_107, %c0_108, %c0_109] : memref<2x196x128xf32, #tpu.memory_space<vmem>>, vector<1x196x128xf32>
    %157 = vector.shape_cast %156 : vector<1x196x128xf32> to vector<196x128xf32>
    %158 = vector.shape_cast %155 : vector<196x128xf32> to vector<1x196x128xf32>
    tpu.vector_store %arg8[%c1_107, %c0_108, %c0_109], %158 {strides = array<i32>} : memref<2x196x128xf32, #tpu.memory_space<vmem>>, vector<1x196x128xf32>,
    return
  }
  func.func @transform_0(%arg0: i32) -> (i32, i32, i32) {
    %c0_i32 = arith.constant 0 : i32
    %c0_i32_0 = arith.constant 0 : i32
    %c0_i32_1 = arith.constant 0 : i32
    return %arg0, %c0_i32, %c0_i32_0 : i32, i32, i32
  }
  func.func @transform_1(%arg0: i32) -> (i32, i32) {
    %c0_i32 = arith.constant 0 : i32
    %c0_i32_0 = arith.constant 0 : i32
    %c0_i32_1 = arith.constant 0 : i32
    return %c0_i32, %c0_i32_0 : i32, i32
  }
  func.func @transform_2(%arg0: i32) -> (i32, i32) {
    %c0_i32 = arith.constant 0 : i32
    %c0_i32_0 = arith.constant 0 : i32
    %c0_i32_1 = arith.constant 0 : i32
    return %c0_i32, %c0_i32_0 : i32, i32
  }
  func.func @transform_3(%arg0: i32) -> (i32, i32) {
    %c0_i32 = arith.constant 0 : i32
    %c0_i32_0 = arith.constant 0 : i32
    %c0_i32_1 = arith.constant 0 : i32
    return %c0_i32, %c0_i32_0 : i32, i32
  }
  func.func @transform_4(%arg0: i32) -> (i32, i32) {
    %c0_i32 = arith.constant 0 : i32
    %c0_i32_0 = arith.constant 0 : i32
    %c0_i32_1 = arith.constant 0 : i32
    return %c0_i32, %c0_i32_0 : i32, i32
  }
  func.func @transform_5(%arg0: i32) -> (i32, i32) {
    %c0_i32 = arith.constant 0 : i32
    %c0_i32_0 = arith.constant 0 : i32
    %c0_i32_1 = arith.constant 0 : i32
    return %c0_i32, %c0_i32_0 : i32, i32
  }
  func.func @transform_6(%arg0: i32) -> (i32, i32) {
    %c0_i32 = arith.constant 0 : i32
    %c0_i32_0 = arith.constant 0 : i32
    %c0_i32_1 = arith.constant 0 : i32
    return %c0_i32, %c0_i32_0 : i32, i32
  }
  func.func @transform_7(%arg0: i32) -> (i32, i32, i32) {
    %c0_i32 = arith.constant 0 : i32
    %c0_i32_0 = arith.constant 0 : i32
    %c0_i32_1 = arith.constant 0 : i32
    return %arg0, %c0_i32, %c0_i32_0 : i32, i32, i32
  }
  func.func @transform_8(%arg0: i32) -> (i32, i32, i32) {
    %c0_i32 = arith.constant 0 : i32
    %c0_i32_0 = arith.constant 0 : i32
    %c0_i32_1 = arith.constant 0 : i32
    return %arg0, %c0_i32, %c0_i32_0 : i32, i32, i32
  }
}

</mosaic_0001>

<bundles_post_ra>
// kernel: image2caption_forward.1
= control target key start
LH: loop header
LB: loop body
LE: loop exit
PB: predicated region body
PF: predicated region fallthrough
CT: control target
= control target key end

     0   :  { %14 = vsyncpa [#allocation5], 0  ;;  %s12893_s0 = inlined_call_operand.vmem [shape: f32[4,196,48], index: 0, kind: input, shape index: {}]   ;;  %s12894_s1 = inlined_call_operand.vmem [shape: f32[192,32], index: 1, kind: input, shape index: {}]   ;;  %s12895_s2 = inlined_call_operand.vmem [shape: f32[1,32], index: 2, kind: input, shape index: {}]   ;;  %s12896_s3 = inlined_call_operand.vmem [shape: f32[288,64], index: 3, kind: input, shape index: {}]   ;;  %s12897_s4 = inlined_call_operand.vmem [shape: f32[1,64], index: 4, kind: input, shape index: {}]   ;;  %s12898_s5 = inlined_call_operand.vmem [shape: f32[64,128], index: 5, kind: input, shape index: {}]   ;;  %s12899_s6 = inlined_call_operand.vmem [shape: f32[1,128], index: 6, kind: input, shape index: {}]   ;;  %s12900_s7 = inlined_call_operand.vmem [shape: f32[4,196,128], index: 7, kind: output, shape index: {0}]   ;;  %s12901_s8 = inlined_call_operand.hbm [shape: f32[4,1,128], index: 8, kind: output, shape index: {1}]  }
   0x1   :  { %16 = vsyncpa [#allocation5 + $0x1], 0  ;;  %s9291_s27 = smov 0   ;;  %s9293_s28 = smov 0  }
   0x2   :  { %s9295_s29 = smov 0   ;;  %s9297_s30 = smov 0  }
   0x3 LB: > { %s9312_s9 = sadd.s32 4294967295, %s9233_s30   ;;  %s6942_s10 = sadd.s32 4294967294, %s9233_s30   ;;  %s9233_s30 = sphi %s9297_s30, %s13387_s30   ;;  %s9229_s29 = sphi %s9295_s29, %s13386_s29   ;;  %s9225_s28 = sphi %s9293_s28, %s13385_s28   ;;  %s9221_s27 = sphi %s9291_s27, %s13384_s27  }
   0x4   : > { %s9316_s11 = sadd.s32 1, %s9233_s30   ;;  %s207_s12 = sadd.s32 1, %s9229_s29 }
   0x5   : > { %s204_s13 = ssub.s32 %s9233_s30, %s9316_s11  ;;  %p217_p0 = scmp.ne.s32.totalorder %s9229_s29, %s9225_s28 }
   0x6   : > { %p205_p1 = scmp.eq.s32.totalorder %s204_s13, 0  ;;  %p218_p2 = scmp.eq.s32.totalorder %s9312_s9, 1 }
   0x7   : > { %p223_p3 = scmp.ne.s32.totalorder %s9225_s28, %s9221_s27  ;;  %p224_p4 = scmp.eq.s32.totalorder %s6942_s10, 1 }
   0x8   : > { %s9327_s14 = scalar_select %p205_p1, %s9229_s29, %s207_s12  }
   0x9   : > { %p9329_p5 = por %p218_p2, %p217_p0  ;;  %p9333_p6 = por %p224_p4, %p223_p3 }
   0xa   : > { %p6945_p7 = scmp.ge.s32.totalorder %s9233_s30, 1  ;;  %p270_p8 = scmp.lt.s32.totalorder %s9233_s30, 3 }
   0xc   : > { %p271_p9 = pnand %p6945_p7, %p270_p8 }
   0xe   : > { %274 = sbr.rel (%p271_p9) target bundleno = 2187 (0x88b), region = 48 }
  0x15   : > { %s6947_s17 = sshll.u32 %s9312_s9, 1  ;;  %vm326_vm0 = vcmask 392192   ;;  %v340_v0 = vlaneseq  ;;  %v991_v1 = vld [vmem:[%s12894_s1] sm:$0xff]  ;;  %v12902_v2 = vmov 0.0   ;;  %v992_v3 = vld [vmem:[%s12894_s1 + $0x8] sm:$0xff]  ;;  %v993_v4 = vld [vmem:[%s12894_s1 + $0x10] sm:$0xff] }
  0x16   : > { %p312_p10 = scmp.lt.s32.totalorder %s6947_s17, 3  ;;  %327 = vst.msk [vmem:[#allocation2] sm:$0xff] %vm326_vm0, %v12902_v2  ;;  %328 = vst.msk [vmem:[#allocation2 + $0x8] sm:$0xff] %vm326_vm0, %v12902_v2  ;;  %v994_v5 = vld [vmem:[%s12894_s1 + $0x18] sm:$0xff]  ;;  %v12904_v7 = vmov 0.0|0.0   ;;  %v9359_v8 = vpack.c.bf16 %v992_v3, %v991_v1  ;;  %v995_v10 = vld [vmem:[%s12894_s1 + $0x20] sm:$0xff] }
  0x17   : > { %v9356_v6 = vshrl.u32 %v340_v0, 7  ;;  %7740 = vmatprep.subr.bf16.mxu0 %v12904_v7  ;;  %7776 = vmatprep.subr.bf16.mxu1 %v12904_v7  ;;  %v9364_v9 = vpack.c.bf16 %v994_v5, %v993_v4  ;;  %v996_v11 = vld [vmem:[%s12894_s1 + $0x28] sm:$0xff]  ;;  %v997_v19 = vld [vmem:[%s12894_s1 + $0x30] sm:$0xff]  ;;  %v998_v20 = vld [vmem:[%s12894_s1 + $0x38] sm:$0xff]  ;;  %v12915_v21 = vmov 0   ;;  %s9238_s23 = smov 16  }
  0x18   : > { %13091 = vst [vmem:[#allocation8_spill] sm:$0xff] %v9359_v8  ;;  %s13389_s17 = smov (!%p312_p10, %s6947_s17), 3  ;;  %7742 = vmatpush1.bf16.msra.mxu0 %v9359_v8  ;;  %v9389_v18 = vpack.c.bf16 %v996_v11, %v995_v10  ;;  %v999_v26 = vld [vmem:[%s12894_s1 + $0x40] sm:$0xff]  ;;  %v1000_v27 = vld [vmem:[%s12894_s1 + $0x48] sm:$0xff]  ;;  %v9443_v43 = vpack.c.bf16 %v998_v20, %v997_v19  ;;  %v1001_v4 = vld [vmem:[%s12894_s1 + $0x50] sm:$0xff]  ;;  %s9239_s24 = smov 48  }
  0x19   : > { %13090 = vst [vmem:[#allocation7_spill] sm:$0xff] %v9356_v6  ;;  %13092 = vst [vmem:[#allocation9_spill] sm:$0xff] %v9364_v9  ;;  %v9373_v12 = vadd.s32 8, %v9356_v6  ;;  %v9376_v13 = vmul.u32.u64.low 2454267026, %v9356_v6  ;;  %v9377_v14 = vmul.u32.u64.high 2454267026, %v9356_v6, %v9376_v13  ;;  %v9380_v15 = vadd.s32 32, %v9356_v6  ;;  %7743 = vmatprep.subr.bf16.mxu0 %v12904_v7 }
  0x1a   : > { %s12965_s18 = smul.u32 200, %s13389_s17  ;;  %13093 = vst [vmem:[#allocation10_spill] sm:$0xff] %v9389_v18  ;;  %v9410_v25 = vadd.s32 16, %v9356_v6  ;;  %v9422_v31 = vadd.s32 40, %v9356_v6  ;;  %v9425_v32 = vadd.s32 24, %v9356_v6  ;;  %13094 = vst [vmem:[#allocation11_spill] sm:$0xff] %v9443_v43  ;;  %v9456_v50 = vpack.c.bf16 %v1000_v27, %v999_v26 }
  0x1b   : > { %v9386_v16 = vmul.u32.u64.low 2454267026, %v9373_v12  ;;  %v9387_v17 = vmul.u32.u64.high 2454267026, %v9373_v12, %v9386_v16  ;;  %vm372_vm1 = vc.u32 %v9376_v13, 2454267026  ;;  %v1002_v5 = vld [vmem:[%s12894_s1 + $0x58] sm:$0xff]  ;;  %s9240_s26 = smov 96  }
  0x1c   : > { %s9402_s25 = scalar_lea.vmem %s12893_s0, %s12965_s18  ;;  %v373_v22 = vsel %vm372_vm1, 1, %v12915_v21  ;;  %v9406_v23 = vmul.u32.u64.low 2454267026, %v9380_v15  ;;  %v9407_v24 = vmul.u32.u64.high 2454267026, %v9380_v15, %v9406_v23  ;;  %7745 = vmatpush1.bf16.msra.mxu0 %v9364_v9  ;;  %13095 = vst [vmem:[#allocation12_spill] sm:$0xff] %v9456_v50  ;;  %s13025_s21 = smov 32  }
  0x1d   : > { %v1062_v28 = vld [vmem:[%s9402_s25] sm:$0xff]  ;;  %v1063_v29 = vld [vmem:[%s9402_s25 + $0x8] sm:$0xff]  ;;  %vm386_vm2 = vc.u32 %v9386_v16, 2454267026  ;;  %v374_v30 = vadd.s32 %v9377_v14, %v373_v22  ;;  %v1064_v33 = vld [vmem:[%s9402_s25 + $0x10] sm:$0xff]  ;;  %7746 = vmatprep.subr.bf16.mxu0 %v12904_v7  ;;  %s13023_s22 = smov 64  }
  0x1e   : > { %1087 = vst.msk [vmem:[#allocation2 + $0x10] sm:$0xff] %vm326_vm0, %v1062_v28  ;;  %1088 = vst.msk [vmem:[#allocation2 + $0x18] sm:$0xff] %vm326_vm0, %v1063_v29  ;;  %v1065_v34 = vld [vmem:[%s9402_s25 + $0x18] sm:$0xff]  ;;  %v1066_v35 = vld [vmem:[%s9402_s25 + $0x20] sm:$0xff]  ;;  %v387_v36 = vsel %vm386_vm2, 1, %v12915_v21  ;;  %s13334_s19 = smov 64  }
  0x1f   : > { %vm428_vm3 = vc.u32 %v9406_v23, 2454267026  ;;  %1089 = vst.msk [vmem:[#allocation2 + $0x20] sm:$0xff] %vm326_vm0, %v1064_v33  ;;  %1090 = vst.msk [vmem:[#allocation2 + $0x28] sm:$0xff] %vm326_vm0, %v1065_v34  ;;  %v388_v37 = vadd.s32 %v9387_v17, %v387_v36  ;;  %v375_v38 = vshrl.u32 %v374_v30, 3  ;;  %v1067_v40 = vld [vmem:[%s9402_s25 + $0x28] sm:$0xff] }
  0x20   : > { %1091 = vst.msk [vmem:[#allocation2 + $0x30] sm:$0xff] %vm326_vm0, %v1066_v35  ;;  %v429_v39 = vsel %vm428_vm3, 1, %v12915_v21  ;;  %v1068_v41 = vld [vmem:[%s9402_s25 + $0x30] sm:$0xff]  ;;  %v1069_v42 = vld [vmem:[%s9402_s25 + $0x38] sm:$0xff]  ;;  %v9447_v45 = vmul.u32.u64.low 2454267026, %v9410_v25  ;;  %v9448_v46 = vmul.u32.u64.high 2454267026, %v9410_v25, %v9447_v45  ;;  %7748 = vmatpush1.bf16.msra.mxu0 %v9389_v18  ;;  %v9502_v35 = vpack.c.bf16 %v1002_v5, %v1001_v4 }
  0x21   : > { %v430_v44 = vadd.s32 %v9407_v24, %v429_v39  ;;  %1092 = vst.msk [vmem:[#allocation2 + $0x38] sm:$0xff] %vm326_vm0, %v1067_v40  ;;  %1093 = vst.msk [vmem:[#allocation2 + $0x40] sm:$0xff] %vm326_vm0, %v1068_v41  ;;  %v1070_v47 = vld [vmem:[%s9402_s25 + $0x40] sm:$0xff]  ;;  %v1071_v48 = vld [vmem:[%s9402_s25 + $0x48] sm:$0xff]  ;;  %v389_v52 = vshrl.u32 %v388_v37, 3  ;;  %v376_v53 = vmul.u32 14, %v375_v38  ;;  %7749 = vmatprep.subr.bf16.mxu0 %v12904_v7 }
  0x22   : > { %1094 = vst.msk [vmem:[#allocation2 + $0x48] sm:$0xff] %vm326_vm0, %v1069_v42  ;;  %v1072_v49 = vld [vmem:[%s9402_s25 + $0x50] sm:$0xff]  ;;  %v1162_v51 = vld [vmem:[#allocation2 + $0x2] sm:$0xff]  ;;  %v9459_v54 = vmul.u32.u64.low 2454267026, %v9422_v31  ;;  %v9460_v55 = vmul.u32.u64.high 2454267026, %v9422_v31, %v9459_v54  ;;  %1095 = vst.msk [vmem:[#allocation2 + $0x50] sm:$0xff] %vm326_vm0, %v1070_v47 }
  0x23   : > { %1096 = vst.msk [vmem:[#allocation2 + $0x58] sm:$0xff] %vm326_vm0, %v1071_v48  ;;  %1097 = vst.msk [vmem:[#allocation2 + $0x60] sm:$0xff] %vm326_vm0, %v1072_v49  ;;  %v1073_v56 = vld [vmem:[%s9402_s25 + $0x58] sm:$0xff]  ;;  %v1074_v57 = vld [vmem:[%s9402_s25 + $0x60] sm:$0xff]  ;;  %v431_v58 = vshrl.u32 %v430_v44, 3  ;;  %v390_v62 = vmul.u32 14, %v389_v52  ;;  %v377_v63 = vsub.s32 %v9356_v6, %v376_v53 }
  0x24   : > { %vm400_vm4 = vc.u32 %v9447_v45, 2454267026  ;;  %v9469_v59 = vmul.u32.u64.low 2454267026, %v9425_v32  ;;  %v9470_v60 = vmul.u32.u64.high 2454267026, %v9425_v32, %v9469_v59  ;;  %1098 = vst.msk [vmem:[#allocation2 + $0x68] sm:$0xff] %vm326_vm0, %v1073_v56  ;;  %1099 = vst.msk [vmem:[#allocation2 + $0x70] sm:$0xff] %vm326_vm0, %v1074_v57  ;;  %7751 = vmatpush1.bf16.msra.mxu0 %v9443_v43 }
  0x25   : > { %v1075_v61 = vld [vmem:[%s9402_s25 + $0x68] sm:$0xff]  ;;  %v401_v0 = vsel %vm400_vm4, 1, %v12915_v21  ;;  %vm442_vm5 = vc.u32 %v9459_v54, 2454267026  ;;  %v1076_v1 = vld [vmem:[%s9402_s25 + $0x70] sm:$0xff]  ;;  %v1077_v3 = vld [vmem:[%s9402_s25 + $0x78] sm:$0xff]  ;;  %v391_v22 = vsub.s32 %v9373_v12, %v390_v62  ;;  %7752 = vmatprep.subr.bf16.mxu0 %v12904_v7 }
  0x26   : > { %1100 = vst.msk [vmem:[#allocation2 + $0x78] sm:$0xff] %vm326_vm0, %v1075_v61  ;;  %v432_v10 = vmul.u32 14, %v431_v58  ;;  %v402_v11 = vadd.s32 %v9448_v46, %v401_v0  ;;  %v443_v13 = vsel %vm442_vm5, 1, %v12915_v21  ;;  %vm414_vm6 = vc.u32 %v9469_v59, 2454267026  ;;  %1101 = vst.msk [vmem:[#allocation2 + $0x80] sm:$0xff] %vm326_vm0, %v1076_v1 }
  0x27   : > { %1102 = vst.msk [vmem:[#allocation2 + $0x88] sm:$0xff] %vm326_vm0, %v1077_v3  ;;  %v1078_v14 = vld [vmem:[%s9402_s25 + $0x80] sm:$0xff]  ;;  %v1079_v16 = vld [vmem:[%s9402_s25 + $0x88] sm:$0xff]  ;;  %v1237_v17 = vld [vmem:[#allocation2 + $0x10] sm:$0xff]  ;;  %vm716_vm7 = vcmp.ne.s32.totalorder %v377_v63, 0  ;;  %vm741_vm8 = vcmp.lt.s32.totalorder %v377_v63, 0  ;;  %v444_v29 = vadd.s32 %v9460_v55, %v443_v13 }
  0x28   : > { %v1163_v19 = vld [vmem:[#allocation2 + $0xa] sm:$0xff]  ;;  %v1164_v20 = vld [vmem:[#allocation2 + $0x12] sm:$0xff]  ;;  %v791_v23 = vadd.s32 14, %v377_v63  ;;  %1103 = vst.msk [vmem:[#allocation2 + $0x90] sm:$0xff] %vm326_vm0, %v1078_v14  ;;  %1104 = vst.msk [vmem:[#allocation2 + $0x98] sm:$0xff] %vm326_vm0, %v1079_v16  ;;  %1487 = vrot.lane.b32.xlu1 %v1237_v17, %s9238_s23  ;;  %v433_v27 = vsub.s32 %v9380_v15, %v432_v10  ;;  %v403_v28 = vshrl.u32 %v402_v11, 3  ;;  %7754 = vmatpush1.bf16.msra.mxu0 %v9456_v50 }
  0x29   : > { %v8218_v24 = vpack.i.bf16 %v1163_v19, %v1162_v51  ;;  %v1165_v26 = vld [vmem:[#allocation2 + $0x1a] sm:$0xff]  ;;  %vm717_vm9 = vcmp.ne.s32.totalorder %v391_v22, 0  ;;  %vm742_vm10 = vcmp.lt.s32.totalorder %v391_v22, 0  ;;  %v792_v30 = vadd.s32 14, %v391_v22  ;;  %13096 = vst [vmem:[#allocation13_spill] sm:$0xff] %v9502_v35  ;;  %v1166_v15 = vld [vmem:[#allocation2 + $0x22] sm:$0xff]  ;;  %vm766_vm14 = vmand %vm741_vm8, %vm716_vm7  ;;  %7755 = vmatprep.subr.bf16.mxu0 %v12904_v7 }
  0x2a   : > { %v8223_v12 = vpack.i.bf16 %v1165_v26, %v1164_v20  ;;  %v1238_v33 = vld [vmem:[#allocation2 + $0x18] sm:$0xff]  ;;  %vm767_vm11 = vmand %vm742_vm10, %vm717_vm9  ;;  %vm720_vm12 = vcmp.ne.s32.totalorder %v433_v27, 0  ;;  %vm745_vm13 = vcmp.lt.s32.totalorder %v433_v27, 0  ;;  %v795_v34 = vadd.s32 14, %v433_v27  ;;  %v1167_v36 = vld [vmem:[#allocation2 + $0x2a] sm:$0xff]  ;;  %s7211_s18 = sshll.u32 %s9312_s9, 5 }
  0x2b   : > { %8219 = vrot.lane.b32.xlu0 %v8218_v24, %s9239_s24  ;;  %v9504_v37 = vsel %vm767_vm11, %v792_v30, %v391_v22  ;;  %v404_v38 = vmul.u32 14, %v403_v28  ;;  %v445_v39 = vshrl.u32 %v444_v29, 3  ;;  %v415_v40 = vsel %vm414_vm6, 1, %v12915_v21  ;;  %vm770_vm15 = vmand %vm745_vm13, %vm720_vm12  ;;  %v1239_v45 = vld [vmem:[#allocation2 + $0x20] sm:$0xff]  ;;  %v1240_v57 = vld [vmem:[#allocation2 + $0x28] sm:$0xff] }
  0x2c   : > { %13097 = vst [vmem:[#allocation14_spill] sm:$0xff] %v9504_v37  ;;  %8224 = vrot.lane.b32.xlu1 %v8223_v12, %s9239_s24  ;;  %v9512_v41 = vsel %vm766_vm14, %v791_v23, %v377_v63  ;;  %v416_v42 = vadd.s32 %v9470_v60, %v415_v40  ;;  %v9516_v44 = vadd.s32 48, %v9356_v6  ;;  %v9519_v46 = vsel %vm770_vm15, %v795_v34, %v433_v27  ;;  %v1188_v59 = vld [vmem:[#allocation2 + $0x17] sm:$0xff]  ;;  %v1187_v63 = vld [vmem:[#allocation2 + $0xf] sm:$0xff]  ;;  %v1189_v5 = vld [vmem:[#allocation2 + $0x1f] sm:$0xff] }
  0x2d   : > { %13098 = vst [vmem:[#allocation15_spill] sm:$0xff] %v9512_v41  ;;  %13099 = vst [vmem:[#allocation16_spill] sm:$0xff] %v9519_v46  ;;  %v405_v47 = vsub.s32 %v9410_v25, %v404_v38  ;;  %v9523_v48 = vadd.s32 56, %v9356_v6  ;;  %v9526_v49 = vadd.s32 64, %v9356_v6  ;;  %v8228_v51 = vpack.i.bf16 %v1167_v36, %v1166_v15  ;;  %7757 = vmatpush1.bf16.msra.mxu0 %v9502_v35  ;;  %v1191_v0 = vld [vmem:[#allocation2 + $0x2f] sm:$0xff]  ;;  %v1192_v30 = vld [vmem:[#allocation2 + $0x37] sm:$0xff] }
  0x2e   : > { %vm842_vm1 = vcmp.ge.s32.totalorder %v9504_v37, 1  ;;  %vm841_vm2 = vcmp.ge.s32.totalorder %v9512_v41, 1  ;;  %v446_v52 = vmul.u32 14, %v445_v39  ;;  %v9532_v53 = vadd.s32 72, %v9356_v6  ;;  %7758 = vmatprep.subr.bf16.mxu0 %v12904_v7  ;;  %v1190_v38 = vld [vmem:[#allocation2 + $0x27] sm:$0xff]  ;;  %v1005_v35 = vld [vmem:[%s12894_s1 + $0x70] sm:$0xff] }
  0x2f   : > { %1489 = vrot.lane.b32.xlu0 %v1238_v33, %s9238_s23  ;;  %vm718_vm3 = vcmp.ne.s32.totalorder %v405_v47, 0  ;;  %vm743_vm4 = vcmp.lt.s32.totalorder %v405_v47, 0  ;;  %v9535_v25 = vadd.s32 80, %v9356_v6  ;;  %vm845_vm5 = vcmp.ge.s32.totalorder %v9519_v46, 1  ;;  %v9810_v50 = vld [vmem:[#allocation2 + $0x51] sm:$0xff] }
  0x30   : > { %1491 = vrot.lane.b32.xlu1 %v1239_v45, %s9238_s23  ;;  %vm768_vm6 = vmand %vm743_vm4, %vm718_vm3  ;;  %v793_v54 = vadd.s32 14, %v405_v47  ;;  %v447_v55 = vsub.s32 %v9422_v31, %v446_v52  ;;  %v417_v56 = vshrl.u32 %v416_v42, 3  ;;  %v9545_v58 = vsel %vm842_vm1, 1.0, %v12902_v2  ;;  %v1241_v31 = vld [vmem:[#allocation2 + $0x30] sm:$0xff] }
  0x31   : > { %13100 = vst [vmem:[#allocation17_spill] sm:$0xff] %v9545_v58  ;;  %v9550_v60 = vsel %vm841_vm2, 1.0, %v12902_v2  ;;  %v9553_v61 = vmul.u32.u64.low 2454267026, %v9516_v44  ;;  %v9554_v62 = vmul.u32.u64.high 2454267026, %v9516_v44, %v9553_v61  ;;  %v9562_v4 = vsel %vm845_vm5, 1.0, %v12902_v2  ;;  %v1168_v52 = vld [vmem:[#allocation2 + $0x32] sm:$0xff] }
  0x32   : > { %13101 = vst [vmem:[#allocation18_spill] sm:$0xff] %v9550_v60  ;;  %v9557_v1 = vsel %vm768_vm6, %v793_v54, %v405_v47  ;;  %vm721_vm7 = vcmp.ne.s32.totalorder %v447_v55, 0  ;;  %vm746_vm8 = vcmp.lt.s32.totalorder %v447_v55, 0  ;;  %v796_v3 = vadd.s32 14, %v447_v55  ;;  %v1080_v47 = vld [vmem:[%s9402_s25 + $0x90] sm:$0xff] }
  0x33   : > { %8229 = vrot.lane.b32.xlu0 %v8228_v51, %s9239_s24  ;;  %13102 = vst [vmem:[#allocation19_spill] sm:$0xff] %v9557_v1  ;;  %vm843_vm9 = vcmp.ge.s32.totalorder %v9557_v1, 1  ;;  %vm771_vm10 = vmand %vm746_vm8, %vm721_vm7  ;;  %v418_v10 = vmul.u32 14, %v417_v56  ;;  %vm456_vm11 = vc.u32 %v9553_v61, 2454267026  ;;  %v1213_v11 = vmul.f32 %v9545_v58, %v1188_v59  ;;  %v1082_v59 = vld [vmem:[%s9402_s25 + $0xa0] sm:$0xff] }
  0x34   : > { %1493 = vrot.lane.b32.xlu1 %v1240_v57, %s9238_s23  ;;  %v9568_v13 = vsel %vm843_vm9, 1.0, %v12902_v2  ;;  %v9570_v14 = vsel %vm771_vm10, %v796_v3, %v447_v55  ;;  %v457_v16 = vsel %vm456_vm11, 1, %v12915_v21  ;;  %v1212_v17 = vmul.f32 %v9550_v60, %v1187_v63  ;;  %1105 = vst.msk [vmem:[#allocation2 + $0xa0] sm:$0xff] %vm326_vm0, %v1080_v47  ;;  %v1081_v57 = vld [vmem:[%s9402_s25 + $0x98] sm:$0xff]  ;;  %1107 = vst.msk [vmem:[#allocation2 + $0xb0] sm:$0xff] %vm326_vm0, %v1082_v59  ;;  %v1084_v3 = vld [vmem:[%s9402_s25 + $0xb0] sm:$0xff] }
  0x35   : > { %13103 = vst [vmem:[#allocation20_spill] sm:$0xff] %v9568_v13  ;;  %13104 = vst [vmem:[#allocation21_spill] sm:$0xff] %v9570_v14  ;;  %vm846_vm12 = vcmp.ge.s32.totalorder %v9570_v14, 1  ;;  %v419_v19 = vsub.s32 %v9425_v32, %v418_v10  ;;  %v458_v20 = vadd.s32 %v9554_v62, %v457_v16  ;;  %v1216_v22 = vmul.f32 %v9562_v4, %v1191_v0  ;;  %v1169_v62 = vld [vmem:[#allocation2 + $0x3a] sm:$0xff]  ;;  %v7091_v14 = vld [vmem:[%s9402_s25 + $0x128] sm:$0xff] }
  0x36   : > { %v1214_v23 = vmul.f32 %v9568_v13, %v1189_v5  ;;  %v9581_v24 = vmul.u32.u64.low 2454267026, %v9523_v48  ;;  %v9582_v26 = vmul.u32.u64.high 2454267026, %v9523_v48, %v9581_v24  ;;  %v9585_v27 = vsel %vm846_vm12, 1.0, %v12902_v2  ;;  %1106 = vst.msk [vmem:[#allocation2 + $0xa8] sm:$0xff] %vm326_vm0, %v1081_v57  ;;  %1109 = vst.msk [vmem:[#allocation2 + $0xc0] sm:$0xff] %vm326_vm0, %v1084_v3  ;;  %v1243_v47 = vld [vmem:[#allocation2 + $0x40] sm:$0xff] }
  0x37   : > { %1495 = vrot.lane.b32.xlu0 %v1241_v31, %s9238_s23  ;;  %vm719_vm13 = vcmp.ne.s32.totalorder %v419_v19, 0  ;;  %vm744_vm14 = vcmp.lt.s32.totalorder %v419_v19, 0  ;;  %v794_v28 = vadd.s32 14, %v419_v19  ;;  %v459_v32 = vshrl.u32 %v458_v20, 3  ;;  %v1201_v1 = vld [vmem:[#allocation2 + $0x7f] sm:$0xff] }
  0x38   : > { %1389 = vrot.lane.b32.xlu1 %v1213_v11, %s9240_s26  ;;  %vm769_vm15 = vmand %vm744_vm14, %vm719_vm13  ;;  %vm470_vm1 = vc.u32 %v9581_v24, 2454267026  ;;  %v9589_v29 = vmul.u32.u64.low 2454267026, %v9526_v49  ;;  %v9590_v12 = vmul.u32.u64.high 2454267026, %v9526_v49, %v9589_v29  ;;  %v1217_v51 = vmul.f32 %v9585_v27, %v1192_v30 }
  0x39   : > { %v9592_v33 = vsel %vm769_vm15, %v794_v28, %v419_v19  ;;  %v471_v34 = vsel %vm470_vm1, 1, %v12915_v21  ;;  %v9596_v15 = vmul.u32.u64.low 2454267026, %v9532_v53  ;;  %v9597_v36 = vmul.u32.u64.high 2454267026, %v9532_v53, %v9596_v15  ;;  %v1085_v19 = vld [vmem:[%s9402_s25 + $0xb8] sm:$0xff] }
  0x3a   : > { %13105 = vst [vmem:[#allocation22_spill] sm:$0xff] %v9592_v33  ;;  %vm844_vm2 = vcmp.ge.s32.totalorder %v9592_v33, 1  ;;  %v460_v39 = vmul.u32 14, %v459_v32  ;;  %v472_v40 = vadd.s32 %v9582_v26, %v471_v34  ;;  %vm484_vm3 = vc.u32 %v9589_v29, 2454267026  ;;  %1110 = vst.msk [vmem:[#allocation2 + $0xc8] sm:$0xff] %vm326_vm0, %v1085_v19 }
  0x3b   : > { %1387 = vrot.lane.b32.xlu0 %v1212_v17, %s9240_s26  ;;  %v9603_v42 = vsel %vm844_vm2, 1.0, %v12902_v2  ;;  %v485_v45 = vsel %vm484_vm3, 1, %v12915_v21  ;;  %vm498_vm4 = vc.u32 %v9596_v15, 2454267026  ;;  %v9629_v17 = vadd.s32 88, %v9356_v6 }
  0x3c   : > { %1395 = vrot.lane.b32.xlu1 %v1216_v22, %s9240_s26  ;;  %v461_v54 = vsub.s32 %v9516_v44, %v460_v39  ;;  %v473_v55 = vshrl.u32 %v472_v40, 3  ;;  %v486_v56 = vadd.s32 %v9590_v12, %v485_v45  ;;  %v1215_v61 = vmul.f32 %v9603_v42, %v1190_v38  ;;  %v1083_v44 = vld [vmem:[%s9402_s25 + $0xa8] sm:$0xff]  ;;  %v1242_v12 = vld [vmem:[#allocation2 + $0x38] sm:$0xff] }
  0x3d   : > { %v499_v31 = vsel %vm498_vm4, 1, %v12915_v21  ;;  %v9617_v63 = vmul.u32.u64.low 2454267026, %v9535_v25  ;;  %v9618_v0 = vmul.u32.u64.high 2454267026, %v9535_v25, %v9617_v63  ;;  %1108 = vst.msk [vmem:[#allocation2 + $0xb8] sm:$0xff] %vm326_vm0, %v1083_v44  ;;  %v8233_v20 = vpack.i.bf16 %v1169_v62, %v1168_v52  ;;  %v1195_v62 = vld [vmem:[#allocation2 + $0x4f] sm:$0xff] }
  0x3e   : > { %vm722_vm5 = vcmp.ne.s32.totalorder %v461_v54, 0  ;;  %vm747_vm6 = vcmp.lt.s32.totalorder %v461_v54, 0  ;;  %v797_v5 = vadd.s32 14, %v461_v54  ;;  %v474_v10 = vmul.u32 14, %v473_v55 }
  0x3f   : > { %1391 = vrot.lane.b32.xlu0 %v1214_v23, %s9240_s26  ;;  %vm772_vm7 = vmand %vm747_vm6, %vm722_vm5  ;;  %v487_v11 = vshrl.u32 %v486_v56, 3  ;;  %v500_v16 = vadd.s32 %v9597_v36, %v499_v31  ;;  %vm512_vm8 = vc.u32 %v9617_v63, 2454267026  ;;  %v9653_v45 = vadd.s32 96, %v9356_v6  ;;  %v1194_v56 = vld [vmem:[#allocation2 + $0x47] sm:$0xff] }
  0x40   : > { %1397 = vrot.lane.b32.xlu1 %v1217_v51, %s9240_s26  ;;  %v9633_v22 = vsel %vm772_vm7, %v797_v5, %v461_v54  ;;  %v475_v23 = vsub.s32 %v9523_v48, %v474_v10  ;;  %v513_v24 = vsel %vm512_vm8, 1, %v12915_v21  ;;  %v1193_v48 = vld [vmem:[#allocation2 + $0x3f] sm:$0xff]  ;;  %v9677_v5 = vadd.s32 104, %v9356_v6 }
  0x41   : > { %13106 = vst [vmem:[#allocation23_spill] sm:$0xff] %v9633_v22  ;;  %vm847_vm9 = vcmp.ge.s32.totalorder %v9633_v22, 1  ;;  %v488_v26 = vmul.u32 14, %v487_v11  ;;  %v501_v28 = vshrl.u32 %v500_v16, 3  ;;  %v514_v32 = vadd.s32 %v9618_v0, %v513_v24  ;;  %v9670_v63 = vld [vmem:[#allocation2 + $0x42] sm:$0xff]  ;;  %v9672_v0 = vld [vmem:[#allocation2 + $0x4a] sm:$0xff] }
  0x42   : > { %vm723_vm10 = vcmp.ne.s32.totalorder %v475_v23, 0  ;;  %vm748_vm11 = vcmp.lt.s32.totalorder %v475_v23, 0  ;;  %v798_v29 = vadd.s32 14, %v475_v23  ;;  %v9642_v30 = vsel %vm847_vm9, 1.0, %v12902_v2  ;;  %v9927_v22 = vld [vmem:[#allocation2 + $0x71] sm:$0xff] }
  0x43   : > { %1393 = vrot.lane.b32.xlu0 %v1215_v61, %s9240_s26  ;;  %vm773_vm12 = vmand %vm748_vm11, %vm723_vm10  ;;  %v489_v34 = vsub.s32 %v9526_v49, %v488_v26  ;;  %v502_v15 = vmul.u32 14, %v501_v28  ;;  %v515_v36 = vshrl.u32 %v514_v32, 3  ;;  %v1218_v49 = vmul.f32 %v9642_v30, %v1193_v48  ;;  %v1244_v61 = vld [vmem:[#allocation2 + $0x48] sm:$0xff]  ;;  %v1196_v28 = vld [vmem:[#allocation2 + $0x57] sm:$0xff] }
  0x44   : > { %8234 = vrot.lane.b32.xlu1 %v8233_v20, %s9239_s24  ;;  %v9646_v38 = vsel %vm773_vm12, %v798_v29, %v475_v23  ;;  %v9649_v39 = vmul.u32.u64.low 2454267026, %v9629_v17  ;;  %v9650_v40 = vmul.u32.u64.high 2454267026, %v9629_v17, %v9649_v39  ;;  %v9688_v20 = vld [vmem:[#allocation2 + $0x52] sm:$0xff]  ;;  %v8238_v26 = vpack.i.bf16 %v9672_v0, %v9670_v63  ;;  %v1003_v29 = vld [vmem:[%s12894_s1 + $0x60] sm:$0xff]  ;;  %v9702_v48 = vld [vmem:[#allocation2 + $0x9] sm:$0xff] }
  0x45   : > { %13107 = vst [vmem:[#allocation24_spill] sm:$0xff] %v9646_v38  ;;  %vm848_vm13 = vcmp.ge.s32.totalorder %v9646_v38, 1  ;;  %vm724_vm14 = vcmp.ne.s32.totalorder %v489_v34, 0  ;;  %vm749_vm15 = vcmp.lt.s32.totalorder %v489_v34, 0  ;;  %v799_v51 = vadd.s32 14, %v489_v34 }
  0x46   : > { %vm774_vm1 = vmand %vm749_vm15, %vm724_vm14  ;;  %v503_v52 = vsub.s32 %v9532_v53, %v502_v15  ;;  %v516_v54 = vmul.u32 14, %v515_v36  ;;  %vm526_vm2 = vc.u32 %v9649_v39, 2454267026  ;;  %v9660_v55 = vsel %vm848_vm13, 1.0, %v12902_v2 }
  0x47   : > { %1497 = vrot.lane.b32.xlu0 %v1242_v12, %s9238_s23  ;;  %v9662_v57 = vsel %vm774_vm1, %v799_v51, %v489_v34  ;;  %v527_v59 = vsel %vm526_vm2, 1, %v12915_v21  ;;  %v1219_v10 = vmul.f32 %v9660_v55, %v1194_v56  ;;  %v1004_v12 = vld [vmem:[%s12894_s1 + $0x68] sm:$0xff]  ;;  %v9713_v39 = vadd.s32 112, %v9356_v6  ;;  %v9718_v51 = vld [vmem:[#allocation2 + $0x19] sm:$0xff] }
  0x48   : > { %13108 = vst [vmem:[#allocation25_spill] sm:$0xff] %v9662_v57  ;;  %1499 = vrot.lane.b32.xlu1 %v1243_v47, %s9238_s23  ;;  %vm849_vm3 = vcmp.ge.s32.totalorder %v9662_v57, 1  ;;  %vm725_vm4 = vcmp.ne.s32.totalorder %v503_v52, 0  ;;  %vm750_vm5 = vcmp.lt.s32.totalorder %v503_v52, 0  ;;  %v800_v31 = vadd.s32 14, %v503_v52  ;;  %v7079_v47 = vld [vmem:[%s9402_s25 + $0xc8] sm:$0xff] }
  0x49   : > { %v9668_v53 = vsel %vm849_vm3, 1.0, %v12902_v2  ;;  %vm775_vm6 = vmand %vm750_vm5, %vm725_vm4  ;;  %v517_v44 = vsub.s32 %v9535_v25, %v516_v54  ;;  %v528_v3 = vadd.s32 %v9650_v40, %v527_v59  ;;  %v9690_v25 = vld [vmem:[#allocation2 + $0x5a] sm:$0xff]  ;;  %v9715_v40 = vld [vmem:[#allocation2 + $0x11] sm:$0xff]  ;;  %v9725_v56 = vadd.s32 120, %v9356_v6 }
  0x4a   : > { %v9681_v11 = vsel %vm775_vm6, %v800_v31, %v503_v52  ;;  %v9684_v16 = vmul.u32.u64.low 2454267026, %v9653_v45  ;;  %v9685_v19 = vmul.u32.u64.high 2454267026, %v9653_v45, %v9684_v16  ;;  %v1220_v24 = vmul.f32 %v9668_v53, %v1195_v62  ;;  %3982 = vst.msk [vmem:[#allocation2 + $0x10] sm:$0xff] %vm326_vm0, %v7079_v47  ;;  %v7080_v59 = vld [vmem:[%s9402_s25 + $0xd0] sm:$0xff]  ;;  %v7081_v62 = vld [vmem:[%s9402_s25 + $0xd8] sm:$0xff] }
  0x4b   : > { %1399 = vrot.lane.b32.xlu0 %v1218_v49, %s9240_s26  ;;  %13109 = vst [vmem:[#allocation26_spill] sm:$0xff] %v9681_v11  ;;  %vm850_vm7 = vcmp.ge.s32.totalorder %v9681_v11, 1  ;;  %vm726_vm8 = vcmp.ne.s32.totalorder %v517_v44, 0  ;;  %vm751_vm9 = vcmp.lt.s32.totalorder %v517_v44, 0  ;;  %v801_v23 = vadd.s32 14, %v517_v44  ;;  %3983 = vst.msk [vmem:[#allocation2 + $0x18] sm:$0xff] %vm326_vm0, %v7080_v59 }
  0x4c   : > { %1501 = vrot.lane.b32.xlu1 %v1244_v61, %s9238_s23  ;;  %vm776_vm10 = vmand %vm751_vm9, %vm726_vm8  ;;  %v529_v32 = vshrl.u32 %v528_v3, 3  ;;  %vm540_vm11 = vc.u32 %v9684_v16, 2454267026  ;;  %v9707_v34 = vsel %vm850_vm7, 1.0, %v12902_v2  ;;  %v9729_v61 = vld [vmem:[#allocation2 + $0x21] sm:$0xff]  ;;  %v9737_v0 = vadd.s32 128, %v9356_v6 }
  0x4d   : > { %v9709_v15 = vsel %vm776_vm10, %v801_v23, %v517_v44  ;;  %v541_v36 = vsel %vm540_vm11, 1, %v12915_v21  ;;  %v9733_v31 = vmul.u32.u64.low 2454267026, %v9677_v5  ;;  %v9734_v63 = vmul.u32.u64.high 2454267026, %v9677_v5, %v9733_v31  ;;  %3984 = vst.msk [vmem:[#allocation2 + $0x20] sm:$0xff] %vm326_vm0, %v7081_v62  ;;  %v9744_v3 = vld [vmem:[#allocation2 + $0x29] sm:$0xff]  ;;  %v9755_v47 = vld [vmem:[#allocation2 + $0x39] sm:$0xff] }
  0x4e   : > { %13110 = vst [vmem:[#allocation27_spill] sm:$0xff] %v9709_v15  ;;  %v530_v52 = vmul.u32 14, %v529_v32  ;;  %v542_v54 = vadd.s32 %v9685_v19, %v541_v36  ;;  %v9740_v44 = vadd.s32 136, %v9356_v6  ;;  %v1221_v16 = vmul.f32 %v9707_v34, %v1196_v28  ;;  %v9752_v32 = vld [vmem:[#allocation2 + $0x31] sm:$0xff]  ;;  %v7083_v36 = vld [vmem:[%s9402_s25 + $0xe8] sm:$0xff] }
  0x4f   : > { %1401 = vrot.lane.b32.xlu0 %v1219_v10, %s9240_s26  ;;  %v7082_v10 = vld [vmem:[%s9402_s25 + $0xe0] sm:$0xff]  ;;  %vm851_vm12 = vcmp.ge.s32.totalorder %v9709_v15, 1  ;;  %v1245_v59 = vld [vmem:[#allocation2 + $0x50] sm:$0xff]  ;;  %vm554_vm13 = vc.u32 %v9733_v31, 2454267026  ;;  %v9761_v28 = vpack.c.bf16 %v1004_v12, %v1003_v29  ;;  %3986 = vst.msk [vmem:[#allocation2 + $0x30] sm:$0xff] %vm326_vm0, %v7083_v36  ;;  %v13115_v43 = vpack.i.bf16 %v9690_v25, %v9688_v20 }
  0x50   : > { %1403 = vrot.lane.b32.xlu1 %v1220_v24, %s9240_s26  ;;  %v531_v19 = vsub.s32 %v9629_v17, %v530_v52  ;;  %v543_v23 = vshrl.u32 %v542_v54, 3  ;;  %3985 = vst.msk [vmem:[#allocation2 + $0x28] sm:$0xff] %vm326_vm0, %v7082_v10  ;;  %v9758_v62 = vmul.u32.u64.low 2454267026, %v9713_v39  ;;  %v9759_v24 = vmul.u32.u64.high 2454267026, %v9713_v39, %v9758_v62  ;;  %v7084_v17 = vld [vmem:[%s9402_s25 + $0xf0] sm:$0xff]  ;;  %v9765_v52 = vld [vmem:[#allocation2 + $0x41] sm:$0xff] }
  0x51   : > { %13111 = vst [vmem:[#allocation28_spill] sm:$0xff] %v9761_v28  ;;  %3987 = vst.msk [vmem:[#allocation2 + $0x38] sm:$0xff] %vm326_vm0, %v7084_v17  ;;  %v7085_v49 = vld [vmem:[%s9402_s25 + $0xf8] sm:$0xff]  ;;  %v9770_v2 = vld [vmem:[#allocation2 + $0x49] sm:$0xff]  ;;  %v555_v29 = vsel %vm554_vm13, 1, %v12915_v21  ;;  %7760 = vmatpush1.bf16.msra.mxu0 %v9761_v28  ;;  %v10006_v37 = vadd.s32 184, %v9356_v6 }
  0x52   : > { %vm727_vm14 = vcmp.ne.s32.totalorder %v531_v19, 0  ;;  %vm752_vm15 = vcmp.lt.s32.totalorder %v531_v19, 0  ;;  %v802_v54 = vadd.s32 14, %v531_v19  ;;  %v544_v10 = vmul.u32 14, %v543_v23  ;;  %3988 = vst.msk [vmem:[#allocation2 + $0x40] sm:$0xff] %vm326_vm0, %v7085_v49  ;;  %v1246_v49 = vld [vmem:[#allocation2 + $0x58] sm:$0xff] }
  0x53   : > { %8239 = vrot.lane.b32.xlu0 %v8238_v26, %s9239_s24  ;;  %vm777_vm1 = vmand %vm752_vm15, %vm727_vm14  ;;  %vm568_vm2 = vc.u32 %v9758_v62, 2454267026  ;;  %v9775_v12 = vmul.u32.u64.low 2454267026, %v9725_v56  ;;  %v9776_v36 = vmul.u32.u64.high 2454267026, %v9725_v56, %v9775_v12  ;;  %v7086_v26 = vld [vmem:[%s9402_s25 + $0x100] sm:$0xff]  ;;  %v556_v7 = vadd.s32 %v9734_v63, %v555_v29  ;;  %v1006_v63 = vld [vmem:[%s12894_s1 + $0x78] sm:$0xff] }
  0x54   : > { %1405 = vrot.lane.b32.xlu1 %v1221_v16, %s9240_s26  ;;  %v9782_v23 = vsel %vm777_vm1, %v802_v54, %v531_v19  ;;  %v545_v17 = vsub.s32 %v9653_v45, %v544_v10  ;;  %v569_v31 = vsel %vm568_vm2, 1, %v12915_v21  ;;  %v13113_v62 = vmov 0.0|0.0   ;;  %3989 = vst.msk [vmem:[#allocation2 + $0x48] sm:$0xff] %vm326_vm0, %v7086_v26  ;;  %v1197_v10 = vld [vmem:[#allocation2 + $0x5f] sm:$0xff]  ;;  %v1198_v29 = vld [vmem:[#allocation2 + $0x67] sm:$0xff] }
  0x55   : > { %13112 = vst [vmem:[#allocation29_spill] sm:$0xff] %v9782_v23  ;;  %7761 = vmatprep.subr.bf16.mxu0 %v13113_v62  ;;  %vm852_vm3 = vcmp.ge.s32.totalorder %v9782_v23, 1  ;;  %v570_v16 = vadd.s32 %v9759_v24, %v569_v31  ;;  %vm582_vm4 = vc.u32 %v9775_v12, 2454267026  ;;  %v9795_v45 = vadd.s32 144, %v9356_v6  ;;  %v7089_v11 = vld [vmem:[%s9402_s25 + $0x118] sm:$0xff] }
  0x56   : > { %v13114_v19 = vmov 0.0   ;;  %vm728_vm5 = vcmp.ne.s32.totalorder %v545_v17, 0  ;;  %vm753_vm6 = vcmp.lt.s32.totalorder %v545_v17, 0  ;;  %v803_v24 = vadd.s32 14, %v545_v17 }
  0x57   : > { %1503 = vrot.lane.b32.xlu0 %v1245_v59, %s9238_s23  ;;  %v9804_v54 = vsel %vm851_vm12, 1.0, %v13114_v19  ;;  %v9807_v12 = vsel %vm852_vm3, 1.0, %v13114_v19  ;;  %vm778_vm7 = vmand %vm753_vm6, %vm728_vm5  ;;  %v557_v26 = vshrl.u32 %v556_v7, 3  ;;  %v571_v31 = vshrl.u32 %v570_v16, 3  ;;  %v7087_v59 = vld [vmem:[%s9402_s25 + $0x108] sm:$0xff]  ;;  %v1247_v7 = vld [vmem:[#allocation2 + $0x60] sm:$0xff] }
  0x58   : > { %v583_v28 = vsel %vm582_vm4, 1, %v12915_v21  ;;  %8244 = vrot.lane.b32.xlu1 %v13115_v43, %s9239_s24  ;;  %v9817_v18 = vsel %vm778_vm7, %v803_v24, %v545_v17  ;;  %v9821_v8 = vmul.u32.u64.low 2454267026, %v9737_v0  ;;  %v9822_v23 = vmul.u32.u64.high 2454267026, %v9737_v0, %v9821_v8  ;;  %3990 = vst.msk [vmem:[#allocation2 + $0x50] sm:$0xff] %vm326_vm0, %v7087_v59  ;;  %v9850_v59 = vld [vmem:[#allocation2 + $0x72] sm:$0xff] }
  0x59   : > { %13116 = vst [vmem:[#allocation30_spill] sm:$0xff] %v9817_v18  ;;  %v584_v9 = vadd.s32 %v9776_v36, %v583_v28  ;;  %vm853_vm8 = vcmp.ge.s32.totalorder %v9817_v18, 1  ;;  %v558_v16 = vmul.u32 14, %v557_v26  ;;  %v572_v21 = vmul.u32 14, %v571_v31  ;;  %v9865_v18 = vld [vmem:[#allocation2 + $0x61] sm:$0xff] }
  0x5a   : > { %v9826_v15 = vpack.c.bf16 %v1006_v63, %v1005_v35  ;;  %v1222_v43 = vmul.f32 %v9804_v54, %v1197_v10  ;;  %v1223_v20 = vmul.f32 %v9807_v12, %v1198_v29  ;;  %vm596_vm9 = vc.u32 %v9821_v8, 2454267026  ;;  %v9838_v35 = vld [vmem:[#allocation2 + $0x59] sm:$0xff]  ;;  %v1248_v63 = vld [vmem:[#allocation2 + $0x68] sm:$0xff] }
  0x5b   : > { %1505 = vrot.lane.b32.xlu0 %v1246_v49, %s9238_s23  ;;  %v585_v25 = vshrl.u32 %v584_v9, 3  ;;  %v9832_v28 = vsel %vm853_vm8, 1.0, %v13114_v19  ;;  %v559_v36 = vsub.s32 %v9677_v5, %v558_v16  ;;  %v573_v17 = vsub.s32 %v9713_v39, %v572_v21  ;;  %v7088_v49 = vld [vmem:[%s9402_s25 + $0x110] sm:$0xff]  ;;  %v1174_v21 = vld [vmem:[#allocation2 + $0x62] sm:$0xff] }
  0x5c   : > { %13117 = vst [vmem:[#allocation31_spill] sm:$0xff] %v9826_v15  ;;  %v13118_v24 = vmov 0   ;;  %7763 = vmatpush1.bf16.msra.mxu0 %v9826_v15  ;;  %1507 = vrot.lane.b32.xlu1 %v1247_v7, %s9238_s23  ;;  %v1199_v10 = vld [vmem:[#allocation2 + $0x6f] sm:$0xff]  ;;  %v9844_v29 = vmul.u32.u64.low 2454267026, %v9740_v44  ;;  %v9845_v31 = vmul.u32.u64.high 2454267026, %v9740_v44, %v9844_v29  ;;  %3991 = vst.msk [vmem:[#allocation2 + $0x58] sm:$0xff] %vm326_vm0, %v7088_v49 }
  0x5d   : > { %v597_v26 = vsel %vm596_vm9, 1, %v13118_v24  ;;  %v586_v9 = vmul.u32 14, %v585_v25  ;;  %7764 = vmatprep.subr.bf16.mxu0 %v13113_v62  ;;  %v1175_v5 = vld [vmem:[#allocation2 + $0x6a] sm:$0xff]  ;;  %vm729_vm10 = vcmp.ne.s32.totalorder %v559_v36, 0  ;;  %vm754_vm11 = vcmp.lt.s32.totalorder %v559_v36, 0  ;;  %3992 = vst.msk [vmem:[#allocation2 + $0x60] sm:$0xff] %vm326_vm0, %v7089_v11 }
  0x5e   : > { %v598_v8 = vadd.s32 %v9822_v23, %v597_v26  ;;  %v804_v39 = vadd.s32 14, %v559_v36  ;;  %vm730_vm12 = vcmp.ne.s32.totalorder %v573_v17, 0  ;;  %vm779_vm13 = vmand %vm754_vm11, %vm729_vm10  ;;  %v9852_v23 = vld [vmem:[#allocation2 + $0x7a] sm:$0xff]  ;;  %vm755_vm14 = vcmp.lt.s32.totalorder %v573_v17, 0 }
  0x5f   : > { %1407 = vrot.lane.b32.xlu0 %v1222_v43, %s9240_s26  ;;  %v805_v7 = vadd.s32 14, %v573_v17  ;;  %v587_v16 = vsub.s32 %v9725_v56, %v586_v9  ;;  %vm9857_vm15 = vmand %vm755_vm14, %vm730_vm12  ;;  %vm610_vm1 = vc.u32 %v9844_v29, 2454267026  ;;  %v1224_v57 = vmul.f32 %v9832_v28, %v1199_v10 }
  0x60   : > { %v599_v25 = vshrl.u32 %v598_v8, 3  ;;  %v9855_v26 = vsel %vm779_vm13, %v804_v39, %v559_v36  ;;  %v9862_v15 = vmul.u32.u64.low 2454267026, %v9795_v45  ;;  %v9863_v43 = vmul.u32.u64.high 2454267026, %v9795_v45, %v9862_v15  ;;  %1509 = vrot.lane.b32.xlu1 %v1248_v63, %s9238_s23  ;;  %v1200_v8 = vld [vmem:[#allocation2 + $0x77] sm:$0xff] }
  0x61   : > { %13119 = vst [vmem:[#allocation32_spill] sm:$0xff] %v9855_v26  ;;  %v8248_v56 = vpack.i.bf16 %v1175_v5, %v1174_v21  ;;  %vm854_vm2 = vcmp.ge.s32.totalorder %v9855_v26, 1  ;;  %v9872_v36 = vadd.s32 152, %v9356_v6  ;;  %v8253_v39 = vpack.i.bf16 %v9852_v23, %v9850_v59  ;;  %v9895_v23 = vld [vmem:[#allocation2 + $0x69] sm:$0xff] }
  0x62   : > { %v9876_v9 = vsel %vm854_vm2, 1.0, %v13114_v19  ;;  %v600_v38 = vmul.u32 14, %v599_v25  ;;  %v9881_v63 = vadd.s32 160, %v9356_v6  ;;  %v9886_v10 = vsel %vm9857_vm15, %v805_v7, %v573_v17 }
  0x63   : > { %1409 = vrot.lane.b32.xlu0 %v1223_v20, %s9240_s26  ;;  %13122 = vst [vmem:[#allocation33_spill] sm:$0xff] %v9886_v10  ;;  %v611_v11 = vsel %vm610_vm1, 1, %v13118_v24  ;;  %vm624_vm3 = vc.u32 %v9862_v15, 2454267026  ;;  %v9891_v21 = vadd.s32 168, %v9356_v6  ;;  %vm731_vm4 = vcmp.ne.s32.totalorder %v587_v16, 0 }
  0x64   : > { %vm756_vm5 = vcmp.lt.s32.totalorder %v587_v16, 0  ;;  %v601_v5 = vsub.s32 %v9737_v0, %v600_v38  ;;  %v612_v59 = vadd.s32 %v9845_v31, %v611_v11  ;;  %v7090_v20 = vld [vmem:[%s9402_s25 + $0x120] sm:$0xff]  ;;  %1411 = vrot.lane.b32.xlu1 %v1224_v57, %s9240_s26  ;;  %v1225_v17 = vmul.f32 %v9876_v9, %v1200_v8  ;;  %v1249_v0 = vld [vmem:[#allocation2 + $0x70] sm:$0xff] }
  0x65   : > { %v625_v29 = vsel %vm624_vm3, 1, %v13118_v24  ;;  %v9902_v15 = vmul.u32.u64.low 2454267026, %v9872_v36  ;;  %v9903_v7 = vmul.u32.u64.high 2454267026, %v9872_v36, %v9902_v15  ;;  %3993 = vst.msk [vmem:[#allocation2 + $0x68] sm:$0xff] %vm326_vm0, %v7090_v20  ;;  %vm855_vm6 = vcmp.ge.s32.totalorder %v9886_v10, 1  ;;  %vm9910_vm9 = vmand %vm756_vm5, %vm731_vm4  ;;  %v1250_v10 = vld [vmem:[#allocation2 + $0x78] sm:$0xff] }
  0x66   : > { %v806_v38 = vadd.s32 14, %v587_v16  ;;  %vm732_vm7 = vcmp.ne.s32.totalorder %v601_v5, 0  ;;  %vm757_vm8 = vcmp.lt.s32.totalorder %v601_v5, 0  ;;  %v807_v31 = vadd.s32 14, %v601_v5  ;;  %3994 = vst.msk [vmem:[#allocation2 + $0x70] sm:$0xff] %vm326_vm0, %v7091_v14  ;;  %v9952_v57 = vld [vmem:[#allocation2 + $0x79] sm:$0xff] }
  0x67   : > { %8249 = vrot.lane.b32.xlu0 %v8248_v56, %s9239_s24  ;;  %v613_v25 = vshrl.u32 %v612_v59, 3  ;;  %v626_v49 = vadd.s32 %v9863_v43, %v625_v29  ;;  %vm638_vm10 = vc.u32 %v9902_v15, 2454267026  ;;  %vm9915_vm11 = vmand %vm757_vm8, %vm732_vm7  ;;  %v9925_v26 = vadd.s32 176, %v9356_v6  ;;  %v1007_v8 = vld [vmem:[%s12894_s1 + $0x80] sm:$0xff] }
  0x68   : > { %v639_v11 = vsel %vm638_vm10, 1, %v13118_v24  ;;  %v9921_v56 = vmul.u32.u64.low 2454267026, %v9881_v63  ;;  %v9922_v20 = vmul.u32.u64.high 2454267026, %v9881_v63, %v9921_v56  ;;  %1413 = vrot.lane.b32.xlu1 %v1225_v17, %s9240_s26  ;;  %v9934_v43 = vsel %vm855_vm6, 1.0, %v13114_v19 }
  0x69   : > { %v614_v59 = vmul.u32 14, %v613_v25  ;;  %v627_v29 = vshrl.u32 %v626_v49, 3  ;;  %v640_v15 = vadd.s32 %v9903_v7, %v639_v11  ;;  %v9940_v46 = vsel %vm9910_vm9, %v806_v38, %v587_v16 }
  0x6a   : > { %13127 = vst [vmem:[#allocation34_spill] sm:$0xff] %v9940_v46  ;;  %vm652_vm12 = vc.u32 %v9921_v56, 2454267026  ;;  %v9943_v33 = vmul.u32.u64.low 2454267026, %v9891_v21  ;;  %v9944_v17 = vmul.u32.u64.high 2454267026, %v9891_v21, %v9943_v33  ;;  %v9949_v25 = vsel %vm9915_vm11, %v807_v31, %v601_v5  ;;  %v1251_v56 = vld [vmem:[#allocation2 + $0x80] sm:$0xff] }
  0x6b   : > { %1511 = vrot.lane.b32.xlu0 %v1249_v0, %s9238_s23  ;;  %13128 = vst [vmem:[#allocation35_spill] sm:$0xff] %v9949_v25  ;;  %v615_v7 = vsub.s32 %v9740_v44, %v614_v59  ;;  %v628_v14 = vmul.u32 14, %v627_v29  ;;  %v641_v49 = vshrl.u32 %v640_v15, 3  ;;  %v653_v16 = vsel %vm652_vm12, 1, %v13118_v24  ;;  %v7092_v0 = vld [vmem:[%s9402_s25 + $0x130] sm:$0xff] }
  0x6c   : > { %vm666_vm13 = vc.u32 %v9943_v33, 2454267026  ;;  %v9956_v38 = vmul.u32.u64.low 2454267026, %v9925_v26  ;;  %v9957_v11 = vmul.u32.u64.high 2454267026, %v9925_v26, %v9956_v38  ;;  %8254 = vrot.lane.b32.xlu1 %v8253_v39, %s9239_s24  ;;  %vm856_vm14 = vcmp.ge.s32.totalorder %v9940_v46, 1  ;;  %3995 = vst.msk [vmem:[#allocation2 + $0x78] sm:$0xff] %vm326_vm0, %v7092_v0 }
  0x6d   : > { %vm733_vm15 = vcmp.ne.s32.totalorder %v615_v7, 0  ;;  %vm758_vm1 = vcmp.lt.s32.totalorder %v615_v7, 0  ;;  %v808_v44 = vadd.s32 14, %v615_v7  ;;  %v629_v5 = vsub.s32 %v9795_v45, %v628_v14  ;;  %v1008_v39 = vld [vmem:[%s12894_s1 + $0x88] sm:$0xff] }
  0x6e   : > { %vm783_vm2 = vmand %vm758_vm1, %vm733_vm15  ;;  %v654_v33 = vadd.s32 %v9922_v20, %v653_v16  ;;  %v667_v31 = vsel %vm666_vm13, 1, %v13118_v24  ;;  %v1226_v59 = vmul.f32 %v9934_v43, %v1201_v1  ;;  %vm857_vm3 = vcmp.ge.s32.totalorder %v9949_v25, 1  ;;  %v1202_v20 = vld [vmem:[#allocation2 + $0x87] sm:$0xff]  ;;  %v1009_v1 = vld [vmem:[%s12894_s1 + $0x90] sm:$0xff] }
  0x6f   : > { %1513 = vrot.lane.b32.xlu0 %v1250_v10, %s9238_s23  ;;  %v9975_v29 = vsel %vm783_vm2, %v808_v44, %v615_v7  ;;  %v9978_v45 = vsel %vm856_vm14, 1.0, %v13114_v19  ;;  %v642_v15 = vmul.u32 14, %v641_v49  ;;  %v668_v16 = vadd.s32 %v9944_v17, %v667_v31  ;;  %v1010_v10 = vld [vmem:[%s12894_s1 + $0x98] sm:$0xff]  ;;  %v1252_v7 = vld [vmem:[#allocation2 + $0x88] sm:$0xff]  ;;  %v1011_v25 = vld [vmem:[%s12894_s1 + $0xa0] sm:$0xff] }
  0x70   : > { %13129 = vst [vmem:[#allocation36_spill] sm:$0xff] %v9975_v29  ;;  %v655_v14 = vshrl.u32 %v654_v33, 3  ;;  %1515 = vrot.lane.b32.xlu1 %v1251_v56, %s9238_s23  ;;  %vm680_vm4 = vc.u32 %v9956_v38, 2454267026  ;;  %v9982_v0 = vpack.c.bf16 %v1008_v39, %v1007_v8  ;;  %v9991_v44 = vsel %vm857_vm3, 1.0, %v13114_v19  ;;  %v1203_v49 = vld [vmem:[#allocation2 + $0x8f] sm:$0xff] }
  0x71   : > { %13131 = vst [vmem:[#allocation38_spill] sm:$0xff] %v9991_v44  ;;  %vm858_vm5 = vcmp.ge.s32.totalorder %v9975_v29, 1  ;;  %vm734_vm6 = vcmp.ne.s32.totalorder %v629_v5, 0  ;;  %vm759_vm7 = vcmp.lt.s32.totalorder %v629_v5, 0  ;;  %v1227_v17 = vmul.f32 %v9978_v45, %v1202_v20  ;;  %v1178_v56 = vld [vmem:[#allocation2 + $0x82] sm:$0xff]  ;;  %v1179_v33 = vld [vmem:[#allocation2 + $0x8a] sm:$0xff] }
  0x72   : > { %13130 = vst [vmem:[#allocation37_spill] sm:$0xff] %v9982_v0  ;;  %v809_v31 = vadd.s32 14, %v629_v5  ;;  %v656_v8 = vmul.u32 14, %v655_v14  ;;  %v669_v39 = vshrl.u32 %v668_v16, 3  ;;  %7766 = vmatpush1.bf16.msra.mxu0 %v9982_v0  ;;  %v10001_v46 = vsub.s32 %v9872_v36, %v642_v15  ;;  %v1012_v14 = vld [vmem:[%s12894_s1 + $0xa8] sm:$0xff]  ;;  %v7093_v0 = vld [vmem:[%s9402_s25 + $0x138] sm:$0xff]  ;;  %vm784_vm8 = vmand %vm759_vm7, %vm734_vm6 }
  0x73   : > { %1415 = vrot.lane.b32.xlu0 %v1226_v59, %s9240_s26  ;;  %v681_v59 = vsel %vm680_vm4, 1, %v13118_v24  ;;  %7767 = vmatprep.subr.bf16.mxu0 %v13113_v62  ;;  %v10009_v20 = vpack.c.bf16 %v1010_v10, %v1009_v1  ;;  %v10014_v16 = vld [vmem:[#allocation2 + $0x81] sm:$0xff]  ;;  %v1228_v36 = vmul.f32 %v9991_v44, %v1203_v49  ;;  %v10022_v38 = vsel %vm858_vm5, 1.0, %v13114_v19  ;;  %v1204_v15 = vld [vmem:[#allocation2 + $0x97] sm:$0xff] }
  0x74   : > { %1517 = vrot.lane.b32.xlu1 %v1252_v7, %s9238_s23  ;;  %13133 = vst [vmem:[#allocation40_spill] sm:$0xff] %v10022_v38  ;;  %3996 = vst.msk [vmem:[#allocation2 + $0x80] sm:$0xff] %vm326_vm0, %v7093_v0  ;;  %v10028_v1 = vsub.s32 %v9881_v63, %v656_v8  ;;  %v670_v10 = vmul.u32 14, %v669_v39  ;;  %v10031_v7 = vmul.u32.u64.low 2454267026, %v10006_v37  ;;  %v10032_v41 = vmul.u32.u64.high 2454267026, %v10006_v37, %v10031_v7  ;;  %v1013_v63 = vld [vmem:[%s12894_s1 + $0xb0] sm:$0xff] }
  0x75   : > { %13132 = vst [vmem:[#allocation39_spill] sm:$0xff] %v10009_v20  ;;  %v8258_v49 = vpack.i.bf16 %v1179_v33, %v1178_v56  ;;  %v682_v29 = vadd.s32 %v9957_v11, %v681_v59  ;;  %v10037_v44 = vpack.c.bf16 %v1012_v14, %v1011_v25  ;;  %v1086_v0 = vld [vmem:[%s9402_s25 + $0xc0] sm:$0xf]  ;;  %v1014_v8 = vld [vmem:[%s12894_s1 + $0xb8] sm:$0xff]  ;;  %v10046_v39 = vsel %vm784_vm8, %v809_v31, %v629_v5  ;;  %v10051_v25 = vld [vmem:[#allocation2 + $0x89] sm:$0xff] }
  0x76   : > { %7769 = vmatpush1.bf16.msra.mxu0 %v10009_v20  ;;  %13135 = vst [vmem:[#allocation42_spill] sm:$0xff] %v10046_v39  ;;  %vm735_vm9 = vcmp.ne.s32.totalorder %v10001_v46, 0  ;;  %vm760_vm10 = vcmp.lt.s32.totalorder %v10001_v46, 0  ;;  %vm694_vm11 = vc.u32 %v10031_v7, 2454267026  ;;  %v7094_v11 = vld [vmem:[%s9402_s25 + $0x140] sm:$0xff]  ;;  %v671_v14 = vsub.s32 %v9891_v21, %v670_v10 }
  0x77   : > { %1417 = vrot.lane.b32.xlu0 %v1227_v17, %s9240_s26  ;;  %13134 = vst [vmem:[#allocation41_spill] sm:$0xff] %v10037_v44  ;;  %7770 = vmatprep.subr.bf16.mxu0 %v13113_v62  ;;  %v1229_v17 = vmul.f32 %v10022_v38, %v1204_v15  ;;  %v695_v56 = vsel %vm694_vm11, 1, %v13118_v24  ;;  %vm331_vm12 = vcmask 388096   ;;  %v10058_v5 = vadd.s32 192, %v9356_v6  ;;  %3997 = vst.msk [vmem:[#allocation2 + $0x88] sm:$0xff] %vm326_vm0, %v7094_v11  ;;  %v1180_v33 = vld [vmem:[#allocation2 + $0x92] sm:$0xff] }
  0x78   : > { %1419 = vrot.lane.b32.xlu1 %v1228_v36, %s9240_s26  ;;  %v1181_v31 = vld [vmem:[#allocation2 + $0x9a] sm:$0xff]  ;;  %v810_v59 = vadd.s32 14, %v10001_v46  ;;  %vm736_vm13 = vcmp.ne.s32.totalorder %v10028_v1, 0  ;;  %vm761_vm14 = vcmp.lt.s32.totalorder %v10028_v1, 0  ;;  %1111 = vst.msk [vmem:[#allocation2 + $0xd0] sm:$0xf] %vm331_vm12, %v1086_v0  ;;  %vm10072_vm1 = vmand %vm760_vm10, %vm735_vm9  ;;  %v10077_v7 = vpack.c.bf16 %v1014_v8, %v1013_v63 }
  0x79   : > { %vm859_vm15 = vcmp.ge.s32.totalorder %v10046_v39, 1  ;;  %v683_v15 = vshrl.u32 %v682_v29, 3  ;;  %v1253_v21 = vld [vmem:[#allocation2 + $0x90] sm:$0xff]  ;;  %v811_v10 = vadd.s32 14, %v10028_v1  ;;  %v7095_v20 = vld [vmem:[%s9402_s25 + $0x148] sm:$0xff]  ;;  %v8263_v29 = vpack.i.bf16 %v1181_v31, %v1180_v33  ;;  %vm10094_vm2 = vmand %vm761_vm14, %vm736_vm13 }
  0x7a   : > { %7772 = vmatpush1.bf16.msra.mxu0 %v10037_v44  ;;  %13138 = vst [vmem:[#allocation43_spill] sm:$0xff] %v10077_v7  ;;  %v10082_v0 = vmul.u32.u64.low 2454267026, %v10058_v5  ;;  %v10083_v11 = vmul.u32.u64.high 2454267026, %v10058_v5, %v10082_v0  ;;  %v10086_v6 = vld [vmem:[#allocation2 + $0x91] sm:$0xff]  ;;  %v10102_v8 = vsel %vm10072_vm1, %v810_v59, %v10001_v46  ;;  %vm737_vm3 = vcmp.ne.s32.totalorder %v671_v14, 0  ;;  %v1205_v33 = vld [vmem:[#allocation2 + $0x9f] sm:$0xff] }
  0x7b   : > { %8259 = vrot.lane.b32.xlu0 %v8258_v49, %s9239_s24  ;;  %v696_v49 = vadd.s32 %v10032_v41, %v695_v56  ;;  %7773 = vmatprep.subr.bf16.mxu0 %v13113_v62  ;;  %13139 = vst [vmem:[#allocation44_spill] sm:$0xff] %v10086_v6  ;;  %3998 = vst.msk [vmem:[#allocation2 + $0x90] sm:$0xff] %vm326_vm0, %v7095_v20  ;;  %v1254_v41 = vld [vmem:[#allocation2 + $0x98] sm:$0xff]  ;;  %vm762_vm4 = vcmp.lt.s32.totalorder %v671_v14, 0  ;;  %v10109_v56 = vsel %vm859_vm15, 1.0, %v13114_v19  ;;  %v684_v20 = vmul.u32 14, %v683_v15 }
  0x7c   : > { %1421 = vrot.lane.b32.xlu1 %v1229_v17, %s9240_s26  ;;  %13142 = vst [vmem:[#allocation45_spill] sm:$0xff] %v10102_v8  ;;  %vm708_vm5 = vc.u32 %v10082_v0, 2454267026  ;;  %v7103_v17 = vld [vmem:[%s9402_s25 + $0x188] sm:$0xf]  ;;  %13143 = vst [vmem:[#allocation46_spill] sm:$0xff] %v10109_v56  ;;  %v10119_v59 = vsel %vm10094_vm2, %v811_v10, %v10028_v1 }
  0x7d   : > { %v10111_v31 = vld [vmem:[#allocation2 + $0xc8] sm:$0xff]  ;;  %v709_v36 = vsel %vm708_vm5, 1, %v13118_v24  ;;  %v7102_v46 = vld [vmem:[%s9402_s25 + $0x180] sm:$0xff]  ;;  %13144 = vst [vmem:[#allocation47_spill] sm:$0xff] %v10119_v59  ;;  %v697_v0 = vshrl.u32 %v696_v49, 3  ;;  %v7096_v15 = vld [vmem:[%s9402_s25 + $0x150] sm:$0xff] }
  0x7e   : > { %7775 = vmatpush1.bf16.msra.mxu0 %v10077_v7  ;;  %v10121_v44 = vld [vmem:[#allocation2 + $0xc7] sm:$0xff]  ;;  %v710_v39 = vadd.s32 %v10083_v11, %v709_v36  ;;  %v10124_v6 = vld [vmem:[#allocation2 + $0x99] sm:$0xff]  ;;  %vm860_vm6 = vcmp.ge.s32.totalorder %v10102_v8, 1  ;;  %vm787_vm7 = vmand %vm762_vm4, %vm737_vm3  ;;  %v1230_v11 = vmul.f32 %v10109_v56, %v1205_v33  ;;  %vm861_vm8 = vcmp.ge.s32.totalorder %v10119_v59, 1 }
  0x7f   : > { %1519 = vrot.lane.b32.xlu0 %v1253_v21, %s9238_s23  ;;  %v812_v21 = vadd.s32 14, %v671_v14  ;;  %7830 = vmatprep.subr.bf16.mxu0 %v13113_v62  ;;  %v10132_v24 = vld [vmem:[#allocation2 + $0xcf] sm:$0xf]  ;;  %3999 = vst.msk [vmem:[#allocation2 + $0x98] sm:$0xff] %vm326_vm0, %v7096_v15  ;;  %v1255_v10 = vld [vmem:[#allocation2 + $0xa0] sm:$0xff]  ;;  %v685_v15 = vsub.s32 %v9925_v26, %v684_v20 }
  0x80   : > { %8264 = vrot.lane.b32.xlu1 %v8263_v29, %s9239_s24  ;;  %v10134_v1 = vld [vmem:[#allocation2 + $0xd0] sm:$0xf]  ;;  %v711_v49 = vshrl.u32 %v710_v39, 3  ;;  %4005 = vst.msk [vmem:[#allocation2 + $0xc8] sm:$0xff] %vm326_vm0, %v7102_v46  ;;  %v10143_v29 = vsel %vm860_vm6, 1.0, %v13114_v19  ;;  %v1206_v63 = vld [vmem:[#allocation2 + $0xa7] sm:$0xff] }
  0x81   : > { %4006 = vst.msk [vmem:[#allocation2 + $0xd0] sm:$0xf] %vm331_vm12, %v7103_v17  ;;  %13145 = vst [vmem:[#allocation48_spill] sm:$0xff] %v10143_v29  ;;  %v10145_v36 = vsel %vm787_vm7, %v812_v21, %v671_v14  ;;  %v698_v39 = vmul.u32 14, %v697_v0  ;;  %v1256_v46 = vld [vmem:[#allocation2 + $0xa8] sm:$0xff]  ;;  %v10150_v17 = vsel %vm861_vm8, 1.0, %v13114_v19  ;;  %v1231_v7 = vmul.f32 %v10143_v29, %v1206_v63 }
  0x82   : > { %13146 = vst [vmem:[#allocation49_spill] sm:$0xff] %v10145_v36  ;;  %13147 = vst [vmem:[#allocation50_spill] sm:$0xff] %v10150_v17  ;;  %v712_v33 = vmul.u32 14, %v711_v49  ;;  %v1182_v59 = vld [vmem:[#allocation2 + $0xa2] sm:$0xff]  ;;  %vm862_vm9 = vcmp.ge.s32.totalorder %v10145_v36, 1  ;;  %v1183_v14 = vld [vmem:[#allocation2 + $0xaa] sm:$0xff] }
  0x83   : > { %1521 = vrot.lane.b32.xlu0 %v1254_v41, %s9238_s23  ;;  %v1207_v41 = vld [vmem:[#allocation2 + $0xaf] sm:$0xff]  ;;  %vm738_vm10 = vcmp.ne.s32.totalorder %v685_v15, 0  ;;  %vm763_vm11 = vcmp.lt.s32.totalorder %v685_v15, 0  ;;  %v699_v26 = vsub.s32 %v10006_v37, %v698_v39  ;;  %v10156_v20 = vld [vmem:[#allocation2 + $0xa1] sm:$0xff]  ;;  %v7097_v21 = vld [vmem:[%s9402_s25 + $0x158] sm:$0xff]  ;;  %v8268_v37 = vpack.i.bf16 %v1183_v14, %v1182_v59 }
  0x84   : > { %1523 = vrot.lane.b32.xlu1 %v1255_v10, %s9238_s23  ;;  %v1232_v0 = vmul.f32 %v10150_v17, %v1207_v41  ;;  %4000 = vst.msk [vmem:[#allocation2 + $0xa0] sm:$0xff] %vm326_vm0, %v7097_v21  ;;  %v10163_v10 = vsel %vm862_vm9, 1.0, %v13114_v19  ;;  %v1208_v49 = vld [vmem:[#allocation2 + $0xb7] sm:$0xff]  ;;  %v713_v63 = vsub.s32 %v10058_v5, %v712_v33  ;;  %vm788_vm12 = vmand %vm763_vm11, %vm738_vm10  ;;  %v10167_v39 = vld [vmem:[#allocation2 + $0xa9] sm:$0xff]  ;;  %vm333_vm7 = vcmask 261120  }
  0x85   : > { %13148 = vst [vmem:[#allocation51_spill] sm:$0xff] %v10163_v10  ;;  %vm739_vm13 = vcmp.ne.s32.totalorder %v699_v26, 0  ;;  %vm764_vm14 = vcmp.lt.s32.totalorder %v699_v26, 0  ;;  %v1233_v41 = vmul.f32 %v10163_v10, %v1208_v49  ;;  %v1184_v21 = vld [vmem:[#allocation2 + $0xb2] sm:$0xff]  ;;  %v1185_v36 = vld [vmem:[#allocation2 + $0xba] sm:$0xff]  ;;  %v814_v5 = vadd.s32 14, %v699_v26 }
  0x86   : > { %vm740_vm15 = vcmp.ne.s32.totalorder %v713_v63, 0  ;;  %vm765_vm1 = vcmp.lt.s32.totalorder %v713_v63, 0  ;;  %vm789_vm2 = vmand %vm764_vm14, %vm739_vm13  ;;  %v815_v59 = vadd.s32 14, %v713_v63  ;;  %v10176_v33 = vld [vmem:[#allocation2 + $0xb1] sm:$0xff]  ;;  %v7099_v14 = vld [vmem:[%s9402_s25 + $0x168] sm:$0xff]  ;;  %334 = vst.msk [vmem:[#allocation3] sm:$0xff] %vm333_vm7, %v13114_v19 }
  0x87   : > { %1423 = vrot.lane.b32.xlu0 %v1230_v11, %s9240_s26  ;;  %v813_v11 = vadd.s32 14, %v685_v15  ;;  %13150 = vst [vmem:[#allocation53_spill] sm:$0xff] %v10176_v33  ;;  %vm790_vm4 = vmand %vm765_vm1, %vm740_vm15  ;;  %v10182_v49 = vsel %vm789_vm2, %v814_v5, %v699_v26  ;;  %vm1645_vm8 = vcmask 523264   ;;  %vm1613_vm9 = vcmask 130048  }
  0x88   : > { %1525 = vrot.lane.b32.xlu1 %v1256_v46, %s9238_s23  ;;  %v7098_v46 = vld [vmem:[%s9402_s25 + $0x160] sm:$0xff]  ;;  %13151 = vst [vmem:[#allocation54_spill] sm:$0xff] %v10182_v49  ;;  %v10188_v33 = vsel %vm790_vm4, %v815_v59, %v713_v63  ;;  %vm864_vm5 = vcmp.ge.s32.totalorder %v10182_v49, 1  ;;  %335 = vst.msk [vmem:[#allocation3 + $0x8] sm:$0xff] %vm333_vm7, %v13114_v19  ;;  %vm1587_vm10 = vcmask 785408   ;;  %vm338_vm11 = vcmask 257024  }
  0x89   : > { %4001 = vst.msk [vmem:[#allocation2 + $0xa8] sm:$0xff] %vm326_vm0, %v7098_v46  ;;  %v10173_v8 = vsel %vm788_vm12, %v813_v11, %v685_v15  ;;  %v1258_v15 = vld [vmem:[#allocation2 + $0xb8] sm:$0xff]  ;;  %v1259_v11 = vld [vmem:[#allocation2 + $0xc0] sm:$0xff]  ;;  %13153 = vst [vmem:[#allocation56_spill] sm:$0xff] %v10188_v33  ;;  %vm865_vm6 = vcmp.ge.s32.totalorder %v10188_v33, 1  ;;  %v10202_v63 = vsel %vm864_vm5, 1.0, %v13114_v19 }
  0x8a   : > { %13149 = vst [vmem:[#allocation52_spill] sm:$0xff] %v10173_v8  ;;  %vm863_vm3 = vcmp.ge.s32.totalorder %v10173_v8, 1  ;;  %v1186_v46 = vld [vmem:[#allocation2 + $0xc2] sm:$0xf]  ;;  %13155 = vst [vmem:[#allocation58_spill] sm:$0xff] %v10202_v63  ;;  %v10206_v5 = vsel %vm865_vm6, 1.0, %v13114_v19  ;;  %v1235_v59 = vmul.f32 %v10202_v63, %v10121_v44 }
  0x8b   : > { %1425 = vrot.lane.b32.xlu0 %v1231_v7, %s9240_s26  ;;  %v1257_v7 = vld [vmem:[#allocation2 + $0xb0] sm:$0xff]  ;;  %v10186_v62 = vsel %vm863_vm3, 1.0, %v13114_v19  ;;  %13156 = vst [vmem:[#allocation59_spill] sm:$0xff] %v10206_v5  ;;  %336 = vst.msk [vmem:[#allocation3 + $0xd4] sm:$0xff] %vm333_vm7, %v13114_v19 }
  0x8c   : > { %1427 = vrot.lane.b32.xlu1 %v1232_v0, %s9240_s26  ;;  %v8273_v0 = vpack.i.bf16 %v1185_v36, %v1184_v21  ;;  %4002 = vst.msk [vmem:[#allocation2 + $0xb0] sm:$0xff] %vm326_vm0, %v7099_v14  ;;  %13152 = vst [vmem:[#allocation55_spill] sm:$0xff] %v10186_v62  ;;  %v10192_v36 = vld [vmem:[#allocation2 + $0xc1] sm:$0xf]  ;;  %v7101_v21 = vld [vmem:[%s9402_s25 + $0x178] sm:$0xff] }
  0x8d   : > { %13154 = vst [vmem:[#allocation57_spill] sm:$0xff] %v10192_v36  ;;  %337 = vst.msk [vmem:[#allocation3 + $0xdc] sm:$0xff] %vm333_vm7, %v13114_v19 }
  0x8f   : > { %8269 = vrot.lane.b32.xlu0 %v8268_v37, %s9239_s24  ;;  %v1209_v37 = vld [vmem:[#allocation2 + $0xbf] sm:$0xff] }
  0x90   : > { %1429 = vrot.lane.b32.xlu1 %v1233_v41, %s9240_s26  ;;  %v10190_v41 = vld [vmem:[#allocation2 + $0xb9] sm:$0xff]  ;;  %v1234_v26 = vmul.f32 %v10186_v62, %v1209_v37 }
  0x91   : > { %4004 = vst.msk [vmem:[#allocation2 + $0xc0] sm:$0xff] %vm326_vm0, %v7101_v21 }
  0x93   : > { %1527 = vrot.lane.b32.xlu0 %v1257_v7, %s9238_s23 }
  0x94   : > { %8274 = vrot.lane.b32.xlu1 %v8273_v0, %s9239_s24  ;;  %v1236_v0 = vmul.f32 %v10206_v5, %v10132_v24  ;;  %v1138_v5 = vmul.f32 %v9545_v58, %v9702_v48 }
  0x97   : > { %1529 = vrot.lane.b32.xlu0 %v1258_v15, %s9238_s23 }
  0x98   : > { %1531 = vrot.lane.b32.xlu1 %v1259_v11, %s9238_s23  ;;  %v1112_v11 = vld [vmem:[#allocation2 + $0x1] sm:$0xff] }
  0x99   : > { %v1137_v33 = vmul.f32 %v9550_v60, %v1112_v11 }
  0x9a   : > { %v1488_v7 = vpop.permute.xlu1 %1487 }
  0x9b   : > { %1431 = vrot.lane.b32.xlu0 %v1234_v26, %s9240_s26 }
  0x9c   : > { %1533 = vrot.lane.b32.xlu1 %v10111_v31, %s9238_s23 }
  0x9d   : > { %v8220_v14 = vpop.permute.xlu0 %8219 }
  0x9e   : > { %v8225_v44 = vpop.permute.xlu1 %8224  ;;  %v8221_v21 = vunpack.i.l.bf16 %v8220_v14  ;;  %v8222_v49 = vunpack.i.h.bf16 %v8220_v14 }
  0x9f   : > { %1433 = vrot.lane.b32.xlu0 %v1235_v59, %s9240_s26  ;;  %v8226_v36 = vunpack.i.l.bf16 %v8225_v44 }
  0xa0   : > { %1435 = vrot.lane.b32.xlu1 %v1236_v0, %s9240_s26  ;;  %v1562_v0 = vsel %vm326_vm0, %v1137_v33, %v8221_v21  ;;  %v1563_v33 = vsel %vm326_vm0, %v1138_v5, %v8222_v49 }
  0xa1   : > { %v1490_v15 = vpop.permute.xlu0 %1489 }
  0xa2   : > { %v1492_v31 = vpop.permute.xlu1 %1491 }
  0xa3   : > { %1335 = vrot.lane.b32.xlu0 %v1186_v46, %s9239_s24 }
  0xa5   : > { %v10226_v24 = vpop.permute.xlu0 %8229 }
  0xa6   : > { %v1494_v37 = vpop.permute.xlu1 %1493 }
  0xa7   : > { %1535 = vrot.lane.b32.xlu0 %v10134_v1, %s9238_s23 }
  0xa9   : > { %v1496_v26 = vpop.permute.xlu0 %1495 }
  0xaa   : > { %v1390_v8 = vpop.permute.xlu1 %1389 }
  0xab   : > { %v1615_v11 = vsel %vm1613_vm9, %v1390_v8, %v1490_v15  ;;  %v1589_v21 = vsel %vm1587_vm10, %v1563_v33, %v1390_v8  ;;  %v8231_v8 = vunpack.i.l.bf16 %v10226_v24  ;;  %v1143_v33 = vmul.f32 %v9642_v30, %v9752_v32 }
  0xad   : > { %v1388_v59 = vpop.permute.xlu0 %1387 }
  0xae   : > { %v1614_v46 = vsel %vm1613_vm9, %v1388_v59, %v1488_v7  ;;  %v1588_v19 = vsel %vm1587_vm10, %v1562_v0, %v1388_v59  ;;  %v1396_v1 = vpop.permute.xlu1 %1395  ;;  %v1139_v7 = vmul.f32 %v9568_v13, %v9715_v40  ;;  %v1140_v0 = vmul.f32 %v9603_v42, %v9718_v51 }
  0xaf   : > { %7002 = vmatprep.mubr.msk.f32.mxu0 %vm1645_vm8, %v1614_v46 }
  0xb0   : > { %1786 = vmatmul.mubr.f32.vlgmr.msra.gmra.mrb[0].mxu0 %v1588_v19  ;;  %v8227_v19 = vunpack.i.h.bf16 %v8225_v44  ;;  %v1564_v15 = vsel %vm326_vm0, %v1139_v7, %v8226_v36  ;;  %v1141_v44 = vmul.f32 %v9562_v4, %v9729_v61  ;;  %v8232_v7 = vunpack.i.h.bf16 %v10226_v24 }
  0xb1   : > { %v1392_v60 = vpop.permute.xlu0 %1391  ;;  %7003 = vmatprep.mubr.msk.f32.mxu0 %vm1645_vm8, %v1615_v11 }
  0xb2   : > { %v1398_v14 = vpop.permute.xlu1 %1397  ;;  %v1616_v48 = vsel %vm1613_vm9, %v1392_v60, %v1492_v31  ;;  %v1590_v49 = vsel %vm1587_vm10, %v1564_v15, %v1392_v60  ;;  %v1565_v31 = vsel %vm326_vm0, %v1140_v0, %v8227_v19  ;;  %v1618_v60 = vsel %vm1613_vm9, %v1396_v1, %v1496_v26 }
  0xb4   : > { %1791 = vmatmul.mubr.f32.gmra.mrb[2].mxu0 %v1589_v21 }
  0xb5   : > { %v1394_v59 = vpop.permute.xlu0 %1393  ;;  %7004 = vmatprep.mubr.msk.f32.mxu0 %vm1645_vm8, %v1616_v48  ;;  %v1566_v48 = vsel %vm326_vm0, %v1141_v44, %v8231_v8 }
  0xb6   : > { %v8235_v5 = vpop.permute.xlu1 %8234  ;;  %v1617_v40 = vsel %vm1613_vm9, %v1394_v59, %v1494_v37  ;;  %v1591_v36 = vsel %vm1587_vm10, %v1565_v31, %v1394_v59  ;;  %v1142_v37 = vmul.f32 %v9585_v27, %v9744_v3  ;;  %v1592_v59 = vsel %vm1587_vm10, %v1566_v48, %v1396_v1 }
  0xb7   : > { %v8236_v21 = vunpack.i.l.bf16 %v8235_v5  ;;  %v1144_v3 = vmul.f32 %v9660_v55, %v9755_v47  ;;  %v8237_v15 = vunpack.i.h.bf16 %v8235_v5  ;;  %v1145_v5 = vmul.f32 %v9668_v53, %v9765_v52 }
  0xb8   : > { %1796 = vmatmul.mubr.f32.gmra.mrb[4].mxu0 %v1590_v49  ;;  %v1567_v32 = vsel %vm326_vm0, %v1142_v37, %v8232_v7  ;;  %v1146_v37 = vmul.f32 %v9707_v34, %v9770_v2 }
  0xb9   : > { %v1498_v46 = vpop.permute.xlu0 %1497  ;;  %7005 = vmatprep.mubr.msk.f32.mxu0 %vm1645_vm8, %v1617_v40  ;;  %v1568_v0 = vsel %vm326_vm0, %v1143_v33, %v8236_v21  ;;  %v1593_v49 = vsel %vm1587_vm10, %v1567_v32, %v1398_v14  ;;  %v1569_v47 = vsel %vm326_vm0, %v1144_v3, %v8237_v15 }
  0xba   : > { %v1500_v11 = vpop.permute.xlu1 %1499  ;;  %v1619_v61 = vsel %vm1613_vm9, %v1398_v14, %v1498_v46 }
  0xbc   : > { %1801 = vmatmul.mubr.f32.gmra.mrb[6].mxu0 %v1591_v36 }
  0xbd   : > { %v1400_v51 = vpop.permute.xlu0 %1399  ;;  %7006 = vmatprep.mubr.msk.f32.mxu0 %vm1645_vm8, %v1618_v60 }
  0xbe   : > { %v1502_v19 = vpop.permute.xlu1 %1501  ;;  %v1620_v24 = vsel %vm1613_vm9, %v1400_v51, %v1500_v11  ;;  %v1594_v46 = vsel %vm1587_vm10, %v1568_v0, %v1400_v51 }
  0xc0   : > { %1806 = vmatmul.mubr.f32.gmra.mrb[8].mxu0 %v1592_v59  ;;  %v1147_v59 = vmul.f32 %v9804_v54, %v9810_v50 }
  0xc1   : > { %v1402_v26 = vpop.permute.xlu0 %1401  ;;  %7007 = vmatprep.mubr.msk.f32.mxu0 %vm1645_vm8, %v1619_v61 }
  0xc2   : > { %v1404_v40 = vpop.permute.xlu1 %1403  ;;  %v1621_v31 = vsel %vm1613_vm9, %v1402_v26, %v1502_v19  ;;  %v1595_v14 = vsel %vm1587_vm10, %v1569_v47, %v1402_v26 }
  0xc4   : > { %1811 = vmatmul.mubr.f32.gmra.mrb[10].mxu0 %v1593_v49 }
  0xc5   : > { %v8240_v1 = vpop.permute.xlu0 %8239  ;;  %7008 = vmatprep.mubr.msk.f32.mxu0 %vm1645_vm8, %v1620_v24  ;;  %v1148_v24 = vmul.f32 %v9807_v12, %v9838_v35 }
  0xc6   : > { %v8241_v8 = vunpack.i.l.bf16 %v8240_v1  ;;  %v1406_v44 = vpop.permute.xlu1 %1405  ;;  %v8242_v11 = vunpack.i.h.bf16 %v8240_v1 }
  0xc8   : > { %1816 = vmatmul.mubr.f32.gmra.mrb[12].mxu0 %v1594_v46  ;;  %v1570_v51 = vsel %vm326_vm0, %v1145_v5, %v8241_v8  ;;  %v1571_v48 = vsel %vm326_vm0, %v1146_v37, %v8242_v11  ;;  %v1149_v8 = vmul.f32 %v9832_v28, %v9865_v18 }
  0xc9   : > { %v1504_v36 = vpop.permute.xlu0 %1503  ;;  %7009 = vmatprep.mubr.msk.f32.mxu0 %vm1645_vm8, %v1621_v31  ;;  %v1596_v52 = vsel %vm1587_vm10, %v1570_v51, %v1404_v40  ;;  %v1597_v2 = vsel %vm1587_vm10, %v1571_v48, %v1406_v44 }
  0xca   : > { %v1622_v60 = vsel %vm1613_vm9, %v1404_v40, %v1504_v36  ;;  %v8245_v33 = vpop.permute.xlu1 %8244 }
  0xcb   : > { %v8246_v21 = vunpack.i.l.bf16 %v8245_v33  ;;  %v8247_v3 = vunpack.i.h.bf16 %v8245_v33  ;;  %v1151_v33 = vmul.f32 %v9934_v43, %v9927_v22 }
  0xcc   : > { %1821 = vmatmul.mubr.f32.gmra.mrb[14].mxu0 %v1595_v14 }
  0xcd   : > { %v1506_v7 = vpop.permute.xlu0 %1505  ;;  %7010 = vmatprep.mubr.msk.f32.mxu0 %vm1645_vm8, %v1622_v60  ;;  %v1572_v32 = vsel %vm326_vm0, %v1147_v59, %v8246_v21  ;;  %v1573_v1 = vsel %vm326_vm0, %v1148_v24, %v8247_v3 }
  0xce   : > { %v1623_v61 = vsel %vm1613_vm9, %v1406_v44, %v1506_v7  ;;  %v1508_v19 = vpop.permute.xlu1 %1507  ;;  %v1150_v44 = vmul.f32 %v9876_v9, %v9895_v23 }
  0xd0   : > { %1826 = vmatmul.mubr.f32.gmra.mrb[16].mxu0 %v1596_v52 }
  0xd1   : > { %v1408_v26 = vpop.permute.xlu0 %1407  ;;  %7011 = vmatprep.mubr.msk.f32.mxu0 %vm1645_vm8, %v1623_v61 }
  0xd2   : > { %v1624_v15 = vsel %vm1613_vm9, %v1408_v26, %v1508_v19  ;;  %v1510_v0 = vpop.permute.xlu1 %1509  ;;  %v1598_v50 = vsel %vm1587_vm10, %v1572_v32, %v1408_v26  ;;  %v1152_v19 = vmul.f32 %v9978_v45, %v9952_v57 }
  0xd4   : > { %1831 = vmatmul.mubr.f32.gmra.mrb[18].mxu0 %v1597_v2 }
  0xd5   : > { %v1410_v49 = vpop.permute.xlu0 %1409  ;;  %7012 = vmatprep.mubr.msk.f32.mxu0 %vm1645_vm8, %v1624_v15 }
  0xd6   : > { %v1625_v40 = vsel %vm1613_vm9, %v1410_v49, %v1510_v0  ;;  %v1412_v46 = vpop.permute.xlu1 %1411  ;;  %v1599_v35 = vsel %vm1587_vm10, %v1573_v1, %v1410_v49  ;;  %v13157_v49 = vld [vmem:[#allocation38_spill] sm:$0xff] }
  0xd8   : > { %1836 = vmatmul.mubr.f32.gmra.mrb[20].mxu0 %v1598_v50  ;;  %v1153_v50 = vmul.f32 %v13157_v49, %v10014_v16  ;;  %v13158_v16 = vld [vmem:[#allocation44_spill] sm:$0xff] }
  0xd9   : > { %v8250_v31 = vpop.permute.xlu0 %8249  ;;  %7013 = vmatprep.mubr.msk.f32.mxu0 %vm1645_vm8, %v1625_v40 }
  0xda   : > { %v8252_v47 = vunpack.i.h.bf16 %v8250_v31  ;;  %v8251_v5 = vunpack.i.l.bf16 %v8250_v31  ;;  %v1414_v36 = vpop.permute.xlu1 %1413 }
  0xdc   : > { %1841 = vmatmul.mubr.f32.gmra.mrb[22].mxu0 %v1599_v35  ;;  %v1574_v14 = vsel %vm326_vm0, %v1149_v8, %v8251_v5  ;;  %v1575_v18 = vsel %vm326_vm0, %v1150_v44, %v8252_v47  ;;  %v1154_v8 = vmul.f32 %v10022_v38, %v10051_v25 }
  0xdd   : > { %v1512_v11 = vpop.permute.xlu0 %1511  ;;  %v1600_v60 = vsel %vm1587_vm10, %v1574_v14, %v1412_v46  ;;  %v1601_v52 = vsel %vm1587_vm10, %v1575_v18, %v1414_v36 }
  0xde   : > { %v1626_v51 = vsel %vm1613_vm9, %v1412_v46, %v1512_v11  ;;  %v8255_v37 = vpop.permute.xlu1 %8254  ;;  %v1155_v11 = vmul.f32 %v10109_v56, %v13158_v16  ;;  %v1160_v16 = vmul.f32 %v10202_v63, %v10190_v41 }
  0xdf   : > { %7014 = vmatprep.mubr.msk.f32.mxu0 %vm1645_vm8, %v1626_v51  ;;  %v8256_v7 = vunpack.i.l.bf16 %v8255_v37  ;;  %v8257_v61 = vunpack.i.h.bf16 %v8255_v37 }
  0xe0   : > { %1846 = vmatmul.mubr.f32.gmra.mrb[24].mxu0 %v1600_v60 }
  0xe1   : > { %v1514_v23 = vpop.permute.xlu0 %1513  ;;  %v1576_v59 = vsel %vm326_vm0, %v1151_v33, %v8256_v7  ;;  %v1577_v15 = vsel %vm326_vm0, %v1152_v19, %v8257_v61 }
  0xe2   : > { %v1627_v21 = vsel %vm1613_vm9, %v1414_v36, %v1514_v23  ;;  %v1516_v48 = vpop.permute.xlu1 %1515  ;;  %v1156_v23 = vmul.f32 %v10143_v29, %v10124_v6 }
  0xe3   : > { %7015 = vmatprep.mubr.msk.f32.mxu0 %vm1645_vm8, %v1627_v21 }
  0xe4   : > { %1851 = vmatmul.mubr.f32.gmra.mrb[26].mxu0 %v1601_v52 }
  0xe5   : > { %v1416_v26 = vpop.permute.xlu0 %1415 }
  0xe6   : > { %v1628_v22 = vsel %vm1613_vm9, %v1416_v26, %v1516_v48  ;;  %v1602_v2 = vsel %vm1587_vm10, %v1576_v59, %v1416_v26  ;;  %v1518_v3 = vpop.permute.xlu1 %1517 }
  0xe7   : > { %7016 = vmatprep.mubr.msk.f32.mxu0 %vm1645_vm8, %v1628_v22 }
  0xe8   : > { %1856 = vmatmul.mubr.f32.gmra.mrb[28].mxu0 %v1602_v2  ;;  %v1157_v2 = vmul.f32 %v10150_v17, %v10156_v20  ;;  %v13159_v20 = vld [vmem:[#allocation53_spill] sm:$0xff] }
  0xe9   : > { %v1418_v32 = vpop.permute.xlu0 %1417 }
  0xea   : > { %v1629_v24 = vsel %vm1613_vm9, %v1418_v32, %v1518_v3  ;;  %v1603_v0 = vsel %vm1587_vm10, %v1577_v15, %v1418_v32  ;;  %v1420_v57 = vpop.permute.xlu1 %1419 }
  0xeb   : > { %7017 = vmatprep.mubr.msk.f32.mxu0 %vm1645_vm8, %v1629_v24  ;;  %v1158_v24 = vmul.f32 %v10163_v10, %v10167_v39 }
  0xec   : > { %1861 = vmatmul.mubr.f32.gmra.mrb[30].mxu0 %v1603_v0 }
  0xed   : > { %v8260_v40 = vpop.permute.xlu0 %8259 }
  0xee   : > { %v8262_v1 = vunpack.i.h.bf16 %v8260_v40  ;;  %v8261_v46 = vunpack.i.l.bf16 %v8260_v40  ;;  %v1422_v31 = vpop.permute.xlu1 %1421 }
  0xf0   : > { %v1578_v35 = vsel %vm326_vm0, %v1153_v50, %v8261_v46  ;;  %v1579_v36 = vsel %vm326_vm0, %v1154_v8, %v8262_v1 }
  0xf1   : > { %v1520_v47 = vpop.permute.xlu0 %1519  ;;  %v1604_v5 = vsel %vm1587_vm10, %v1578_v35, %v1420_v57  ;;  %v1605_v25 = vsel %vm1587_vm10, %v1579_v36, %v1422_v31 }
  0xf2   : > { %v1630_v44 = vsel %vm1613_vm9, %v1420_v57, %v1520_v47  ;;  %v8265_v14 = vpop.permute.xlu1 %8264 }
  0xf3   : > { %7018 = vmatprep.mubr.msk.f32.mxu0 %vm1645_vm8, %v1630_v44  ;;  %v8266_v60 = vunpack.i.l.bf16 %v8265_v14  ;;  %v8267_v37 = vunpack.i.h.bf16 %v8265_v14 }
  0xf4   : > { %1866 = vmatmul.mubr.f32.gmra.mrb[32].mxu0 %v1604_v5 }
  0xf5   : > { %v1522_v51 = vpop.permute.xlu0 %1521  ;;  %v1580_v7 = vsel %vm326_vm0, %v1155_v11, %v8266_v60  ;;  %v1581_v59 = vsel %vm326_vm0, %v1156_v23, %v8267_v37  ;;  %v13160_v23 = vld [vmem:[#allocation57_spill] sm:$0xff] }
  0xf6   : > { %v1631_v18 = vsel %vm1613_vm9, %v1422_v31, %v1522_v51  ;;  %v1524_v33 = vpop.permute.xlu1 %1523  ;;  %v1159_v31 = vmul.f32 %v10186_v62, %v13159_v20  ;;  %v1024_v20 = vld [vmem:[%s12896_s3 + $0x48] sm:$0xff] }
  0xf7   : > { %7019 = vmatprep.mubr.msk.f32.mxu0 %vm1645_vm8, %v1631_v18 }
  0xf8   : > { %1871 = vmatmul.mubr.f32.gmra.mrb[34].mxu0 %v1605_v25 }
  0xf9   : > { %v1424_v52 = vpop.permute.xlu0 %1423 }
  0xfa   : > { %v1632_v21 = vsel %vm1613_vm9, %v1424_v52, %v1524_v33  ;;  %v1606_v61 = vsel %vm1587_vm10, %v1580_v7, %v1424_v52  ;;  %v1526_v48 = vpop.permute.xlu1 %1525  ;;  %v13161_v52 = vld [vmem:[#allocation59_spill] sm:$0xff] }
  0xfb   : > { %7020 = vmatprep.mubr.msk.f32.mxu0 %vm1645_vm8, %v1632_v21  ;;  %v1161_v41 = vmul.f32 %v13161_v52, %v13160_v23  ;;  %v1036_v23 = vld [vmem:[%s12896_s3 + $0xa8] sm:$0xff] }
  0xfc   : > { %1876 = vmatmul.mubr.f32.gmra.mrb[36].mxu0 %v1606_v61 }
  0xfd   : > { %v1426_v19 = vpop.permute.xlu0 %1425 }
  0xfe   : > { %v1633_v26 = vsel %vm1613_vm9, %v1426_v19, %v1526_v48  ;;  %v1607_v22 = vsel %vm1587_vm10, %v1581_v59, %v1426_v19  ;;  %v1428_v6 = vpop.permute.xlu1 %1427 }
  0xff   : > { %7021 = vmatprep.mubr.msk.f32.mxu0 %vm1645_vm8, %v1633_v26 }
 0x100   : > { %1881 = vmatmul.mubr.f32.gmra.mrb[38].mxu0 %v1607_v22  ;;  %v1015_v22 = vld [vmem:[%s12896_s3] sm:$0xff] }
 0x101   : > { %v8270_v3 = vpop.permute.xlu0 %8269 }
 0x102   : > { %v8272_v15 = vunpack.i.h.bf16 %v8270_v3  ;;  %v8271_v32 = vunpack.i.l.bf16 %v8270_v3  ;;  %v1430_v0 = vpop.permute.xlu1 %1429  ;;  %v13162_v3 = vmov 0.0|0.0  }
 0x104   : > { %v1582_v57 = vsel %vm326_vm0, %v1157_v2, %v8271_v32  ;;  %v1583_v46 = vsel %vm326_vm0, %v1158_v24, %v8272_v15  ;;  %v1017_v15 = vld [vmem:[%s12896_s3 + $0x10] sm:$0xff]  ;;  %v1018_v32 = vld [vmem:[%s12896_s3 + $0x18] sm:$0xff] }
 0x105   : > { %v1528_v50 = vpop.permute.xlu0 %1527  ;;  %v1608_v40 = vsel %vm1587_vm10, %v1582_v57, %v1428_v6  ;;  %v1609_v39 = vsel %vm1587_vm10, %v1583_v46, %v1430_v0  ;;  %v10397_v24 = vpack.c.bf16 %v1018_v32, %v1017_v15  ;;  %v1020_v57 = vld [vmem:[%s12896_s3 + $0x28] sm:$0xff] }
 0x106   : > { %v1634_v1 = vsel %vm1613_vm9, %v1428_v6, %v1528_v50  ;;  %v8275_v8 = vpop.permute.xlu1 %8274  ;;  %v1016_v6 = vld [vmem:[%s12896_s3 + $0x8] sm:$0xff] }
 0x107   : > { %7022 = vmatprep.mubr.msk.f32.mxu0 %vm1645_vm8, %v1634_v1  ;;  %v8276_v35 = vunpack.i.l.bf16 %v8275_v8  ;;  %v8277_v44 = vunpack.i.h.bf16 %v8275_v8  ;;  %v10387_v2 = vpack.c.bf16 %v1016_v6, %v1015_v22  ;;  %v1022_v1 = vld [vmem:[%s12896_s3 + $0x38] sm:$0xff]  ;;  %v1023_v8 = vld [vmem:[%s12896_s3 + $0x40] sm:$0xff]  ;;  %v1040_v22 = vld [vmem:[%s12896_s3 + $0xc8] sm:$0xff] }
 0x108   : > { %1886 = vmatmul.mubr.f32.gmra.mrb[40].mxu0 %v1608_v40  ;;  %v1021_v40 = vld [vmem:[%s12896_s3 + $0x30] sm:$0xff] }
 0x109   : > { %v1530_v47 = vpop.permute.xlu0 %1529  ;;  %v1584_v14 = vsel %vm326_vm0, %v1159_v31, %v8276_v35  ;;  %v1585_v18 = vsel %vm326_vm0, %v1160_v16, %v8277_v44  ;;  %7778 = vmatpush1.bf16.msra.mxu1 %v10387_v2  ;;  %v10417_v46 = vpack.c.bf16 %v1022_v1, %v1021_v40  ;;  %v10427_v31 = vpack.c.bf16 %v1024_v20, %v1023_v8  ;;  %v1025_v35 = vld [vmem:[%s12896_s3 + $0x50] sm:$0xff]  ;;  %v1028_v44 = vld [vmem:[%s12896_s3 + $0x68] sm:$0xff]  ;;  %v1030_v16 = vld [vmem:[%s12896_s3 + $0x78] sm:$0xff] }
 0x10a   : > { %v1635_v5 = vsel %vm1613_vm9, %v1430_v0, %v1530_v47  ;;  %v1532_v36 = vpop.permute.xlu1 %1531  ;;  %7779 = vmatprep.subr.bf16.mxu1 %v13162_v3  ;;  %v1019_v0 = vld [vmem:[%s12896_s3 + $0x20] sm:$0xff]  ;;  %v1026_v47 = vld [vmem:[%s12896_s3 + $0x58] sm:$0xff]  ;;  %v1041_v40 = vld [vmem:[%s12896_s3 + $0xd0] sm:$0xff] }
 0x10b   : > { %7023 = vmatprep.mubr.msk.f32.mxu0 %vm1645_vm8, %v1635_v5  ;;  %v10407_v50 = vpack.c.bf16 %v1020_v57, %v1019_v0  ;;  %13163 = vst [vmem:[#allocation44_spill] sm:$0xff] %v10417_v46  ;;  %13164 = vst [vmem:[#allocation53_spill] sm:$0xff] %v10427_v31  ;;  %v1027_v5 = vld [vmem:[%s12896_s3 + $0x60] sm:$0xff]  ;;  %v1042_v1 = vld [vmem:[%s12896_s3 + $0xd8] sm:$0xff] }
 0x10c   : > { %1891 = vmatmul.mubr.f32.gmra.mrb[42].mxu0 %v1609_v39  ;;  %v10437_v39 = vpack.c.bf16 %v1026_v47, %v1025_v35  ;;  %v10525_v35 = vpack.c.bf16 %v1042_v1, %v1041_v40  ;;  %v2011_v40 = vld [vmem:[#allocation3 + $0x2] sm:$0xff] }
 0x10d   : > { %v1432_v11 = vpop.permute.xlu0 %1431  ;;  %7781 = vmatpush1.bf16.msra.mxu1 %v10397_v24  ;;  %v2036_v1 = vld [vmem:[#allocation3 + $0x3] sm:$0xff] }
 0x10e   : > { %v1636_v60 = vsel %vm1613_vm9, %v1432_v11, %v1532_v36  ;;  %v1610_v51 = vsel %vm1587_vm10, %v1584_v14, %v1432_v11  ;;  %v1534_v25 = vpop.permute.xlu1 %1533  ;;  %7782 = vmatprep.subr.bf16.mxu1 %v13162_v3  ;;  %13165 = vst [vmem:[#allocation57_spill] sm:$0xff] %v10437_v39  ;;  %v10447_v36 = vpack.c.bf16 %v1028_v44, %v1027_v5  ;;  %v1029_v14 = vld [vmem:[%s12896_s3 + $0x70] sm:$0xff]  ;;  %13173 = vst [vmem:[#allocation66_spill] sm:$0xff] %v10525_v35  ;;  %v1043_v44 = vld [vmem:[%s12896_s3 + $0xe0] sm:$0xff] }
 0x10f   : > { %7024 = vmatprep.mubr.msk.f32.mxu0 %vm1645_vm8, %v1636_v60  ;;  %v10457_v11 = vpack.c.bf16 %v1030_v16, %v1029_v14  ;;  %v1031_v60 = vld [vmem:[%s12896_s3 + $0x80] sm:$0xff]  ;;  %v1044_v14 = vld [vmem:[%s12896_s3 + $0xe8] sm:$0xff] }
 0x110   : > { %1896 = vmatmul.mubr.f32.gmra.mrb[44].mxu0 %v1610_v51  ;;  %13166 = vst [vmem:[#allocation59_spill] sm:$0xff] %v10447_v36  ;;  %v1032_v51 = vld [vmem:[%s12896_s3 + $0x88] sm:$0xff] }
 0x111   : > { %v1434_v37 = vpop.permute.xlu0 %1433  ;;  %7784 = vmatpush1.bf16.msra.mxu1 %v10407_v50  ;;  %13167 = vst [vmem:[#allocation60_spill] sm:$0xff] %v10457_v11 }
 0x112   : > { %v1637_v33 = vsel %vm1613_vm9, %v1434_v37, %v1534_v25  ;;  %v1611_v7 = vsel %vm1587_vm10, %v1585_v18, %v1434_v37  ;;  %v1436_v48 = vpop.permute.xlu1 %1435  ;;  %7785 = vmatprep.subr.bf16.mxu1 %v13162_v3  ;;  %v10467_v25 = vpack.c.bf16 %v1032_v51, %v1031_v60  ;;  %v1033_v18 = vld [vmem:[%s12896_s3 + $0x90] sm:$0xff]  ;;  %v1034_v37 = vld [vmem:[%s12896_s3 + $0x98] sm:$0xff]  ;;  %v10537_v51 = vpack.c.bf16 %v1044_v14, %v1043_v44 }
 0x113   : > { %7025 = vmatprep.mubr.msk.f32.mxu0 %vm1645_vm8, %v1637_v33  ;;  %v10477_v33 = vpack.c.bf16 %v1034_v37, %v1033_v18  ;;  %v13175_v37 = vld [vmem:[#allocation15_spill] sm:$0xff] }
 0x114   : > { %1901 = vmatmul.mubr.f32.gmra.mrb[46].mxu0 %v1611_v7  ;;  %13168 = vst [vmem:[#allocation61_spill] sm:$0xff] %v10467_v25  ;;  %v1035_v7 = vld [vmem:[%s12896_s3 + $0xa0] sm:$0xff]  ;;  %13174 = vst [vmem:[#allocation67_spill] sm:$0xff] %v10537_v51  ;;  %vm916_vm12 = vcmp.le.s32.totalorder %v13175_v37, 12 }
 0x115   : > { %v1336_v21 = vpop.permute.xlu0 %1335  ;;  %7787 = vmatpush1.bf16.msra.mxu1 %v10417_v46  ;;  %13169 = vst [vmem:[#allocation62_spill] sm:$0xff] %v10477_v33 }
 0x116   : > { %v1586_v61 = vsel %vm326_vm0, %v1161_v41, %v1336_v21  ;;  %7788 = vmatprep.subr.bf16.mxu1 %v13162_v3  ;;  %v10487_v41 = vpack.c.bf16 %v1036_v23, %v1035_v7  ;;  %v1037_v21 = vld [vmem:[%s12896_s3 + $0xb0] sm:$0xff] }
 0x117   : > { %v1612_v19 = vsel %vm1587_vm10, %v1586_v61, %v1436_v48  ;;  %v1038_v61 = vld [vmem:[%s12896_s3 + $0xb8] sm:$0xff] }
 0x118   : > { %13170 = vst [vmem:[#allocation63_spill] sm:$0xff] %v10487_v41 }
 0x119   : > { %v1536_v59 = vpop.permute.xlu0 %1535  ;;  %7790 = vmatpush1.bf16.msra.mxu1 %v10427_v31 }
 0x11a   : > { %v1638_v26 = vsel %vm1613_vm9, %v1436_v48, %v1536_v59  ;;  %7791 = vmatprep.subr.bf16.mxu1 %v13162_v3  ;;  %v10497_v48 = vpack.c.bf16 %v1038_v61, %v1037_v21  ;;  %v10502_v59 = vld [vmem:[%s12895_s2] ss:$0 sm:$0xff]  ;;  %v1045_v61 = vld [vmem:[%s12896_s3 + $0xf0] sm:$0xff] }
 0x11b   : > { %7026 = vmatprep.mubr.msk.f32.mxu0 %vm1645_vm8, %v1638_v26  ;;  %v1039_v26 = vld [vmem:[%s12896_s3 + $0xc0] sm:$0xff] }
 0x11c   : > { %1906 = vmatmul.mubr.f32.gmra.mrb[48].mxu0 %v1612_v19  ;;  %13171 = vst [vmem:[#allocation64_spill] sm:$0xff] %v10497_v48  ;;  %v10513_v32 = vpack.c.bf16 %v1040_v22, %v1039_v26  ;;  %v13176_v26 = vmov 0.0  }
 0x11d   : > { %7793 = vmatpush1.bf16.msra.mxu1 %v10437_v39  ;;  %v10551_v22 = vsel %vm916_vm12, 1.0, %v13176_v26 }
 0x11e   : > { %7794 = vmatprep.subr.bf16.mxu1 %v13162_v3  ;;  %13172 = vst [vmem:[#allocation65_spill] sm:$0xff] %v10513_v32  ;;  %13177 = vst [vmem:[#allocation15_spill] sm:$0xff] %v10551_v22 }
 0x121   : > { %7796 = vmatpush1.bf16.msra.mxu1 %v10447_v36 }
 0x122   : > { %7797 = vmatprep.subr.bf16.mxu1 %v13162_v3 }
 0x125   : > { %7799 = vmatpush1.bf16.msra.mxu1 %v10457_v11 }
 0x126   : > { %7800 = vmatprep.subr.bf16.mxu1 %v13162_v3 }
 0x129   : > { %7802 = vmatpush1.bf16.msra.mxu1 %v10467_v25 }
 0x12a   : > { %7803 = vmatprep.subr.bf16.mxu1 %v13162_v3 }
 0x12d   : > { %7805 = vmatpush1.bf16.msra.mxu1 %v10477_v33 }
 0x12e   : > { %7806 = vmatprep.subr.bf16.mxu1 %v13162_v3 }
 0x131   : > { %7808 = vmatpush1.bf16.msra.mxu1 %v10487_v41 }
 0x132   : > { %7809 = vmatprep.subr.bf16.mxu1 %v13162_v3 }
 0x135   : > { %7811 = vmatpush1.bf16.msra.mxu1 %v10497_v48 }
 0x136   : > { %7812 = vmatprep.subr.bf16.mxu1 %v13162_v3 }
 0x139   : > { %7814 = vmatpush1.bf16.msra.mxu1 %v10513_v32 }
 0x13a   : > { %7815 = vmatprep.subr.bf16.mxu1 %v13162_v3 }
 0x13d   : > { %7817 = vmatpush1.bf16.msra.mxu1 %v10525_v35 }
 0x13e   : > { %7818 = vmatprep.subr.bf16.mxu1 %v13162_v3 }
 0x141   : > { %7820 = vmatpush1.bf16.msra.mxu1 %v10537_v51 }
 0x142   : > { %7821 = vmatprep.subr.bf16.mxu1 %v13162_v3 }
 0x183   : > { %v1787_v19 = vpop.f32.mrb[0].mxu0 }
 0x184   : > { %v1788_v6 = vadd.f32 %v10502_v59, %v1787_v19  ;;  %v1789_v15 = vpop.f32.mrb[1].mxu0  ;;  %v1046_v19 = vld [vmem:[%s12896_s3 + $0xf8] sm:$0xff] }
 0x186   : > { %v1911_v0 = vmax.f32 %v1788_v6, 0.0  ;;  %v10553_v6 = vpack.c.bf16 %v1046_v19, %v1045_v61  ;;  %v13180_v19 = vld [vmem:[#allocation18_spill] sm:$0xff] }
 0x187   : > { %v1792_v57 = vpop.f32.mrb[2].mxu0 }
 0x188   : > { %1936 = vst.msk [vmem:[#allocation3 + $0x10] sm:$0xff] %vm333_vm7, %v1911_v0  ;;  %v1793_v8 = vadd.f32 %v10502_v59, %v1792_v57  ;;  %v1794_v20 = vpop.f32.mrb[3].mxu0  ;;  %13178 = vst [vmem:[#allocation68_spill] sm:$0xff] %v10553_v6  ;;  %7823 = vmatpush1.bf16.msra.mxu1 %v10553_v6 }
 0x189   : > { %7824 = vmatprep.subr.bf16.mxu1 %v13162_v3 }
 0x18a   : > { %v1912_v47 = vmax.f32 %v1793_v8, 0.0 }
 0x18b   : > { %v1797_v5 = vpop.f32.mrb[4].mxu0 }
 0x18c   : > { %1937 = vst.msk [vmem:[#allocation3 + $0x18] sm:$0xff] %vm333_vm7, %v1912_v47  ;;  %v1798_v16 = vadd.f32 %v10502_v59, %v1797_v5  ;;  %v1799_v60 = vpop.f32.mrb[5].mxu0 }
 0x18d   : > { %v13179_v60 = vld [vmem:[#allocation14_spill] sm:$0xff] }
 0x18e   : > { %v1913_v18 = vmax.f32 %v1798_v16, 0.0  ;;  %v2061_v16 = vmul.f32 %v10551_v22, %v2036_v1  ;;  %vm917_vm13 = vcmp.le.s32.totalorder %v13179_v60, 12  ;;  %v13182_v1 = vld [vmem:[#allocation19_spill] sm:$0xff] }
 0x18f   : > { %v1802_v7 = vpop.f32.mrb[6].mxu0  ;;  %v2086_v5 = vld [vmem:[#allocation3 + $0xf] sm:$0xff]  ;;  %vm918_vm14 = vcmp.le.s32.totalorder %v13182_v1, 12 }
 0x190   : > { %1938 = vst.msk [vmem:[#allocation3 + $0x20] sm:$0xff] %vm333_vm7, %v1913_v18  ;;  %v1803_v23 = vadd.f32 %v10502_v59, %v1802_v7  ;;  %v1804_v21 = vpop.f32.mrb[7].mxu0  ;;  %v2136_v31 = vld [vmem:[#allocation3 + $0x10] sm:$0xff] }
 0x192   : > { %v1914_v15 = vmax.f32 %v1803_v23, 0.0 }
 0x193   : > { %v1807_v0 = vpop.f32.mrb[8].mxu0  ;;  %v1963_v57 = vld [vmem:[#allocation3 + $0x11] sm:$0xff] }
 0x194   : > { %1939 = vst.msk [vmem:[#allocation3 + $0x28] sm:$0xff] %vm333_vm7, %v1914_v15  ;;  %v1808_v8 = vadd.f32 %v10502_v59, %v1807_v0  ;;  %v1809_v20 = vpop.f32.mrb[9].mxu0  ;;  %v2164_v47 = vmul.f32 %v10551_v22, %v1963_v57  ;;  %v2111_v0 = vmul.f32 %v13180_v19, %v2086_v5  ;;  %v10568_v57 = vsel %vm917_vm13, 1.0, %v13176_v26 }
 0x195   : > { %13181 = vst [vmem:[#allocation14_spill] sm:$0xff] %v10568_v57 }
 0x196   : > { %v1915_v44 = vmax.f32 %v1808_v8, 0.0  ;;  %v8278_v14 = vpack.i.bf16 %v2011_v40, %v2164_v47  ;;  %v2037_v40 = vld [vmem:[#allocation3 + $0xb] sm:$0xff] }
 0x197   : > { %v1812_v18 = vpop.f32.mrb[10].mxu0  ;;  %v2189_v37 = vld [vmem:[#allocation3 + $0x1d] sm:$0xff] }
 0x198   : > { %v2239_v7 = vld [vmem:[#allocation3 + $0x1e] sm:$0xff]  ;;  %1940 = vst.msk [vmem:[#allocation3 + $0x30] sm:$0xff] %vm333_vm7, %v1915_v44  ;;  %v1813_v21 = vadd.f32 %v10502_v59, %v1812_v18  ;;  %v1814_v61 = vpop.f32.mrb[11].mxu0  ;;  %8279 = vrot.lane.b32.xlu1 %v8278_v14, %s13025_s21  ;;  %v2214_v15 = vmul.f32 %v13180_v19, %v2189_v37  ;;  %v2062_v37 = vmul.f32 %v10568_v57, %v2037_v40 }
 0x199   : > { %v1964_v23 = vld [vmem:[#allocation3 + $0x19] sm:$0xff]  ;;  %v8283_v47 = vpack.i.bf16 %v2111_v0, %v2239_v7  ;;  %v2012_v7 = vld [vmem:[#allocation3 + $0xa] sm:$0xff] }
 0x19a   : > { %v1916_v8 = vmax.f32 %v1813_v21, 0.0  ;;  %v8288_v20 = vpack.i.bf16 %v2061_v16, %v2214_v15  ;;  %v2165_v44 = vmul.f32 %v10568_v57, %v1964_v23  ;;  %v2087_v21 = vld [vmem:[#allocation3 + $0x17] sm:$0xff]  ;;  %v10581_v23 = vsel %vm918_vm14, 1.0, %v13176_v26 }
 0x19b   : > { %v1817_v60 = vpop.f32.mrb[12].mxu0  ;;  %v2190_v18 = vld [vmem:[#allocation3 + $0x25] sm:$0xff]  ;;  %13183 = vst [vmem:[#allocation19_spill] sm:$0xff] %v10581_v23  ;;  %v2112_v1 = vmul.f32 %v9545_v58, %v2087_v21 }
 0x19c   : > { %v1965_v61 = vld [vmem:[#allocation3 + $0x21] sm:$0xff]  ;;  %1941 = vst.msk [vmem:[#allocation3 + $0x38] sm:$0xff] %vm333_vm7, %v1916_v8  ;;  %v1818_v14 = vadd.f32 %v10502_v59, %v1817_v60  ;;  %8289 = vrot.lane.b32.xlu0 %v8288_v20, %s13023_s22  ;;  %8284 = vrot.lane.b32.xlu1 %v8283_v47, %s9240_s26  ;;  %v1819_v5 = vpop.f32.mrb[13].mxu0  ;;  %v2215_v16 = vmul.f32 %v9545_v58, %v2190_v18 }
 0x19d   : > { %v8293_v0 = vpack.i.bf16 %v2012_v7, %v2165_v44  ;;  %v2166_v60 = vmul.f32 %v10581_v23, %v1965_v61  ;;  %v2240_v6 = vld [vmem:[#allocation3 + $0x26] sm:$0xff]  ;;  %v2038_v44 = vld [vmem:[#allocation3 + $0x13] sm:$0xff] }
 0x19e   : > { %v1917_v15 = vmax.f32 %v1818_v14, 0.0  ;;  %v8303_v8 = vpack.i.bf16 %v2062_v37, %v2215_v16  ;;  %v2088_v5 = vld [vmem:[#allocation3 + $0x1f] sm:$0xff]  ;;  %v2013_v14 = vld [vmem:[#allocation3 + $0x12] sm:$0xff]  ;;  %v8298_v16 = vpack.i.bf16 %v2112_v1, %v2240_v6  ;;  %v2063_v6 = vmul.f32 %v10581_v23, %v2038_v44 }
 0x19f   : > { %v1822_v20 = vpop.f32.mrb[14].mxu0  ;;  %v2191_v47 = vld [vmem:[#allocation3 + $0x2d] sm:$0xff]  ;;  %v13184_v37 = vld [vmem:[#allocation22_spill] sm:$0xff]  ;;  %v8308_v7 = vpack.i.bf16 %v2013_v14, %v2166_v60 }
 0x1a0   : > { %1942 = vst.msk [vmem:[#allocation3 + $0x40] sm:$0xff] %vm333_vm7, %v1917_v15  ;;  %v1823_v40 = vadd.f32 %v10502_v59, %v1822_v20  ;;  %8294 = vrot.lane.b32.xlu0 %v8293_v0, %s13025_s21  ;;  %8304 = vrot.lane.b32.xlu1 %v8303_v8, %s13023_s22  ;;  %v1824_v18 = vpop.f32.mrb[15].mxu0  ;;  %vm919_vm15 = vcmp.le.s32.totalorder %v13184_v37, 12  ;;  %v2216_v51 = vmul.f32 %v9568_v13, %v2191_v47  ;;  %v2241_v15 = vld [vmem:[#allocation3 + $0x2e] sm:$0xff] }
 0x1a1   : > { %v2113_v20 = vmul.f32 %v9568_v13, %v2088_v5  ;;  %v1966_v0 = vld [vmem:[#allocation3 + $0x29] sm:$0xff]  ;;  %v10600_v47 = vsel %vm919_vm15, 1.0, %v13176_v26  ;;  %v13186_v18 = vld [vmem:[#allocation16_spill] sm:$0xff] }
 0x1a2   : > { %v1918_v61 = vmax.f32 %v1823_v40, 0.0  ;;  %13185 = vst [vmem:[#allocation22_spill] sm:$0xff] %v10600_v47  ;;  %v2039_v40 = vld [vmem:[#allocation3 + $0x1b] sm:$0xff]  ;;  %vm920_vm1 = vcmp.le.s32.totalorder %v13186_v18, 12  ;;  %v8318_v5 = vpack.i.bf16 %v2063_v6, %v2216_v51 }
 0x1a3   : > { %v1827_v35 = vpop.f32.mrb[16].mxu0  ;;  %v2192_v32 = vld [vmem:[#allocation3 + $0x35] sm:$0xff]  ;;  %v8313_v60 = vpack.i.bf16 %v2113_v20, %v2241_v15  ;;  %v2089_v20 = vld [vmem:[#allocation3 + $0x27] sm:$0xff]  ;;  %v10611_v51 = vsel %vm920_vm1, 1.0, %v13176_v26 }
 0x1a4   : > { %1943 = vst.msk [vmem:[#allocation3 + $0x48] sm:$0xff] %vm333_vm7, %v1918_v61  ;;  %v1828_v21 = vadd.f32 %v10502_v59, %v1827_v35  ;;  %8299 = vrot.lane.b32.xlu0 %v8298_v16, %s9240_s26  ;;  %8309 = vrot.lane.b32.xlu1 %v8308_v7, %s13025_s21  ;;  %v1829_v8 = vpop.f32.mrb[17].mxu0  ;;  %v2167_v35 = vmul.f32 %v10600_v47, %v1966_v0  ;;  %v1967_v16 = vld [vmem:[#allocation3 + $0x31] sm:$0xff]  ;;  %v2014_v15 = vld [vmem:[#allocation3 + $0x1a] sm:$0xff]  ;;  %13187 = vst [vmem:[#allocation16_spill] sm:$0xff] %v10611_v51 }
 0x1a5   : > { %v2217_v14 = vmul.f32 %v9603_v42, %v2192_v32  ;;  %v2064_v7 = vmul.f32 %v10600_v47, %v2039_v40  ;;  %v2168_v8 = vmul.f32 %v10611_v51, %v1967_v16  ;;  %v2242_v18 = vld [vmem:[#allocation3 + $0x36] sm:$0xff] }
 0x1a6   : > { %v1919_v1 = vmax.f32 %v1828_v21, 0.0  ;;  %v8323_v32 = vpack.i.bf16 %v2014_v15, %v2167_v35  ;;  %v2040_v35 = vld [vmem:[#allocation3 + $0x23] sm:$0xff] }
 0x1a7   : > { %v1832_v61 = vpop.f32.mrb[18].mxu0  ;;  %v8333_v21 = vpack.i.bf16 %v2064_v7, %v2217_v14  ;;  %v13188_v14 = vld [vmem:[#allocation21_spill] sm:$0xff] }
 0x1a8   : > { %1944 = vst.msk [vmem:[#allocation3 + $0x50] sm:$0xff] %vm333_vm7, %v1919_v1  ;;  %v1833_v44 = vadd.f32 %v10502_v59, %v1832_v61  ;;  %8319 = vrot.lane.b32.xlu0 %v8318_v5, %s13023_s22  ;;  %8314 = vrot.lane.b32.xlu1 %v8313_v60, %s9240_s26  ;;  %v1834_v37 = vpop.f32.mrb[19].mxu0  ;;  %v2193_v1 = vld [vmem:[#allocation3 + $0x3d] sm:$0xff]  ;;  %v2114_v5 = vmul.f32 %v9603_v42, %v2089_v20  ;;  %v2090_v61 = vld [vmem:[#allocation3 + $0x2f] sm:$0xff]  ;;  %vm921_vm2 = vcmp.le.s32.totalorder %v13188_v14, 12 }
 0x1a9   : > { %v2218_v15 = vmul.f32 %v9562_v4, %v2193_v1  ;;  %v10630_v1 = vsel %vm921_vm2, 1.0, %v13176_v26 }
 0x1aa   : > { %v1920_v0 = vmax.f32 %v1833_v44, 0.0  ;;  %v2015_v44 = vld [vmem:[#allocation3 + $0x22] sm:$0xff]  ;;  %v8328_v37 = vpack.i.bf16 %v2114_v5, %v2242_v18  ;;  %v2065_v18 = vmul.f32 %v10611_v51, %v2040_v35  ;;  %13189 = vst [vmem:[#allocation21_spill] sm:$0xff] %v10630_v1 }
 0x1ab   : > { %v1837_v6 = vpop.f32.mrb[20].mxu0  ;;  %v8338_v7 = vpack.i.bf16 %v2015_v44, %v2168_v8  ;;  %v2194_v41 = vld [vmem:[#allocation3 + $0x45] sm:$0xff] }
 0x1ac   : > { %1945 = vst.msk [vmem:[#allocation3 + $0x58] sm:$0xff] %vm333_vm7, %v1920_v0  ;;  %v1838_v60 = vadd.f32 %v10502_v59, %v1837_v6  ;;  %8324 = vrot.lane.b32.xlu0 %v8323_v32, %s13025_s21  ;;  %8334 = vrot.lane.b32.xlu1 %v8333_v21, %s13023_s22  ;;  %v1839_v40 = vpop.f32.mrb[21].mxu0  ;;  %v2243_v0 = vld [vmem:[#allocation3 + $0x3e] sm:$0xff]  ;;  %v2115_v6 = vmul.f32 %v9562_v4, %v2090_v61 }
 0x1ad   : > { %v1968_v32 = vld [vmem:[#allocation3 + $0x39] sm:$0xff]  ;;  %v13190_v40 = vld [vmem:[#allocation23_spill] sm:$0xff]  ;;  %v8348_v61 = vpack.i.bf16 %v2065_v18, %v2218_v15  ;;  %v2219_v44 = vmul.f32 %v9585_v27, %v2194_v41 }
 0x1ae   : > { %v1921_v16 = vmax.f32 %v1838_v60, 0.0  ;;  %v8343_v8 = vpack.i.bf16 %v2115_v6, %v2243_v0  ;;  %v2041_v60 = vld [vmem:[#allocation3 + $0x2b] sm:$0xff]  ;;  %vm922_vm3 = vcmp.le.s32.totalorder %v13190_v40, 12  ;;  %v2091_v6 = vld [vmem:[#allocation3 + $0x37] sm:$0xff] }
 0x1af   : > { %v1842_v48 = vpop.f32.mrb[22].mxu0  ;;  %v2016_v0 = vld [vmem:[#allocation3 + $0x2a] sm:$0xff]  ;;  %v10641_v15 = vsel %vm922_vm3, 1.0, %v13176_v26 }
 0x1b0   : > { %1946 = vst.msk [vmem:[#allocation3 + $0x60] sm:$0xff] %vm333_vm7, %v1921_v16  ;;  %v1843_v20 = vadd.f32 %v10502_v59, %v1842_v48  ;;  %8329 = vrot.lane.b32.xlu0 %v8328_v37, %s9240_s26  ;;  %8339 = vrot.lane.b32.xlu1 %v8338_v7, %s13025_s21  ;;  %v1844_v21 = vpop.f32.mrb[23].mxu0  ;;  %v2169_v48 = vmul.f32 %v10630_v1, %v1968_v32  ;;  %v1969_v37 = vld [vmem:[#allocation3 + $0x41] sm:$0xff]  ;;  %13191 = vst [vmem:[#allocation23_spill] sm:$0xff] %v10641_v15 }
 0x1b1   : > { %v2066_v7 = vmul.f32 %v10630_v1, %v2041_v60  ;;  %v2170_v21 = vmul.f32 %v10641_v15, %v1969_v37  ;;  %v2244_v40 = vld [vmem:[#allocation3 + $0x46] sm:$0xff] }
 0x1b2   : > { %v1922_v5 = vmax.f32 %v1843_v20, 0.0  ;;  %v8353_v41 = vpack.i.bf16 %v2016_v0, %v2169_v48  ;;  %v2042_v48 = vld [vmem:[#allocation3 + $0x33] sm:$0xff] }
 0x1b3   : > { %v1847_v16 = vpop.f32.mrb[24].mxu0  ;;  %v8363_v20 = vpack.i.bf16 %v2066_v7, %v2219_v44  ;;  %v13192_v44 = vld [vmem:[#allocation24_spill] sm:$0xff] }
 0x1b4   : > { %1947 = vst.msk [vmem:[#allocation3 + $0x68] sm:$0xff] %vm333_vm7, %v1922_v5  ;;  %v1848_v35 = vadd.f32 %v10502_v59, %v1847_v16  ;;  %8349 = vrot.lane.b32.xlu0 %v8348_v61, %s13023_s22  ;;  %8344 = vrot.lane.b32.xlu1 %v8343_v8, %s9240_s26  ;;  %v1849_v14 = vpop.f32.mrb[25].mxu0  ;;  %v2195_v5 = vld [vmem:[#allocation3 + $0x4d] sm:$0xff]  ;;  %v2116_v61 = vmul.f32 %v9585_v27, %v2091_v6  ;;  %v2092_v16 = vld [vmem:[#allocation3 + $0x3f] sm:$0xff]  ;;  %vm923_vm4 = vcmp.le.s32.totalorder %v13192_v44, 12  ;;  %v2196_v25 = vld [vmem:[#allocation3 + $0x55] sm:$0xff] }
 0x1b5   : > { %v2220_v0 = vmul.f32 %v9642_v30, %v2195_v5  ;;  %v10660_v5 = vsel %vm923_vm4, 1.0, %v13176_v26  ;;  %v2095_v11 = vld [vmem:[#allocation3 + $0x57] sm:$0xff] }
 0x1b6   : > { %v1923_v32 = vmax.f32 %v1848_v35, 0.0  ;;  %v2017_v35 = vld [vmem:[#allocation3 + $0x32] sm:$0xff]  ;;  %v8358_v14 = vpack.i.bf16 %v2116_v61, %v2244_v40  ;;  %v2067_v40 = vmul.f32 %v10641_v15, %v2042_v48  ;;  %13193 = vst [vmem:[#allocation24_spill] sm:$0xff] %v10660_v5 }
 0x1b7   : > { %v1852_v18 = vpop.f32.mrb[26].mxu0  ;;  %v8368_v7 = vpack.i.bf16 %v2017_v35, %v2170_v21  ;;  %v2221_v35 = vmul.f32 %v9660_v55, %v2196_v25 }
 0x1b8   : > { %1948 = vst.msk [vmem:[#allocation3 + $0x70] sm:$0xff] %vm333_vm7, %v1923_v32  ;;  %v1853_v8 = vadd.f32 %v10502_v59, %v1852_v18  ;;  %8354 = vrot.lane.b32.xlu0 %v8353_v41, %s13025_s21  ;;  %8364 = vrot.lane.b32.xlu1 %v8363_v20, %s13023_s22  ;;  %v1854_v60 = vpop.f32.mrb[27].mxu0  ;;  %v2245_v32 = vld [vmem:[#allocation3 + $0x4e] sm:$0xff]  ;;  %v2117_v18 = vmul.f32 %v9642_v30, %v2092_v16 }
 0x1b9   : > { %v1970_v41 = vld [vmem:[#allocation3 + $0x49] sm:$0xff]  ;;  %v13194_v60 = vld [vmem:[#allocation25_spill] sm:$0xff]  ;;  %v8378_v16 = vpack.i.bf16 %v2067_v40, %v2220_v0 }
 0x1ba   : > { %v1924_v37 = vmax.f32 %v1853_v8, 0.0  ;;  %v8373_v21 = vpack.i.bf16 %v2117_v18, %v2245_v32  ;;  %v2043_v8 = vld [vmem:[#allocation3 + $0x3b] sm:$0xff]  ;;  %vm924_vm5 = vcmp.le.s32.totalorder %v13194_v60, 12  ;;  %v2093_v18 = vld [vmem:[#allocation3 + $0x47] sm:$0xff] }
 0x1bb   : > { %v1857_v33 = vpop.f32.mrb[28].mxu0  ;;  %v2068_v44 = vmul.f32 %v10660_v5, %v2043_v8  ;;  %v2018_v32 = vld [vmem:[#allocation3 + $0x3a] sm:$0xff]  ;;  %v10671_v0 = vsel %vm924_vm5, 1.0, %v13176_v26  ;;  %v2094_v8 = vld [vmem:[#allocation3 + $0x4f] sm:$0xff] }
 0x1bc   : > { %1949 = vst.msk [vmem:[#allocation3 + $0x78] sm:$0xff] %vm333_vm7, %v1924_v37  ;;  %v1858_v6 = vadd.f32 %v10502_v59, %v1857_v33  ;;  %8359 = vrot.lane.b32.xlu0 %v8358_v14, %s9240_s26  ;;  %8369 = vrot.lane.b32.xlu1 %v8368_v7, %s13025_s21  ;;  %v1859_v20 = vpop.f32.mrb[29].mxu0  ;;  %v2171_v33 = vmul.f32 %v10660_v5, %v1970_v41  ;;  %v1971_v14 = vld [vmem:[#allocation3 + $0x51] sm:$0xff]  ;;  %13195 = vst [vmem:[#allocation25_spill] sm:$0xff] %v10671_v0  ;;  %v2197_v60 = vld [vmem:[#allocation3 + $0x5d] sm:$0xff] }
 0x1bd   : > { %v2172_v20 = vmul.f32 %v10671_v0, %v1971_v14  ;;  %v2246_v40 = vld [vmem:[#allocation3 + $0x56] sm:$0xff]  ;;  %v1973_v5 = vld [vmem:[#allocation3 + $0x61] sm:$0xff] }
 0x1be   : > { %v1925_v61 = vmax.f32 %v1858_v6, 0.0  ;;  %v8383_v25 = vpack.i.bf16 %v2018_v32, %v2171_v33  ;;  %v8393_v6 = vpack.i.bf16 %v2068_v44, %v2221_v35  ;;  %v2222_v33 = vmul.f32 %v9668_v53, %v2197_v60  ;;  %v2247_v35 = vld [vmem:[#allocation3 + $0x5e] sm:$0xff]  ;;  %v2045_v60 = vld [vmem:[#allocation3 + $0x4b] sm:$0xff] }
 0x1bf   : > { %v1862_v37 = vpop.f32.mrb[30].mxu0  ;;  %v2119_v44 = vmul.f32 %v9668_v53, %v2094_v8  ;;  %v1972_v32 = vld [vmem:[#allocation3 + $0x59] sm:$0xff] }
 0x1c0   : > { %1950 = vst.msk [vmem:[#allocation3 + $0x80] sm:$0xff] %vm333_vm7, %v1925_v61  ;;  %v1863_v48 = vadd.f32 %v10502_v59, %v1862_v37  ;;  %8379 = vrot.lane.b32.xlu0 %v8378_v16, %s13023_s22  ;;  %8374 = vrot.lane.b32.xlu1 %v8373_v21, %s9240_s26  ;;  %v1864_v7 = vpop.f32.mrb[31].mxu0  ;;  %v2118_v21 = vmul.f32 %v9660_v55, %v2093_v18  ;;  %v2019_v61 = vld [vmem:[#allocation3 + $0x42] sm:$0xff] }
 0x1c1   : > { %v2044_v16 = vld [vmem:[#allocation3 + $0x43] sm:$0xff]  ;;  %v8398_v7 = vpack.i.bf16 %v2019_v61, %v2172_v20  ;;  %v8403_v20 = vpack.i.bf16 %v2119_v44, %v2247_v35 }
 0x1c2   : > { %v1926_v41 = vmax.f32 %v1863_v48, 0.0  ;;  %v8388_v37 = vpack.i.bf16 %v2118_v21, %v2246_v40  ;;  %v13196_v48 = vld [vmem:[#allocation26_spill] sm:$0xff]  ;;  %v13198_v21 = vld [vmem:[#allocation27_spill] sm:$0xff] }
 0x1c3   : > { %vm925_vm6 = vcmp.le.s32.totalorder %v13196_v48, 12  ;;  %vm926_vm12 = vcmp.le.s32.totalorder %v13198_v21, 12  ;;  %v2020_v44 = vld [vmem:[#allocation3 + $0x4a] sm:$0xff]  ;;  %v2021_v21 = vld [vmem:[#allocation3 + $0x52] sm:$0xff] }
 0x1c4   : > { %1951 = vst.msk [vmem:[#allocation3 + $0x88] sm:$0xff] %vm333_vm7, %v1926_v41  ;;  %8384 = vrot.lane.b32.xlu0 %v8383_v25, %s13025_s21  ;;  %8394 = vrot.lane.b32.xlu1 %v8393_v6, %s13023_s22  ;;  %v2198_v41 = vld [vmem:[#allocation3 + $0x65] sm:$0xff]  ;;  %v2069_v6 = vmul.f32 %v10671_v0, %v2044_v16  ;;  %v10686_v40 = vsel %vm925_vm6, 1.0, %v13176_v26  ;;  %v2200_v0 = vld [vmem:[#allocation3 + $0x75] sm:$0xff] }
 0x1c5   : > { %13197 = vst [vmem:[#allocation26_spill] sm:$0xff] %v10686_v40  ;;  %v2173_v48 = vmul.f32 %v10686_v40, %v1972_v32  ;;  %v2070_v35 = vmul.f32 %v10686_v40, %v2045_v60  ;;  %v10700_v32 = vsel %vm926_vm12, 1.0, %v13176_v26  ;;  %v2096_v60 = vld [vmem:[#allocation3 + $0x5f] sm:$0xff] }
 0x1c6   : > { %v8408_v8 = vpack.i.bf16 %v2069_v6, %v2222_v33  ;;  %v2120_v33 = vmul.f32 %v9707_v34, %v2095_v11  ;;  %13199 = vst [vmem:[#allocation27_spill] sm:$0xff] %v10700_v32  ;;  %v2174_v6 = vmul.f32 %v10700_v32, %v1973_v5 }
 0x1c7   : > { %v1867_v14 = vpop.f32.mrb[32].mxu0 }
 0x1c8   : > { %v1868_v25 = vadd.f32 %v10502_v59, %v1867_v14  ;;  %8389 = vrot.lane.b32.xlu0 %v8388_v37, %s9240_s26  ;;  %8399 = vrot.lane.b32.xlu1 %v8398_v7, %s13025_s21  ;;  %v1869_v18 = vpop.f32.mrb[33].mxu0  ;;  %v2223_v14 = vmul.f32 %v9707_v34, %v2198_v41  ;;  %v8428_v5 = vpack.i.bf16 %v2021_v21, %v2174_v6  ;;  %v13201_v6 = vld [vmem:[#allocation30_spill] sm:$0xff] }
 0x1c9   : > { %vm928_vm14 = vcmp.le.s32.totalorder %v13201_v6, 12  ;;  %v2225_v21 = vmul.f32 %v9807_v12, %v2200_v0  ;;  %v2201_v6 = vld [vmem:[#allocation3 + $0x7d] sm:$0xff] }
 0x1ca   : > { %v1927_v61 = vmax.f32 %v1868_v25, 0.0  ;;  %v8413_v25 = vpack.i.bf16 %v2020_v44, %v2173_v48  ;;  %v8423_v18 = vpack.i.bf16 %v2070_v35, %v2223_v14  ;;  %v2249_v44 = vld [vmem:[#allocation3 + $0x6e] sm:$0xff] }
 0x1cb   : > { %v1872_v37 = vpop.f32.mrb[34].mxu0  ;;  %v2202_v36 = vld [vmem:[#allocation3 + $0x85] sm:$0xff] }
 0x1cc   : > { %1952 = vst.msk [vmem:[#allocation3 + $0x90] sm:$0xff] %vm333_vm7, %v1927_v61  ;;  %v1873_v16 = vadd.f32 %v10502_v59, %v1872_v37  ;;  %8409 = vrot.lane.b32.xlu0 %v8408_v8, %s13023_s22  ;;  %8404 = vrot.lane.b32.xlu1 %v8403_v20, %s9240_s26  ;;  %v1874_v7 = vpop.f32.mrb[35].mxu0  ;;  %v2248_v8 = vld [vmem:[#allocation3 + $0x66] sm:$0xff] }
 0x1cd   : > { %v2199_v37 = vld [vmem:[#allocation3 + $0x6d] sm:$0xff]  ;;  %v8418_v14 = vpack.i.bf16 %v2120_v33, %v2248_v8 }
 0x1ce   : > { %v1928_v41 = vmax.f32 %v1873_v16, 0.0  ;;  %v2046_v7 = vld [vmem:[#allocation3 + $0x53] sm:$0xff]  ;;  %v13200_v16 = vld [vmem:[#allocation29_spill] sm:$0xff]  ;;  %v2224_v35 = vmul.f32 %v9804_v54, %v2199_v37 }
 0x1cf   : > { %v1877_v61 = vpop.f32.mrb[36].mxu0  ;;  %vm927_vm13 = vcmp.le.s32.totalorder %v13200_v16, 12 }
 0x1d0   : > { %1953 = vst.msk [vmem:[#allocation3 + $0x98] sm:$0xff] %vm333_vm7, %v1928_v41  ;;  %v1878_v20 = vadd.f32 %v10502_v59, %v1877_v61  ;;  %8414 = vrot.lane.b32.xlu0 %v8413_v25, %s13025_s21  ;;  %8424 = vrot.lane.b32.xlu1 %v8423_v18, %s13023_s22  ;;  %v1879_v11 = vpop.f32.mrb[37].mxu0  ;;  %v2121_v41 = vmul.f32 %v9804_v54, %v2096_v60  ;;  %v1974_v61 = vld [vmem:[#allocation3 + $0x69] sm:$0xff]  ;;  %v10719_v37 = vsel %vm927_vm13, 1.0, %v13176_v26 }
 0x1d1   : > { %v2071_v18 = vmul.f32 %v10700_v32, %v2046_v7  ;;  %13202 = vst [vmem:[#allocation29_spill] sm:$0xff] %v10719_v37  ;;  %v1975_v7 = vld [vmem:[#allocation3 + $0x71] sm:$0xff]  ;;  %v1976_v32 = vld [vmem:[#allocation3 + $0x79] sm:$0xff] }
 0x1d2   : > { %v1929_v48 = vmax.f32 %v1878_v20, 0.0  ;;  %v8433_v8 = vpack.i.bf16 %v2121_v41, %v2249_v44  ;;  %v2047_v20 = vld [vmem:[#allocation3 + $0x5b] sm:$0xff] }
 0x1d3   : > { %v1882_v40 = vpop.f32.mrb[38].mxu0  ;;  %v8438_v60 = vpack.i.bf16 %v2071_v18, %v2224_v35  ;;  %v2072_v16 = vmul.f32 %v10719_v37, %v2047_v20  ;;  %v2250_v18 = vld [vmem:[#allocation3 + $0x76] sm:$0xff]  ;;  %v2048_v20 = vld [vmem:[#allocation3 + $0x63] sm:$0xff] }
 0x1d4   : > { %1954 = vst.msk [vmem:[#allocation3 + $0xa0] sm:$0xff] %vm333_vm7, %v1929_v48  ;;  %v1883_v25 = vadd.f32 %v10502_v59, %v1882_v40  ;;  %8419 = vrot.lane.b32.xlu0 %v8418_v14, %s9240_s26  ;;  %8429 = vrot.lane.b32.xlu1 %v8428_v5, %s13025_s21  ;;  %v1884_v33 = vpop.f32.mrb[39].mxu0  ;;  %v2175_v40 = vmul.f32 %v10719_v37, %v1974_v61  ;;  %v2097_v48 = vld [vmem:[#allocation3 + $0x67] sm:$0xff]  ;;  %v10724_v14 = vsel %vm928_vm14, 1.0, %v13176_v26  ;;  %v2022_v5 = vld [vmem:[#allocation3 + $0x5a] sm:$0xff]  ;;  %v2098_v61 = vld [vmem:[#allocation3 + $0x6f] sm:$0xff] }
 0x1d5   : > { %13203 = vst [vmem:[#allocation30_spill] sm:$0xff] %v10724_v14  ;;  %v8453_v35 = vpack.i.bf16 %v2072_v16, %v2225_v21  ;;  %v2122_v41 = vmul.f32 %v9807_v12, %v2097_v48  ;;  %v2176_v0 = vmul.f32 %v10724_v14, %v1975_v7  ;;  %v2023_v33 = vld [vmem:[#allocation3 + $0x62] sm:$0xff]  ;;  %v2226_v16 = vmul.f32 %v9832_v28, %v2201_v6 }
 0x1d6   : > { %v1930_v11 = vmax.f32 %v1883_v25, 0.0  ;;  %v8443_v44 = vpack.i.bf16 %v2022_v5, %v2175_v40  ;;  %v13204_v40 = vld [vmem:[#allocation32_spill] sm:$0xff]  ;;  %v2251_v5 = vld [vmem:[#allocation3 + $0x7e] sm:$0xff] }
 0x1d7   : > { %vm929_vm15 = vcmp.le.s32.totalorder %v13204_v40, 12  ;;  %v8448_v48 = vpack.i.bf16 %v2122_v41, %v2250_v18  ;;  %v8458_v7 = vpack.i.bf16 %v2023_v33, %v2176_v0  ;;  %v2049_v18 = vld [vmem:[#allocation3 + $0x6b] sm:$0xff] }
 0x1d8   : > { %1955 = vst.msk [vmem:[#allocation3 + $0xa8] sm:$0xff] %vm333_vm7, %v1930_v11  ;;  %8439 = vrot.lane.b32.xlu0 %v8438_v60, %s13023_s22  ;;  %8434 = vrot.lane.b32.xlu1 %v8433_v8, %s9240_s26  ;;  %v2123_v60 = vmul.f32 %v9832_v28, %v2098_v61  ;;  %v10747_v0 = vsel %vm929_vm15, 1.0, %v13176_v26 }
 0x1d9   : > { %13206 = vst [vmem:[#allocation32_spill] sm:$0xff] %v10747_v0 }
 0x1da   : > { %v8463_v41 = vpack.i.bf16 %v2123_v60, %v2251_v5 }
 0x1db   : > { %v1887_v25 = vpop.f32.mrb[40].mxu0 }
 0x1dc   : > { %v1888_v11 = vadd.f32 %v10502_v59, %v1887_v25  ;;  %8444 = vrot.lane.b32.xlu0 %v8443_v44, %s13025_s21  ;;  %8454 = vrot.lane.b32.xlu1 %v8453_v35, %s13023_s22  ;;  %v1889_v8 = vpop.f32.mrb[41].mxu0  ;;  %v2073_v35 = vmul.f32 %v10724_v14, %v2048_v20  ;;  %v13205_v25 = vld [vmem:[#allocation33_spill] sm:$0xff]  ;;  %v2025_v14 = vld [vmem:[#allocation3 + $0x72] sm:$0xff] }
 0x1dd   : > { %vm930_vm1 = vcmp.le.s32.totalorder %v13205_v25, 12  ;;  %v2099_v8 = vld [vmem:[#allocation3 + $0x77] sm:$0xff] }
 0x1de   : > { %v1931_v21 = vmax.f32 %v1888_v11, 0.0  ;;  %v8468_v6 = vpack.i.bf16 %v2073_v35, %v2226_v16  ;;  %v2227_v11 = vmul.f32 %v9876_v9, %v2202_v36  ;;  %v10752_v20 = vsel %vm930_vm1, 1.0, %v13176_v26 }
 0x1df   : > { %v1892_v37 = vpop.f32.mrb[42].mxu0  ;;  %13207 = vst [vmem:[#allocation33_spill] sm:$0xff] %v10752_v20  ;;  %v2124_v36 = vmul.f32 %v9876_v9, %v2099_v8  ;;  %v2050_v8 = vld [vmem:[#allocation3 + $0x73] sm:$0xff] }
 0x1e0   : > { %1956 = vst.msk [vmem:[#allocation3 + $0xb0] sm:$0xff] %vm333_vm7, %v1931_v21  ;;  %v1893_v44 = vadd.f32 %v10502_v59, %v1892_v37  ;;  %8449 = vrot.lane.b32.xlu0 %v8448_v48, %s9240_s26  ;;  %8459 = vrot.lane.b32.xlu1 %v8458_v7, %s13025_s21  ;;  %v1894_v61 = vpop.f32.mrb[43].mxu0  ;;  %v2177_v37 = vmul.f32 %v10747_v0, %v1976_v32  ;;  %v1977_v48 = vld [vmem:[#allocation3 + $0x81] sm:$0xff]  ;;  %v2024_v32 = vld [vmem:[#allocation3 + $0x6a] sm:$0xff] }
 0x1e1   : > { %v2074_v7 = vmul.f32 %v10747_v0, %v2049_v18  ;;  %v2178_v35 = vmul.f32 %v10752_v20, %v1977_v48  ;;  %v2100_v61 = vld [vmem:[#allocation3 + $0x7f] sm:$0xff] }
 0x1e2   : > { %v1932_v33 = vmax.f32 %v1893_v44, 0.0  ;;  %v8473_v5 = vpack.i.bf16 %v2024_v32, %v2177_v37  ;;  %v2125_v37 = vmul.f32 %v9934_v43, %v2100_v61  ;;  %v1978_v32 = vld [vmem:[#allocation3 + $0x89] sm:$0xff]  ;;  %v2205_v0 = vld [vmem:[#allocation3 + $0x9d] sm:$0xff] }
 0x1e3   : > { %v1897_v21 = vpop.f32.mrb[44].mxu0  ;;  %v8483_v44 = vpack.i.bf16 %v2074_v7, %v2227_v11  ;;  %v13208_v11 = vld [vmem:[#allocation34_spill] sm:$0xff]  ;;  %v2253_v7 = vld [vmem:[#allocation3 + $0x8e] sm:$0xff] }
 0x1e4   : > { %1957 = vst.msk [vmem:[#allocation3 + $0xb8] sm:$0xff] %vm333_vm7, %v1932_v33  ;;  %8469 = vrot.lane.b32.xlu0 %v8468_v6, %s13023_s22  ;;  %8464 = vrot.lane.b32.xlu1 %v8463_v41, %s9240_s26  ;;  %v1898_v60 = vadd.f32 %v10502_v59, %v1897_v21  ;;  %v1899_v40 = vpop.f32.mrb[45].mxu0  ;;  %v2252_v33 = vld [vmem:[#allocation3 + $0x86] sm:$0xff]  ;;  %vm931_vm2 = vcmp.le.s32.totalorder %v13208_v11, 12  ;;  %v1979_v11 = vld [vmem:[#allocation3 + $0x91] sm:$0xff] }
 0x1e5   : > { %v2203_v6 = vld [vmem:[#allocation3 + $0x8d] sm:$0xff]  ;;  %v8478_v48 = vpack.i.bf16 %v2124_v36, %v2252_v33  ;;  %v10774_v61 = vsel %vm931_vm2, 1.0, %v13176_v26  ;;  %v2051_v36 = vld [vmem:[#allocation3 + $0x7b] sm:$0xff]  ;;  %vm9243_vm2 = vmmov 0  }
 0x1e6   : > { %v1933_v16 = vmax.f32 %v1898_v60, 0.0  ;;  %v8488_v60 = vpack.i.bf16 %v2025_v14, %v2178_v35  ;;  %v2228_v40 = vmul.f32 %v9934_v43, %v2203_v6  ;;  %13210 = vst [vmem:[#allocation34_spill] sm:$0xff] %v10774_v61  ;;  %v8493_v35 = vpack.i.bf16 %v2125_v37, %v2253_v7  ;;  %v2101_v6 = vld [vmem:[#allocation3 + $0x87] sm:$0xff]  ;;  %v2026_v37 = vld [vmem:[#allocation3 + $0x7a] sm:$0xff]  ;;  %7453 = vmatprep.mubr.msk.f32.mxu0 %vm9243_vm2, %v13176_v26 }
 0x1e7   : > { %v1902_v25 = vpop.f32.mrb[46].mxu0 }
 0x1e8   : > { %1958 = vst.msk [vmem:[#allocation3 + $0xc0] sm:$0xff] %vm333_vm7, %v1933_v16  ;;  %8474 = vrot.lane.b32.xlu0 %v8473_v5, %s13025_s21  ;;  %8484 = vrot.lane.b32.xlu1 %v8483_v44, %s13023_s22  ;;  %v1903_v41 = vadd.f32 %v10502_v59, %v1902_v25  ;;  %v1904_v18 = vpop.f32.mrb[47].mxu0  ;;  %v2204_v16 = vld [vmem:[#allocation3 + $0x95] sm:$0xff]  ;;  %v2075_v5 = vmul.f32 %v10752_v20, %v2050_v8  ;;  %v13209_v44 = vld [vmem:[#allocation35_spill] sm:$0xff] }
 0x1e9   : > { %vm932_vm3 = vcmp.le.s32.totalorder %v13209_v44, 12  ;;  %v2179_v25 = vmul.f32 %v10774_v61, %v1978_v32  ;;  %v2229_v33 = vmul.f32 %v9978_v45, %v2204_v16  ;;  %v2027_v16 = vld [vmem:[#allocation3 + $0x82] sm:$0xff]  ;;  %v2254_v20 = vld [vmem:[#allocation3 + $0x96] sm:$0xff] }
 0x1ea   : > { %v1934_v21 = vmax.f32 %v1903_v41, 0.0  ;;  %v8498_v14 = vpack.i.bf16 %v2075_v5, %v2228_v40  ;;  %v10779_v18 = vsel %vm932_vm3, 1.0, %v13176_v26  ;;  %v2052_v44 = vld [vmem:[#allocation3 + $0x83] sm:$0xff]  ;;  %vm3575_vm3 = vcmask 519168  }
 0x1eb   : > { %13211 = vst [vmem:[#allocation35_spill] sm:$0xff] %v10779_v18  ;;  %v8503_v7 = vpack.i.bf16 %v2026_v37, %v2179_v25  ;;  %v2180_v5 = vmul.f32 %v10779_v18, %v1979_v11  ;;  %v2053_v37 = vld [vmem:[#allocation3 + $0x8b] sm:$0xff] }
 0x1ec   : > { %1959 = vst.msk [vmem:[#allocation3 + $0xc8] sm:$0xff] %vm333_vm7, %v1934_v21  ;;  %8479 = vrot.lane.b32.xlu0 %v8478_v48, %s9240_s26  ;;  %8489 = vrot.lane.b32.xlu1 %v8488_v60, %s13025_s21  ;;  %v2076_v21 = vmul.f32 %v10774_v61, %v2051_v36  ;;  %v2126_v60 = vmul.f32 %v9978_v45, %v2101_v6 }
 0x1ed   : > { %v2077_v36 = vmul.f32 %v10779_v18, %v2052_v44  ;;  %v8518_v25 = vpack.i.bf16 %v2027_v16, %v2180_v5  ;;  %v1981_v5 = vld [vmem:[#allocation3 + $0xa1] sm:$0xff] }
 0x1ee   : > { %v8513_v32 = vpack.i.bf16 %v2076_v21, %v2229_v33  ;;  %v2230_v33 = vmul.f32 %v13157_v49, %v2205_v0  ;;  %v2206_v21 = vld [vmem:[#allocation3 + $0xa5] sm:$0xff] }
 0x1ef   : > { %v1907_v41 = vpop.f32.mrb[48].mxu0  ;;  %v2231_v0 = vmul.f32 %v10022_v38, %v2206_v21  ;;  %v13216_v21 = vld [vmem:[#allocation45_spill] sm:$0xff] }
 0x1f0   : > { %8499 = vrot.lane.b32.xlu0 %v8498_v14, %s13023_s22  ;;  %8494 = vrot.lane.b32.xlu1 %v8493_v35, %s9240_s26  ;;  %v1908_v8 = vadd.f32 %v10502_v59, %v1907_v41  ;;  %v1909_v48 = vpop.f32.mrb[49].mxu0  ;;  %v2102_v14 = vld [vmem:[#allocation3 + $0x8f] sm:$0xff]  ;;  %v8508_v35 = vpack.i.bf16 %v2126_v60, %v2254_v20  ;;  %v2255_v41 = vld [vmem:[#allocation3 + $0x9e] sm:$0xff]  ;;  %vm935_vm6 = vcmp.le.s32.totalorder %v13216_v21, 12 }
 0x1f1   : > { %v13212_v59 = vld [vmem:[#allocation36_spill] sm:$0xff]  ;;  %v2127_v6 = vmul.f32 %v13157_v49, %v2102_v14  ;;  %v13214_v48 = vld [vmem:[#allocation42_spill] sm:$0xff] }
 0x1f2   : > { %v1935_v40 = vmax.f32 %v1908_v8, 0.0  ;;  %vm933_vm4 = vcmp.le.s32.totalorder %v13212_v59, 12  ;;  %v1980_v8 = vld [vmem:[#allocation3 + $0x99] sm:$0xff]  ;;  %vm934_vm5 = vcmp.le.s32.totalorder %v13214_v48, 12  ;;  %v2056_v18 = vld [vmem:[#allocation3 + $0xa3] sm:$0xff] }
 0x1f3   : > { %v10795_v11 = vsel %vm933_vm4, 1.0, %v13176_v26  ;;  %v8523_v20 = vpack.i.bf16 %v2127_v6, %v2255_v41  ;;  %v10803_v16 = vsel %vm934_vm5, 1.0, %v13176_v26  ;;  %v2256_v6 = vld [vmem:[#allocation3 + $0xa6] sm:$0xff]  ;;  %v2059_v51 = vld [vmem:[#allocation3 + $0xbb] sm:$0xff] }
 0x1f4   : > { %1960 = vst.msk [vmem:[#allocation3 + $0xd0] sm:$0xf] %vm338_vm11, %v1935_v40  ;;  %8504 = vrot.lane.b32.xlu0 %v8503_v7, %s13025_s21  ;;  %8514 = vrot.lane.b32.xlu1 %v8513_v32, %s13023_s22  ;;  %13213 = vst [vmem:[#allocation36_spill] sm:$0xff] %v10795_v11  ;;  %v8528_v40 = vpack.i.bf16 %v2077_v36, %v2230_v33  ;;  %v2181_v60 = vmul.f32 %v10795_v11, %v1980_v8  ;;  %v2028_v7 = vld [vmem:[#allocation3 + $0x8a] sm:$0xff]  ;;  %v2103_v32 = vld [vmem:[#allocation3 + $0x97] sm:$0xff] }
 0x1f5   : > { %13215 = vst [vmem:[#allocation42_spill] sm:$0xff] %v10803_v16  ;;  %v2078_v44 = vmul.f32 %v10795_v11, %v2053_v37  ;;  %v2128_v36 = vmul.f32 %v10022_v38, %v2103_v32  ;;  %v2054_v33 = vld [vmem:[#allocation3 + $0x93] sm:$0xff]  ;;  %v2104_v8 = vld [vmem:[#allocation3 + $0x9f] sm:$0xff]  ;;  %v1982_v32 = vld [vmem:[#allocation3 + $0xa9] sm:$0xff] }
 0x1f6   : > { %v8533_v14 = vpack.i.bf16 %v2028_v7, %v2181_v60  ;;  %v2207_v41 = vld [vmem:[#allocation3 + $0xad] sm:$0xff]  ;;  %v2079_v48 = vmul.f32 %v10803_v16, %v2054_v33  ;;  %v2129_v60 = vmul.f32 %v10109_v56, %v2104_v8  ;;  %v10817_v7 = vsel %vm935_vm6, 1.0, %v13176_v26  ;;  %v2030_v33 = vld [vmem:[#allocation3 + $0x9a] sm:$0xff] }
 0x1f7   : > { %v8543_v59 = vpack.i.bf16 %v2078_v44, %v2231_v0  ;;  %v8538_v37 = vpack.i.bf16 %v2128_v36, %v2256_v6  ;;  %v2257_v0 = vld [vmem:[#allocation3 + $0xae] sm:$0xff]  ;;  %13217 = vst [vmem:[#allocation45_spill] sm:$0xff] %v10817_v7 }
 0x1f8   : > { %8509 = vrot.lane.b32.xlu0 %v8508_v35, %s9240_s26  ;;  %8519 = vrot.lane.b32.xlu1 %v8518_v25, %s13025_s21  ;;  %v2029_v35 = vld [vmem:[#allocation3 + $0x92] sm:$0xff]  ;;  %v2182_v25 = vmul.f32 %v10803_v16, %v1981_v5  ;;  %v8553_v36 = vpack.i.bf16 %v2129_v60, %v2257_v0  ;;  %v2105_v6 = vld [vmem:[#allocation3 + $0xa7] sm:$0xff] }
 0x1f9   : > { %v2208_v5 = vld [vmem:[#allocation3 + $0xb5] sm:$0xff]  ;;  %v13218_v44 = vld [vmem:[#allocation47_spill] sm:$0xff] }
 0x1fa   : > { %vm936_vm12 = vcmp.le.s32.totalorder %v13218_v44, 12  ;;  %v1983_v8 = vld [vmem:[#allocation3 + $0xb1] sm:$0xff] }
 0x1fb   : > { %v2106_v16 = vld [vmem:[#allocation3 + $0xaf] sm:$0xff] }
 0x1fc   : > { %8529 = vrot.lane.b32.xlu0 %v8528_v40, %s13023_s22  ;;  %8524 = vrot.lane.b32.xlu1 %v8523_v20, %s9240_s26  ;;  %v8548_v40 = vpack.i.bf16 %v2029_v35, %v2182_v25  ;;  %v2232_v20 = vmul.f32 %v10109_v56, %v2207_v41  ;;  %v2183_v35 = vmul.f32 %v10817_v7, %v1982_v32  ;;  %v10825_v41 = vsel %vm936_vm12, 1.0, %v13176_v26  ;;  %v2212_v11 = vld [vmem:[#allocation3 + $0xd5] sm:$0xff] }
 0x1fd   : > { %v2233_v25 = vmul.f32 %v10143_v29, %v2208_v5  ;;  %13219 = vst [vmem:[#allocation47_spill] sm:$0xff] %v10825_v41  ;;  %v2130_v32 = vmul.f32 %v10143_v29, %v2105_v6  ;;  %v2031_v5 = vld [vmem:[#allocation3 + $0xa2] sm:$0xff]  ;;  %v2184_v44 = vmul.f32 %v10825_v41, %v1983_v8  ;;  %v10849_v6 = vmul.f32 %v10202_v63, %v2212_v11  ;;  %v1047_v8 = vld [vmem:[%s12896_s3 + $0x100] sm:$0xff] }
 0x1fe   : > { %v8563_v60 = vpack.i.bf16 %v2030_v33, %v2183_v35  ;;  %v2131_v35 = vmul.f32 %v10150_v17, %v2106_v16  ;;  %v1048_v16 = vld [vmem:[%s12896_s3 + $0x108] sm:$0xff] }
 0x200   : > { %8534 = vrot.lane.b32.xlu0 %v8533_v14, %s13025_s21  ;;  %8544 = vrot.lane.b32.xlu1 %v8543_v59, %s13023_s22  ;;  %v2055_v14 = vld [vmem:[#allocation3 + $0x9b] sm:$0xff]  ;;  %v8558_v59 = vpack.i.bf16 %v2079_v48, %v2232_v20  ;;  %v13221_v48 = vld [vmem:[#allocation54_spill] sm:$0xff] }
 0x201   : > { %v2080_v21 = vmul.f32 %v10817_v7, %v2055_v14  ;;  %vm939_vm14 = vcmp.le.s32.totalorder %v13221_v48, 12 }
 0x202   : > { %v10846_v33 = vsel %vm939_vm14, 1.0, %v13176_v26 }
 0x203   : > { %v8573_v0 = vpack.i.bf16 %v2080_v21, %v2233_v25  ;;  %13223 = vst [vmem:[#allocation54_spill] sm:$0xff] %v10846_v33 }
 0x204   : > { %8539 = vrot.lane.b32.xlu0 %v8538_v37, %s9240_s26  ;;  %8549 = vrot.lane.b32.xlu1 %v8548_v40, %s13025_s21  ;;  %v1961_v37 = vld [vmem:[#allocation3 + $0x1] sm:$0xff] }
 0x205   : > { %v13220_v40 = vld [vmem:[#allocation49_spill] sm:$0xff]  ;;  %v1986_v7 = vmul.f32 %v13180_v19, %v1961_v37 }
 0x206   : > { %vm937_vm13 = vcmp.le.s32.totalorder %v13220_v40, 12  ;;  %v10859_v19 = vld [vmem:[#allocation3 + $0xb9] sm:$0xff] }
 0x207   : > { %v10841_v25 = vsel %vm937_vm13, 1.0, %v13176_v26 }
 0x208   : > { %8559 = vrot.lane.b32.xlu0 %v8558_v59, %s13023_s22  ;;  %8554 = vrot.lane.b32.xlu1 %v8553_v36, %s9240_s26  ;;  %v2258_v59 = vld [vmem:[#allocation3 + $0xb6] sm:$0xff]  ;;  %13222 = vst [vmem:[#allocation49_spill] sm:$0xff] %v10841_v25 }
 0x209   : > { %v2209_v36 = vld [vmem:[#allocation3 + $0xbd] sm:$0xff]  ;;  %v8568_v40 = vpack.i.bf16 %v2130_v32, %v2258_v59  ;;  %v10866_v59 = vpack.c.bf16 %v1048_v16, %v1047_v8  ;;  %v2057_v16 = vld [vmem:[#allocation3 + $0xab] sm:$0xff] }
 0x20a   : > { %v8280_v20 = vpop.permute.xlu1 %8279  ;;  %v2234_v48 = vmul.f32 %v10150_v17, %v2209_v36  ;;  %v2107_v8 = vld [vmem:[#allocation3 + $0xb7] sm:$0xff] }
 0x20b   : > { %v8282_v61 = vunpack.i.h.bf16 %v8280_v20  ;;  %v8281_v14 = vunpack.i.l.bf16 %v8280_v20  ;;  %v8578_v20 = vpack.i.bf16 %v2031_v5, %v2184_v44  ;;  %v13224_v44 = vld [vmem:[#allocation52_spill] sm:$0xff] }
 0x20c   : > { %8564 = vrot.lane.b32.xlu0 %v8563_v60, %s13025_s21  ;;  %8574 = vrot.lane.b32.xlu1 %v8573_v0, %s13023_s22  ;;  %v2081_v60 = vmul.f32 %v10825_v41, %v2056_v18  ;;  %v2259_v0 = vld [vmem:[#allocation3 + $0xbe] sm:$0xff]  ;;  %v1962_v18 = vld [vmem:[#allocation3 + $0x9] sm:$0xff]  ;;  %vm938_vm15 = vcmp.le.s32.totalorder %v13224_v44, 12  ;;  %13225 = vst [vmem:[#allocation52_spill] sm:$0xff] %v10866_v59  ;;  %v2185_v41 = vmul.f32 %v10841_v25, %v10859_v19 }
 0x20d   : > { %v2967_v32 = vsel %vm333_vm7, %v2136_v31, %v8281_v14  ;;  %v2892_v5 = vsel %vm333_vm7, %v1986_v7, %v8282_v61  ;;  %v2032_v7 = vld [vmem:[#allocation3 + $0xaa] sm:$0xff]  ;;  %v2084_v14 = vmul.f32 %v10846_v33, %v2059_v51  ;;  %v2137_v51 = vld [vmem:[#allocation3 + $0x18] sm:$0xff]  ;;  %v2161_v44 = vld [vmem:[#allocation3 + $0xc1] sm:$0xff] }
 0x20e   : > { %v8290_v21 = vpop.permute.xlu0 %8289  ;;  %v8285_v37 = vpop.permute.xlu1 %8284  ;;  %v8588_v31 = vpack.i.bf16 %v2081_v60, %v2234_v48  ;;  %v10887_v48 = vsel %vm938_vm15, 1.0, %v13176_v26 }
 0x20f   : > { %v8292_v11 = vunpack.i.h.bf16 %v8290_v21  ;;  %v8291_v15 = vunpack.i.l.bf16 %v8290_v21  ;;  %v8287_v39 = vunpack.i.h.bf16 %v8285_v37  ;;  %v8286_v1 = vunpack.i.l.bf16 %v8285_v37  ;;  %13226 = vst [vmem:[#allocation69_spill] sm:$0xff] %v10887_v48 }
 0x210   : > { %8569 = vrot.lane.b32.xlu0 %v8568_v40, %s9240_s26  ;;  %8579 = vrot.lane.b32.xlu1 %v8578_v20, %s13025_s21  ;;  %v8583_v21 = vpack.i.bf16 %v2131_v35, %v2259_v0  ;;  %v1987_v35 = vmul.f32 %v9545_v58, %v1962_v18  ;;  %v2210_v0 = vld [vmem:[#allocation3 + $0xc5] sm:$0xff]  ;;  %v2132_v18 = vmul.f32 %v10163_v10, %v2107_v8  ;;  %v9088_v8 = vld [vmem:[#allocation3 + $0x11] sm:$0xff] }
 0x211   : > { %v2992_v36 = vsel %vm1645_vm8, %v2967_v32, %v8291_v15  ;;  %v2917_v37 = vsel %vm1645_vm8, %v2892_v5, %v8292_v11  ;;  %v1049_v11 = vld [vmem:[%s12896_s3 + $0x110] sm:$0xff]  ;;  %v13228_v58 = vld [vmem:[#allocation56_spill] sm:$0xff] }
 0x212   : > { %v8295_v40 = vpop.permute.xlu0 %8294  ;;  %v8305_v46 = vpop.permute.xlu1 %8304  ;;  %v3017_v20 = vsel %vm1587_vm10, %v2992_v36, %v8286_v1  ;;  %v2942_v61 = vsel %vm1587_vm10, %v2917_v37, %v8287_v39  ;;  %v1050_v1 = vld [vmem:[%s12896_s3 + $0x118] sm:$0xff]  ;;  %v2082_v36 = vmul.f32 %v10841_v25, %v2057_v16  ;;  %v1988_v16 = vmul.f32 %v9088_v8, %v9568_v13  ;;  %v2108_v25 = vld [vmem:[#allocation3 + $0xbf] sm:$0xff] }
 0x213   : > { %v8297_v47 = vunpack.i.h.bf16 %v8295_v40  ;;  %v8296_v15 = vunpack.i.l.bf16 %v8295_v40  ;;  %3187 = vmatprep.mubr.f32.mxu1 %v3017_v20  ;;  %v8307_v39 = vunpack.i.h.bf16 %v8305_v46  ;;  %v8306_v60 = vunpack.i.l.bf16 %v8305_v46 }
 0x214   : > { %8589 = vrot.lane.b32.xlu0 %v8588_v31, %s13023_s22  ;;  %8584 = vrot.lane.b32.xlu1 %v8583_v21, %s9240_s26  ;;  %v8593_v40 = vpack.i.bf16 %v2032_v7, %v2185_v41  ;;  %v8598_v21 = vpack.i.bf16 %v2084_v14, %v10849_v6  ;;  %v2235_v20 = vmul.f32 %v10163_v10, %v2210_v0  ;;  %v2058_v31 = vld [vmem:[#allocation3 + $0xb3] sm:$0xff]  ;;  %vm940_vm1 = vcmp.le.s32.totalorder %v13228_v58, 12 }
 0x215   : > { %3188 = vmatmul.mubr.f32.vlgmr.msra.gmra.mrb[0].mxu1 %v2942_v61  ;;  %v2968_v32 = vsel %vm333_vm7, %v2137_v51, %v8296_v15  ;;  %v2893_v5 = vsel %vm333_vm7, %v1987_v35, %v8297_v47  ;;  %v10896_v61 = vpack.c.bf16 %v1050_v1, %v1049_v11  ;;  %v2260_v47 = vld [vmem:[#allocation3 + $0xc6] sm:$0xff]  ;;  %v2083_v1 = vmul.f32 %v10887_v48, %v2058_v31 }
 0x216   : > { %v8300_v46 = vpop.permute.xlu0 %8299  ;;  %v8310_v37 = vpop.permute.xlu1 %8309  ;;  %7826 = vmatpush3.bf16.msra.mxu1 %v10866_v59  ;;  %v2211_v35 = vld [vmem:[#allocation3 + $0xcd] sm:$0xff]  ;;  %v2993_v7 = vsel %vm1645_vm8, %v2968_v32, %v8306_v60  ;;  %v2918_v14 = vsel %vm1645_vm8, %v2893_v5, %v8307_v39  ;;  %v8608_v13 = vpack.i.bf16 %v2082_v36, %v2235_v20  ;;  %v10919_v20 = vsel %vm940_vm1, 1.0, %v13176_v26 }
 0x217   : > { %13227 = vst [vmem:[#allocation70_spill] sm:$0xff] %v10896_v61  ;;  %v8302_v15 = vunpack.i.h.bf16 %v8300_v46  ;;  %v8301_v51 = vunpack.i.l.bf16 %v8300_v46  ;;  %7827 = vmatprep.subr.bf16.mxu1 %v13162_v3  ;;  %v8312_v41 = vunpack.i.h.bf16 %v8310_v37  ;;  %v8311_v6 = vunpack.i.l.bf16 %v8310_v37  ;;  %v2162_v31 = vld [vmem:[#allocation3 + $0xc9] sm:$0xff]  ;;  %13229 = vst [vmem:[#allocation56_spill] sm:$0xff] %v10919_v20 }
 0x218   : > { %8594 = vrot.lane.b32.xlu0 %v8593_v40, %s13025_s21  ;;  %8599 = vrot.lane.b32.xlu1 %v8598_v21, %s13023_s22  ;;  %v2186_v46 = vmul.f32 %v10887_v48, %v2161_v44  ;;  %v8603_v37 = vpack.i.bf16 %v2132_v18, %v2260_v47  ;;  %v2236_v40 = vmul.f32 %v10186_v62, %v2211_v35  ;;  %v2033_v21 = vld [vmem:[#allocation3 + $0xb2] sm:$0xff] }
 0x219   : > { %v3018_v0 = vsel %vm1587_vm10, %v2993_v7, %v8301_v51  ;;  %v2943_v11 = vsel %vm1587_vm10, %v2918_v14, %v8302_v15  ;;  %v2138_v15 = vld [vmem:[#allocation3 + $0x20] sm:$0xff]  ;;  %v2894_v36 = vsel %vm333_vm7, %v1988_v16, %v8312_v41  ;;  %v2133_v47 = vmul.f32 %v10186_v62, %v2108_v25  ;;  %v2163_v25 = vld [vmem:[#allocation3 + $0xd1] sm:$0xf] }
 0x21a   : > { %v8320_v8 = vpop.permute.xlu0 %8319  ;;  %v8315_v59 = vpop.permute.xlu1 %8314  ;;  %3192 = vmatprep.mubr.f32.mxu1 %v3018_v0  ;;  %7829 = vmatpush3.bf16.msra.mxu1 %v10896_v61  ;;  %v2969_v18 = vsel %vm333_vm7, %v2138_v15, %v8311_v6  ;;  %v8613_v44 = vpack.i.bf16 %v2033_v21, %v2186_v46  ;;  %v8623_v14 = vpack.i.bf16 %v2083_v1, %v2236_v40  ;;  %v2034_v16 = vld [vmem:[#allocation3 + $0xba] sm:$0xff]  ;;  %v2109_v21 = vld [vmem:[#allocation3 + $0xc7] sm:$0xff]  ;;  %v4060_v61 = vld [vmem:[#allocation2 + $0x1a] sm:$0xff] }
 0x21b   : > { %v8322_v39 = vunpack.i.h.bf16 %v8320_v8  ;;  %v8321_v60 = vunpack.i.l.bf16 %v8320_v8  ;;  %v8317_v32 = vunpack.i.h.bf16 %v8315_v59  ;;  %v8316_v5 = vunpack.i.l.bf16 %v8315_v59  ;;  %3193 = vmatmul.mubr.f32.gmra.mrb[2].mxu1 %v2943_v11  ;;  %7890 = vmatprep.subr.bf16.mxu1 %v13162_v3  ;;  %v2261_v8 = vld [vmem:[#allocation3 + $0xce] sm:$0xff]  ;;  %v9089_v46 = vld [vmem:[#allocation3 + $0x19] sm:$0xff] }
 0x21c   : > { %8604 = vrot.lane.b32.xlu0 %v8603_v37, %s9240_s26  ;;  %8609 = vrot.lane.b32.xlu1 %v8608_v13, %s13023_s22  ;;  %v2187_v41 = vmul.f32 %v10846_v33, %v2162_v31  ;;  %v1989_v37 = vmul.f32 %v9089_v46, %v9603_v42  ;;  %v2139_v1 = vld [vmem:[#allocation3 + $0x28] sm:$0xff]  ;;  %v8618_v31 = vpack.i.bf16 %v2133_v47, %v2261_v8 }
 0x21d   : > { %v2994_v59 = vsel %vm1645_vm8, %v2969_v18, %v8321_v60  ;;  %v2919_v51 = vsel %vm1645_vm8, %v2894_v36, %v8322_v39  ;;  %v2134_v18 = vmul.f32 %v10202_v63, %v2109_v21  ;;  %v2262_v36 = vld [vmem:[#allocation3 + $0xd6] sm:$0xff]  ;;  %v9090_v8 = vld [vmem:[#allocation3 + $0x21] sm:$0xff] }
 0x21e   : > { %v8325_v35 = vpop.permute.xlu0 %8324  ;;  %v8335_v7 = vpop.permute.xlu1 %8334  ;;  %v3019_v13 = vsel %vm1587_vm10, %v2994_v59, %v8316_v5  ;;  %v2944_v6 = vsel %vm1587_vm10, %v2919_v51, %v8317_v32  ;;  %v8628_v15 = vpack.i.bf16 %v2034_v16, %v2187_v41  ;;  %v2188_v59 = vmul.f32 %v10919_v20, %v2163_v25  ;;  %v2213_v51 = vld [vmem:[#allocation3 + $0xdd] sm:$0xf] }
 0x21f   : > { %v8327_v58 = vunpack.i.h.bf16 %v8325_v35  ;;  %v8326_v0 = vunpack.i.l.bf16 %v8325_v35  ;;  %v8336_v11 = vunpack.i.l.bf16 %v8335_v7  ;;  %3197 = vmatprep.mubr.f32.mxu1 %v3019_v13  ;;  %v8337_v39 = vunpack.i.h.bf16 %v8335_v7  ;;  %v2035_v13 = vld [vmem:[#allocation3 + $0xc2] sm:$0xf] }
 0x220   : > { %8624 = vrot.lane.b32.xlu0 %v8623_v14, %s13023_s22  ;;  %8614 = vrot.lane.b32.xlu1 %v8613_v44, %s13025_s21  ;;  %v2060_v14 = vld [vmem:[#allocation3 + $0xc3] sm:$0xf]  ;;  %v8633_v25 = vpack.i.bf16 %v2134_v18, %v2262_v36 }
 0x221   : > { %3198 = vmatmul.mubr.f32.gmra.mrb[4].mxu1 %v2944_v6  ;;  %v2970_v40 = vsel %vm333_vm7, %v2139_v1, %v8326_v0  ;;  %v2895_v60 = vsel %vm333_vm7, %v1989_v37, %v8327_v58  ;;  %v2110_v6 = vld [vmem:[#allocation3 + $0xcf] sm:$0xf]  ;;  %v2238_v58 = vmul.f32 %v13161_v52, %v2213_v51  ;;  %v8643_v1 = vpack.i.bf16 %v2035_v13, %v2188_v59  ;;  %v2263_v51 = vld [vmem:[#allocation3 + $0xde] sm:$0xf] }
 0x222   : > { %v8330_v32 = vpop.permute.xlu0 %8329  ;;  %v8340_v5 = vpop.permute.xlu1 %8339  ;;  %v2995_v44 = vsel %vm1645_vm8, %v2970_v40, %v8336_v11  ;;  %v2920_v47 = vsel %vm1645_vm8, %v2895_v60, %v8337_v39  ;;  %v1990_v11 = vmul.f32 %v9090_v8, %v9562_v4  ;;  %v2085_v39 = vmul.f32 %v10919_v20, %v2060_v14  ;;  %v9091_v8 = vld [vmem:[#allocation3 + $0x29] sm:$0xff] }
 0x223   : > { %v8332_v35 = vunpack.i.h.bf16 %v8330_v32  ;;  %v8331_v7 = vunpack.i.l.bf16 %v8330_v32  ;;  %v8342_v0 = vunpack.i.h.bf16 %v8340_v5  ;;  %v8341_v46 = vunpack.i.l.bf16 %v8340_v5 }
 0x224   : > { %8629 = vrot.lane.b32.xlu0 %v8628_v15, %s13025_s21  ;;  %8619 = vrot.lane.b32.xlu1 %v8618_v31, %s9240_s26  ;;  %v2135_v40 = vmul.f32 %v13161_v52, %v2110_v6  ;;  %v2140_v31 = vld [vmem:[#allocation3 + $0x30] sm:$0xff]  ;;  %v8638_v14 = vpack.i.bf16 %v2085_v39, %v2238_v58 }
 0x225   : > { %v3020_v16 = vsel %vm1587_vm10, %v2995_v44, %v8331_v7  ;;  %v2945_v41 = vsel %vm1587_vm10, %v2920_v47, %v8332_v35  ;;  %v2971_v35 = vsel %vm333_vm7, %v2140_v31, %v8341_v46  ;;  %v2896_v18 = vsel %vm333_vm7, %v1990_v11, %v8342_v0  ;;  %v2141_v11 = vld [vmem:[#allocation3 + $0x38] sm:$0xff] }
 0x226   : > { %v8350_v37 = vpop.permute.xlu0 %8349  ;;  %v8345_v21 = vpop.permute.xlu1 %8344  ;;  %3202 = vmatprep.mubr.f32.mxu1 %v3020_v16  ;;  %v8648_v6 = vpack.i.bf16 %v2135_v40, %v2263_v51  ;;  %v1991_v46 = vmul.f32 %v9091_v8, %v9585_v27 }
 0x227   : > { %v8352_v60 = vunpack.i.h.bf16 %v8350_v37  ;;  %v8351_v32 = vunpack.i.l.bf16 %v8350_v37  ;;  %v8347_v5 = vunpack.i.h.bf16 %v8345_v21  ;;  %v8346_v15 = vunpack.i.l.bf16 %v8345_v21  ;;  %3203 = vmatmul.mubr.f32.gmra.mrb[6].mxu1 %v2945_v41 }
 0x228   : > { %8634 = vrot.lane.b32.xlu0 %v8633_v25, %s9240_s26  ;;  %8644 = vrot.lane.b32.xlu1 %v8643_v1, %s13025_s21 }
 0x229   : > { %v2996_v36 = vsel %vm1645_vm8, %v2971_v35, %v8351_v32  ;;  %v2921_v59 = vsel %vm1645_vm8, %v2896_v18, %v8352_v60 }
 0x22a   : > { %v8355_v7 = vpop.permute.xlu0 %8354  ;;  %v8365_v44 = vpop.permute.xlu1 %8364  ;;  %v3021_v13 = vsel %vm1587_vm10, %v2996_v36, %v8346_v15  ;;  %v2946_v47 = vsel %vm1587_vm10, %v2921_v59, %v8347_v5  ;;  %v9092_v36 = vld [vmem:[#allocation3 + $0x31] sm:$0xff] }
 0x22b   : > { %v8357_v16 = vunpack.i.h.bf16 %v8355_v7  ;;  %v8356_v41 = vunpack.i.l.bf16 %v8355_v7  ;;  %3207 = vmatprep.mubr.f32.mxu1 %v3021_v13  ;;  %v8367_v37 = vunpack.i.h.bf16 %v8365_v44  ;;  %v8366_v0 = vunpack.i.l.bf16 %v8365_v44 }
 0x22c   : > { %8639 = vrot.lane.b32.xlu0 %v8638_v14, %s13023_s22  ;;  %8649 = vrot.lane.b32.xlu1 %v8648_v6, %s9240_s26  ;;  %v1992_v59 = vmul.f32 %v9092_v36, %v9642_v30  ;;  %v2142_v6 = vld [vmem:[#allocation3 + $0x40] sm:$0xff]  ;;  %s13330_s22 = smul.u32 200, %s13389_s17 }
 0x22d   : > { %3208 = vmatmul.mubr.f32.gmra.mrb[8].mxu1 %v2946_v47  ;;  %v2972_v21 = vsel %vm333_vm7, %v2141_v11, %v8356_v41  ;;  %v2897_v58 = vsel %vm333_vm7, %v1991_v46, %v8357_v16 }
 0x22e   : > { %v8360_v25 = vpop.permute.xlu0 %8359  ;;  %v8370_v1 = vpop.permute.xlu1 %8369  ;;  %v2997_v5 = vsel %vm1645_vm8, %v2972_v21, %v8366_v0  ;;  %v2922_v15 = vsel %vm1645_vm8, %v2897_v58, %v8367_v37  ;;  %s12054_s12 = scalar_lea.vmem %s12900_s7, %s13330_s22 }
 0x22f   : > { %v8362_v39 = vunpack.i.h.bf16 %v8360_v25  ;;  %v8361_v40 = vunpack.i.l.bf16 %v8360_v25  ;;  %v8372_v60 = vunpack.i.h.bf16 %v8370_v1  ;;  %v8371_v32 = vunpack.i.l.bf16 %v8370_v1  ;;  %v9093_v25 = vld [vmem:[#allocation3 + $0x39] sm:$0xff] }
 0x230   : > { %v1993_v1 = vmul.f32 %v9093_v25, %v9660_v55 }
 0x231   : > { %v3022_v31 = vsel %vm1587_vm10, %v2997_v5, %v8361_v40  ;;  %v2947_v51 = vsel %vm1587_vm10, %v2922_v15, %v8362_v39  ;;  %v2973_v47 = vsel %vm333_vm7, %v2142_v6, %v8371_v32  ;;  %v2898_v16 = vsel %vm333_vm7, %v1992_v59, %v8372_v60  ;;  %v2143_v60 = vld [vmem:[#allocation3 + $0x48] sm:$0xff] }
 0x232   : > { %v8380_v35 = vpop.permute.xlu0 %8379  ;;  %v8375_v18 = vpop.permute.xlu1 %8374  ;;  %3212 = vmatprep.mubr.f32.mxu1 %v3022_v31 }
 0x233   : > { %v8382_v7 = vunpack.i.h.bf16 %v8380_v35  ;;  %v8381_v44 = vunpack.i.l.bf16 %v8380_v35  ;;  %v8377_v13 = vunpack.i.h.bf16 %v8375_v18  ;;  %v8376_v14 = vunpack.i.l.bf16 %v8375_v18  ;;  %3213 = vmatmul.mubr.f32.gmra.mrb[10].mxu1 %v2947_v51 }
 0x235   : > { %v2998_v41 = vsel %vm1645_vm8, %v2973_v47, %v8381_v44  ;;  %v2923_v8 = vsel %vm1645_vm8, %v2898_v16, %v8382_v7  ;;  %v9094_v47 = vld [vmem:[#allocation3 + $0x41] sm:$0xff] }
 0x236   : > { %v8385_v46 = vpop.permute.xlu0 %8384  ;;  %v8395_v37 = vpop.permute.xlu1 %8394  ;;  %v3023_v0 = vsel %vm1587_vm10, %v2998_v41, %v8376_v14  ;;  %v2948_v11 = vsel %vm1587_vm10, %v2923_v8, %v8377_v13  ;;  %v1994_v16 = vmul.f32 %v9094_v47, %v9668_v53 }
 0x237   : > { %v8387_v21 = vunpack.i.h.bf16 %v8385_v46  ;;  %v8386_v58 = vunpack.i.l.bf16 %v8385_v46  ;;  %3217 = vmatprep.mubr.f32.mxu1 %v3023_v0  ;;  %v8397_v39 = vunpack.i.h.bf16 %v8395_v37  ;;  %v8396_v40 = vunpack.i.l.bf16 %v8395_v37  ;;  %v2144_v0 = vld [vmem:[#allocation3 + $0x50] sm:$0xff] }
 0x238   : > { %3218 = vmatmul.mubr.f32.gmra.mrb[12].mxu1 %v2948_v11 }
 0x239   : > { %v2974_v32 = vsel %vm333_vm7, %v2143_v60, %v8386_v58  ;;  %v2899_v5 = vsel %vm333_vm7, %v1993_v1, %v8387_v21 }
 0x23a   : > { %v8390_v15 = vpop.permute.xlu0 %8389  ;;  %v8400_v31 = vpop.permute.xlu1 %8399  ;;  %v2999_v59 = vsel %vm1645_vm8, %v2974_v32, %v8396_v40  ;;  %v2924_v7 = vsel %vm1645_vm8, %v2899_v5, %v8397_v39 }
 0x23b   : > { %v8392_v51 = vunpack.i.h.bf16 %v8390_v15  ;;  %v8391_v35 = vunpack.i.l.bf16 %v8390_v15  ;;  %v8402_v18 = vunpack.i.h.bf16 %v8400_v31  ;;  %v8401_v36 = vunpack.i.l.bf16 %v8400_v31  ;;  %v9095_v15 = vld [vmem:[#allocation3 + $0x49] sm:$0xff] }
 0x23c   : > { %v1995_v31 = vmul.f32 %v9095_v15, %v9707_v34 }
 0x23d   : > { %v3024_v44 = vsel %vm1587_vm10, %v2999_v59, %v8391_v35  ;;  %v2949_v13 = vsel %vm1587_vm10, %v2924_v7, %v8392_v51  ;;  %v2975_v11 = vsel %vm333_vm7, %v2144_v0, %v8401_v36  ;;  %v2900_v21 = vsel %vm333_vm7, %v1994_v16, %v8402_v18  ;;  %v2145_v18 = vld [vmem:[#allocation3 + $0x58] sm:$0xff] }
 0x23e   : > { %v8410_v14 = vpop.permute.xlu0 %8409  ;;  %v8405_v6 = vpop.permute.xlu1 %8404  ;;  %3222 = vmatprep.mubr.f32.mxu1 %v3024_v44 }
 0x23f   : > { %v8412_v41 = vunpack.i.h.bf16 %v8410_v14  ;;  %v8411_v8 = vunpack.i.l.bf16 %v8410_v14  ;;  %v8407_v46 = vunpack.i.h.bf16 %v8405_v6  ;;  %v8406_v37 = vunpack.i.l.bf16 %v8405_v6  ;;  %3223 = vmatmul.mubr.f32.gmra.mrb[14].mxu1 %v2949_v13 }
 0x241   : > { %v3000_v58 = vsel %vm1645_vm8, %v2975_v11, %v8411_v8  ;;  %v2925_v25 = vsel %vm1645_vm8, %v2900_v21, %v8412_v41  ;;  %v9096_v11 = vld [vmem:[#allocation3 + $0x51] sm:$0xff] }
 0x242   : > { %v8415_v1 = vpop.permute.xlu0 %8414  ;;  %v8425_v39 = vpop.permute.xlu1 %8424  ;;  %v3025_v40 = vsel %vm1587_vm10, %v3000_v58, %v8406_v37  ;;  %v2950_v60 = vsel %vm1587_vm10, %v2925_v25, %v8407_v46  ;;  %v1996_v21 = vmul.f32 %v9096_v11, %v9804_v54 }
 0x243   : > { %v8417_v32 = vunpack.i.h.bf16 %v8415_v1  ;;  %v8416_v5 = vunpack.i.l.bf16 %v8415_v1  ;;  %3227 = vmatprep.mubr.f32.mxu1 %v3025_v40  ;;  %v8427_v51 = vunpack.i.h.bf16 %v8425_v39  ;;  %v8426_v35 = vunpack.i.l.bf16 %v8425_v39  ;;  %v2146_v40 = vld [vmem:[#allocation3 + $0x60] sm:$0xff] }
 0x244   : > { %3228 = vmatmul.mubr.f32.gmra.mrb[16].mxu1 %v2950_v60 }
 0x245   : > { %v2976_v36 = vsel %vm333_vm7, %v2145_v18, %v8416_v5  ;;  %v2901_v59 = vsel %vm333_vm7, %v1995_v31, %v8417_v32 }
 0x246   : > { %v8420_v7 = vpop.permute.xlu0 %8419  ;;  %v8430_v44 = vpop.permute.xlu1 %8429  ;;  %v3001_v16 = vsel %vm1645_vm8, %v2976_v36, %v8426_v35  ;;  %v2926_v41 = vsel %vm1645_vm8, %v2901_v59, %v8427_v51 }
 0x247   : > { %v8422_v13 = vunpack.i.h.bf16 %v8420_v7  ;;  %v8421_v14 = vunpack.i.l.bf16 %v8420_v7  ;;  %v8432_v6 = vunpack.i.h.bf16 %v8430_v44  ;;  %v8431_v47 = vunpack.i.l.bf16 %v8430_v44  ;;  %v9097_v7 = vld [vmem:[#allocation3 + $0x59] sm:$0xff] }
 0x248   : > { %v1997_v44 = vmul.f32 %v9097_v7, %v9807_v12 }
 0x249   : > { %v3026_v8 = vsel %vm1587_vm10, %v3001_v16, %v8421_v14  ;;  %v2951_v46 = vsel %vm1587_vm10, %v2926_v41, %v8422_v13  ;;  %v2977_v60 = vsel %vm333_vm7, %v2146_v40, %v8431_v47  ;;  %v2902_v32 = vsel %vm333_vm7, %v1996_v21, %v8432_v6  ;;  %v2147_v6 = vld [vmem:[#allocation3 + $0x68] sm:$0xff] }
 0x24a   : > { %v8440_v37 = vpop.permute.xlu0 %8439  ;;  %v8435_v0 = vpop.permute.xlu1 %8434  ;;  %3232 = vmatprep.mubr.f32.mxu1 %v3026_v8 }
 0x24b   : > { %v8442_v58 = vunpack.i.h.bf16 %v8440_v37  ;;  %v8441_v25 = vunpack.i.l.bf16 %v8440_v37  ;;  %v8437_v1 = vunpack.i.h.bf16 %v8435_v0  ;;  %v8436_v39 = vunpack.i.l.bf16 %v8435_v0  ;;  %3233 = vmatmul.mubr.f32.gmra.mrb[18].mxu1 %v2951_v46 }
 0x24d   : > { %v3002_v5 = vsel %vm1645_vm8, %v2977_v60, %v8441_v25  ;;  %v2927_v15 = vsel %vm1645_vm8, %v2902_v32, %v8442_v58  ;;  %v9098_v60 = vld [vmem:[#allocation3 + $0x61] sm:$0xff] }
 0x24e   : > { %v8445_v31 = vpop.permute.xlu0 %8444  ;;  %v8455_v51 = vpop.permute.xlu1 %8454  ;;  %v3027_v35 = vsel %vm1587_vm10, %v3002_v5, %v8436_v39  ;;  %v2952_v18 = vsel %vm1587_vm10, %v2927_v15, %v8437_v1  ;;  %v1998_v32 = vmul.f32 %v9098_v60, %v9832_v28 }
 0x24f   : > { %v8447_v36 = vunpack.i.h.bf16 %v8445_v31  ;;  %v8446_v59 = vunpack.i.l.bf16 %v8445_v31  ;;  %3237 = vmatprep.mubr.f32.mxu1 %v3027_v35  ;;  %v8457_v13 = vunpack.i.h.bf16 %v8455_v51  ;;  %v8456_v14 = vunpack.i.l.bf16 %v8455_v51  ;;  %v2148_v35 = vld [vmem:[#allocation3 + $0x70] sm:$0xff] }
 0x250   : > { %3238 = vmatmul.mubr.f32.gmra.mrb[20].mxu1 %v2952_v18 }
 0x251   : > { %v2978_v47 = vsel %vm333_vm7, %v2147_v6, %v8446_v59  ;;  %v2903_v16 = vsel %vm333_vm7, %v1997_v44, %v8447_v36 }
 0x252   : > { %v8450_v41 = vpop.permute.xlu0 %8449  ;;  %v8460_v8 = vpop.permute.xlu1 %8459  ;;  %v3003_v21 = vsel %vm1645_vm8, %v2978_v47, %v8456_v14  ;;  %v2928_v58 = vsel %vm1645_vm8, %v2903_v16, %v8457_v13 }
 0x253   : > { %v8452_v46 = vunpack.i.h.bf16 %v8450_v41  ;;  %v8451_v37 = vunpack.i.l.bf16 %v8450_v41  ;;  %v8462_v0 = vunpack.i.h.bf16 %v8460_v8  ;;  %v8461_v11 = vunpack.i.l.bf16 %v8460_v8  ;;  %v9099_v41 = vld [vmem:[#allocation3 + $0x69] sm:$0xff] }
 0x254   : > { %v1999_v8 = vmul.f32 %v9099_v41, %v9876_v9 }
 0x255   : > { %v3028_v25 = vsel %vm1587_vm10, %v3003_v21, %v8451_v37  ;;  %v2953_v1 = vsel %vm1587_vm10, %v2928_v58, %v8452_v46  ;;  %v2979_v18 = vsel %vm333_vm7, %v2148_v35, %v8461_v11  ;;  %v2904_v36 = vsel %vm333_vm7, %v1998_v32, %v8462_v0  ;;  %v2149_v0 = vld [vmem:[#allocation3 + $0x78] sm:$0xff] }
 0x256   : > { %v8470_v39 = vpop.permute.xlu0 %8469  ;;  %v8465_v40 = vpop.permute.xlu1 %8464  ;;  %3242 = vmatprep.mubr.f32.mxu1 %v3028_v25 }
 0x257   : > { %v8472_v5 = vunpack.i.h.bf16 %v8470_v39  ;;  %v8471_v15 = vunpack.i.l.bf16 %v8470_v39  ;;  %v8467_v31 = vunpack.i.h.bf16 %v8465_v40  ;;  %v8466_v51 = vunpack.i.l.bf16 %v8465_v40  ;;  %3243 = vmatmul.mubr.f32.gmra.mrb[22].mxu1 %v2953_v1 }
 0x259   : > { %v3004_v59 = vsel %vm1645_vm8, %v2979_v18, %v8471_v15  ;;  %v2929_v7 = vsel %vm1645_vm8, %v2904_v36, %v8472_v5  ;;  %v9100_v18 = vld [vmem:[#allocation3 + $0x71] sm:$0xff] }
 0x25a   : > { %v8475_v44 = vpop.permute.xlu0 %8474  ;;  %v8485_v13 = vpop.permute.xlu1 %8484  ;;  %v3029_v14 = vsel %vm1587_vm10, %v3004_v59, %v8466_v51  ;;  %v2954_v6 = vsel %vm1587_vm10, %v2929_v7, %v8467_v31  ;;  %v2000_v36 = vmul.f32 %v9100_v18, %v9934_v43 }
 0x25b   : > { %v8477_v47 = vunpack.i.h.bf16 %v8475_v44  ;;  %v8476_v16 = vunpack.i.l.bf16 %v8475_v44  ;;  %3247 = vmatprep.mubr.f32.mxu1 %v3029_v14  ;;  %v8487_v46 = vunpack.i.h.bf16 %v8485_v13  ;;  %v8486_v37 = vunpack.i.l.bf16 %v8485_v13  ;;  %v2150_v14 = vld [vmem:[#allocation3 + $0x80] sm:$0xff] }
 0x25c   : > { %3248 = vmatmul.mubr.f32.gmra.mrb[24].mxu1 %v2954_v6 }
 0x25d   : > { %v2980_v11 = vsel %vm333_vm7, %v2149_v0, %v8476_v16  ;;  %v2905_v21 = vsel %vm333_vm7, %v1999_v8, %v8477_v47 }
 0x25e   : > { %v8480_v58 = vpop.permute.xlu0 %8479  ;;  %v8490_v25 = vpop.permute.xlu1 %8489  ;;  %v3005_v32 = vsel %vm1645_vm8, %v2980_v11, %v8486_v37  ;;  %v2930_v5 = vsel %vm1645_vm8, %v2905_v21, %v8487_v46 }
 0x25f   : > { %v8482_v1 = vunpack.i.h.bf16 %v8480_v58  ;;  %v8481_v39 = vunpack.i.l.bf16 %v8480_v58  ;;  %v8492_v40 = vunpack.i.h.bf16 %v8490_v25  ;;  %v8491_v60 = vunpack.i.l.bf16 %v8490_v25  ;;  %v9101_v58 = vld [vmem:[#allocation3 + $0x79] sm:$0xff] }
 0x260   : > { %v2001_v25 = vmul.f32 %v9101_v58, %v9978_v45 }
 0x261   : > { %v3030_v15 = vsel %vm1587_vm10, %v3005_v32, %v8481_v39  ;;  %v2955_v31 = vsel %vm1587_vm10, %v2930_v5, %v8482_v1  ;;  %v2981_v6 = vsel %vm333_vm7, %v2150_v14, %v8491_v60  ;;  %v2906_v47 = vsel %vm333_vm7, %v2000_v36, %v8492_v40  ;;  %v2151_v40 = vld [vmem:[#allocation3 + $0x88] sm:$0xff] }
 0x262   : > { %v8500_v51 = vpop.permute.xlu0 %8499  ;;  %v8495_v35 = vpop.permute.xlu1 %8494  ;;  %3252 = vmatprep.mubr.f32.mxu1 %v3030_v15 }
 0x263   : > { %v8502_v59 = vunpack.i.h.bf16 %v8500_v51  ;;  %v8501_v7 = vunpack.i.l.bf16 %v8500_v51  ;;  %v8497_v44 = vunpack.i.h.bf16 %v8495_v35  ;;  %v8496_v13 = vunpack.i.l.bf16 %v8495_v35  ;;  %3253 = vmatmul.mubr.f32.gmra.mrb[26].mxu1 %v2955_v31 }
 0x265   : > { %v3006_v16 = vsel %vm1645_vm8, %v2981_v6, %v8501_v7  ;;  %v2931_v41 = vsel %vm1645_vm8, %v2906_v47, %v8502_v59  ;;  %v9102_v6 = vld [vmem:[#allocation3 + $0x81] sm:$0xff] }
 0x266   : > { %v8505_v8 = vpop.permute.xlu0 %8504  ;;  %v8515_v46 = vpop.permute.xlu1 %8514  ;;  %v3031_v37 = vsel %vm1587_vm10, %v3006_v16, %v8496_v13  ;;  %v2956_v0 = vsel %vm1587_vm10, %v2931_v41, %v8497_v44  ;;  %v2002_v47 = vmul.f32 %v9102_v6, %v13157_v49 }
 0x267   : > { %v8507_v11 = vunpack.i.h.bf16 %v8505_v8  ;;  %v8506_v21 = vunpack.i.l.bf16 %v8505_v8  ;;  %3257 = vmatprep.mubr.f32.mxu1 %v3031_v37  ;;  %v8517_v1 = vunpack.i.h.bf16 %v8515_v46  ;;  %v8516_v39 = vunpack.i.l.bf16 %v8515_v46  ;;  %v2152_v37 = vld [vmem:[#allocation3 + $0x90] sm:$0xff] }
 0x268   : > { %3258 = vmatmul.mubr.f32.gmra.mrb[28].mxu1 %v2956_v0 }
 0x269   : > { %v2982_v60 = vsel %vm333_vm7, %v2151_v40, %v8506_v21  ;;  %v2907_v32 = vsel %vm333_vm7, %v2001_v25, %v8507_v11 }
 0x26a   : > { %v8510_v5 = vpop.permute.xlu0 %8509  ;;  %v8520_v15 = vpop.permute.xlu1 %8519  ;;  %v3007_v36 = vsel %vm1645_vm8, %v2982_v60, %v8516_v39  ;;  %v2932_v59 = vsel %vm1645_vm8, %v2907_v32, %v8517_v1 }
 0x26b   : > { %v8512_v31 = vunpack.i.h.bf16 %v8510_v5  ;;  %v8511_v51 = vunpack.i.l.bf16 %v8510_v5  ;;  %v8522_v35 = vunpack.i.h.bf16 %v8520_v15  ;;  %v8521_v18 = vunpack.i.l.bf16 %v8520_v15  ;;  %v9103_v5 = vld [vmem:[#allocation3 + $0x89] sm:$0xff] }
 0x26c   : > { %v2003_v15 = vmul.f32 %v9103_v5, %v10022_v38 }
 0x26d   : > { %v3032_v7 = vsel %vm1587_vm10, %v3007_v36, %v8511_v51  ;;  %v2957_v44 = vsel %vm1587_vm10, %v2932_v59, %v8512_v31  ;;  %v2983_v0 = vsel %vm333_vm7, %v2152_v37, %v8521_v18  ;;  %v2908_v11 = vsel %vm333_vm7, %v2002_v47, %v8522_v35  ;;  %v2153_v35 = vld [vmem:[#allocation3 + $0x98] sm:$0xff] }
 0x26e   : > { %v8530_v13 = vpop.permute.xlu0 %8529  ;;  %v8525_v14 = vpop.permute.xlu1 %8524  ;;  %3262 = vmatprep.mubr.f32.mxu1 %v3032_v7 }
 0x26f   : > { %v8532_v16 = vunpack.i.h.bf16 %v8530_v13  ;;  %v8531_v41 = vunpack.i.l.bf16 %v8530_v13  ;;  %v8527_v8 = vunpack.i.h.bf16 %v8525_v14  ;;  %v8526_v46 = vunpack.i.l.bf16 %v8525_v14  ;;  %3263 = vmatmul.mubr.f32.gmra.mrb[30].mxu1 %v2957_v44 }
 0x271   : > { %v3008_v21 = vsel %vm1645_vm8, %v2983_v0, %v8531_v41  ;;  %v2933_v58 = vsel %vm1645_vm8, %v2908_v11, %v8532_v16  ;;  %v9104_v0 = vld [vmem:[#allocation3 + $0x91] sm:$0xff] }
 0x272   : > { %v8535_v25 = vpop.permute.xlu0 %8534  ;;  %v8545_v1 = vpop.permute.xlu1 %8544  ;;  %v3033_v39 = vsel %vm1587_vm10, %v3008_v21, %v8526_v46  ;;  %v2958_v40 = vsel %vm1587_vm10, %v2933_v58, %v8527_v8  ;;  %v2004_v11 = vmul.f32 %v9104_v0, %v10109_v56 }
 0x273   : > { %v8537_v60 = vunpack.i.h.bf16 %v8535_v25  ;;  %v8536_v32 = vunpack.i.l.bf16 %v8535_v25  ;;  %3267 = vmatprep.mubr.f32.mxu1 %v3033_v39  ;;  %v8547_v31 = vunpack.i.h.bf16 %v8545_v1  ;;  %v8546_v51 = vunpack.i.l.bf16 %v8545_v1  ;;  %v2154_v39 = vld [vmem:[#allocation3 + $0xa0] sm:$0xff] }
 0x274   : > { %3268 = vmatmul.mubr.f32.gmra.mrb[32].mxu1 %v2958_v40 }
 0x275   : > { %v2984_v18 = vsel %vm333_vm7, %v2153_v35, %v8536_v32  ;;  %v2909_v36 = vsel %vm333_vm7, %v2003_v15, %v8537_v60 }
 0x276   : > { %v8540_v59 = vpop.permute.xlu0 %8539  ;;  %v8550_v7 = vpop.permute.xlu1 %8549  ;;  %v3009_v47 = vsel %vm1645_vm8, %v2984_v18, %v8546_v51  ;;  %v2934_v16 = vsel %vm1645_vm8, %v2909_v36, %v8547_v31 }
 0x277   : > { %v8542_v44 = vunpack.i.h.bf16 %v8540_v59  ;;  %v8541_v13 = vunpack.i.l.bf16 %v8540_v59  ;;  %v8552_v14 = vunpack.i.h.bf16 %v8550_v7  ;;  %v8551_v6 = vunpack.i.l.bf16 %v8550_v7  ;;  %v9105_v59 = vld [vmem:[#allocation3 + $0x99] sm:$0xff] }
 0x278   : > { %v2005_v7 = vmul.f32 %v9105_v59, %v10143_v29 }
 0x279   : > { %v3034_v41 = vsel %vm1587_vm10, %v3009_v47, %v8541_v13  ;;  %v2959_v8 = vsel %vm1587_vm10, %v2934_v16, %v8542_v44  ;;  %v2985_v40 = vsel %vm333_vm7, %v2154_v39, %v8551_v6  ;;  %v2910_v60 = vsel %vm333_vm7, %v2004_v11, %v8552_v14  ;;  %v2155_v14 = vld [vmem:[#allocation3 + $0xa8] sm:$0xff] }
 0x27a   : > { %v8560_v46 = vpop.permute.xlu0 %8559  ;;  %v8555_v37 = vpop.permute.xlu1 %8554  ;;  %3272 = vmatprep.mubr.f32.mxu1 %v3034_v41 }
 0x27b   : > { %v8562_v21 = vunpack.i.h.bf16 %v8560_v46  ;;  %v8561_v58 = vunpack.i.l.bf16 %v8560_v46  ;;  %v8557_v25 = vunpack.i.h.bf16 %v8555_v37  ;;  %v8556_v1 = vunpack.i.l.bf16 %v8555_v37  ;;  %3273 = vmatmul.mubr.f32.gmra.mrb[34].mxu1 %v2959_v8 }
 0x27d   : > { %v3010_v32 = vsel %vm1645_vm8, %v2985_v40, %v8561_v58  ;;  %v2935_v5 = vsel %vm1645_vm8, %v2910_v60, %v8562_v21  ;;  %v9106_v40 = vld [vmem:[#allocation3 + $0xa1] sm:$0xff] }
 0x27e   : > { %v8565_v15 = vpop.permute.xlu0 %8564  ;;  %v8575_v31 = vpop.permute.xlu1 %8574  ;;  %v3035_v51 = vsel %vm1587_vm10, %v3010_v32, %v8556_v1  ;;  %v2960_v35 = vsel %vm1587_vm10, %v2935_v5, %v8557_v25  ;;  %v2006_v60 = vmul.f32 %v9106_v40, %v10150_v17 }
 0x27f   : > { %v8567_v18 = vunpack.i.h.bf16 %v8565_v15  ;;  %v8566_v36 = vunpack.i.l.bf16 %v8565_v15  ;;  %3277 = vmatprep.mubr.f32.mxu1 %v3035_v51  ;;  %v8577_v44 = vunpack.i.h.bf16 %v8575_v31  ;;  %v8576_v13 = vunpack.i.l.bf16 %v8575_v31  ;;  %v2156_v51 = vld [vmem:[#allocation3 + $0xb0] sm:$0xff] }
 0x280   : > { %3278 = vmatmul.mubr.f32.gmra.mrb[36].mxu1 %v2960_v35 }
 0x281   : > { %v2986_v6 = vsel %vm333_vm7, %v2155_v14, %v8566_v36  ;;  %v2911_v47 = vsel %vm333_vm7, %v2005_v7, %v8567_v18 }
 0x282   : > { %v8570_v16 = vpop.permute.xlu0 %8569  ;;  %v8580_v41 = vpop.permute.xlu1 %8579  ;;  %v3011_v11 = vsel %vm1645_vm8, %v2986_v6, %v8576_v13  ;;  %v2936_v21 = vsel %vm1645_vm8, %v2911_v47, %v8577_v44 }
 0x283   : > { %v8572_v8 = vunpack.i.h.bf16 %v8570_v16  ;;  %v8571_v46 = vunpack.i.l.bf16 %v8570_v16  ;;  %v8582_v37 = vunpack.i.h.bf16 %v8580_v41  ;;  %v8581_v0 = vunpack.i.l.bf16 %v8580_v41 }
 0x285   : > { %v3036_v58 = vsel %vm1587_vm10, %v3011_v11, %v8571_v46  ;;  %v2961_v25 = vsel %vm1587_vm10, %v2936_v21, %v8572_v8  ;;  %v2987_v35 = vsel %vm333_vm7, %v2156_v51, %v8581_v0  ;;  %v2912_v18 = vsel %vm333_vm7, %v2006_v60, %v8582_v37  ;;  %v9107_v8 = vld [vmem:[#allocation3 + $0xa9] sm:$0xff] }
 0x286   : > { %v8590_v1 = vpop.permute.xlu0 %8589  ;;  %v8585_v39 = vpop.permute.xlu1 %8584  ;;  %3282 = vmatprep.mubr.f32.mxu1 %v3036_v58  ;;  %v2007_v46 = vmul.f32 %v9107_v8, %v10163_v10  ;;  %v2157_v58 = vld [vmem:[#allocation3 + $0xb8] sm:$0xff] }
 0x287   : > { %v8592_v32 = vunpack.i.h.bf16 %v8590_v1  ;;  %v8591_v5 = vunpack.i.l.bf16 %v8590_v1  ;;  %v8587_v15 = vunpack.i.h.bf16 %v8585_v39  ;;  %v8586_v31 = vunpack.i.l.bf16 %v8585_v39  ;;  %3283 = vmatmul.mubr.f32.gmra.mrb[38].mxu1 %v2961_v25 }
 0x289   : > { %v3012_v36 = vsel %vm1645_vm8, %v2987_v35, %v8591_v5  ;;  %v2937_v59 = vsel %vm1645_vm8, %v2912_v18, %v8592_v32  ;;  %v9108_v35 = vld [vmem:[#allocation3 + $0xb1] sm:$0xff] }
 0x28a   : > { %v8595_v7 = vpop.permute.xlu0 %8594  ;;  %v11066_v44 = vpop.permute.xlu1 %8599  ;;  %v3037_v13 = vsel %vm1587_vm10, %v3012_v36, %v8586_v31  ;;  %v2962_v14 = vsel %vm1587_vm10, %v2937_v59, %v8587_v15  ;;  %v2008_v18 = vmul.f32 %v9108_v35, %v10186_v62 }
 0x28b   : > { %3287 = vmatprep.mubr.f32.mxu1 %v3037_v13  ;;  %v8597_v6 = vunpack.i.h.bf16 %v8595_v7  ;;  %v8596_v47 = vunpack.i.l.bf16 %v8595_v7  ;;  %v2158_v7 = vld [vmem:[#allocation3 + $0xc0] sm:$0xff] }
 0x28c   : > { %3288 = vmatmul.mubr.f32.gmra.mrb[40].mxu1 %v2962_v14 }
 0x28d   : > { %v2988_v25 = vsel %vm333_vm7, %v2157_v58, %v8596_v47  ;;  %v2913_v1 = vsel %vm333_vm7, %v2007_v46, %v8597_v6 }
 0x28e   : > { %v8605_v16 = vpop.permute.xlu0 %8604  ;;  %v8610_v41 = vpop.permute.xlu1 %8609 }
 0x28f   : > { %v8607_v37 = vunpack.i.h.bf16 %v8605_v16  ;;  %v8606_v0 = vunpack.i.l.bf16 %v8605_v16  ;;  %v8612_v11 = vunpack.i.h.bf16 %v8610_v41  ;;  %v8611_v21 = vunpack.i.l.bf16 %v8610_v41 }
 0x290   : > { %v2009_v16 = vmul.f32 %v10202_v63, %v10859_v19  ;;  %v8601_v19 = vunpack.i.l.bf16 %v11066_v44 }
 0x291   : > { %v3013_v39 = vsel %vm1645_vm8, %v2988_v25, %v8611_v21  ;;  %v2938_v40 = vsel %vm1645_vm8, %v2913_v1, %v8612_v11  ;;  %v2159_v21 = vld [vmem:[#allocation3 + $0xc8] sm:$0xff] }
 0x292   : > { %v8625_v60 = vpop.permute.xlu0 %8624  ;;  %v8615_v32 = vpop.permute.xlu1 %8614  ;;  %v3038_v5 = vsel %vm1587_vm10, %v3013_v39, %v8606_v0  ;;  %v2963_v15 = vsel %vm1587_vm10, %v2938_v40, %v8607_v37  ;;  %v8602_v40 = vunpack.i.h.bf16 %v11066_v44 }
 0x293   : > { %v8617_v31 = vunpack.i.h.bf16 %v8615_v32  ;;  %v8616_v51 = vunpack.i.l.bf16 %v8615_v32  ;;  %3292 = vmatprep.mubr.f32.mxu1 %v3038_v5  ;;  %v8627_v36 = vunpack.i.h.bf16 %v8625_v60  ;;  %v8626_v59 = vunpack.i.l.bf16 %v8625_v60 }
 0x294   : > { %3293 = vmatmul.mubr.f32.gmra.mrb[42].mxu1 %v2963_v15 }
 0x295   : > { %v2989_v13 = vsel %vm333_vm7, %v2158_v7, %v8616_v51  ;;  %v2914_v14 = vsel %vm333_vm7, %v2008_v18, %v8617_v31  ;;  %v1985_v31 = vld [vmem:[#allocation3 + $0xc1] sm:$0xf] }
 0x296   : > { %v8630_v6 = vpop.permute.xlu0 %8629  ;;  %v8620_v47 = vpop.permute.xlu1 %8619  ;;  %v3014_v0 = vsel %vm1645_vm8, %v2989_v13, %v8626_v59  ;;  %v2939_v11 = vsel %vm1645_vm8, %v2914_v14, %v8627_v36  ;;  %v2010_v44 = vmul.f32 %v13161_v52, %v1985_v31  ;;  %v13232_v31 = vld [vmem:[#allocation16_spill] sm:$0xff] }
 0x297   : > { %v8632_v41 = vunpack.i.h.bf16 %v8630_v6  ;;  %v8631_v8 = vunpack.i.l.bf16 %v8630_v6  ;;  %v8622_v46 = vunpack.i.h.bf16 %v8620_v47  ;;  %v8621_v37 = vunpack.i.l.bf16 %v8620_v47 }
 0x299   : > { %v3039_v58 = vsel %vm1587_vm10, %v3014_v0, %v8621_v37  ;;  %v2964_v25 = vsel %vm1587_vm10, %v2939_v11, %v8622_v46  ;;  %v2990_v1 = vsel %vm333_vm7, %v2159_v21, %v8631_v8  ;;  %v2915_v39 = vsel %vm333_vm7, %v2009_v16, %v8632_v41  ;;  %v2160_v8 = vld [vmem:[#allocation3 + $0xd0] sm:$0xf] }
 0x29a   : > { %v8635_v60 = vpop.permute.xlu0 %8634  ;;  %v8645_v32 = vpop.permute.xlu1 %8644  ;;  %3297 = vmatprep.mubr.f32.mxu1 %v3039_v58  ;;  %v3015_v18 = vsel %vm1645_vm8, %v2990_v1, %v8601_v19  ;;  %v2940_v36 = vsel %vm1645_vm8, %v2915_v39, %v8602_v40  ;;  %v9110_v39 = vld [vmem:[#allocation3 + $0x27] sm:$0xff]  ;;  %v9111_v19 = vld [vmem:[#allocation3 + $0x2f] sm:$0xff] }
 0x29b   : > { %v8637_v5 = vunpack.i.h.bf16 %v8635_v60  ;;  %v8636_v15 = vunpack.i.l.bf16 %v8635_v60  ;;  %3298 = vmatmul.mubr.f32.gmra.mrb[44].mxu1 %v2964_v25  ;;  %v8647_v51 = vunpack.i.h.bf16 %v8645_v32  ;;  %v8646_v35 = vunpack.i.l.bf16 %v8645_v32  ;;  %v9109_v25 = vld [vmem:[#allocation3 + $0x1f] sm:$0xff] }
 0x29c   : > { %v2267_v1 = vmul.f32 %v9109_v25, %v10551_v22  ;;  %v2268_v40 = vmul.f32 %v9110_v39, %v10568_v57  ;;  %v2269_v60 = vmul.f32 %v9111_v19, %v10581_v23  ;;  %v13230_v32 = vld [vmem:[#allocation22_spill] sm:$0xff]  ;;  %v13244_v39 = vld [vmem:[#allocation27_spill] sm:$0xff]  ;;  %v4150_v23 = vld [vmem:[#allocation2 + $0xa0] sm:$0xff] }
 0x29d   : > { %v3040_v59 = vsel %vm1587_vm10, %v3015_v18, %v8636_v15  ;;  %v2965_v7 = vsel %vm1587_vm10, %v2940_v36, %v8637_v5  ;;  %v2991_v46 = vsel %vm333_vm7, %v2160_v8, %v8646_v35  ;;  %v2916_v37 = vsel %vm333_vm7, %v2010_v44, %v8647_v51  ;;  %v9113_v15 = vld [vmem:[#allocation3 + $0x3f] sm:$0xff]  ;;  %v9114_v35 = vld [vmem:[#allocation3 + $0x47] sm:$0xff] }
 0x29e   : > { %v8640_v13 = vpop.permute.xlu0 %8639  ;;  %v8650_v14 = vpop.permute.xlu1 %8649  ;;  %3302 = vmatprep.mubr.f32.mxu1 %v3040_v59  ;;  %v2271_v51 = vmul.f32 %v9113_v15, %v13232_v31  ;;  %v13234_v18 = vld [vmem:[#allocation21_spill] sm:$0xff]  ;;  %v13237_v44 = vld [vmem:[#allocation59_spill] sm:$0xff]  ;;  %v13243_v25 = vld [vmem:[#allocation62_spill] sm:$0xff] }
 0x29f   : > { %v8642_v6 = vunpack.i.h.bf16 %v8640_v13  ;;  %v8641_v47 = vunpack.i.l.bf16 %v8640_v13  ;;  %v8652_v16 = vunpack.i.h.bf16 %v8650_v14  ;;  %v8651_v41 = vunpack.i.l.bf16 %v8650_v14  ;;  %3303 = vmatmul.mubr.f32.gmra.mrb[46].mxu1 %v2965_v7  ;;  %v13235_v59 = vld [vmem:[#allocation57_spill] sm:$0xff]  ;;  %v9115_v7 = vld [vmem:[#allocation3 + $0x4f] sm:$0xff] }
 0x2a0   : > { %v2272_v36 = vmul.f32 %v9114_v35, %v13234_v18  ;;  %v13236_v13 = vld [vmem:[#allocation23_spill] sm:$0xff]  ;;  %v9117_v8 = vld [vmem:[#allocation3 + $0x5f] sm:$0xff] }
 0x2a1   : > { %v3016_v0 = vsel %vm1645_vm8, %v2991_v46, %v8641_v47  ;;  %v2941_v11 = vsel %vm1645_vm8, %v2916_v37, %v8642_v6  ;;  %v2273_v14 = vmul.f32 %v9115_v7, %v13236_v13  ;;  %v9116_v6 = vld [vmem:[#allocation3 + $0x57] sm:$0xff]  ;;  %v13245_v19 = vld [vmem:[#allocation63_spill] sm:$0xff]  ;;  %v9121_v15 = vld [vmem:[#allocation3 + $0x7f] sm:$0xff] }
 0x2a2   : > { %v3041_v21 = vsel %vm1587_vm10, %v3016_v0, %v8651_v41  ;;  %v2966_v58 = vsel %vm1587_vm10, %v2941_v11, %v8652_v16  ;;  %v13238_v47 = vld [vmem:[#allocation24_spill] sm:$0xff]  ;;  %v13240_v46 = vld [vmem:[#allocation25_spill] sm:$0xff]  ;;  %v9118_v11 = vld [vmem:[#allocation3 + $0x67] sm:$0xff] }
 0x2a3   : > { %3307 = vmatprep.mubr.f32.mxu1 %v3041_v21  ;;  %v2274_v16 = vmul.f32 %v9116_v6, %v13238_v47  ;;  %v13239_v41 = vld [vmem:[#allocation60_spill] sm:$0xff]  ;;  %v2275_v37 = vmul.f32 %v9117_v8, %v13240_v46  ;;  %v13241_v0 = vld [vmem:[#allocation61_spill] sm:$0xff]  ;;  %v13242_v21 = vld [vmem:[#allocation26_spill] sm:$0xff] }
 0x2a4   : > { %3308 = vmatmul.mubr.f32.gmra.mrb[48].mxu1 %v2966_v58  ;;  %v2276_v58 = vmul.f32 %v9118_v11, %v13242_v21  ;;  %v13249_v35 = vld [vmem:[#allocation65_spill] sm:$0xff]  ;;  %v13255_v11 = vld [vmem:[#allocation68_spill] sm:$0xff]  ;;  %v4098_v21 = vld [vmem:[#allocation2 + $0x8f] sm:$0xff] }
 0x2a5   : > { %7362 = vmatprep.mubr.msk.f32.mxu1 %vm9243_vm2, %v13176_v26  ;;  %v13252_v6 = vld [vmem:[#allocation33_spill] sm:$0xff]  ;;  %v4075_v31 = vld [vmem:[#allocation2 + $0x92] sm:$0xff] }
 0x2a6   : > { %v9124_v8 = vld [vmem:[#allocation3 + $0x97] sm:$0xff]  ;;  %v7100_v22 = vld [vmem:[%s9402_s25 + $0x170] sm:$0xff]  ;;  %s308_s25 = sand.u32 1, %s9225_s28  }
 0x2a7   : > { %4003 = vst.msk [vmem:[#allocation2 + $0xb8] sm:$0xff] %vm326_vm0, %v7100_v22  ;;  %s12850_s9 = scalar_lea.sflag [#allocation5], %s308_s25 }
 0x2a8   : > { %7363 = vmatmul.mubr.msk.f32.vlgmr.msra.gmra.mrb[0].mxu1 %vm333_vm7, %v2267_v1  ;;  %v9119_v1 = vld [vmem:[#allocation3 + $0x6f] sm:$0xff] }
 0x2a9   : > { %7365 = vmatprep.mubr.msk.f32.mxu1 %vm9243_vm2, %v13176_v26  ;;  %7892 = vmatpush1.bf16.msra.mxu1 %v10387_v2  ;;  %v9112_v2 = vld [vmem:[#allocation3 + $0x37] sm:$0xff] }
 0x2aa   : > { %7893 = vmatprep.subr.bf16.mxu1 %v13162_v3  ;;  %v2270_v5 = vmul.f32 %v9112_v2, %v13230_v32  ;;  %v13246_v2 = vld [vmem:[#allocation29_spill] sm:$0xff]  ;;  %v4076_v32 = vld [vmem:[#allocation2 + $0x9a] sm:$0xff] }
 0x2ac   : > { %7366 = vmatmul.mubr.msk.f32.gmra.mrb[2].mxu1 %vm333_vm7, %v2268_v40  ;;  %v2277_v40 = vmul.f32 %v9119_v1, %v13244_v39 }
 0x2ad   : > { %7368 = vmatprep.mubr.msk.f32.mxu1 %vm9243_vm2, %v13176_v26  ;;  %7895 = vmatpush1.bf16.msra.mxu1 %v10397_v24  ;;  %v13231_v24 = vld [vmem:[#allocation44_spill] sm:$0xff] }
 0x2ae   : > { %7896 = vmatprep.subr.bf16.mxu1 %v13162_v3 }
 0x2b0   : > { %7369 = vmatmul.mubr.msk.f32.gmra.mrb[4].mxu1 %vm333_vm7, %v2269_v60  ;;  %v9120_v60 = vld [vmem:[#allocation3 + $0x77] sm:$0xff] }
 0x2b1   : > { %7371 = vmatprep.mubr.msk.f32.mxu1 %vm9243_vm2, %v13176_v26  ;;  %7898 = vmatpush1.bf16.msra.mxu1 %v10407_v50  ;;  %v13233_v50 = vld [vmem:[#allocation53_spill] sm:$0xff] }
 0x2b2   : > { %7899 = vmatprep.subr.bf16.mxu1 %v13162_v3 }
 0x2b4   : > { %7372 = vmatmul.mubr.msk.f32.gmra.mrb[6].mxu1 %vm333_vm7, %v2270_v5  ;;  %v2278_v5 = vmul.f32 %v9120_v60, %v13246_v2  ;;  %v4097_v2 = vld [vmem:[#allocation2 + $0x87] sm:$0xff] }
 0x2b5   : > { %7374 = vmatprep.mubr.msk.f32.mxu1 %vm9243_vm2, %v13176_v26  ;;  %7901 = vmatpush1.bf16.msra.mxu1 %v13231_v24  ;;  %v13247_v24 = vld [vmem:[#allocation64_spill] sm:$0xff] }
 0x2b6   : > { %7902 = vmatprep.subr.bf16.mxu1 %v13162_v3 }
 0x2b8   : > { %7375 = vmatmul.mubr.msk.f32.gmra.mrb[8].mxu1 %vm333_vm7, %v2271_v51  ;;  %v13248_v51 = vld [vmem:[#allocation30_spill] sm:$0xff] }
 0x2b9   : > { %7377 = vmatprep.mubr.msk.f32.mxu1 %vm9243_vm2, %v13176_v26  ;;  %7904 = vmatpush1.bf16.msra.mxu1 %v13233_v50  ;;  %v2279_v50 = vmul.f32 %v9121_v15, %v13248_v51  ;;  %v4096_v51 = vld [vmem:[#allocation2 + $0x7f] sm:$0xff] }
 0x2ba   : > { %7905 = vmatprep.subr.bf16.mxu1 %v13162_v3 }
 0x2bc   : > { %7378 = vmatmul.mubr.msk.f32.gmra.mrb[10].mxu1 %vm333_vm7, %v2272_v36  ;;  %v9122_v36 = vld [vmem:[#allocation3 + $0x87] sm:$0xff] }
 0x2bd   : > { %7380 = vmatprep.mubr.msk.f32.mxu1 %vm9243_vm2, %v13176_v26  ;;  %7907 = vmatpush1.bf16.msra.mxu1 %v13235_v59  ;;  %v13250_v59 = vld [vmem:[#allocation32_spill] sm:$0xff] }
 0x2be   : > { %7908 = vmatprep.subr.bf16.mxu1 %v13162_v3  ;;  %v2280_v7 = vmul.f32 %v9122_v36, %v13250_v59 }
 0x2c0   : > { %7381 = vmatmul.mubr.msk.f32.gmra.mrb[12].mxu1 %vm333_vm7, %v2273_v14  ;;  %v13251_v14 = vld [vmem:[#allocation66_spill] sm:$0xff] }
 0x2c1   : > { %7383 = vmatprep.mubr.msk.f32.mxu1 %vm9243_vm2, %v13176_v26  ;;  %7910 = vmatpush1.bf16.msra.mxu1 %v13237_v44  ;;  %v9123_v44 = vld [vmem:[#allocation3 + $0x8f] sm:$0xff] }
 0x2c2   : > { %7911 = vmatprep.subr.bf16.mxu1 %v13162_v3 }
 0x2c4   : > { %7384 = vmatmul.mubr.msk.f32.gmra.mrb[14].mxu1 %vm333_vm7, %v2274_v16  ;;  %v2281_v16 = vmul.f32 %v9123_v44, %v13252_v6 }
 0x2c5   : > { %7386 = vmatprep.mubr.msk.f32.mxu1 %vm9243_vm2, %v13176_v26  ;;  %7913 = vmatpush1.bf16.msra.mxu1 %v13239_v41  ;;  %v13253_v41 = vld [vmem:[#allocation67_spill] sm:$0xff] }
 0x2c6   : > { %7914 = vmatprep.subr.bf16.mxu1 %v13162_v3 }
 0x2c8   : > { %7387 = vmatmul.mubr.msk.f32.gmra.mrb[16].mxu1 %vm333_vm7, %v2275_v37  ;;  %v13254_v37 = vld [vmem:[#allocation34_spill] sm:$0xff] }
 0x2c9   : > { %7389 = vmatprep.mubr.msk.f32.mxu1 %vm9243_vm2, %v13176_v26  ;;  %7916 = vmatpush1.bf16.msra.mxu1 %v13241_v0  ;;  %v2282_v0 = vmul.f32 %v9124_v8, %v13254_v37 }
 0x2ca   : > { %7917 = vmatprep.subr.bf16.mxu1 %v13162_v3 }
 0x2cc   : > { %7390 = vmatmul.mubr.msk.f32.gmra.mrb[18].mxu1 %vm333_vm7, %v2276_v58  ;;  %v9125_v58 = vld [vmem:[#allocation3 + $0x9f] sm:$0xff] }
 0x2cd   : > { %7392 = vmatprep.mubr.msk.f32.mxu1 %vm9243_vm2, %v13176_v26  ;;  %7919 = vmatpush1.bf16.msra.mxu1 %v13243_v25  ;;  %v13256_v25 = vld [vmem:[#allocation35_spill] sm:$0xff] }
 0x2ce   : > { %7920 = vmatprep.subr.bf16.mxu1 %v13162_v3  ;;  %v2283_v1 = vmul.f32 %v9125_v58, %v13256_v25  ;;  %v4093_v25 = vld [vmem:[#allocation2 + $0x67] sm:$0xff] }
 0x2d0   : > { %7393 = vmatmul.mubr.msk.f32.gmra.mrb[20].mxu1 %vm333_vm7, %v2277_v40  ;;  %v9126_v40 = vld [vmem:[#allocation3 + $0xa7] sm:$0xff] }
 0x2d1   : > { %7395 = vmatprep.mubr.msk.f32.mxu1 %vm9243_vm2, %v13176_v26  ;;  %7922 = vmatpush1.bf16.msra.mxu1 %v13245_v19  ;;  %v13257_v19 = vld [vmem:[#allocation36_spill] sm:$0xff] }
 0x2d2   : > { %7923 = vmatprep.subr.bf16.mxu1 %v13162_v3  ;;  %v2284_v60 = vmul.f32 %v9126_v40, %v13257_v19  ;;  %v2266_v40 = vld [vmem:[#allocation3 + $0xdf] sm:$0xf]  ;;  %v4141_v19 = vld [vmem:[#allocation2 + $0x58] sm:$0xff] }
 0x2d4   : > { %7396 = vmatmul.mubr.msk.f32.gmra.mrb[22].mxu1 %vm333_vm7, %v2278_v5  ;;  %v9127_v5 = vld [vmem:[#allocation3 + $0xaf] sm:$0xff] }
 0x2d5   : > { %7398 = vmatprep.mubr.msk.f32.mxu1 %vm9243_vm2, %v13176_v26  ;;  %7925 = vmatpush1.bf16.msra.mxu1 %v13247_v24  ;;  %v13258_v24 = vld [vmem:[#allocation42_spill] sm:$0xff] }
 0x2d6   : > { %7926 = vmatprep.subr.bf16.mxu1 %v13162_v3  ;;  %v2285_v15 = vmul.f32 %v9127_v5, %v13258_v24  ;;  %v1053_v5 = vld [vmem:[%s12898_s5] sm:$0xff] }
 0x2d8   : > { %7399 = vmatmul.mubr.msk.f32.gmra.mrb[24].mxu1 %vm333_vm7, %v2279_v50  ;;  %v9128_v50 = vld [vmem:[#allocation3 + $0xb7] sm:$0xff] }
 0x2d9   : > { %7401 = vmatprep.mubr.msk.f32.mxu1 %vm9243_vm2, %v13176_v26  ;;  %7928 = vmatpush1.bf16.msra.mxu1 %v13249_v35  ;;  %v13259_v35 = vld [vmem:[#allocation45_spill] sm:$0xff] }
 0x2da   : > { %7929 = vmatprep.subr.bf16.mxu1 %v13162_v3  ;;  %v2286_v36 = vmul.f32 %v9128_v50, %v13259_v35 }
 0x2dc   : > { %7402 = vmatmul.mubr.msk.f32.gmra.mrb[26].mxu1 %vm333_vm7, %v2280_v7  ;;  %v9129_v7 = vld [vmem:[#allocation3 + $0xbf] sm:$0xff] }
 0x2dd   : > { %7404 = vmatprep.mubr.msk.f32.mxu1 %vm9243_vm2, %v13176_v26  ;;  %7931 = vmatpush1.bf16.msra.mxu1 %v13251_v14  ;;  %v13260_v14 = vld [vmem:[#allocation47_spill] sm:$0xff] }
 0x2de   : > { %7932 = vmatprep.subr.bf16.mxu1 %v13162_v3  ;;  %v2287_v44 = vmul.f32 %v9129_v7, %v13260_v14  ;;  %v1056_v7 = vld [vmem:[%s12898_s5 + $0x18] sm:$0xff]  ;;  %v4066_v14 = vld [vmem:[#allocation2 + $0x4a] sm:$0xff] }
 0x2e0   : > { %7405 = vmatmul.mubr.msk.f32.gmra.mrb[28].mxu1 %vm333_vm7, %v2281_v16  ;;  %v9130_v16 = vld [vmem:[#allocation3 + $0xc7] sm:$0xff] }
 0x2e1   : > { %7407 = vmatprep.mubr.msk.f32.mxu1 %vm9243_vm2, %v13176_v26  ;;  %7934 = vmatpush1.bf16.msra.mxu1 %v13253_v41  ;;  %v13261_v41 = vld [vmem:[#allocation49_spill] sm:$0xff] }
 0x2e2   : > { %7935 = vmatprep.subr.bf16.mxu1 %v13162_v3  ;;  %v2288_v8 = vmul.f32 %v9130_v16, %v13261_v41  ;;  %v1057_v16 = vld [vmem:[%s12898_s5 + $0x20] sm:$0xff]  ;;  %v4062_v41 = vld [vmem:[#allocation2 + $0x2a] sm:$0xff] }
 0x2e4   : > { %7408 = vmatmul.mubr.msk.f32.gmra.mrb[30].mxu1 %vm333_vm7, %v2282_v0  ;;  %v2264_v0 = vld [vmem:[#allocation3 + $0xcf] sm:$0xff] }
 0x2e5   : > { %7410 = vmatprep.mubr.msk.f32.mxu1 %vm9243_vm2, %v13176_v26  ;;  %7937 = vmatpush1.bf16.msra.mxu1 %v13255_v11  ;;  %v2265_v11 = vld [vmem:[#allocation3 + $0xd7] sm:$0xff]  ;;  %v2289_v58 = vmul.f32 %v10887_v48, %v2264_v0  ;;  %v4085_v48 = vld [vmem:[#allocation2 + $0x27] sm:$0xff] }
 0x2e6   : > { %7938 = vmatprep.subr.bf16.mxu1 %v13162_v3 }
 0x2e8   : > { %7411 = vmatmul.mubr.msk.f32.gmra.mrb[32].mxu1 %vm333_vm7, %v2283_v1  ;;  %v2290_v1 = vmul.f32 %v10846_v33, %v2265_v11  ;;  %v4057_v11 = vld [vmem:[#allocation2 + $0x2] sm:$0xff] }
 0x2e9   : > { %7413 = vmatprep.mubr.msk.f32.mxu1 %vm9243_vm2, %v13176_v26  ;;  %v4061_v33 = vld [vmem:[#allocation2 + $0x22] sm:$0xff] }
 0x2ec   : > { %7414 = vmatmul.mubr.msk.f32.gmra.mrb[34].mxu1 %vm333_vm7, %v2284_v60  ;;  %v2291_v60 = vmul.f32 %v10919_v20, %v2266_v40  ;;  %v4082_v40 = vld [vmem:[#allocation2 + $0xf] sm:$0xff]  ;;  %v4133_v20 = vld [vmem:[#allocation2 + $0x18] sm:$0xff] }
 0x2ed   : > { %7416 = vmatprep.mubr.msk.f32.mxu1 %vm9243_vm2, %v13176_v26 }
 0x2f0   : > { %7417 = vmatmul.mubr.msk.f32.gmra.mrb[36].mxu1 %vm333_vm7, %v2285_v15  ;;  %v1054_v15 = vld [vmem:[%s12898_s5 + $0x8] sm:$0xff] }
 0x2f1   : > { %7419 = vmatprep.mubr.msk.f32.mxu1 %vm9243_vm2, %v13176_v26  ;;  %v11239_v50 = vpack.c.bf16 %v1054_v15, %v1053_v5  ;;  %v1060_v5 = vld [vmem:[%s12898_s5 + $0x38] sm:$0xff]  ;;  %v13264_v15 = vld [vmem:[#allocation18_spill] sm:$0xff] }
 0x2f3   : > { %7832 = vmatpush3.bf16.msra.mxu0 %v11239_v50 }
 0x2f4   : > { %7420 = vmatmul.mubr.msk.f32.gmra.mrb[38].mxu1 %vm333_vm7, %v2286_v36  ;;  %7833 = vmatprep.subr.bf16.mxu0 %v13162_v3  ;;  %v1055_v36 = vld [vmem:[%s12898_s5 + $0x10] sm:$0xff] }
 0x2f5   : > { %7422 = vmatprep.mubr.msk.f32.mxu1 %vm9243_vm2, %v13176_v26 }
 0x2f8   : > { %7423 = vmatmul.mubr.msk.f32.gmra.mrb[40].mxu1 %vm333_vm7, %v2287_v44  ;;  %v11249_v44 = vpack.c.bf16 %v1056_v7, %v1055_v36  ;;  %v4107_v36 = vmul.f32 %v13264_v15, %v4082_v40 }
 0x2f9   : > { %7425 = vmatprep.mubr.msk.f32.mxu1 %vm9243_vm2, %v13176_v26 }
 0x2fa   : > { %13262 = vst [vmem:[#allocation44_spill] sm:$0xff] %v11249_v44  ;;  %7835 = vmatpush3.bf16.msra.mxu0 %v11249_v44  ;;  %4282 = vrot.lane.b32.xlu1 %v4107_v36, %s9240_s26 }
 0x2fb   : > { %7836 = vmatprep.subr.bf16.mxu0 %v13162_v3 }
 0x2fc   : > { %7426 = vmatmul.mubr.msk.f32.gmra.mrb[42].mxu1 %vm333_vm7, %v2288_v8  ;;  %v1058_v8 = vld [vmem:[%s12898_s5 + $0x28] sm:$0xff] }
 0x2fd   : > { %7428 = vmatprep.mubr.msk.f32.mxu1 %vm9243_vm2, %v13176_v26  ;;  %v11259_v0 = vpack.c.bf16 %v1058_v8, %v1057_v16  ;;  %v4132_v16 = vld [vmem:[#allocation2 + $0x10] sm:$0xff] }
 0x2fe   : > { %v4083_v8 = vld [vmem:[#allocation2 + $0x17] sm:$0xff] }
 0x2ff   : > { %13263 = vst [vmem:[#allocation53_spill] sm:$0xff] %v11259_v0  ;;  %7838 = vmatpush3.bf16.msra.mxu0 %v11259_v0 }
 0x300   : > { %7429 = vmatmul.mubr.msk.f32.gmra.mrb[44].mxu1 %vm333_vm7, %v2289_v58  ;;  %7839 = vmatprep.subr.bf16.mxu0 %v13162_v3  ;;  %v4058_v58 = vld [vmem:[#allocation2 + $0xa] sm:$0xff] }
 0x301   : > { %7431 = vmatprep.mubr.msk.f32.mxu1 %vm9243_vm2, %v13176_v26 }
 0x304   : > { %7432 = vmatmul.mubr.msk.f32.gmra.mrb[46].mxu1 %vm333_vm7, %v2290_v1  ;;  %v8653_v1 = vpack.i.bf16 %v4058_v58, %v4057_v11  ;;  %v13266_v11 = vld [vmem:[#allocation17_spill] sm:$0xff] }
 0x305   : > { %7434 = vmatprep.mubr.msk.f32.mxu1 %vm9243_vm2, %v13176_v26  ;;  %v4108_v58 = vmul.f32 %v13266_v11, %v4083_v8  ;;  %v4110_v8 = vmul.f32 %v9603_v42, %v4085_v48 }
 0x306   : > { %8654 = vrot.lane.b32.xlu0 %v8653_v1, %s9239_s24  ;;  %v4059_v1 = vld [vmem:[#allocation2 + $0x12] sm:$0xff] }
 0x307   : > { %4284 = vrot.lane.b32.xlu1 %v4108_v58, %s9240_s26  ;;  %v8658_v40 = vpack.i.bf16 %v4060_v61, %v4059_v1  ;;  %v4135_v58 = vld [vmem:[#allocation2 + $0x28] sm:$0xff]  ;;  %v8663_v61 = vpack.i.bf16 %v4062_v41, %v4061_v33  ;;  %v4088_v41 = vld [vmem:[#allocation2 + $0x3f] sm:$0xff] }
 0x308   : > { %7435 = vmatmul.mubr.msk.f32.gmra.mrb[48].mxu1 %vm333_vm7, %v2291_v60  ;;  %v1059_v60 = vld [vmem:[%s12898_s5 + $0x30] sm:$0xff] }
 0x309   : > { %v11271_v7 = vpack.c.bf16 %v1060_v5, %v1059_v60  ;;  %v4084_v60 = vld [vmem:[#allocation2 + $0x1f] sm:$0xff] }
 0x30a   : > { %4382 = vrot.lane.b32.xlu0 %v4132_v16, %s9238_s23  ;;  %v13267_v5 = vld [vmem:[#allocation20_spill] sm:$0xff] }
 0x30b   : > { %13265 = vst [vmem:[#allocation57_spill] sm:$0xff] %v11271_v7  ;;  %7841 = vmatpush3.bf16.msra.mxu0 %v11271_v7  ;;  %8659 = vrot.lane.b32.xlu1 %v8658_v40, %s9239_s24  ;;  %v4109_v36 = vmul.f32 %v13267_v5, %v4084_v60  ;;  %v4134_v16 = vld [vmem:[#allocation2 + $0x20] sm:$0xff]  ;;  %v4136_v40 = vld [vmem:[#allocation2 + $0x30] sm:$0xff] }
 0x30c   : > { %7842 = vmatprep.subr.bf16.mxu0 %v13162_v3  ;;  %v4087_v60 = vld [vmem:[#allocation2 + $0x37] sm:$0xff] }
 0x30d   : > { %v4112_v48 = vmul.f32 %v9585_v27, %v4087_v60 }
 0x30e   : > { %4384 = vrot.lane.b32.xlu0 %v4133_v20, %s9238_s23  ;;  %v4086_v20 = vld [vmem:[#allocation2 + $0x2f] sm:$0xff] }
 0x30f   : > { %4386 = vrot.lane.b32.xlu1 %v4134_v16, %s9238_s23  ;;  %v4111_v1 = vmul.f32 %v9562_v4, %v4086_v20  ;;  %v4063_v16 = vld [vmem:[#allocation2 + $0x32] sm:$0xff] }
 0x312   : > { %4286 = vrot.lane.b32.xlu0 %v4109_v36, %s9240_s26  ;;  %v4137_v36 = vld [vmem:[#allocation2 + $0x38] sm:$0xff] }
 0x313   : > { %4388 = vrot.lane.b32.xlu1 %v4135_v58, %s9238_s23 }
 0x316   : > { %4288 = vrot.lane.b32.xlu0 %v4110_v8, %s9240_s26  ;;  %v4064_v8 = vld [vmem:[#allocation2 + $0x3a] sm:$0xff] }
 0x317   : > { %4290 = vrot.lane.b32.xlu1 %v4111_v1, %s9240_s26  ;;  %v8668_v33 = vpack.i.bf16 %v4064_v8, %v4063_v16  ;;  %v4138_v1 = vld [vmem:[#allocation2 + $0x40] sm:$0xff]  ;;  %v4139_v16 = vld [vmem:[#allocation2 + $0x48] sm:$0xff] }
 0x318   : > { %v4065_v8 = vld [vmem:[#allocation2 + $0x42] sm:$0xff] }
 0x31a   : > { %8664 = vrot.lane.b32.xlu0 %v8663_v61, %s9239_s24  ;;  %v4113_v61 = vmul.f32 %v9642_v30, %v4088_v41  ;;  %v8673_v41 = vpack.i.bf16 %v4066_v14, %v4065_v8  ;;  %v4067_v8 = vld [vmem:[#allocation2 + $0x52] sm:$0xff] }
 0x31b   : > { %4292 = vrot.lane.b32.xlu1 %v4112_v48, %s9240_s26 }
 0x31e   : > { %4390 = vrot.lane.b32.xlu0 %v4136_v40, %s9238_s23  ;;  %v4089_v40 = vld [vmem:[#allocation2 + $0x47] sm:$0xff] }
 0x31f   : > { %8669 = vrot.lane.b32.xlu1 %v8668_v33, %s9239_s24  ;;  %v4114_v48 = vmul.f32 %v9660_v55, %v4089_v40 }
 0x322   : > { %4392 = vrot.lane.b32.xlu0 %v4137_v36, %s9238_s23 }
 0x323   : > { %4394 = vrot.lane.b32.xlu1 %v4138_v1, %s9238_s23  ;;  %v4140_v1 = vld [vmem:[#allocation2 + $0x50] sm:$0xff] }
 0x326   : > { %4294 = vrot.lane.b32.xlu0 %v4113_v61, %s9240_s26 }
 0x327   : > { %4396 = vrot.lane.b32.xlu1 %v4139_v16, %s9238_s23 }
 0x32a   : > { %4296 = vrot.lane.b32.xlu0 %v4114_v48, %s9240_s26  ;;  %v4091_v48 = vld [vmem:[#allocation2 + $0x57] sm:$0xff] }
 0x32e   : > { %8674 = vrot.lane.b32.xlu0 %v8673_v41, %s9239_s24  ;;  %v4068_v41 = vld [vmem:[#allocation2 + $0x5a] sm:$0xff] }
 0x332   : > { %4398 = vrot.lane.b32.xlu0 %v4140_v1, %s9238_s23 }
 0x336   : > { %4400 = vrot.lane.b32.xlu0 %v4141_v19, %s9238_s23 }
 0x37b   : > { %v11294_v58 = vpop.f32.mrb[0].mxu1 }
 0x37c   : > { %v7364_v20 = vpop.f32.mrb[1].mxu1 }
 0x37d   : > { %v4090_v20 = vld [vmem:[#allocation2 + $0x4f] sm:$0xff] }
 0x37e   : > { %v4115_v35 = vmul.f32 %v9668_v53, %v4090_v20  ;;  %v4092_v20 = vld [vmem:[#allocation2 + $0x5f] sm:$0xff] }
 0x37f   : > { %v11299_v60 = vpop.f32.mrb[2].mxu1 }
 0x380   : > { %v7367_v36 = vpop.f32.mrb[3].mxu1  ;;  %4298 = vrot.lane.b32.xlu1 %v4115_v35, %s9240_s26  ;;  %v4117_v35 = vmul.f32 %v9804_v54, %v4092_v20  ;;  %v4070_v20 = vld [vmem:[#allocation2 + $0x6a] sm:$0xff] }
 0x381   : > { %v4116_v36 = vmul.f32 %v9707_v34, %v4091_v48  ;;  %v4142_v48 = vld [vmem:[#allocation2 + $0x60] sm:$0xff] }
 0x382   : > { %4302 = vrot.lane.b32.xlu0 %v4117_v35, %s9240_s26  ;;  %v4094_v35 = vld [vmem:[#allocation2 + $0x6f] sm:$0xff] }
 0x383   : > { %v11304_v33 = vpop.f32.mrb[4].mxu1 }
 0x384   : > { %v7370_v61 = vpop.f32.mrb[5].mxu1  ;;  %4300 = vrot.lane.b32.xlu1 %v4116_v36, %s9240_s26  ;;  %v4118_v36 = vmul.f32 %v9807_v12, %v4093_v25  ;;  %v4119_v25 = vmul.f32 %v9832_v28, %v4094_v35 }
 0x385   : > { %v8678_v61 = vpack.i.bf16 %v4068_v41, %v4067_v8  ;;  %v4143_v8 = vld [vmem:[#allocation2 + $0x68] sm:$0xff] }
 0x386   : > { %4304 = vrot.lane.b32.xlu0 %v4118_v36, %s9240_s26  ;;  %v4069_v41 = vld [vmem:[#allocation2 + $0x62] sm:$0xff]  ;;  %v4095_v36 = vld [vmem:[#allocation2 + $0x77] sm:$0xff] }
 0x387   : > { %v11309_v24 = vpop.f32.mrb[6].mxu1  ;;  %v8683_v37 = vpack.i.bf16 %v4070_v20, %v4069_v41  ;;  %v4145_v41 = vld [vmem:[#allocation2 + $0x78] sm:$0xff] }
 0x388   : > { %v7373_v40 = vpop.f32.mrb[7].mxu1  ;;  %8679 = vrot.lane.b32.xlu1 %v8678_v61, %s9239_s24 }
 0x38a   : > { %8684 = vrot.lane.b32.xlu0 %v8683_v37, %s9239_s24  ;;  %v4071_v37 = vld [vmem:[#allocation2 + $0x72] sm:$0xff] }
 0x38b   : > { %v11314_v16 = vpop.f32.mrb[8].mxu1 }
 0x38c   : > { %v7376_v14 = vpop.f32.mrb[9].mxu1  ;;  %4402 = vrot.lane.b32.xlu1 %v4142_v48, %s9238_s23 }
 0x38f   : > { %v11319_v40 = vpop.f32.mrb[10].mxu1 }
 0x390   : > { %v7379_v1 = vpop.f32.mrb[11].mxu1  ;;  %4404 = vrot.lane.b32.xlu1 %v4143_v8, %s9238_s23 }
 0x391   : > { %v4144_v1 = vld [vmem:[#allocation2 + $0x70] sm:$0xff] }
 0x392   : > { %4406 = vrot.lane.b32.xlu0 %v4144_v1, %s9238_s23 }
 0x393   : > { %v11324_v14 = vpop.f32.mrb[12].mxu1 }
 0x394   : > { %v7382_v19 = vpop.f32.mrb[13].mxu1  ;;  %4306 = vrot.lane.b32.xlu1 %v4119_v25, %s9240_s26  ;;  %v4121_v25 = vmul.f32 %v9934_v43, %v4096_v51 }
 0x395   : > { %v4120_v19 = vmul.f32 %v9876_v9, %v4095_v36  ;;  %v4146_v36 = vld [vmem:[#allocation2 + $0x80] sm:$0xff] }
 0x396   : > { %4408 = vrot.lane.b32.xlu0 %v4145_v41, %s9238_s23 }
 0x397   : > { %v11328_v6 = vpop.f32.mrb[14].mxu1 }
 0x398   : > { %v7385_v61 = vpop.f32.mrb[15].mxu1  ;;  %4308 = vrot.lane.b32.xlu1 %v4120_v19, %s9240_s26  ;;  %v4122_v19 = vmul.f32 %v9978_v45, %v4097_v2 }
 0x399   : > { %v4072_v61 = vld [vmem:[#allocation2 + $0x7a] sm:$0xff] }
 0x39a   : > { %v8688_v35 = vpack.i.bf16 %v4072_v61, %v4071_v37  ;;  %4310 = vrot.lane.b32.xlu0 %v4121_v25, %s9240_s26  ;;  %v4147_v61 = vld [vmem:[#allocation2 + $0x88] sm:$0xff] }
 0x39b   : > { %v11333_v59 = vpop.f32.mrb[16].mxu1  ;;  %v4074_v25 = vld [vmem:[#allocation2 + $0x8a] sm:$0xff] }
 0x39c   : > { %v7388_v48 = vpop.f32.mrb[17].mxu1  ;;  %8689 = vrot.lane.b32.xlu1 %v8688_v35, %s9239_s24  ;;  %v4073_v35 = vld [vmem:[#allocation2 + $0x82] sm:$0xff] }
 0x39d   : > { %v8693_v39 = vpack.i.bf16 %v4074_v25, %v4073_v35 }
 0x39e   : > { %4312 = vrot.lane.b32.xlu0 %v4122_v19, %s9240_s26 }
 0x39f   : > { %v11338_v20 = vpop.f32.mrb[18].mxu1 }
 0x3a0   : > { %v7391_v8 = vpop.f32.mrb[19].mxu1  ;;  %4410 = vrot.lane.b32.xlu1 %v4146_v36, %s9238_s23 }
 0x3a1   : > { %v11351_v8 = vld [vmem:[%s12897_s4] ss:$0 sm:$0xff] }
 0x3a2   : > { %v11358_v51 = vadd.f32 %v11351_v8, %v11299_v60  ;;  %v11363_v2 = vadd.f32 %v11351_v8, %v11294_v58  ;;  %v11375_v19 = vadd.f32 %v11351_v8, %v11309_v24  ;;  %8694 = vrot.lane.b32.xlu0 %v8693_v39, %s9239_s24  ;;  %v4123_v58 = vmul.f32 %v13157_v49, %v4098_v21 }
 0x3a3   : > { %v11343_v48 = vpop.f32.mrb[20].mxu1  ;;  %v11383_v25 = vadd.f32 %v11351_v8, %v11314_v16  ;;  %v11394_v21 = vadd.f32 %v11351_v8, %v11319_v40  ;;  %v11407_v40 = vadd.f32 %v11351_v8, %v11324_v14 }
 0x3a4   : > { %v7394_v1 = vpop.f32.mrb[21].mxu1  ;;  %4412 = vrot.lane.b32.xlu1 %v4147_v61, %s9238_s23  ;;  %v4148_v61 = vld [vmem:[#allocation2 + $0x90] sm:$0xff]  ;;  %v13268_v24 = vmax.f32 %v11358_v51, 0.0  ;;  %v13269_v46 = vmax.f32 %v11363_v2, 0.0 }
 0x3a5   : > { %v11367_v1 = vadd.f32 %v11351_v8, %v11304_v33  ;;  %v4099_v33 = vld [vmem:[#allocation2 + $0x97] sm:$0xff] }
 0x3a6   : > { %4414 = vrot.lane.b32.xlu0 %v4148_v61, %s9238_s23  ;;  %v4124_v16 = vmul.f32 %v10022_v38, %v4099_v33  ;;  %v13271_v33 = vmax.f32 %v11375_v19, 0.0 }
 0x3a7   : > { %v11353_v41 = vpop.f32.mrb[22].mxu1  ;;  %v13270_v47 = vmax.f32 %v11367_v1, 0.0 }
 0x3a8   : > { %v7397_v37 = vpop.f32.mrb[23].mxu1  ;;  %4314 = vrot.lane.b32.xlu1 %v4123_v58, %s9240_s26  ;;  %v3528_v58 = vsel %vm1645_vm8, %v13269_v46, 0.0  ;;  %v3533_v61 = vsel %vm1645_vm8, %v13271_v33, 0.0  ;;  %v11425_v33 = vadd.f32 %v11351_v8, %v11333_v59 }
 0x3ab   : > { %v11369_v36 = vpop.f32.mrb[24].mxu1 }
 0x3ac   : > { %v7400_v37 = vpop.f32.mrb[25].mxu1  ;;  %4316 = vrot.lane.b32.xlu1 %v4124_v16, %s9240_s26 }
 0x3ad   : > { %v3529_v37 = vsel %vm1645_vm8, %v13268_v24, 0.0  ;;  %v3531_v24 = vsel %vm1645_vm8, %v13270_v47, 0.0  ;;  %v11416_v47 = vadd.f32 %v11351_v8, %v11328_v6 }
 0x3ae   : > { %v3530_v13 = vadd.f32 %v3529_v37, %v3528_v58  ;;  %v8698_v37 = vpack.i.bf16 %v4076_v32, %v4075_v31  ;;  %v13272_v58 = vmax.f32 %v11383_v25, 0.0  ;;  %v11434_v31 = vadd.f32 %v11351_v8, %v11338_v20 }
 0x3af   : > { %v11385_v60 = vpop.f32.mrb[26].mxu1  ;;  %v13275_v20 = vmax.f32 %v11416_v47, 0.0 }
 0x3b0   : > { %v7403_v35 = vpop.f32.mrb[27].mxu1  ;;  %v3532_v14 = vadd.f32 %v3531_v24, %v3530_v13  ;;  %v3535_v16 = vsel %vm1645_vm8, %v13272_v58, 0.0  ;;  %8699 = vrot.lane.b32.xlu1 %v8698_v37, %s9239_s24  ;;  %v13038_v37 = vmax.f32 %v11425_v33, 0.0 }
 0x3b1   : > { %v4149_v35 = vld [vmem:[#allocation2 + $0x98] sm:$0xff] }
 0x3b2   : > { %4416 = vrot.lane.b32.xlu0 %v4149_v35, %s9238_s23  ;;  %v3534_v46 = vadd.f32 %v3533_v61, %v3532_v14  ;;  %v4100_v35 = vld [vmem:[#allocation2 + $0x9f] sm:$0xff]  ;;  %v13274_v61 = vmax.f32 %v11407_v40, 0.0 }
 0x3b3   : > { %v3449_v18 = vpop.f32.mrb[28].mxu1  ;;  %v4125_v59 = vmul.f32 %v10109_v56, %v4100_v35 }
 0x3b4   : > { %v7406_v39 = vpop.f32.mrb[29].mxu1  ;;  %v3536_v58 = vadd.f32 %v3535_v16, %v3534_v46  ;;  %v3539_v14 = vsel %vm1645_vm8, %v13274_v61, 0.0  ;;  %4418 = vrot.lane.b32.xlu1 %v4150_v23, %s9238_s23  ;;  %v3541_v46 = vsel %vm1645_vm8, %v13275_v20, 0.0  ;;  %v4101_v61 = vld [vmem:[#allocation2 + $0xa7] sm:$0xff]  ;;  %v3543_v23 = vsel %vm1645_vm8, %v13038_v37, 0.0 }
 0x3b5   : > { %v13273_v39 = vmax.f32 %v11394_v21, 0.0  ;;  %v11462_v20 = vadd.f32 %v11351_v8, %v11369_v36  ;;  %v4078_v36 = vld [vmem:[#allocation2 + $0xaa] sm:$0xff] }
 0x3b6   : > { %4318 = vrot.lane.b32.xlu0 %v4125_v59, %s9240_s26  ;;  %v4077_v59 = vld [vmem:[#allocation2 + $0xa2] sm:$0xff] }
 0x3b7   : > { %v3454_v6 = vpop.f32.mrb[30].mxu1  ;;  %v3537_v13 = vsel %vm1645_vm8, %v13273_v39, 0.0  ;;  %v11443_v39 = vadd.f32 %v11351_v8, %v11343_v48 }
 0x3b8   : > { %v7409_v24 = vpop.f32.mrb[31].mxu1  ;;  %v3538_v32 = vadd.f32 %v3537_v13, %v3536_v58  ;;  %v4126_v13 = vmul.f32 %v10143_v29, %v4101_v61  ;;  %v4151_v58 = vld [vmem:[#allocation2 + $0xa8] sm:$0xff]  ;;  %v11472_v61 = vadd.f32 %v11351_v8, %v11385_v60  ;;  %v11489_v22 = vadd.f32 %v11351_v8, %v3454_v6 }
 0x3b9   : > { %v11453_v24 = vadd.f32 %v11351_v8, %v11353_v41  ;;  %4420 = vrot.lane.b32.xlu1 %v4151_v58, %s9238_s23 }
 0x3ba   : > { %v3540_v48 = vadd.f32 %v3539_v14, %v3538_v32  ;;  %4320 = vrot.lane.b32.xlu0 %v4126_v13, %s9240_s26  ;;  %v13276_v32 = vmax.f32 %v11434_v31, 0.0  ;;  %v13277_v13 = vmax.f32 %v11443_v39, 0.0 }
 0x3bb   : > { %v3459_v57 = vpop.f32.mrb[32].mxu1 }
 0x3bc   : > { %v7412_v35 = vpop.f32.mrb[33].mxu1  ;;  %v3542_v16 = vadd.f32 %v3541_v46, %v3540_v48  ;;  %v3545_v14 = vsel %vm1645_vm8, %v13276_v32, 0.0  ;;  %v8703_v48 = vpack.i.bf16 %v4078_v36, %v4077_v59  ;;  %v3547_v58 = vsel %vm1645_vm8, %v13277_v13, 0.0  ;;  %v4102_v36 = vld [vmem:[#allocation2 + $0xaf] sm:$0xff] }
 0x3bd   : > { %v11481_v35 = vadd.f32 %v11351_v8, %v3449_v18  ;;  %v4152_v32 = vld [vmem:[#allocation2 + $0xb0] sm:$0xff]  ;;  %v4127_v18 = vmul.f32 %v10150_v17, %v4102_v36  ;;  %v11497_v56 = vadd.f32 %v11351_v8, %v3459_v57  ;;  %v4153_v57 = vld [vmem:[#allocation2 + $0xb8] sm:$0xff] }
 0x3be   : > { %v3544_v46 = vadd.f32 %v3543_v23, %v3542_v16  ;;  %8704 = vrot.lane.b32.xlu0 %v8703_v48, %s9239_s24 }
 0x3bf   : > { %v3464_v41 = vpop.f32.mrb[34].mxu1  ;;  %4322 = vrot.lane.b32.xlu1 %v4127_v18, %s9240_s26  ;;  %v4080_v18 = vld [vmem:[#allocation2 + $0xba] sm:$0xff] }
 0x3c0   : > { %v7415_v37 = vpop.f32.mrb[35].mxu1  ;;  %v3546_v29 = vadd.f32 %v3545_v14, %v3544_v46  ;;  %v13279_v14 = vmax.f32 %v11462_v20, 0.0 }
 0x3c1   : > { %v13278_v37 = vmax.f32 %v11453_v24, 0.0 }
 0x3c2   : > { %v3548_v13 = vadd.f32 %v3547_v58, %v3546_v29  ;;  %v3551_v46 = vsel %vm1645_vm8, %v13279_v14, 0.0  ;;  %4422 = vrot.lane.b32.xlu0 %v4152_v32, %s9238_s23  ;;  %v13280_v29 = vmax.f32 %v11472_v61, 0.0  ;;  %v4103_v14 = vld [vmem:[#allocation2 + $0xb7] sm:$0xff] }
 0x3c3   : > { %v3469_v60 = vpop.f32.mrb[36].mxu1  ;;  %v3549_v16 = vsel %vm1645_vm8, %v13278_v37, 0.0 }
 0x3c4   : > { %v7418_v59 = vpop.f32.mrb[37].mxu1  ;;  %v3550_v37 = vadd.f32 %v3549_v16, %v3548_v13  ;;  %v3553_v6 = vsel %vm1645_vm8, %v13280_v29, 0.0  ;;  %v4128_v16 = vmul.f32 %v10163_v10, %v4103_v14  ;;  %v13281_v13 = vmax.f32 %v11481_v35, 0.0 }
 0x3c5   : > { %v11506_v59 = vadd.f32 %v11351_v8, %v3464_v41  ;;  %v11514_v17 = vadd.f32 %v11351_v8, %v3469_v60  ;;  %v13282_v41 = vmax.f32 %v11489_v22, 0.0 }
 0x3c6   : > { %v3552_v48 = vadd.f32 %v3551_v46, %v3550_v37  ;;  %v3555_v32 = vsel %vm1645_vm8, %v13281_v13, 0.0  ;;  %4424 = vrot.lane.b32.xlu0 %v4153_v57, %s9238_s23  ;;  %4324 = vrot.lane.b32.xlu1 %v4128_v16, %s9240_s26  ;;  %v4079_v13 = vld [vmem:[#allocation2 + $0xb2] sm:$0xff] }
 0x3c7   : > { %v3474_v23 = vpop.f32.mrb[38].mxu1  ;;  %v3557_v46 = vsel %vm1645_vm8, %v13282_v41, 0.0  ;;  %v13053_v37 = vmax.f32 %v11506_v59, 0.0  ;;  %v8708_v10 = vpack.i.bf16 %v4080_v18, %v4079_v13  ;;  %v13052_v57 = vmax.f32 %v11514_v17, 0.0 }
 0x3c8   : > { %v7421_v36 = vpop.f32.mrb[39].mxu1  ;;  %v3554_v29 = vadd.f32 %v3553_v6, %v3552_v48  ;;  %v13283_v48 = vmax.f32 %v11497_v56, 0.0 }
 0x3c9   : > { %v11523_v36 = vadd.f32 %v11351_v8, %v3474_v23  ;;  %v3561_v23 = vsel %vm1645_vm8, %v13053_v37, 0.0 }
 0x3ca   : > { %v3556_v60 = vadd.f32 %v3555_v32, %v3554_v29  ;;  %v3559_v6 = vsel %vm1645_vm8, %v13283_v48, 0.0  ;;  %8709 = vrot.lane.b32.xlu1 %v8708_v10, %s9239_s24 }
 0x3cb   : > { %v3479_v58 = vpop.f32.mrb[40].mxu1  ;;  %v13059_v32 = vmax.f32 %v11523_v36, 0.0 }
 0x3cc   : > { %v7424_v14 = vpop.f32.mrb[41].mxu1  ;;  %v11530_v16 = vadd.f32 %v11351_v8, %v3479_v58  ;;  %v3558_v41 = vadd.f32 %v3557_v46, %v3556_v60  ;;  %v4154_v58 = vld [vmem:[#allocation2 + $0xc0] sm:$0xff]  ;;  %v3563_v46 = vsel %vm1645_vm8, %v13052_v57, 0.0 }
 0x3cd   : > { %v4104_v14 = vld [vmem:[#allocation2 + $0xbf] sm:$0xff] }
 0x3ce   : > { %v3560_v13 = vadd.f32 %v3559_v6, %v3558_v41  ;;  %v4129_v48 = vmul.f32 %v10186_v62, %v4104_v14  ;;  %v13056_v10 = vmax.f32 %v11530_v16, 0.0  ;;  %4426 = vrot.lane.b32.xlu1 %v4154_v58, %s9238_s23  ;;  %v4105_v14 = vld [vmem:[#allocation2 + $0xc7] sm:$0xff] }
 0x3cf   : > { %v3484_v38 = vpop.f32.mrb[42].mxu1  ;;  %v4130_v37 = vmul.f32 %v10202_v63, %v4105_v14 }
 0x3d0   : > { %v11538_v18 = vadd.f32 %v11351_v8, %v3484_v38  ;;  %v7427_v29 = vpop.f32.mrb[43].mxu1  ;;  %v3562_v60 = vadd.f32 %v3561_v23, %v3560_v13  ;;  %4326 = vrot.lane.b32.xlu0 %v4129_v48, %s9240_s26  ;;  %v3565_v38 = vsel %vm1645_vm8, %v13059_v32, 0.0  ;;  %v4155_v23 = vld [vmem:[#allocation2 + $0xc8] sm:$0xff]  ;;  %v3567_v13 = vsel %vm1645_vm8, %v13056_v10, 0.0 }
 0x3d2   : > { %v13058_v6 = vmax.f32 %v11538_v18, 0.0  ;;  %v3564_v57 = vadd.f32 %v3563_v46, %v3562_v60  ;;  %4428 = vrot.lane.b32.xlu1 %v4155_v23, %s9238_s23 }
 0x3d3   : > { %v3489_v49 = vpop.f32.mrb[44].mxu1 }
 0x3d4   : > { %v11552_v41 = vadd.f32 %v11351_v8, %v3489_v49  ;;  %v7430_v29 = vpop.f32.mrb[45].mxu1  ;;  %v3566_v58 = vadd.f32 %v3565_v38, %v3564_v57  ;;  %4328 = vrot.lane.b32.xlu0 %v4130_v37, %s9240_s26  ;;  %v3569_v49 = vsel %vm1645_vm8, %v13058_v6, 0.0  ;;  %v4081_v38 = vld [vmem:[#allocation2 + $0xc2] sm:$0xf]  ;;  %v4106_v6 = vld [vmem:[#allocation2 + $0xcf] sm:$0xf] }
 0x3d6   : > { %v13057_v48 = vmax.f32 %v11552_v41, 0.0  ;;  %v3568_v29 = vadd.f32 %v3567_v13, %v3566_v58 }
 0x3d7   : > { %v3494_v62 = vpop.f32.mrb[46].mxu1 }
 0x3d8   : > { %v11565_v46 = vadd.f32 %v11351_v8, %v3494_v62  ;;  %v7433_v60 = vpop.f32.mrb[47].mxu1  ;;  %v3571_v14 = vsel %vm1645_vm8, %v13057_v48, 0.0  ;;  %v3570_v10 = vadd.f32 %v3569_v49, %v3568_v29  ;;  %4230 = vrot.lane.b32.xlu0 %v4081_v38, %s9239_s24  ;;  %v4156_v48 = vld [vmem:[#allocation2 + $0xd0] sm:$0xf]  ;;  %v4131_v49 = vmul.f32 %v13161_v52, %v4106_v6  ;;  %s6946_s24 = sshll.u32 %s308_s25, 1 }
 0x3d9   : > { %v13286_v6 = vmax.f32 %v11358_v51, 0.0  ;;  %v11619_v51 = vpop.permute.xlu1 %4282  ;;  %s12043_s21 = scalar_lea.vmem [#allocation4], %s6946_s24  ;;  %s13332_s24 = smov 32  }
 0x3da   : > { %v13060_v57 = vmax.f32 %v11565_v46, 0.0  ;;  %v3572_v13 = vadd.f32 %v3571_v14, %v3570_v10  ;;  %4330 = vrot.lane.b32.xlu1 %v4131_v49, %s9240_s26  ;;  %v13291_v49 = vld [vmem:[#allocation11_spill] sm:$0xff]  ;;  %s6854_s22 = sshll.u32 %s12043_s21, 4  ;;  %s12837_s22 = int_to_ptr.vmem [resolvable:$true] %s6854_s22 }
 0x3db   : > { %v3499_v37 = vpop.f32.mrb[48].mxu1 }
 0x3dc   : > { %v3573_v23 = vsel %vm1645_vm8, %v13060_v57, 0.0  ;;  %v11576_v62 = vadd.f32 %v11351_v8, %v3499_v37  ;;  %v7436_v60 = vpop.f32.mrb[49].mxu1  ;;  %4430 = vrot.lane.b32.xlu0 %v4156_v48, %s9238_s23  ;;  %v13287_v48 = vld [vmem:[#allocation9_spill] sm:$0xff] }
 0x3dd   : > { %v3574_v32 = vadd.f32 %v3573_v23, %v3572_v13  ;;  %v13289_v23 = vld [vmem:[#allocation10_spill] sm:$0xff]  ;;  %v13290_v13 = vmax.f32 %v11375_v19, 0.0  ;;  %v11636_v19 = vpop.permute.xlu1 %4284 }
 0x3de   : > { %v3527_v58 = vmax.f32 %v11576_v62, 0.0 }
 0x3e0   : > { %v3576_v29 = vsel %vm3575_vm3, %v3527_v58, 0.0 }
 0x3e1   : > { %v3577_v38 = vadd.f32 %v3576_v29, %v3574_v32  ;;  %v13285_v32 = vld [vmem:[#allocation8_spill] sm:$0xff]  ;;  %v13292_v29 = vmax.f32 %v11383_v25, 0.0  ;;  %v13295_v25 = vld [vmem:[#allocation13_spill] sm:$0xff] }
 0x3e3   : > { %v3578_v8 = vrot.slane %v3577_v38, 4 }
 0x3e5   : > { %v3579_v37 = vadd.f32 %v3578_v8, %v3577_v38  ;;  %v13293_v38 = vld [vmem:[#allocation12_spill] sm:$0xff] }
 0x3e7   : > { %v3580_v10 = vrot.slane %v3579_v37, 2 }
 0x3e9   : > { %v3581_v14 = vadd.f32 %v3580_v10, %v3579_v37  ;;  %v13294_v37 = vmax.f32 %v11394_v21, 0.0  ;;  %v11648_v10 = vpop.permute.xlu1 %8659 }
 0x3eb   : > { %v3582_v60 = vrot.slane %v3581_v14, 1 }
 0x3ed   : > { %v3583_v57 = vadd.f32 %v3582_v60, %v3581_v14  ;;  %v13296_v14 = vmax.f32 %v11407_v40, 0.0  ;;  %v13297_v60 = vld [vmem:[#allocation28_spill] sm:$0xff]  ;;  %v11665_v40 = vpop.permute.xlu1 %4386 }
 0x3ef   : > { %v3585_v63 = vmul.f32 0.0051020407, %v3583_v57  ;;  %v13288_v57 = vmax.f32 %v11367_v1, 0.0 }
 0x3f1   : > { %7454 = vmatmul.mubr.msk.f32.vlgmr.msra.gmra.mrb[50].mxu0 %vm1645_vm8, %v3585_v63  ;;  %v13284_v63 = vmax.f32 %v11363_v2, 0.0  ;;  %v11610_v2 = vpop.permute.xlu0 %8654 }
 0x3f2   : > { %7844 = vmatpush3.bf16.msra.mxu0 %v11239_v50  ;;  %7472 = vmatprep.mubr.msk.f32.mxu0 %vm9243_vm2, %v13176_v26 }
 0x3f3   : > { %7845 = vmatprep.subr.bf16.mxu0 %v13162_v3 }
 0x3f5   : > { %v11627_v1 = vpop.permute.xlu0 %4382 }
 0x3f6   : > { %7847 = vmatpush3.bf16.msra.mxu0 %v11249_v44 }
 0x3f7   : > { %7848 = vmatprep.subr.bf16.mxu0 %v13162_v3 }
 0x3f9   : > { %v11639_v8 = vpop.permute.xlu0 %4384 }
 0x3fa   : > { %7850 = vmatpush3.bf16.msra.mxu0 %v11259_v0 }
 0x3fb   : > { %7851 = vmatprep.subr.bf16.mxu0 %v13162_v3 }
 0x3fd   : > { %v11656_v21 = vpop.permute.xlu0 %4286 }
 0x3fe   : > { %7853 = vmatpush3.bf16.msra.mxu0 %v11271_v7 }
 0x3ff   : > { %7854 = vmatprep.subr.bf16.mxu0 %v13162_v3 }
 0x401   : > { %7473 = vmatmul.mubr.msk.f32.vlgmr.msra.gmra.mrb[52].mxu0 %vm1645_vm8, %v13284_v63  ;;  %v13298_v63 = vmax.f32 %v11416_v47, 0.0  ;;  %v13301_v47 = vld [vmem:[#allocation37_spill] sm:$0xff] }
 0x402   : > { %7856 = vmatpush1.bf16.msra.mxu0 %v13285_v32  ;;  %7475 = vmatprep.mubr.msk.f32.mxu0 %vm9243_vm2, %v13176_v26  ;;  %v13299_v32 = vld [vmem:[#allocation31_spill] sm:$0xff] }
 0x403   : > { %7857 = vmatprep.subr.bf16.mxu0 %v13162_v3 }
 0x405   : > { %7476 = vmatmul.mubr.msk.f32.gmra.mrb[54].mxu0 %vm1645_vm8, %v13286_v6  ;;  %v11668_v6 = vpop.permute.xlu0 %4288 }
 0x406   : > { %7478 = vmatprep.mubr.msk.f32.mxu0 %vm9243_vm2, %v13176_v26  ;;  %7859 = vmatpush1.bf16.msra.mxu0 %v13287_v48  ;;  %v13300_v48 = vmax.f32 %v11425_v33, 0.0 }
 0x407   : > { %7860 = vmatprep.subr.bf16.mxu0 %v13162_v3 }
 0x409   : > { %7479 = vmatmul.mubr.msk.f32.gmra.mrb[56].mxu0 %vm1645_vm8, %v13288_v57  ;;  %v11677_v57 = vpop.permute.xlu1 %4388  ;;  %v11685_v33 = vpop.permute.xlu0 %8664 }
 0x40a   : > { %7481 = vmatprep.mubr.msk.f32.mxu0 %vm9243_vm2, %v13176_v26  ;;  %7862 = vmatpush1.bf16.msra.mxu0 %v13289_v23  ;;  %v13302_v23 = vmax.f32 %v11434_v31, 0.0 }
 0x40b   : > { %7863 = vmatprep.subr.bf16.mxu0 %v13162_v3 }
 0x40d   : > { %7482 = vmatmul.mubr.msk.f32.gmra.mrb[58].mxu0 %vm1645_vm8, %v13290_v13  ;;  %v13303_v13 = vld [vmem:[#allocation39_spill] sm:$0xff]  ;;  %v11694_v31 = vpop.permute.xlu1 %4290 }
 0x40e   : > { %7484 = vmatprep.mubr.msk.f32.mxu0 %vm9243_vm2, %v13176_v26  ;;  %7865 = vmatpush1.bf16.msra.mxu0 %v13291_v49  ;;  %v13304_v49 = vmax.f32 %v11443_v39, 0.0  ;;  %v13307_v39 = vld [vmem:[#allocation43_spill] sm:$0xff] }
 0x40f   : > { %7866 = vmatprep.subr.bf16.mxu0 %v13162_v3 }
 0x411   : > { %7485 = vmatmul.mubr.msk.f32.gmra.mrb[60].mxu0 %vm1645_vm8, %v13292_v29  ;;  %v13305_v29 = vld [vmem:[#allocation41_spill] sm:$0xff] }
 0x412   : > { %7487 = vmatprep.mubr.msk.f32.mxu0 %vm9243_vm2, %v13176_v26  ;;  %7868 = vmatpush1.bf16.msra.mxu0 %v13293_v38  ;;  %v11697_v38 = vpop.permute.xlu0 %4390 }
 0x413   : > { %7869 = vmatprep.subr.bf16.mxu0 %v13162_v3 }
 0x415   : > { %7488 = vmatmul.mubr.msk.f32.gmra.mrb[62].mxu0 %vm1645_vm8, %v13294_v37  ;;  %v13306_v37 = vmax.f32 %v11453_v24, 0.0  ;;  %v13309_v24 = vmax.f32 %v11472_v61, 0.0  ;;  %v13311_v61 = vmax.f32 %v11489_v22, 0.0  ;;  %v13313_v22 = vmax.f32 %v11506_v59, 0.0 }
 0x416   : > { %7490 = vmatprep.mubr.msk.f32.mxu0 %vm9243_vm2, %v13176_v26  ;;  %7871 = vmatpush1.bf16.msra.mxu0 %v13295_v25  ;;  %v11706_v25 = vpop.permute.xlu1 %4292 }
 0x417   : > { %7872 = vmatprep.subr.bf16.mxu0 %v13162_v3 }
 0x419   : > { %7491 = vmatmul.mubr.msk.f32.gmra.mrb[64].mxu0 %vm1645_vm8, %v13296_v14  ;;  %v13308_v14 = vmax.f32 %v11462_v20, 0.0  ;;  %v13310_v20 = vmax.f32 %v11481_v35, 0.0 }
 0x41a   : > { %7493 = vmatprep.mubr.msk.f32.mxu0 %vm9243_vm2, %v13176_v26  ;;  %7874 = vmatpush1.bf16.msra.mxu0 %v13297_v60  ;;  %v11713_v60 = vpop.permute.xlu0 %4392 }
 0x41b   : > { %7875 = vmatprep.subr.bf16.mxu0 %v13162_v3 }
 0x41d   : > { %7494 = vmatmul.mubr.msk.f32.gmra.mrb[66].mxu0 %vm1645_vm8, %v13298_v63  ;;  %v11720_v63 = vpop.permute.xlu1 %8669 }
 0x41e   : > { %7496 = vmatprep.mubr.msk.f32.mxu0 %vm9243_vm2, %v13176_v26  ;;  %7877 = vmatpush1.bf16.msra.mxu0 %v13299_v32  ;;  %v11722_v32 = vpop.permute.xlu0 %4294 }
 0x41f   : > { %7878 = vmatprep.subr.bf16.mxu0 %v13162_v3 }
 0x421   : > { %7497 = vmatmul.mubr.msk.f32.gmra.mrb[68].mxu0 %vm1645_vm8, %v13300_v48  ;;  %v11729_v48 = vpop.permute.xlu1 %4394 }
 0x422   : > { %7499 = vmatprep.mubr.msk.f32.mxu0 %vm9243_vm2, %v13176_v26  ;;  %7880 = vmatpush1.bf16.msra.mxu0 %v13301_v47  ;;  %v11736_v47 = vpop.permute.xlu0 %4296 }
 0x423   : > { %7881 = vmatprep.subr.bf16.mxu0 %v13162_v3 }
 0x425   : > { %7500 = vmatmul.mubr.msk.f32.gmra.mrb[70].mxu0 %vm1645_vm8, %v13302_v23  ;;  %v13312_v23 = vmax.f32 %v11497_v56, 0.0  ;;  %v11743_v35 = vpop.permute.xlu1 %4396  ;;  %v13314_v56 = vmax.f32 %v11514_v17, 0.0  ;;  %v13316_v17 = vmax.f32 %v11530_v16, 0.0  ;;  %v4007_v16 = vld [vmem:[#allocation2 + $0x1] sm:$0xff] }
 0x426   : > { %7502 = vmatprep.mubr.msk.f32.mxu0 %vm9243_vm2, %v13176_v26  ;;  %7883 = vmatpush1.bf16.msra.mxu0 %v13303_v13  ;;  %v11745_v13 = vpop.permute.xlu0 %8674 }
 0x427   : > { %7884 = vmatprep.subr.bf16.mxu0 %v13162_v3 }
 0x429   : > { %7503 = vmatmul.mubr.msk.f32.gmra.mrb[72].mxu0 %vm1645_vm8, %v13304_v49  ;;  %v11752_v49 = vpop.permute.xlu1 %4298 }
 0x42a   : > { %7505 = vmatprep.mubr.msk.f32.mxu0 %vm9243_vm2, %v13176_v26  ;;  %7886 = vmatpush1.bf16.msra.mxu0 %v13305_v29  ;;  %v11759_v29 = vpop.permute.xlu0 %4398 }
 0x42b   : > { %7887 = vmatprep.subr.bf16.mxu0 %v13162_v3 }
 0x42d   : > { %7506 = vmatmul.mubr.msk.f32.gmra.mrb[74].mxu0 %vm1645_vm8, %v13306_v37  ;;  %v13315_v37 = vmax.f32 %v11523_v36, 0.0  ;;  %v11766_v59 = vpop.permute.xlu1 %4300  ;;  %v13317_v36 = vmax.f32 %v11538_v18, 0.0  ;;  %v8656_v18 = vunpack.i.l.bf16 %v11610_v2 }
 0x42e   : > { %7508 = vmatprep.mubr.msk.f32.mxu0 %vm9243_vm2, %v13176_v26  ;;  %7889 = vmatpush1.bf16.msra.mxu0 %v13307_v39  ;;  %v11768_v39 = vpop.permute.xlu0 %4400 }
 0x42f   : > { %7956 = vmatprep.subr.bf16.mxu0 %v13162_v3 }
 0x431   : > { %7509 = vmatmul.mubr.msk.f32.gmra.mrb[76].mxu0 %vm1645_vm8, %v13308_v14  ;;  %v11775_v14 = vpop.permute.xlu1 %8679 }
 0x432   : > { %7511 = vmatprep.mubr.msk.f32.mxu0 %vm9243_vm2, %v13176_v26 }
 0x435   : > { %7512 = vmatmul.mubr.msk.f32.gmra.mrb[78].mxu0 %vm1645_vm8, %v13309_v24  ;;  %v11782_v24 = vpop.permute.xlu0 %4302 }
 0x436   : > { %7514 = vmatprep.mubr.msk.f32.mxu0 %vm9243_vm2, %v13176_v26 }
 0x439   : > { %7515 = vmatmul.mubr.msk.f32.gmra.mrb[80].mxu0 %vm1645_vm8, %v13310_v20  ;;  %v13318_v20 = vmax.f32 %v11552_v41, 0.0  ;;  %v4008_v41 = vld [vmem:[#allocation2 + $0x9] sm:$0xff] }
 0x43a   : > { %7517 = vmatprep.mubr.msk.f32.mxu0 %vm9243_vm2, %v13176_v26 }
 0x43d   : > { %7518 = vmatmul.mubr.msk.f32.gmra.mrb[82].mxu0 %vm1645_vm8, %v13311_v61  ;;  %v11789_v61 = vpop.permute.xlu1 %4402 }
 0x43e   : > { %7520 = vmatprep.mubr.msk.f32.mxu0 %vm9243_vm2, %v13176_v26 }
 0x441   : > { %7521 = vmatmul.mubr.msk.f32.gmra.mrb[84].mxu0 %vm1645_vm8, %v13312_v23  ;;  %v11791_v23 = vpop.permute.xlu0 %4304 }
 0x442   : > { %7523 = vmatprep.mubr.msk.f32.mxu0 %vm9243_vm2, %v13176_v26 }
 0x445   : > { %7524 = vmatmul.mubr.msk.f32.gmra.mrb[86].mxu0 %vm1645_vm8, %v13313_v22  ;;  %v4032_v22 = vmul.f32 %v13264_v15, %v4007_v16  ;;  %v4009_v16 = vld [vmem:[#allocation2 + $0x11] sm:$0xff] }
 0x446   : > { %7526 = vmatprep.mubr.msk.f32.mxu0 %vm9243_vm2, %v13176_v26 }
 0x449   : > { %7527 = vmatmul.mubr.msk.f32.gmra.mrb[88].mxu0 %vm1645_vm8, %v13314_v56  ;;  %v13319_v56 = vmax.f32 %v11565_v46, 0.0  ;;  %v4033_v46 = vmul.f32 %v13266_v11, %v4008_v41 }
 0x44a   : > { %7529 = vmatprep.mubr.msk.f32.mxu0 %vm9243_vm2, %v13176_v26 }
 0x44d   : > { %7530 = vmatmul.mubr.msk.f32.gmra.mrb[90].mxu0 %vm1645_vm8, %v13315_v37  ;;  %v11800_v37 = vpop.permute.xlu1 %4404 }
 0x44e   : > { %7532 = vmatprep.mubr.msk.f32.mxu0 %vm9243_vm2, %v13176_v26 }
 0x451   : > { %7533 = vmatmul.mubr.msk.f32.gmra.mrb[92].mxu0 %vm1645_vm8, %v13316_v17  ;;  %v8657_v17 = vunpack.i.h.bf16 %v11610_v2  ;;  %v11823_v41 = vpop.permute.xlu1 %4306 }
 0x452   : > { %7535 = vmatprep.mubr.msk.f32.mxu0 %vm9243_vm2, %v13176_v26 }
 0x453   : > { %v4458_v62 = vsel %vm326_vm0, %v4033_v46, %v8657_v17 }
 0x455   : > { %7536 = vmatmul.mubr.msk.f32.gmra.mrb[94].mxu0 %vm1645_vm8, %v13317_v36  ;;  %v4457_v36 = vsel %vm326_vm0, %v4032_v22, %v8656_v18  ;;  %v4508_v18 = vsel %vm1613_vm9, %v11636_v19, %v11639_v8  ;;  %v4010_v22 = vld [vmem:[#allocation2 + $0x19] sm:$0xff]  ;;  %v4483_v8 = vsel %vm1587_vm10, %v4458_v62, %v11636_v19  ;;  %v8666_v19 = vunpack.i.l.bf16 %v11685_v33  ;;  %v4012_v62 = vld [vmem:[#allocation2 + $0x29] sm:$0xff] }
 0x456   : > { %7538 = vmatprep.mubr.msk.f32.mxu0 %vm9243_vm2, %v13176_v26  ;;  %v4482_v2 = vsel %vm1587_vm10, %v4457_v36, %v11619_v51  ;;  %v4011_v36 = vld [vmem:[#allocation2 + $0x21] sm:$0xff] }
 0x459   : > { %7539 = vmatmul.mubr.msk.f32.gmra.mrb[96].mxu0 %vm1645_vm8, %v13318_v20  ;;  %v4507_v20 = vsel %vm1613_vm9, %v11619_v51, %v11627_v1  ;;  %v8661_v1 = vunpack.i.l.bf16 %v11648_v10  ;;  %v4509_v51 = vsel %vm1613_vm9, %v11656_v21, %v11665_v40  ;;  %v4510_v40 = vsel %vm1613_vm9, %v11668_v6, %v11677_v57 }
 0x45a   : > { %7541 = vmatprep.mubr.msk.f32.mxu0 %vm9243_vm2, %v13176_v26  ;;  %v4511_v57 = vsel %vm1613_vm9, %v11694_v31, %v11697_v38  ;;  %v4512_v38 = vsel %vm1613_vm9, %v11706_v25, %v11713_v60 }
 0x45d   : > { %7542 = vmatmul.mubr.msk.f32.gmra.mrb[98].mxu0 %vm1645_vm8, %v13319_v56  ;;  %v11812_v56 = vpop.permute.xlu0 %8684 }
 0x45e   : > { %7544 = vmatprep.mubr.msk.f32.mxu0 %vm9243_vm2, %v13176_v26 }
 0x461   : > { %7545 = vmatmul.mubr.msk.f32.gmra.mrb[100].mxu0 %vm1645_vm8, %v3527_v58  ;;  %v4034_v58 = vmul.f32 %v13267_v5, %v4009_v16  ;;  %v11832_v17 = vpop.permute.xlu0 %4406  ;;  %v4035_v16 = vmul.f32 %v9603_v42, %v4010_v22 }
 0x462   : > { %7104 = vmatprep.mubr.msk.f32.mxu0 %vm1645_vm8, %v4507_v20  ;;  %v8662_v20 = vunpack.i.h.bf16 %v11648_v10 }
 0x463   : > { %v4459_v46 = vsel %vm326_vm0, %v4034_v58, %v8661_v1 }
 0x464   : > { %v4484_v10 = vsel %vm1587_vm10, %v4459_v46, %v11656_v21  ;;  %v4460_v1 = vsel %vm326_vm0, %v4035_v16, %v8662_v20  ;;  %v4014_v16 = vld [vmem:[#allocation2 + $0x39] sm:$0xff] }
 0x465   : > { %4672 = vmatmul.mubr.f32.vlgmr.msra.gmra.mrb[102].mxu0 %v4482_v2  ;;  %v4036_v2 = vmul.f32 %v9562_v4, %v4011_v36  ;;  %v11851_v58 = vpop.permute.xlu0 %4408  ;;  %v4485_v21 = vsel %vm1587_vm10, %v4460_v1, %v11668_v6  ;;  %v4037_v36 = vmul.f32 %v9585_v27, %v4012_v62  ;;  %v8671_v6 = vunpack.i.l.bf16 %v11720_v63  ;;  %v4015_v62 = vld [vmem:[#allocation2 + $0x41] sm:$0xff] }
 0x466   : > { %7105 = vmatprep.mubr.msk.f32.mxu0 %vm1645_vm8, %v4508_v18  ;;  %7958 = vmatpush3.bf16.msra.mxu0 %v11239_v50  ;;  %v11847_v18 = vpop.permute.xlu1 %4308 }
 0x467   : > { %7959 = vmatprep.subr.bf16.mxu0 %v13162_v3  ;;  %v4461_v22 = vsel %vm326_vm0, %v4036_v2, %v8666_v19  ;;  %v4513_v2 = vsel %vm1613_vm9, %v11722_v32, %v11729_v48  ;;  %v4514_v48 = vsel %vm1613_vm9, %v11736_v47, %v11743_v35  ;;  %v4515_v35 = vsel %vm1613_vm9, %v11752_v49, %v11759_v29 }
 0x468   : > { %v4486_v20 = vsel %vm1587_vm10, %v4461_v22, %v11694_v31  ;;  %v8672_v31 = vunpack.i.h.bf16 %v11720_v63 }
 0x469   : > { %4677 = vmatmul.mubr.f32.gmra.mrb[104].mxu0 %v4483_v8  ;;  %v8667_v8 = vunpack.i.h.bf16 %v11685_v33 }
 0x46a   : > { %7106 = vmatprep.mubr.msk.f32.mxu0 %vm1645_vm8, %v4509_v51  ;;  %7961 = vmatpush3.bf16.msra.mxu0 %v11249_v44  ;;  %v4013_v51 = vld [vmem:[#allocation2 + $0x31] sm:$0xff]  ;;  %v11866_v46 = vpop.permute.xlu1 %8689 }
 0x46b   : > { %7962 = vmatprep.subr.bf16.mxu0 %v13162_v3  ;;  %v4038_v33 = vmul.f32 %v9642_v30, %v4013_v51  ;;  %v4462_v19 = vsel %vm326_vm0, %v4037_v36, %v8667_v8  ;;  %v4016_v8 = vld [vmem:[#allocation2 + $0x49] sm:$0xff] }
 0x46c   : > { %v4487_v1 = vsel %vm1587_vm10, %v4462_v19, %v11706_v25  ;;  %v4040_v25 = vmul.f32 %v9668_v53, %v4015_v62  ;;  %v8681_v19 = vunpack.i.l.bf16 %v11775_v14 }
 0x46d   : > { %4682 = vmatmul.mubr.f32.gmra.mrb[106].mxu0 %v4484_v10  ;;  %v4463_v60 = vsel %vm326_vm0, %v4038_v33, %v8671_v6  ;;  %v4039_v10 = vmul.f32 %v9660_v55, %v4014_v16  ;;  %v4041_v6 = vmul.f32 %v9707_v34, %v4016_v8  ;;  %v4017_v33 = vld [vmem:[#allocation2 + $0x51] sm:$0xff]  ;;  %v4020_v8 = vld [vmem:[#allocation2 + $0x69] sm:$0xff] }
 0x46e   : > { %7107 = vmatprep.mubr.msk.f32.mxu0 %vm1645_vm8, %v4510_v40  ;;  %7964 = vmatpush3.bf16.msra.mxu0 %v11259_v0  ;;  %v11874_v40 = vpop.permute.xlu0 %4310  ;;  %v4488_v63 = vsel %vm1587_vm10, %v4463_v60, %v11722_v32 }
 0x46f   : > { %7965 = vmatprep.subr.bf16.mxu0 %v13162_v3  ;;  %v4464_v51 = vsel %vm326_vm0, %v4039_v10, %v8672_v31  ;;  %v4042_v31 = vmul.f32 %v9804_v54, %v4017_v33 }
 0x470   : > { %v4489_v36 = vsel %vm1587_vm10, %v4464_v51, %v11736_v47 }
 0x471   : > { %4687 = vmatmul.mubr.f32.gmra.mrb[108].mxu0 %v4485_v21  ;;  %v8676_v21 = vunpack.i.l.bf16 %v11745_v13  ;;  %v4467_v62 = vsel %vm326_vm0, %v4042_v31, %v8681_v19 }
 0x472   : > { %7108 = vmatprep.mubr.msk.f32.mxu0 %vm1645_vm8, %v4511_v57  ;;  %7967 = vmatpush3.bf16.msra.mxu0 %v11271_v7  ;;  %v11886_v57 = vpop.permute.xlu1 %4410  ;;  %v11891_v22 = vpop.permute.xlu0 %4312 }
 0x475   : > { %4692 = vmatmul.mubr.f32.gmra.mrb[110].mxu0 %v4486_v20  ;;  %v8677_v20 = vunpack.i.h.bf16 %v11745_v13  ;;  %v4516_v13 = vsel %vm1613_vm9, %v11766_v59, %v11768_v39  ;;  %v4517_v39 = vsel %vm1613_vm9, %v11782_v24, %v11789_v61 }
 0x476   : > { %7109 = vmatprep.mubr.msk.f32.mxu0 %vm1645_vm8, %v4512_v38  ;;  %v11902_v32 = vpop.permute.xlu1 %4412  ;;  %v4465_v38 = vsel %vm326_vm0, %v4040_v25, %v8676_v21  ;;  %v11910_v16 = vpop.permute.xlu0 %8694  ;;  %v4492_v21 = vsel %vm1587_vm10, %v4467_v62, %v11782_v24  ;;  %v4023_v62 = vld [vmem:[#allocation2 + $0x81] sm:$0xff] }
 0x477   : > { %v4490_v47 = vsel %vm1587_vm10, %v4465_v38, %v11752_v49  ;;  %v4466_v29 = vsel %vm326_vm0, %v4041_v6, %v8677_v20  ;;  %v8687_v20 = vunpack.i.h.bf16 %v11812_v56  ;;  %v4045_v38 = vmul.f32 %v9876_v9, %v4020_v8  ;;  %v4021_v6 = vld [vmem:[#allocation2 + $0x71] sm:$0xff] }
 0x478   : > { %v4491_v10 = vsel %vm1587_vm10, %v4466_v29, %v11766_v59  ;;  %v4518_v59 = vsel %vm1613_vm9, %v11791_v23, %v11800_v37  ;;  %v4519_v37 = vsel %vm1613_vm9, %v11823_v41, %v11832_v17  ;;  %v8691_v17 = vunpack.i.l.bf16 %v11866_v46  ;;  %v4022_v29 = vld [vmem:[#allocation2 + $0x79] sm:$0xff] }
 0x479   : > { %4697 = vmatmul.mubr.f32.gmra.mrb[112].mxu0 %v4487_v1  ;;  %v8682_v1 = vunpack.i.h.bf16 %v11775_v14  ;;  %v8686_v14 = vunpack.i.l.bf16 %v11812_v56  ;;  %v4520_v56 = vsel %vm1613_vm9, %v11847_v18, %v11851_v58  ;;  %v4046_v19 = vmul.f32 %v9934_v43, %v4021_v6 }
 0x47a   : > { %7110 = vmatprep.mubr.msk.f32.mxu0 %vm1645_vm8, %v4513_v2  ;;  %v4018_v2 = vld [vmem:[#allocation2 + $0x59] sm:$0xff]  ;;  %v11921_v60 = vpop.permute.xlu1 %4314  ;;  %v4415_v49 = vpop.permute.xlu0 %4414  ;;  %v4521_v58 = vsel %vm1613_vm9, %v11874_v40, %v11886_v57  ;;  %v13320_v57 = vld [vmem:[#allocation38_spill] sm:$0xff] }
 0x47d   : > { %4702 = vmatmul.mubr.f32.gmra.mrb[114].mxu0 %v4488_v63  ;;  %v4043_v63 = vmul.f32 %v9807_v12, %v4018_v2 }
 0x47e   : > { %7111 = vmatprep.mubr.msk.f32.mxu0 %vm1645_vm8, %v4514_v48  ;;  %v4019_v48 = vld [vmem:[#allocation2 + $0x61] sm:$0xff]  ;;  %v11935_v51 = vpop.permute.xlu1 %4316 }
 0x47f   : > { %v4468_v61 = vsel %vm326_vm0, %v4043_v63, %v8682_v1  ;;  %v4044_v25 = vmul.f32 %v9832_v28, %v4019_v48  ;;  %v4471_v1 = vsel %vm326_vm0, %v4046_v19, %v8691_v17  ;;  %v4026_v17 = vld [vmem:[#allocation2 + $0x99] sm:$0xff] }
 0x480   : > { %v4493_v24 = vsel %vm1587_vm10, %v4468_v61, %v11791_v23  ;;  %v4496_v63 = vsel %vm1587_vm10, %v4471_v1, %v11874_v40  ;;  %v8697_v40 = vunpack.i.h.bf16 %v11910_v16 }
 0x481   : > { %4707 = vmatmul.mubr.f32.gmra.mrb[116].mxu0 %v4489_v36  ;;  %v4417_v36 = vpop.permute.xlu0 %4416 }
 0x482   : > { %7112 = vmatprep.mubr.msk.f32.mxu0 %vm1645_vm8, %v4515_v35  ;;  %v4469_v35 = vsel %vm326_vm0, %v4044_v25, %v8686_v14  ;;  %v11952_v33 = vpop.permute.xlu1 %8699 }
 0x483   : > { %v4494_v23 = vsel %vm1587_vm10, %v4469_v35, %v11823_v41  ;;  %v8692_v41 = vunpack.i.h.bf16 %v11866_v46  ;;  %v8696_v46 = vunpack.i.l.bf16 %v11910_v16  ;;  %v8701_v16 = vunpack.i.l.bf16 %v11952_v33 }
 0x485   : > { %4712 = vmatmul.mubr.f32.gmra.mrb[118].mxu0 %v4490_v47  ;;  %v4319_v47 = vpop.permute.xlu0 %4318 }
 0x486   : > { %7113 = vmatprep.mubr.msk.f32.mxu0 %vm1645_vm8, %v4516_v13  ;;  %v4470_v13 = vsel %vm326_vm0, %v4045_v38, %v8687_v20  ;;  %v4419_v2 = vpop.permute.xlu1 %4418 }
 0x487   : > { %v4495_v31 = vsel %vm1587_vm10, %v4470_v13, %v11847_v18  ;;  %v4522_v18 = vsel %vm1613_vm9, %v11891_v22, %v11902_v32  ;;  %v4523_v32 = vsel %vm1613_vm9, %v11921_v60, %v4415_v49 }
 0x489   : > { %4717 = vmatmul.mubr.f32.gmra.mrb[120].mxu0 %v4491_v10  ;;  %v4321_v10 = vpop.permute.xlu0 %4320 }
 0x48a   : > { %7114 = vmatprep.mubr.msk.f32.mxu0 %vm1645_vm8, %v4517_v39  ;;  %v4047_v39 = vmul.f32 %v9978_v45, %v4022_v29  ;;  %v4421_v14 = vpop.permute.xlu1 %4420  ;;  %v4525_v29 = vsel %vm1613_vm9, %v4319_v47, %v4419_v2 }
 0x48c   : > { %v4472_v48 = vsel %vm326_vm0, %v4047_v39, %v8692_v41 }
 0x48d   : > { %4722 = vmatmul.mubr.f32.gmra.mrb[122].mxu0 %v4492_v21  ;;  %v4048_v21 = vmul.f32 %v13320_v57, %v4023_v62  ;;  %v8705_v61 = vpop.permute.xlu0 %8704  ;;  %v4497_v25 = vsel %vm1587_vm10, %v4472_v48, %v11891_v22  ;;  %v4524_v22 = vsel %vm1613_vm9, %v11935_v51, %v4417_v36  ;;  %v4526_v62 = vsel %vm1613_vm9, %v4321_v10, %v4421_v14 }
 0x48e   : > { %7115 = vmatprep.mubr.msk.f32.mxu0 %vm1645_vm8, %v4518_v59  ;;  %v4024_v59 = vld [vmem:[#allocation2 + $0x89] sm:$0xff]  ;;  %v4323_v35 = vpop.permute.xlu1 %4322 }
 0x48f   : > { %v4473_v8 = vsel %vm326_vm0, %v4048_v21, %v8696_v46  ;;  %v4028_v46 = vld [vmem:[#allocation2 + $0xa9] sm:$0xff] }
 0x490   : > { %v4498_v38 = vsel %vm1587_vm10, %v4473_v8, %v11921_v60  ;;  %v8702_v60 = vunpack.i.h.bf16 %v11952_v33 }
 0x491   : > { %4727 = vmatmul.mubr.f32.gmra.mrb[124].mxu0 %v4493_v24  ;;  %v13321_v24 = vld [vmem:[#allocation40_spill] sm:$0xff]  ;;  %v4423_v6 = vpop.permute.xlu0 %4422 }
 0x492   : > { %7116 = vmatprep.mubr.msk.f32.mxu0 %vm1645_vm8, %v4519_v37  ;;  %v4049_v20 = vmul.f32 %v13321_v24, %v4024_v59  ;;  %v4025_v37 = vld [vmem:[#allocation2 + $0x91] sm:$0xff]  ;;  %v4325_v19 = vpop.permute.xlu1 %4324  ;;  %v8707_v59 = vunpack.i.h.bf16 %v8705_v61 }
 0x494   : > { %v4474_v49 = vsel %vm326_vm0, %v4049_v20, %v8697_v40  ;;  %v13325_v40 = vld [vmem:[#allocation51_spill] sm:$0xff] }
 0x495   : > { %4732 = vmatmul.mubr.f32.gmra.mrb[126].mxu0 %v4494_v23  ;;  %v13322_v23 = vld [vmem:[#allocation46_spill] sm:$0xff]  ;;  %v4499_v13 = vsel %vm1587_vm10, %v4474_v49, %v11935_v51  ;;  %v4425_v1 = vpop.permute.xlu0 %4424  ;;  %v4053_v14 = vmul.f32 %v13325_v40, %v4028_v46 }
 0x496   : > { %7117 = vmatprep.mubr.msk.f32.mxu0 %vm1645_vm8, %v4520_v56  ;;  %v4050_v56 = vmul.f32 %v13322_v23, %v4025_v37  ;;  %v8710_v2 = vpop.permute.xlu1 %8709 }
 0x498   : > { %v4475_v36 = vsel %vm326_vm0, %v4050_v56, %v8701_v16 }
 0x499   : > { %4737 = vmatmul.mubr.f32.gmra.mrb[128].mxu0 %v4495_v31  ;;  %v13323_v31 = vld [vmem:[#allocation48_spill] sm:$0xff]  ;;  %v4500_v39 = vsel %vm1587_vm10, %v4475_v36, %v4319_v47  ;;  %v4327_v48 = vpop.permute.xlu0 %4326 }
 0x49a   : > { %7118 = vmatprep.mubr.msk.f32.mxu0 %vm1645_vm8, %v4521_v58  ;;  %v4051_v41 = vmul.f32 %v13323_v31, %v4026_v17  ;;  %v4027_v58 = vld [vmem:[#allocation2 + $0xa1] sm:$0xff]  ;;  %v4427_v20 = vpop.permute.xlu1 %4426  ;;  %v8712_v17 = vunpack.i.h.bf16 %v8710_v2 }
 0x49c   : > { %v4476_v51 = vsel %vm326_vm0, %v4051_v41, %v8702_v60  ;;  %v13327_v60 = vld [vmem:[#allocation58_spill] sm:$0xff]  ;;  %v4031_v41 = vld [vmem:[#allocation2 + $0xc1] sm:$0xf] }
 0x49d   : > { %4742 = vmatmul.mubr.f32.gmra.mrb[130].mxu0 %v4496_v63  ;;  %v8706_v63 = vunpack.i.l.bf16 %v8705_v61  ;;  %v4501_v21 = vsel %vm1587_vm10, %v4476_v51, %v4321_v10  ;;  %v4329_v37 = vpop.permute.xlu0 %4328  ;;  %v8711_v10 = vunpack.i.l.bf16 %v8710_v2  ;;  %v13326_v61 = vld [vmem:[#allocation55_spill] sm:$0xff]  ;;  %v1061_v2 = vld [vmem:[%s12899_s6] sm:$0x1] }
 0x49e   : > { %7119 = vmatprep.mubr.msk.f32.mxu0 %vm1645_vm8, %v4522_v18  ;;  %v13324_v18 = vld [vmem:[#allocation50_spill] sm:$0xff]  ;;  %v4429_v36 = vpop.permute.xlu1 %4428 }
 0x49f   : > { %v4052_v33 = vmul.f32 %v13324_v18, %v4027_v58 }
 0x4a1   : > { %4747 = vmatmul.mubr.f32.gmra.mrb[132].mxu0 %v4497_v25  ;;  %v4527_v25 = vsel %vm1613_vm9, %v4323_v35, %v4423_v6  ;;  %v4477_v47 = vsel %vm326_vm0, %v4052_v33, %v8706_v63  ;;  %v4030_v6 = vld [vmem:[#allocation2 + $0xb9] sm:$0xff]  ;;  %v4231_v56 = vpop.permute.xlu0 %4230 }
 0x4a2   : > { %7120 = vmatprep.mubr.msk.f32.mxu0 %vm1645_vm8, %v4523_v32  ;;  %v4029_v32 = vld [vmem:[#allocation2 + $0xb1] sm:$0xff]  ;;  %v4502_v8 = vsel %vm1587_vm10, %v4477_v47, %v4323_v35  ;;  %v4529_v35 = vsel %vm1613_vm9, %v4327_v48, %v4427_v20  ;;  %v4331_v51 = vpop.permute.xlu1 %4330 }
 0x4a3   : > { %v4054_v16 = vmul.f32 %v13326_v61, %v4029_v32  ;;  %v13328_v47 = vld [vmem:[#allocation7_spill] sm:$0xff] }
 0x4a5   : > { %4752 = vmatmul.mubr.f32.gmra.mrb[134].mxu0 %v4498_v38  ;;  %v4528_v38 = vsel %vm1613_vm9, %v4325_v19, %v4425_v1  ;;  %v4530_v1 = vsel %vm1613_vm9, %v4329_v37, %v4429_v36 }
 0x4a6   : > { %7121 = vmatprep.mubr.msk.f32.mxu0 %vm1645_vm8, %v4524_v22  ;;  %v4478_v22 = vsel %vm326_vm0, %v4053_v14, %v8707_v59  ;;  %v3663_v14 = vsub.s32 0, %v13328_v47 }
 0x4a7   : > { %v4503_v49 = vsel %vm1587_vm10, %v4478_v22, %v4325_v19 }
 0x4a8   : > { %v12047_v32 = vrot.slane %v1061_v2, %v3663_v14 }
 0x4a9   : > { %4757 = vmatmul.mubr.f32.gmra.mrb[136].mxu0 %v4499_v13  ;;  %v4479_v13 = vsel %vm326_vm0, %v4054_v16, %v8711_v10 }
 0x4aa   : > { %7122 = vmatprep.mubr.msk.f32.mxu0 %vm1645_vm8, %v4525_v29  ;;  %v4055_v29 = vmul.f32 %v13327_v60, %v4030_v6  ;;  %v4504_v58 = vsel %vm1587_vm10, %v4479_v13, %v4327_v48  ;;  %13329 = vst [vmem:[#allocation59_spill] sm:$0xff] %v12047_v32 }
 0x4ac   : > { %v4480_v19 = vsel %vm326_vm0, %v4055_v29, %v8712_v17 }
 0x4ad   : > { %4762 = vmatmul.mubr.f32.gmra.mrb[138].mxu0 %v4500_v39  ;;  %v4056_v39 = vmul.f32 %v13161_v52, %v4031_v41  ;;  %v4505_v63 = vsel %vm1587_vm10, %v4480_v19, %v4329_v37 }
 0x4ae   : > { %7123 = vmatprep.mubr.msk.f32.mxu0 %vm1645_vm8, %v4526_v62  ;;  %v4431_v62 = vpop.permute.xlu0 %4430 }
 0x4af   : > { %v4481_v33 = vsel %vm326_vm0, %v4056_v39, %v4231_v56  ;;  %v4531_v46 = vsel %vm1613_vm9, %v4331_v51, %v4431_v62 }
 0x4b0   : > { %v4506_v48 = vsel %vm1587_vm10, %v4481_v33, %v4331_v51 }
 0x4b1   : > { %4767 = vmatmul.mubr.f32.gmra.mrb[140].mxu0 %v4501_v21 }
 0x4b2   : > { %7124 = vmatprep.mubr.msk.f32.mxu0 %vm1645_vm8, %v4527_v25 }
 0x4b5   : > { %4772 = vmatmul.mubr.f32.gmra.mrb[142].mxu0 %v4502_v8 }
 0x4b6   : > { %7125 = vmatprep.mubr.msk.f32.mxu0 %vm1645_vm8, %v4528_v38 }
 0x4b9   : > { %4777 = vmatmul.mubr.f32.gmra.mrb[144].mxu0 %v4503_v49 }
 0x4ba   : > { %7126 = vmatprep.mubr.msk.f32.mxu0 %vm1645_vm8, %v4529_v35 }
 0x4bd   : > { %4782 = vmatmul.mubr.f32.gmra.mrb[146].mxu0 %v4504_v58 }
 0x4be   : > { %7127 = vmatprep.mubr.msk.f32.mxu0 %vm1645_vm8, %v4530_v1 }
 0x4c1   : > { %4787 = vmatmul.mubr.f32.gmra.mrb[148].mxu0 %v4505_v63 }
 0x4c2   : > { %7128 = vmatprep.mubr.msk.f32.mxu0 %vm1645_vm8, %v4531_v46 }
 0x4c4   : > { %v3655_v21 = vpop.f32.mrb[50].mxu0 }
 0x4c5   : > { %v3656_v59 = vadd.f32 %v3655_v21, %v1061_v2  ;;  %v7455_v25 = vpop.f32.mrb[51].mxu0  ;;  %4792 = vmatmul.mubr.f32.gmra.mrb[150].mxu0 %v4506_v48 }
 0x4c6   : > { %7665 = vmatprep.mubr.msk.f32.mxu0 %vm9243_vm2, %v13176_v26 }
 0x4c7   : > { %3659 = vst [vmem:[%s12043_s21] sm:$0x1] %v3656_v59 }
 0x4d4   : > { %v3807_v8 = vpop.f32.mrb[52].mxu0 }
 0x4d5   : > { %v3808_v20 = vadd.f32 %v3807_v8, %v12047_v32  ;;  %v7474_v37 = vpop.f32.mrb[53].mxu0 }
 0x4d7   : > { %3931 = vst [vmem:[%s12054_s12] sm:$0xff] %v3808_v20 }
 0x4d8   : > { %v3812_v38 = vpop.f32.mrb[54].mxu0 }
 0x4d9   : > { %v3813_v22 = vadd.f32 %v3812_v38, %v12047_v32  ;;  %v7477_v10 = vpop.f32.mrb[55].mxu0 }
 0x4db   : > { %3932 = vst [vmem:[%s12054_s12 + $0x8] sm:$0xff] %v3813_v22 }
 0x4dc   : > { %v3817_v16 = vpop.f32.mrb[56].mxu0 }
 0x4dd   : > { %v3818_v6 = vadd.f32 %v3817_v16, %v12047_v32  ;;  %v7480_v49 = vpop.f32.mrb[57].mxu0 }
 0x4df   : > { %3933 = vst [vmem:[%s12054_s12 + $0x10] sm:$0xff] %v3818_v6 }
 0x4e0   : > { %v3822_v56 = vpop.f32.mrb[58].mxu0 }
 0x4e1   : > { %v3823_v17 = vadd.f32 %v3822_v56, %v12047_v32  ;;  %v7483_v35 = vpop.f32.mrb[59].mxu0 }
 0x4e3   : > { %3934 = vst [vmem:[%s12054_s12 + $0x18] sm:$0xff] %v3823_v17 }
 0x4e4   : > { %v3827_v13 = vpop.f32.mrb[60].mxu0 }
 0x4e5   : > { %v3828_v29 = vadd.f32 %v3827_v13, %v12047_v32  ;;  %v7486_v36 = vpop.f32.mrb[61].mxu0 }
 0x4e7   : > { %3935 = vst [vmem:[%s12054_s12 + $0x20] sm:$0xff] %v3828_v29 }
 0x4e8   : > { %v3832_v41 = vpop.f32.mrb[62].mxu0 }
 0x4e9   : > { %v3833_v58 = vadd.f32 %v3832_v41, %v12047_v32  ;;  %v7489_v1 = vpop.f32.mrb[63].mxu0 }
 0x4eb   : > { %3936 = vst [vmem:[%s12054_s12 + $0x28] sm:$0xff] %v3833_v58 }
 0x4ec   : > { %v3837_v19 = vpop.f32.mrb[64].mxu0 }
 0x4ed   : > { %v3838_v39 = vadd.f32 %v3837_v19, %v12047_v32  ;;  %v7492_v62 = vpop.f32.mrb[65].mxu0 }
 0x4ef   : > { %3937 = vst [vmem:[%s12054_s12 + $0x30] sm:$0xff] %v3838_v39 }
 0x4f0   : > { %v3842_v51 = vpop.f32.mrb[66].mxu0 }
 0x4f1   : > { %v3843_v63 = vadd.f32 %v3842_v51, %v12047_v32  ;;  %v7495_v33 = vpop.f32.mrb[67].mxu0 }
 0x4f3   : > { %3938 = vst [vmem:[%s12054_s12 + $0x38] sm:$0xff] %v3843_v63 }
 0x4f4   : > { %v3847_v46 = vpop.f32.mrb[68].mxu0 }
 0x4f5   : > { %v3848_v2 = vadd.f32 %v3847_v46, %v12047_v32  ;;  %v7498_v48 = vpop.f32.mrb[69].mxu0 }
 0x4f7   : > { %3939 = vst [vmem:[%s12054_s12 + $0x40] sm:$0xff] %v3848_v2 }
 0x4f8   : > { %v3852_v21 = vpop.f32.mrb[70].mxu0 }
 0x4f9   : > { %v3853_v59 = vadd.f32 %v3852_v21, %v12047_v32  ;;  %v7501_v25 = vpop.f32.mrb[71].mxu0 }
 0x4fb   : > { %3940 = vst [vmem:[%s12054_s12 + $0x48] sm:$0xff] %v3853_v59 }
 0x4fc   : > { %v3857_v47 = vpop.f32.mrb[72].mxu0 }
 0x4fd   : > { %v3858_v14 = vadd.f32 %v3857_v47, %v12047_v32  ;;  %v7504_v8 = vpop.f32.mrb[73].mxu0 }
 0x4ff   : > { %3941 = vst [vmem:[%s12054_s12 + $0x50] sm:$0xff] %v3858_v14 }
 0x500   : > { %v3862_v20 = vpop.f32.mrb[74].mxu0 }
 0x501   : > { %v3863_v37 = vadd.f32 %v3862_v20, %v12047_v32  ;;  %v7507_v38 = vpop.f32.mrb[75].mxu0 }
 0x503   : > { %3942 = vst [vmem:[%s12054_s12 + $0x58] sm:$0xff] %v3863_v37 }
 0x504   : > { %v3867_v22 = vpop.f32.mrb[76].mxu0 }
 0x505   : > { %v3868_v10 = vadd.f32 %v3867_v22, %v12047_v32  ;;  %v7510_v16 = vpop.f32.mrb[77].mxu0 }
 0x507   : > { %3943 = vst [vmem:[%s12054_s12 + $0x60] sm:$0xff] %v3868_v10 }
 0x508   : > { %v3872_v6 = vpop.f32.mrb[78].mxu0 }
 0x509   : > { %v3873_v49 = vadd.f32 %v3872_v6, %v12047_v32  ;;  %v7513_v56 = vpop.f32.mrb[79].mxu0 }
 0x50b   : > { %3944 = vst [vmem:[%s12054_s12 + $0x68] sm:$0xff] %v3873_v49 }
 0x50c   : > { %v3877_v17 = vpop.f32.mrb[80].mxu0 }
 0x50d   : > { %v3878_v35 = vadd.f32 %v3877_v17, %v12047_v32  ;;  %v7516_v13 = vpop.f32.mrb[81].mxu0 }
 0x50e   : > { %v12109_v13 = vld [vmem:[%s12895_s2] ss:$0 sm:$0xff] }
 0x50f   : > { %3945 = vst [vmem:[%s12054_s12 + $0x70] sm:$0xff] %v3878_v35 }
 0x510   : > { %v3882_v29 = vpop.f32.mrb[82].mxu0 }
 0x511   : > { %v3883_v36 = vadd.f32 %v3882_v29, %v12047_v32  ;;  %v7519_v41 = vpop.f32.mrb[83].mxu0 }
 0x513   : > { %3946 = vst [vmem:[%s12054_s12 + $0x78] sm:$0xff] %v3883_v36 }
 0x514   : > { %v3887_v58 = vpop.f32.mrb[84].mxu0 }
 0x515   : > { %v3888_v1 = vadd.f32 %v3887_v58, %v12047_v32  ;;  %v7522_v19 = vpop.f32.mrb[85].mxu0 }
 0x517   : > { %3947 = vst [vmem:[%s12054_s12 + $0x80] sm:$0xff] %v3888_v1 }
 0x518   : > { %v3892_v39 = vpop.f32.mrb[86].mxu0 }
 0x519   : > { %v3893_v62 = vadd.f32 %v3892_v39, %v12047_v32  ;;  %v7525_v51 = vpop.f32.mrb[87].mxu0 }
 0x51b   : > { %3948 = vst [vmem:[%s12054_s12 + $0x88] sm:$0xff] %v3893_v62 }
 0x51c   : > { %v3897_v63 = vpop.f32.mrb[88].mxu0 }
 0x51d   : > { %v3898_v33 = vadd.f32 %v3897_v63, %v12047_v32  ;;  %v7528_v46 = vpop.f32.mrb[89].mxu0 }
 0x51f   : > { %3949 = vst [vmem:[%s12054_s12 + $0x90] sm:$0xff] %v3898_v33 }
 0x520   : > { %v3902_v2 = vpop.f32.mrb[90].mxu0 }
 0x521   : > { %v3903_v48 = vadd.f32 %v3902_v2, %v12047_v32  ;;  %v7531_v21 = vpop.f32.mrb[91].mxu0 }
 0x523   : > { %3950 = vst [vmem:[%s12054_s12 + $0x98] sm:$0xff] %v3903_v48 }
 0x524   : > { %v3907_v59 = vpop.f32.mrb[92].mxu0 }
 0x525   : > { %v3908_v25 = vadd.f32 %v3907_v59, %v12047_v32  ;;  %v7534_v47 = vpop.f32.mrb[93].mxu0 }
 0x526   : > { %v4897_v47 = vld [vmem:[#allocation3 + $0x2] sm:$0xff] }
 0x527   : > { %3951 = vst [vmem:[%s12054_s12 + $0xa0] sm:$0xff] %v3908_v25 }
 0x528   : > { %v3912_v14 = vpop.f32.mrb[94].mxu0 }
 0x529   : > { %v3913_v8 = vadd.f32 %v3912_v14, %v12047_v32  ;;  %v7537_v20 = vpop.f32.mrb[95].mxu0  ;;  %v4922_v14 = vld [vmem:[#allocation3 + $0x3] sm:$0xff] }
 0x52b   : > { %3952 = vst [vmem:[%s12054_s12 + $0xa8] sm:$0xff] %v3913_v8 }
 0x52c   : > { %v3917_v37 = vpop.f32.mrb[96].mxu0 }
 0x52d   : > { %v3918_v38 = vadd.f32 %v3917_v37, %v12047_v32  ;;  %v7540_v22 = vpop.f32.mrb[97].mxu0  ;;  %v13331_v37 = vld [vmem:[#allocation15_spill] sm:$0xff] }
 0x52f   : > { %3953 = vst [vmem:[%s12054_s12 + $0xb0] sm:$0xff] %v3918_v38 }
 0x530   : > { %v3922_v10 = vpop.f32.mrb[98].mxu0 }
 0x531   : > { %v3923_v16 = vadd.f32 %v3922_v10, %v12047_v32  ;;  %v7543_v6 = vpop.f32.mrb[99].mxu0 }
 0x532   : > { %v4947_v6 = vmul.f32 %v13331_v37, %v4922_v14 }
 0x533   : > { %3954 = vst [vmem:[%s12054_s12 + $0xb8] sm:$0xff] %v3923_v16 }
 0x534   : > { %v3927_v49 = vpop.f32.mrb[100].mxu0 }
 0x535   : > { %v3928_v56 = vadd.f32 %v3927_v49, %v12047_v32  ;;  %v7546_v17 = vpop.f32.mrb[101].mxu0 }
 0x537   : > { %3955 = vst [vmem:[%s12054_s12 + $0xc0] sm:$0xf] %v3928_v56 }
 0x538   : > { %v4673_v35 = vpop.f32.mrb[102].mxu0 }
 0x539   : > { %v4674_v29 = vadd.f32 %v12109_v13, %v4673_v35  ;;  %v4675_v36 = vpop.f32.mrb[103].mxu0 }
 0x53b   : > { %v4797_v41 = vmax.f32 %v4674_v29, 0.0 }
 0x53c   : > { %v4678_v58 = vpop.f32.mrb[104].mxu0 }
 0x53d   : > { %4822 = vst.msk [vmem:[#allocation3 + $0x10] sm:$0xff] %vm333_vm7, %v4797_v41  ;;  %v4679_v1 = vadd.f32 %v12109_v13, %v4678_v58  ;;  %v4680_v19 = vpop.f32.mrb[105].mxu0 }
 0x53f   : > { %v4798_v39 = vmax.f32 %v4679_v1, 0.0 }
 0x540   : > { %v4683_v62 = vpop.f32.mrb[106].mxu0 }
 0x541   : > { %4823 = vst.msk [vmem:[#allocation3 + $0x18] sm:$0xff] %vm333_vm7, %v4798_v39  ;;  %v4684_v51 = vadd.f32 %v12109_v13, %v4683_v62  ;;  %v4685_v63 = vpop.f32.mrb[107].mxu0 }
 0x543   : > { %v4799_v33 = vmax.f32 %v4684_v51, 0.0  ;;  %v13333_v51 = vld [vmem:[#allocation14_spill] sm:$0xff] }
 0x544   : > { %v4688_v46 = vpop.f32.mrb[108].mxu0  ;;  %v4972_v22 = vld [vmem:[#allocation3 + $0xf] sm:$0xff] }
 0x545   : > { %4824 = vst.msk [vmem:[#allocation3 + $0x20] sm:$0xff] %vm333_vm7, %v4799_v33  ;;  %v4689_v2 = vadd.f32 %v12109_v13, %v4688_v46  ;;  %v4690_v48 = vpop.f32.mrb[109].mxu0  ;;  %v4997_v58 = vmul.f32 %v13264_v15, %v4972_v22  ;;  %v4923_v1 = vld [vmem:[#allocation3 + $0xb] sm:$0xff] }
 0x546   : > { %v4898_v14 = vld [vmem:[#allocation3 + $0xa] sm:$0xff] }
 0x547   : > { %v4800_v21 = vmax.f32 %v4689_v2, 0.0  ;;  %v5022_v0 = vld [vmem:[#allocation3 + $0x10] sm:$0xff] }
 0x548   : > { %v4693_v59 = vpop.f32.mrb[110].mxu0  ;;  %v12118_v25 = vld [vmem:[#allocation3 + $0x11] sm:$0xff] }
 0x549   : > { %4825 = vst.msk [vmem:[#allocation3 + $0x28] sm:$0xff] %vm333_vm7, %v4800_v21  ;;  %v4694_v8 = vadd.f32 %v12109_v13, %v4693_v59  ;;  %v4695_v20 = vpop.f32.mrb[111].mxu0  ;;  %v5050_v38 = vmul.f32 %v13331_v37, %v12118_v25  ;;  %v4948_v59 = vmul.f32 %v13333_v51, %v4923_v1 }
 0x54b   : > { %v4801_v10 = vmax.f32 %v4694_v8, 0.0  ;;  %v8713_v16 = vpack.i.bf16 %v4897_v47, %v5050_v38  ;;  %v4973_v8 = vld [vmem:[#allocation3 + $0x17] sm:$0xff] }
 0x54c   : > { %v4698_v49 = vpop.f32.mrb[112].mxu0  ;;  %v5075_v56 = vld [vmem:[#allocation3 + $0x1d] sm:$0xff] }
 0x54d   : > { %v5125_v17 = vld [vmem:[#allocation3 + $0x1e] sm:$0xff]  ;;  %4826 = vst.msk [vmem:[#allocation3 + $0x30] sm:$0xff] %vm333_vm7, %v4801_v10  ;;  %v4699_v29 = vadd.f32 %v12109_v13, %v4698_v49  ;;  %v4700_v36 = vpop.f32.mrb[113].mxu0  ;;  %8714 = vrot.lane.b32.xlu1 %v8713_v16, %s13332_s24  ;;  %v5100_v41 = vmul.f32 %v13264_v15, %v5075_v56  ;;  %v13335_v10 = vld [vmem:[#allocation19_spill] sm:$0xff] }
 0x54e   : > { %v4850_v35 = vld [vmem:[#allocation3 + $0x19] sm:$0xff]  ;;  %v8718_v62 = vpack.i.bf16 %v4997_v58, %v5125_v17 }
 0x54f   : > { %v4802_v19 = vmax.f32 %v4699_v29, 0.0  ;;  %v8723_v39 = vpack.i.bf16 %v4947_v6, %v5100_v41  ;;  %v5051_v63 = vmul.f32 %v13333_v51, %v4850_v35  ;;  %v4998_v29 = vmul.f32 %v13266_v11, %v4973_v8  ;;  %v4974_v36 = vld [vmem:[#allocation3 + $0x1f] sm:$0xff]  ;;  %v4899_v41 = vld [vmem:[#allocation3 + $0x12] sm:$0xff] }
 0x550   : > { %v4703_v33 = vpop.f32.mrb[114].mxu0  ;;  %v5076_v46 = vld [vmem:[#allocation3 + $0x25] sm:$0xff]  ;;  %v4924_v58 = vld [vmem:[#allocation3 + $0x13] sm:$0xff]  ;;  %v4925_v8 = vld [vmem:[#allocation3 + $0x1b] sm:$0xff] }
 0x551   : > { %v4851_v2 = vld [vmem:[#allocation3 + $0x21] sm:$0xff]  ;;  %4827 = vst.msk [vmem:[#allocation3 + $0x38] sm:$0xff] %vm333_vm7, %v4802_v19  ;;  %v4704_v48 = vadd.f32 %v12109_v13, %v4703_v33  ;;  %8724 = vrot.lane.b32.xlu0 %v8723_v39, %s13334_s19  ;;  %8719 = vrot.lane.b32.xlu1 %v8718_v62, %s9240_s26  ;;  %v4705_v21 = vpop.f32.mrb[115].mxu0  ;;  %v5101_v47 = vmul.f32 %v13266_v11, %v5076_v46 }
 0x552   : > { %v8728_v38 = vpack.i.bf16 %v4898_v14, %v5051_v63  ;;  %v5052_v16 = vmul.f32 %v13335_v10, %v4851_v2  ;;  %v5126_v49 = vld [vmem:[#allocation3 + $0x26] sm:$0xff]  ;;  %v4999_v46 = vmul.f32 %v13267_v5, %v4974_v36  ;;  %v4900_v36 = vld [vmem:[#allocation3 + $0x1a] sm:$0xff] }
 0x553   : > { %v4803_v20 = vmax.f32 %v4704_v48, 0.0  ;;  %v8738_v22 = vpack.i.bf16 %v4948_v59, %v5101_v47  ;;  %v8733_v19 = vpack.i.bf16 %v4998_v29, %v5126_v49  ;;  %v4949_v47 = vmul.f32 %v13335_v10, %v4924_v58 }
 0x554   : > { %v4708_v6 = vpop.f32.mrb[116].mxu0  ;;  %v5077_v56 = vld [vmem:[#allocation3 + $0x2d] sm:$0xff]  ;;  %v8743_v39 = vpack.i.bf16 %v4899_v41, %v5052_v16 }
 0x555   : > { %4828 = vst.msk [vmem:[#allocation3 + $0x40] sm:$0xff] %vm333_vm7, %v4803_v20  ;;  %v4709_v17 = vadd.f32 %v12109_v13, %v4708_v6  ;;  %8729 = vrot.lane.b32.xlu0 %v8728_v38, %s13332_s24  ;;  %8739 = vrot.lane.b32.xlu1 %v8738_v22, %s13334_s19  ;;  %v4710_v35 = vpop.f32.mrb[117].mxu0  ;;  %v5102_v62 = vmul.f32 %v13267_v5, %v5077_v56  ;;  %v5127_v63 = vld [vmem:[#allocation3 + $0x2e] sm:$0xff]  ;;  %v13336_v22 = vld [vmem:[#allocation22_spill] sm:$0xff] }
 0x556   : > { %v4852_v2 = vld [vmem:[#allocation3 + $0x29] sm:$0xff]  ;;  %v8748_v14 = vpack.i.bf16 %v4999_v46, %v5127_v63  ;;  %v4950_v29 = vmul.f32 %v13336_v22, %v4925_v8 }
 0x557   : > { %v4804_v1 = vmax.f32 %v4709_v17, 0.0  ;;  %v8753_v38 = vpack.i.bf16 %v4949_v47, %v5102_v62  ;;  %v5053_v16 = vmul.f32 %v13336_v22, %v4852_v2  ;;  %v4975_v41 = vld [vmem:[#allocation3 + $0x27] sm:$0xff] }
 0x558   : > { %v4713_v33 = vpop.f32.mrb[118].mxu0  ;;  %v5078_v48 = vld [vmem:[#allocation3 + $0x35] sm:$0xff]  ;;  %v4901_v47 = vld [vmem:[#allocation3 + $0x22] sm:$0xff] }
 0x559   : > { %4829 = vst.msk [vmem:[#allocation3 + $0x48] sm:$0xff] %vm333_vm7, %v4804_v1  ;;  %v4714_v21 = vadd.f32 %v12109_v13, %v4713_v33  ;;  %8734 = vrot.lane.b32.xlu0 %v8733_v19, %s9240_s26  ;;  %8744 = vrot.lane.b32.xlu1 %v8743_v39, %s13332_s24  ;;  %v4715_v59 = vpop.f32.mrb[119].mxu0  ;;  %v5103_v6 = vmul.f32 %v9603_v42, %v5078_v48  ;;  %v4853_v56 = vld [vmem:[#allocation3 + $0x31] sm:$0xff] }
 0x55a   : > { %v8758_v1 = vpack.i.bf16 %v4900_v36, %v5053_v16  ;;  %v13337_v39 = vld [vmem:[#allocation16_spill] sm:$0xff] }
 0x55b   : > { %v4805_v20 = vmax.f32 %v4714_v21, 0.0  ;;  %v8768_v19 = vpack.i.bf16 %v4950_v29, %v5103_v6  ;;  %v5054_v62 = vmul.f32 %v13337_v39, %v4853_v56  ;;  %v5128_v33 = vld [vmem:[#allocation3 + $0x36] sm:$0xff]  ;;  %v5000_v21 = vmul.f32 %v9603_v42, %v4975_v41 }
 0x55c   : > { %v4718_v49 = vpop.f32.mrb[120].mxu0  ;;  %v5079_v46 = vld [vmem:[#allocation3 + $0x3d] sm:$0xff]  ;;  %v4976_v59 = vld [vmem:[#allocation3 + $0x2f] sm:$0xff] }
 0x55d   : > { %4830 = vst.msk [vmem:[#allocation3 + $0x50] sm:$0xff] %vm333_vm7, %v4805_v20  ;;  %v4719_v17 = vadd.f32 %v12109_v13, %v4718_v49  ;;  %8754 = vrot.lane.b32.xlu0 %v8753_v38, %s13334_s19  ;;  %8749 = vrot.lane.b32.xlu1 %v8748_v14, %s9240_s26  ;;  %v4720_v35 = vpop.f32.mrb[121].mxu0  ;;  %v4926_v14 = vld [vmem:[#allocation3 + $0x23] sm:$0xff]  ;;  %v8763_v20 = vpack.i.bf16 %v5000_v21, %v5128_v33 }
 0x55e   : > { %v8773_v38 = vpack.i.bf16 %v4901_v47, %v5054_v62  ;;  %v5104_v16 = vmul.f32 %v9562_v4, %v5079_v46  ;;  %v5129_v6 = vld [vmem:[#allocation3 + $0x3e] sm:$0xff]  ;;  %v5001_v56 = vmul.f32 %v9562_v4, %v4976_v59  ;;  %v4951_v41 = vmul.f32 %v13337_v39, %v4926_v14  ;;  %v4902_v14 = vld [vmem:[#allocation3 + $0x2a] sm:$0xff] }
 0x55f   : > { %v4806_v58 = vmax.f32 %v4719_v17, 0.0  ;;  %v4854_v17 = vld [vmem:[#allocation3 + $0x39] sm:$0xff] }
 0x560   : > { %v4723_v63 = vpop.f32.mrb[122].mxu0  ;;  %v5080_v35 = vld [vmem:[#allocation3 + $0x45] sm:$0xff]  ;;  %v8783_v62 = vpack.i.bf16 %v4951_v41, %v5104_v16 }
 0x561   : > { %4831 = vst.msk [vmem:[#allocation3 + $0x58] sm:$0xff] %vm333_vm7, %v4806_v58  ;;  %v4724_v2 = vadd.f32 %v12109_v13, %v4723_v63  ;;  %8759 = vrot.lane.b32.xlu0 %v8758_v1, %s13332_s24  ;;  %8769 = vrot.lane.b32.xlu1 %v8768_v19, %s13334_s19  ;;  %v4725_v48 = vpop.f32.mrb[123].mxu0  ;;  %v8778_v58 = vpack.i.bf16 %v5001_v56, %v5129_v6  ;;  %v4927_v1 = vld [vmem:[#allocation3 + $0x2b] sm:$0xff]  ;;  %v13338_v63 = vld [vmem:[#allocation21_spill] sm:$0xff] }
 0x562   : > { %v5055_v33 = vmul.f32 %v13338_v63, %v4854_v17  ;;  %v5105_v46 = vmul.f32 %v9585_v27, %v5080_v35  ;;  %v4855_v48 = vld [vmem:[#allocation3 + $0x41] sm:$0xff]  ;;  %v4952_v47 = vmul.f32 %v13338_v63, %v4927_v1  ;;  %v13339_v6 = vld [vmem:[#allocation23_spill] sm:$0xff] }
 0x563   : > { %v4807_v8 = vmax.f32 %v4724_v2, 0.0  ;;  %v5130_v17 = vld [vmem:[#allocation3 + $0x46] sm:$0xff]  ;;  %v4903_v1 = vld [vmem:[#allocation3 + $0x32] sm:$0xff] }
 0x564   : > { %v4728_v49 = vpop.f32.mrb[124].mxu0  ;;  %v8798_v16 = vpack.i.bf16 %v4952_v47, %v5105_v46  ;;  %v5081_v35 = vld [vmem:[#allocation3 + $0x4d] sm:$0xff] }
 0x565   : > { %4832 = vst.msk [vmem:[#allocation3 + $0x60] sm:$0xff] %vm333_vm7, %v4807_v8  ;;  %v4729_v29 = vadd.f32 %v12109_v13, %v4728_v49  ;;  %8764 = vrot.lane.b32.xlu0 %v8763_v20, %s9240_s26  ;;  %8774 = vrot.lane.b32.xlu1 %v8773_v38, %s13332_s24  ;;  %v4730_v36 = vpop.f32.mrb[125].mxu0  ;;  %v4977_v8 = vld [vmem:[#allocation3 + $0x37] sm:$0xff]  ;;  %v8788_v38 = vpack.i.bf16 %v4902_v14, %v5055_v33  ;;  %v4856_v47 = vld [vmem:[#allocation3 + $0x49] sm:$0xff] }
 0x566   : > { %v5056_v49 = vmul.f32 %v13339_v6, %v4855_v48  ;;  %v5002_v41 = vmul.f32 %v9585_v27, %v4977_v8  ;;  %v5131_v48 = vld [vmem:[#allocation3 + $0x4e] sm:$0xff] }
 0x567   : > { %v4808_v19 = vmax.f32 %v4729_v29, 0.0 }
 0x568   : > { %v4733_v2 = vpop.f32.mrb[126].mxu0  ;;  %v8793_v33 = vpack.i.bf16 %v5002_v41, %v5130_v17  ;;  %v8803_v46 = vpack.i.bf16 %v4903_v1, %v5056_v49  ;;  %v5082_v14 = vld [vmem:[#allocation3 + $0x55] sm:$0xff] }
 0x569   : > { %4833 = vst.msk [vmem:[#allocation3 + $0x68] sm:$0xff] %vm333_vm7, %v4808_v19  ;;  %v4734_v21 = vadd.f32 %v12109_v13, %v4733_v2  ;;  %8784 = vrot.lane.b32.xlu0 %v8783_v62, %s13334_s19  ;;  %8779 = vrot.lane.b32.xlu1 %v8778_v58, %s9240_s26  ;;  %v4735_v59 = vpop.f32.mrb[127].mxu0  ;;  %v4978_v58 = vld [vmem:[#allocation3 + $0x3f] sm:$0xff]  ;;  %v4928_v19 = vld [vmem:[#allocation3 + $0x33] sm:$0xff]  ;;  %v5106_v2 = vmul.f32 %v9642_v30, %v5081_v35 }
 0x56a   : > { %v5003_v59 = vmul.f32 %v9642_v30, %v4978_v58  ;;  %v4929_v49 = vld [vmem:[#allocation3 + $0x3b] sm:$0xff]  ;;  %v4857_v58 = vld [vmem:[#allocation3 + $0x51] sm:$0xff] }
 0x56b   : > { %v4809_v20 = vmax.f32 %v4734_v21, 0.0  ;;  %v13340_v35 = vld [vmem:[#allocation24_spill] sm:$0xff] }
 0x56c   : > { %v4738_v56 = vpop.f32.mrb[128].mxu0 }
 0x56d   : > { %4834 = vst.msk [vmem:[#allocation3 + $0x70] sm:$0xff] %vm333_vm7, %v4809_v20  ;;  %v4739_v29 = vadd.f32 %v12109_v13, %v4738_v56  ;;  %8789 = vrot.lane.b32.xlu0 %v8788_v38, %s13332_s24  ;;  %8799 = vrot.lane.b32.xlu1 %v8798_v16, %s13334_s19  ;;  %v4740_v36 = vpop.f32.mrb[129].mxu0  ;;  %v4953_v38 = vmul.f32 %v13339_v6, %v4928_v19 }
 0x56e   : > { %v8808_v16 = vpack.i.bf16 %v5003_v59, %v5131_v48  ;;  %v5107_v36 = vmul.f32 %v9660_v55, %v5082_v14  ;;  %v4954_v19 = vmul.f32 %v13340_v35, %v4929_v49  ;;  %v13341_v59 = vld [vmem:[#allocation25_spill] sm:$0xff] }
 0x56f   : > { %v4810_v62 = vmax.f32 %v4739_v29, 0.0  ;;  %v8813_v17 = vpack.i.bf16 %v4953_v38, %v5106_v2  ;;  %v5057_v29 = vmul.f32 %v13340_v35, %v4856_v47  ;;  %v5058_v47 = vmul.f32 %v13341_v59, %v4857_v58 }
 0x570   : > { %v4743_v21 = vpop.f32.mrb[130].mxu0 }
 0x571   : > { %4835 = vst.msk [vmem:[#allocation3 + $0x78] sm:$0xff] %vm333_vm7, %v4810_v62  ;;  %v4744_v20 = vadd.f32 %v12109_v13, %v4743_v21  ;;  %8794 = vrot.lane.b32.xlu0 %v8793_v33, %s9240_s26  ;;  %8804 = vrot.lane.b32.xlu1 %v8803_v46, %s13332_s24  ;;  %v4745_v8 = vpop.f32.mrb[131].mxu0  ;;  %v4904_v33 = vld [vmem:[#allocation3 + $0x3a] sm:$0xff]  ;;  %v4979_v46 = vld [vmem:[#allocation3 + $0x47] sm:$0xff]  ;;  %v8828_v21 = vpack.i.bf16 %v4954_v19, %v5107_v36 }
 0x572   : > { %v8818_v48 = vpack.i.bf16 %v4904_v33, %v5057_v29  ;;  %v5083_v8 = vld [vmem:[#allocation3 + $0x5d] sm:$0xff]  ;;  %v5004_v49 = vmul.f32 %v9660_v55, %v4979_v46 }
 0x573   : > { %v4811_v56 = vmax.f32 %v4744_v20, 0.0  ;;  %v5132_v20 = vld [vmem:[#allocation3 + $0x56] sm:$0xff]  ;;  %v4930_v29 = vld [vmem:[#allocation3 + $0x43] sm:$0xff] }
 0x574   : > { %v4748_v41 = vpop.f32.mrb[132].mxu0  ;;  %v4955_v46 = vmul.f32 %v13341_v59, %v4930_v29 }
 0x575   : > { %4836 = vst.msk [vmem:[#allocation3 + $0x80] sm:$0xff] %vm333_vm7, %v4811_v56  ;;  %v4749_v1 = vadd.f32 %v12109_v13, %v4748_v41  ;;  %8814 = vrot.lane.b32.xlu0 %v8813_v17, %s13334_s19  ;;  %8809 = vrot.lane.b32.xlu1 %v8808_v16, %s9240_s26  ;;  %v4750_v62 = vpop.f32.mrb[133].mxu0  ;;  %v4980_v56 = vld [vmem:[#allocation3 + $0x4f] sm:$0xff]  ;;  %v4905_v17 = vld [vmem:[#allocation3 + $0x42] sm:$0xff]  ;;  %v8823_v41 = vpack.i.bf16 %v5004_v49, %v5132_v20 }
 0x576   : > { %v8833_v58 = vpack.i.bf16 %v4905_v17, %v5058_v47  ;;  %v5133_v62 = vld [vmem:[#allocation3 + $0x5e] sm:$0xff]  ;;  %v5005_v33 = vmul.f32 %v9668_v53, %v4980_v56  ;;  %v4931_v20 = vld [vmem:[#allocation3 + $0x4b] sm:$0xff] }
 0x577   : > { %v4812_v2 = vmax.f32 %v4749_v1, 0.0  ;;  %v5108_v1 = vmul.f32 %v9668_v53, %v5083_v8  ;;  %v4981_v17 = vld [vmem:[#allocation3 + $0x57] sm:$0xff] }
 0x578   : > { %v4753_v14 = vpop.f32.mrb[134].mxu0  ;;  %v8838_v47 = vpack.i.bf16 %v5005_v33, %v5133_v62  ;;  %v4906_v62 = vld [vmem:[#allocation3 + $0x4a] sm:$0xff] }
 0x579   : > { %4837 = vst.msk [vmem:[#allocation3 + $0x88] sm:$0xff] %vm333_vm7, %v4812_v2  ;;  %v4754_v38 = vadd.f32 %v12109_v13, %v4753_v14  ;;  %8819 = vrot.lane.b32.xlu0 %v8818_v48, %s13332_s24  ;;  %8829 = vrot.lane.b32.xlu1 %v8828_v21, %s13334_s19  ;;  %v4755_v16 = vpop.f32.mrb[135].mxu0  ;;  %v4858_v2 = vld [vmem:[#allocation3 + $0x59] sm:$0xff]  ;;  %v5084_v14 = vld [vmem:[#allocation3 + $0x65] sm:$0xff] }
 0x57a   : > { %v13342_v16 = vld [vmem:[#allocation26_spill] sm:$0xff]  ;;  %v5109_v56 = vmul.f32 %v9707_v34, %v5084_v14  ;;  %v13343_v14 = vld [vmem:[#allocation27_spill] sm:$0xff] }
 0x57b   : > { %v4813_v36 = vmax.f32 %v4754_v38, 0.0  ;;  %v8843_v38 = vpack.i.bf16 %v4955_v46, %v5108_v1  ;;  %v5059_v49 = vmul.f32 %v13342_v16, %v4858_v2  ;;  %v5006_v1 = vmul.f32 %v9707_v34, %v4981_v17  ;;  %v4932_v17 = vld [vmem:[#allocation3 + $0x53] sm:$0xff] }
 0x57c   : > { %v4758_v19 = vpop.f32.mrb[136].mxu0  ;;  %v4986_v35 = vld [vmem:[#allocation3 + $0x7f] sm:$0xff] }
 0x57d   : > { %4838 = vst.msk [vmem:[#allocation3 + $0x90] sm:$0xff] %vm333_vm7, %v4813_v36  ;;  %v4759_v48 = vadd.f32 %v12109_v13, %v4758_v19  ;;  %8824 = vrot.lane.b32.xlu0 %v8823_v41, %s9240_s26  ;;  %8834 = vrot.lane.b32.xlu1 %v8833_v58, %s13332_s24  ;;  %v4760_v21 = vpop.f32.mrb[137].mxu0  ;;  %v4859_v36 = vld [vmem:[#allocation3 + $0x61] sm:$0xff]  ;;  %v4956_v41 = vmul.f32 %v13342_v16, %v4931_v20  ;;  %v5086_v16 = vld [vmem:[#allocation3 + $0x75] sm:$0xff] }
 0x57e   : > { %v8848_v33 = vpack.i.bf16 %v4906_v62, %v5059_v49  ;;  %v5134_v21 = vld [vmem:[#allocation3 + $0x66] sm:$0xff] }
 0x57f   : > { %v4814_v8 = vmax.f32 %v4759_v48, 0.0  ;;  %v8858_v2 = vpack.i.bf16 %v4956_v41, %v5109_v56  ;;  %v5060_v48 = vmul.f32 %v13343_v14, %v4859_v36  ;;  %v8853_v49 = vpack.i.bf16 %v5006_v1, %v5134_v21  ;;  %v5135_v41 = vld [vmem:[#allocation3 + $0x6e] sm:$0xff] }
 0x580   : > { %v4763_v32 = vpop.f32.mrb[138].mxu0 }
 0x581   : > { %4839 = vst.msk [vmem:[#allocation3 + $0x98] sm:$0xff] %vm333_vm7, %v4814_v8  ;;  %8844 = vrot.lane.b32.xlu0 %v8843_v38, %s13334_s19  ;;  %8839 = vrot.lane.b32.xlu1 %v8838_v47, %s9240_s26  ;;  %v4764_v29 = vadd.f32 %v12109_v13, %v4763_v32  ;;  %v4765_v58 = vpop.f32.mrb[139].mxu0  ;;  %v5085_v8 = vld [vmem:[#allocation3 + $0x6d] sm:$0xff]  ;;  %v4982_v47 = vld [vmem:[#allocation3 + $0x5f] sm:$0xff] }
 0x582   : > { %v4907_v38 = vld [vmem:[#allocation3 + $0x52] sm:$0xff]  ;;  %v5110_v36 = vmul.f32 %v9804_v54, %v5085_v8  ;;  %v5007_v58 = vmul.f32 %v9804_v54, %v4982_v47 }
 0x583   : > { %v4815_v19 = vmax.f32 %v4764_v29, 0.0  ;;  %v8863_v56 = vpack.i.bf16 %v4907_v38, %v5060_v48  ;;  %v4983_v38 = vld [vmem:[#allocation3 + $0x67] sm:$0xff] }
 0x584   : > { %v4768_v46 = vpop.f32.mrb[140].mxu0  ;;  %v8868_v48 = vpack.i.bf16 %v5007_v58, %v5135_v41  ;;  %v5008_v41 = vmul.f32 %v9807_v12, %v4983_v38 }
 0x585   : > { %4840 = vst.msk [vmem:[#allocation3 + $0xa0] sm:$0xff] %vm333_vm7, %v4815_v19  ;;  %8849 = vrot.lane.b32.xlu0 %v8848_v33, %s13332_s24  ;;  %8859 = vrot.lane.b32.xlu1 %v8858_v2, %s13334_s19  ;;  %v4769_v32 = vadd.f32 %v12109_v13, %v4768_v46  ;;  %v4770_v20 = vpop.f32.mrb[141].mxu0  ;;  %v4860_v19 = vld [vmem:[#allocation3 + $0x69] sm:$0xff]  ;;  %v4957_v33 = vmul.f32 %v13343_v14, %v4932_v17  ;;  %v4933_v46 = vld [vmem:[#allocation3 + $0x5b] sm:$0xff] }
 0x586   : > { %v5111_v20 = vmul.f32 %v9807_v12, %v5086_v16  ;;  %v5087_v14 = vld [vmem:[#allocation3 + $0x7d] sm:$0xff] }
 0x587   : > { %v4816_v29 = vmax.f32 %v4769_v32, 0.0  ;;  %v8873_v21 = vpack.i.bf16 %v4957_v33, %v5110_v36  ;;  %v13344_v32 = vld [vmem:[#allocation29_spill] sm:$0xff] }
 0x588   : > { %v4773_v62 = vpop.f32.mrb[142].mxu0  ;;  %v5061_v47 = vmul.f32 %v13344_v32, %v4860_v19  ;;  %v4958_v17 = vmul.f32 %v13344_v32, %v4933_v46  ;;  %v4908_v36 = vld [vmem:[#allocation3 + $0x5a] sm:$0xff]  ;;  %v13345_v19 = vld [vmem:[#allocation30_spill] sm:$0xff] }
 0x589   : > { %4841 = vst.msk [vmem:[#allocation3 + $0xa8] sm:$0xff] %vm333_vm7, %v4816_v29  ;;  %8854 = vrot.lane.b32.xlu0 %v8853_v49, %s9240_s26  ;;  %8864 = vrot.lane.b32.xlu1 %v8863_v56, %s13332_s24  ;;  %v4774_v2 = vadd.f32 %v12109_v13, %v4773_v62  ;;  %v4775_v1 = vpop.f32.mrb[143].mxu0  ;;  %v4861_v29 = vld [vmem:[#allocation3 + $0x71] sm:$0xff]  ;;  %v5138_v32 = vld [vmem:[#allocation3 + $0x86] sm:$0xff] }
 0x58a   : > { %v8878_v58 = vpack.i.bf16 %v4908_v36, %v5061_v47  ;;  %v8888_v62 = vpack.i.bf16 %v4958_v17, %v5111_v20  ;;  %v5062_v33 = vmul.f32 %v13345_v19, %v4861_v29  ;;  %v5136_v1 = vld [vmem:[#allocation3 + $0x76] sm:$0xff]  ;;  %v5112_v29 = vmul.f32 %v9832_v28, %v5087_v14  ;;  %v5137_v17 = vld [vmem:[#allocation3 + $0x7e] sm:$0xff] }
 0x58b   : > { %v4817_v8 = vmax.f32 %v4774_v2, 0.0  ;;  %v4984_v2 = vld [vmem:[#allocation3 + $0x6f] sm:$0xff]  ;;  %v8883_v20 = vpack.i.bf16 %v5008_v41, %v5136_v1  ;;  %v5088_v36 = vld [vmem:[#allocation3 + $0x85] sm:$0xff] }
 0x58c   : > { %v4778_v59 = vpop.f32.mrb[144].mxu0  ;;  %v5009_v47 = vmul.f32 %v9832_v28, %v4984_v2  ;;  %v4935_v2 = vld [vmem:[#allocation3 + $0x6b] sm:$0xff]  ;;  %v13346_v1 = vld [vmem:[#allocation32_spill] sm:$0xff] }
 0x58d   : > { %8874 = vrot.lane.b32.xlu0 %v8873_v21, %s13334_s19  ;;  %8869 = vrot.lane.b32.xlu1 %v8868_v48, %s9240_s26  ;;  %4842 = vst.msk [vmem:[#allocation3 + $0xb0] sm:$0xff] %vm333_vm7, %v4817_v8  ;;  %v4779_v49 = vadd.f32 %v12109_v13, %v4778_v59  ;;  %v4780_v56 = vpop.f32.mrb[145].mxu0  ;;  %v4909_v21 = vld [vmem:[#allocation3 + $0x62] sm:$0xff] }
 0x58e   : > { %v4934_v8 = vld [vmem:[#allocation3 + $0x63] sm:$0xff]  ;;  %v8893_v38 = vpack.i.bf16 %v4909_v21, %v5062_v33  ;;  %v12245_v56 = vld [vmem:[#allocation3 + $0x79] sm:$0xff]  ;;  %v8898_v33 = vpack.i.bf16 %v5009_v47, %v5137_v17 }
 0x58f   : > { %v4818_v16 = vmax.f32 %v4779_v49, 0.0  ;;  %v5063_v21 = vmul.f32 %v13346_v1, %v12245_v56  ;;  %v4910_v17 = vld [vmem:[#allocation3 + $0x6a] sm:$0xff] }
 0x590   : > { %v4783_v48 = vpop.f32.mrb[146].mxu0 }
 0x591   : > { %8879 = vrot.lane.b32.xlu0 %v8878_v58, %s13332_s24  ;;  %8889 = vrot.lane.b32.xlu1 %v8888_v62, %s13334_s19  ;;  %4843 = vst.msk [vmem:[#allocation3 + $0xb8] sm:$0xff] %vm333_vm7, %v4818_v16  ;;  %v4784_v59 = vadd.f32 %v12109_v13, %v4783_v48  ;;  %v4785_v46 = vpop.f32.mrb[147].mxu0  ;;  %v4959_v62 = vmul.f32 %v13345_v19, %v4934_v8  ;;  %v4936_v19 = vld [vmem:[#allocation3 + $0x73] sm:$0xff] }
 0x592   : > { %v5113_v48 = vmul.f32 %v9876_v9, %v5088_v36  ;;  %v4985_v46 = vld [vmem:[#allocation3 + $0x77] sm:$0xff]  ;;  %v4960_v8 = vmul.f32 %v13346_v1, %v4935_v2  ;;  %v8908_v36 = vpack.i.bf16 %v4910_v17, %v5063_v21 }
 0x593   : > { %v4819_v49 = vmax.f32 %v4784_v59, 0.0  ;;  %v8903_v14 = vpack.i.bf16 %v4959_v62, %v5112_v29  ;;  %v4911_v62 = vld [vmem:[#allocation3 + $0x72] sm:$0xff] }
 0x594   : > { %v4788_v58 = vpop.f32.mrb[148].mxu0 }
 0x595   : > { %8884 = vrot.lane.b32.xlu0 %v8883_v20, %s9240_s26  ;;  %8894 = vrot.lane.b32.xlu1 %v8893_v38, %s13332_s24  ;;  %4844 = vst.msk [vmem:[#allocation3 + $0xc0] sm:$0xff] %vm333_vm7, %v4819_v49  ;;  %v4789_v16 = vadd.f32 %v12109_v13, %v4788_v58  ;;  %v4790_v41 = vpop.f32.mrb[149].mxu0  ;;  %v12255_v20 = vld [vmem:[#allocation3 + $0x81] sm:$0xff]  ;;  %v5010_v49 = vmul.f32 %v9876_v9, %v4985_v46  ;;  %v5139_v46 = vld [vmem:[#allocation3 + $0x8e] sm:$0xff] }
 0x596   : > { %v8918_v58 = vpack.i.bf16 %v4960_v8, %v5113_v48  ;;  %v5090_v8 = vld [vmem:[#allocation3 + $0x95] sm:$0xff] }
 0x597   : > { %v4820_v59 = vmax.f32 %v4789_v16, 0.0  ;;  %v13347_v16 = vld [vmem:[#allocation33_spill] sm:$0xff]  ;;  %v8913_v2 = vpack.i.bf16 %v5010_v49, %v5138_v32  ;;  %v5115_v32 = vmul.f32 %v9978_v45, %v5090_v8  ;;  %v4988_v8 = vld [vmem:[#allocation3 + $0x8f] sm:$0xff] }
 0x598   : > { %v4793_v38 = vpop.f32.mrb[150].mxu0  ;;  %v5064_v41 = vmul.f32 %v13347_v16, %v12255_v20  ;;  %v4912_v49 = vld [vmem:[#allocation3 + $0x7a] sm:$0xff] }
 0x599   : > { %8904 = vrot.lane.b32.xlu0 %v8903_v14, %s13334_s19  ;;  %8899 = vrot.lane.b32.xlu1 %v8898_v33, %s9240_s26  ;;  %4845 = vst.msk [vmem:[#allocation3 + $0xc8] sm:$0xff] %vm333_vm7, %v4820_v59  ;;  %v4794_v47 = vadd.f32 %v12109_v13, %v4793_v38  ;;  %v4795_v29 = vpop.f32.mrb[151].mxu0  ;;  %v5089_v33 = vld [vmem:[#allocation3 + $0x8d] sm:$0xff]  ;;  %v4961_v13 = vmul.f32 %v13347_v16, %v4936_v19 }
 0x59a   : > { %v8923_v21 = vpack.i.bf16 %v4911_v62, %v5064_v41  ;;  %v5114_v48 = vmul.f32 %v9934_v43, %v5089_v33  ;;  %v5011_v59 = vmul.f32 %v9934_v43, %v4986_v35  ;;  %v12271_v38 = vld [vmem:[#allocation3 + $0x89] sm:$0xff]  ;;  %v12278_v62 = vld [vmem:[#allocation3 + $0x91] sm:$0xff] }
 0x59b   : > { %v4821_v14 = vmax.f32 %v4794_v47, 0.0  ;;  %v4937_v47 = vld [vmem:[#allocation3 + $0x7b] sm:$0xff] }
 0x59c   : > { %v8933_v29 = vpack.i.bf16 %v4961_v13, %v5114_v48  ;;  %v8928_v17 = vpack.i.bf16 %v5011_v59, %v5139_v46  ;;  %v4913_v13 = vld [vmem:[#allocation3 + $0x82] sm:$0xff]  ;;  %v5140_v59 = vld [vmem:[#allocation3 + $0x96] sm:$0xff] }
 0x59d   : > { %8909 = vrot.lane.b32.xlu0 %v8908_v36, %s13332_s24  ;;  %8919 = vrot.lane.b32.xlu1 %v8918_v58, %s13334_s19  ;;  %4846 = vst.msk [vmem:[#allocation3 + $0xd0] sm:$0xf] %vm338_vm11, %v4821_v14  ;;  %v13348_v36 = vld [vmem:[#allocation34_spill] sm:$0xff]  ;;  %v12323_v22 = vld [vmem:[#allocation3 + $0xb9] sm:$0xff] }
 0x59e   : > { %v5065_v19 = vmul.f32 %v13348_v36, %v12271_v38  ;;  %v4987_v58 = vld [vmem:[#allocation3 + $0x87] sm:$0xff]  ;;  %v4962_v35 = vmul.f32 %v13348_v36, %v4937_v47  ;;  %v5091_v46 = vld [vmem:[#allocation3 + $0x9d] sm:$0xff] }
 0x59f   : > { %v5012_v33 = vmul.f32 %v9978_v45, %v4987_v58  ;;  %v4938_v48 = vld [vmem:[#allocation3 + $0x83] sm:$0xff] }
 0x5a0   : > { %v8938_v41 = vpack.i.bf16 %v4912_v49, %v5065_v19  ;;  %v8948_v14 = vpack.i.bf16 %v4962_v35, %v5115_v32  ;;  %v5116_v19 = vmul.f32 %v13320_v57, %v5091_v46  ;;  %v5013_v32 = vmul.f32 %v13320_v57, %v4988_v8  ;;  %v4939_v49 = vld [vmem:[#allocation3 + $0x8b] sm:$0xff]  ;;  %v5141_v58 = vld [vmem:[#allocation3 + $0x9e] sm:$0xff] }
 0x5a1   : > { %8914 = vrot.lane.b32.xlu0 %v8913_v2, %s9240_s26  ;;  %8924 = vrot.lane.b32.xlu1 %v8923_v21, %s13332_s24  ;;  %v13349_v2 = vld [vmem:[#allocation35_spill] sm:$0xff]  ;;  %v12291_v35 = vld [vmem:[#allocation3 + $0x99] sm:$0xff] }
 0x5a2   : > { %v5066_v21 = vmul.f32 %v13349_v2, %v12278_v62  ;;  %v5092_v36 = vld [vmem:[#allocation3 + $0xa5] sm:$0xff]  ;;  %v8958_v1 = vpack.i.bf16 %v5013_v32, %v5141_v58  ;;  %v5093_v58 = vld [vmem:[#allocation3 + $0xad] sm:$0xff] }
 0x5a3   : > { %v5142_v32 = vld [vmem:[#allocation3 + $0xa6] sm:$0xff]  ;;  %v5145_v7 = vld [vmem:[#allocation3 + $0xbe] sm:$0xff] }
 0x5a4   : > { %v8953_v47 = vpack.i.bf16 %v4913_v13, %v5066_v21  ;;  %v5117_v13 = vmul.f32 %v13321_v24, %v5092_v36  ;;  %v4914_v21 = vld [vmem:[#allocation3 + $0x8a] sm:$0xff] }
 0x5a5   : > { %8934 = vrot.lane.b32.xlu0 %v8933_v29, %s13334_s19  ;;  %8929 = vrot.lane.b32.xlu1 %v8928_v17, %s9240_s26  ;;  %v4963_v29 = vmul.f32 %v13349_v2, %v4938_v48  ;;  %v8943_v17 = vpack.i.bf16 %v5012_v33, %v5140_v59  ;;  %v4989_v48 = vld [vmem:[#allocation3 + $0x97] sm:$0xff]  ;;  %v4867_v59 = vld [vmem:[#allocation3 + $0xa1] sm:$0xff] }
 0x5a6   : > { %v5146_v51 = vld [vmem:[#allocation3 + $0xc6] sm:$0xff] }
 0x5a9   : > { %8939 = vrot.lane.b32.xlu0 %v8938_v41, %s13332_s24  ;;  %8949 = vrot.lane.b32.xlu1 %v8948_v14, %s13334_s19  ;;  %v13350_v41 = vld [vmem:[#allocation36_spill] sm:$0xff]  ;;  %v8963_v14 = vpack.i.bf16 %v4963_v29, %v5116_v19 }
 0x5aa   : > { %v4964_v16 = vmul.f32 %v13350_v41, %v4939_v49  ;;  %v5067_v33 = vmul.f32 %v13350_v41, %v12291_v35  ;;  %v13351_v49 = vld [vmem:[#allocation42_spill] sm:$0xff]  ;;  %v4940_v19 = vld [vmem:[#allocation3 + $0x93] sm:$0xff] }
 0x5ab   : > { %v5068_v29 = vmul.f32 %v13351_v49, %v4867_v59  ;;  %v4990_v41 = vld [vmem:[#allocation3 + $0x9f] sm:$0xff]  ;;  %v4965_v36 = vmul.f32 %v13351_v49, %v4940_v19 }
 0x5ac   : > { %v8968_v46 = vpack.i.bf16 %v4914_v21, %v5067_v33  ;;  %v8978_v8 = vpack.i.bf16 %v4964_v16, %v5117_v13  ;;  %v5015_v16 = vmul.f32 %v13322_v23, %v4990_v41  ;;  %v4941_v33 = vld [vmem:[#allocation3 + $0x9b] sm:$0xff]  ;;  %v5143_v13 = vld [vmem:[#allocation3 + $0xae] sm:$0xff] }
 0x5ad   : > { %8944 = vrot.lane.b32.xlu0 %v8943_v17, %s9240_s26  ;;  %8954 = vrot.lane.b32.xlu1 %v8953_v47, %s13332_s24  ;;  %v5014_v17 = vmul.f32 %v13321_v24, %v4989_v48  ;;  %v4915_v47 = vld [vmem:[#allocation3 + $0x92] sm:$0xff]  ;;  %v4868_v21 = vld [vmem:[#allocation3 + $0xa9] sm:$0xff]  ;;  %v13352_v59 = vld [vmem:[#allocation45_spill] sm:$0xff] }
 0x5ae   : > { %v8983_v2 = vpack.i.bf16 %v4915_v47, %v5068_v29  ;;  %v5094_v48 = vld [vmem:[#allocation3 + $0xb5] sm:$0xff]  ;;  %v5069_v19 = vmul.f32 %v13352_v59, %v4868_v21  ;;  %v4991_v29 = vld [vmem:[#allocation3 + $0xa7] sm:$0xff] }
 0x5af   : > { %v4916_v47 = vld [vmem:[#allocation3 + $0x9a] sm:$0xff]  ;;  %v4942_v21 = vld [vmem:[#allocation3 + $0xa3] sm:$0xff] }
 0x5b0   : > { %v4847_v41 = vld [vmem:[#allocation3 + $0x1] sm:$0xff] }
 0x5b1   : > { %8964 = vrot.lane.b32.xlu0 %v8963_v14, %s13334_s19  ;;  %8959 = vrot.lane.b32.xlu1 %v8958_v1, %s9240_s26  ;;  %v8973_v14 = vpack.i.bf16 %v5014_v17, %v5142_v32  ;;  %v5118_v1 = vmul.f32 %v13322_v23, %v5093_v58  ;;  %v5119_v17 = vmul.f32 %v13323_v31, %v5094_v48  ;;  %v4869_v32 = vld [vmem:[#allocation3 + $0xb1] sm:$0xff]  ;;  %v5095_v48 = vld [vmem:[#allocation3 + $0xbd] sm:$0xff] }
 0x5b3   : > { %v8993_v6 = vpack.i.bf16 %v4965_v36, %v5118_v1  ;;  %v13353_v36 = vld [vmem:[#allocation47_spill] sm:$0xff] }
 0x5b4   : > { %v5070_v1 = vmul.f32 %v13353_v36, %v4869_v32  ;;  %v5120_v32 = vmul.f32 %v13324_v18, %v5095_v48 }
 0x5b5   : > { %8969 = vrot.lane.b32.xlu0 %v8968_v46, %s13332_s24  ;;  %8979 = vrot.lane.b32.xlu1 %v8978_v8, %s13334_s19  ;;  %v4966_v46 = vmul.f32 %v13352_v59, %v4941_v33  ;;  %v8988_v8 = vpack.i.bf16 %v5015_v16, %v5143_v13  ;;  %v4917_v33 = vld [vmem:[#allocation3 + $0xa2] sm:$0xff]  ;;  %v4992_v16 = vld [vmem:[#allocation3 + $0xaf] sm:$0xff]  ;;  %v4872_v59 = vmul.f32 %v13264_v15, %v4847_v41 }
 0x5b6   : > { %v5144_v13 = vld [vmem:[#allocation3 + $0xb6] sm:$0xff] }
 0x5b7   : > { %v9008_v49 = vpack.i.bf16 %v4966_v46, %v5119_v17  ;;  %v5098_v46 = vld [vmem:[#allocation3 + $0xd5] sm:$0xff] }
 0x5b9   : > { %8974 = vrot.lane.b32.xlu0 %v8973_v14, %s9240_s26  ;;  %8984 = vrot.lane.b32.xlu1 %v8983_v2, %s13332_s24  ;;  %v8998_v14 = vpack.i.bf16 %v4916_v47, %v5069_v19  ;;  %v5016_v2 = vmul.f32 %v13323_v31, %v4991_v29  ;;  %v9013_v47 = vpack.i.bf16 %v4917_v33, %v5070_v1  ;;  %v4848_v1 = vld [vmem:[#allocation3 + $0x9] sm:$0xff] }
 0x5ba   : > { %v4967_v29 = vmul.f32 %v13353_v36, %v4942_v21  ;;  %v5123_v33 = vmul.f32 %v13327_v60, %v5098_v46 }
 0x5bb   : > { %v9003_v17 = vpack.i.bf16 %v5016_v2, %v5144_v13 }
 0x5bd   : > { %8994 = vrot.lane.b32.xlu0 %v8993_v6, %s13334_s19  ;;  %8989 = vrot.lane.b32.xlu1 %v8988_v8, %s9240_s26  ;;  %v5017_v6 = vmul.f32 %v13324_v18, %v4992_v16 }
 0x5bf   : > { %v8715_v58 = vpop.permute.xlu1 %8714  ;;  %v9018_v48 = vpack.i.bf16 %v5017_v6, %v5145_v7  ;;  %v4993_v7 = vld [vmem:[#allocation3 + $0xb7] sm:$0xff]  ;;  %v5096_v6 = vld [vmem:[#allocation3 + $0xc5] sm:$0xff] }
 0x5c0   : > { %v8717_v63 = vunpack.i.h.bf16 %v8715_v58  ;;  %v8716_v39 = vunpack.i.l.bf16 %v8715_v58 }
 0x5c1   : > { %8999 = vrot.lane.b32.xlu0 %v8998_v14, %s13332_s24  ;;  %9009 = vrot.lane.b32.xlu1 %v9008_v49, %s13334_s19  ;;  %v4945_v49 = vld [vmem:[#allocation3 + $0xbb] sm:$0xff] }
 0x5c2   : > { %v5778_v16 = vsel %vm333_vm7, %v4872_v59, %v8717_v63  ;;  %v5853_v2 = vsel %vm333_vm7, %v5022_v0, %v8716_v39  ;;  %v9023_v59 = vpack.i.bf16 %v4967_v29, %v5120_v32  ;;  %v4943_v39 = vld [vmem:[#allocation3 + $0xab] sm:$0xff]  ;;  %v5023_v29 = vld [vmem:[#allocation3 + $0x18] sm:$0xff] }
 0x5c3   : > { %v8725_v8 = vpop.permute.xlu0 %8724  ;;  %v8720_v19 = vpop.permute.xlu1 %8719 }
 0x5c4   : > { %v8727_v15 = vunpack.i.h.bf16 %v8725_v8  ;;  %v8726_v41 = vunpack.i.l.bf16 %v8725_v8  ;;  %v8722_v58 = vunpack.i.h.bf16 %v8720_v19  ;;  %v8721_v14 = vunpack.i.l.bf16 %v8720_v19  ;;  %v13354_v8 = vld [vmem:[#allocation49_spill] sm:$0xff] }
 0x5c5   : > { %9004 = vrot.lane.b32.xlu0 %v9003_v17, %s9240_s26  ;;  %9014 = vrot.lane.b32.xlu1 %v9013_v47, %s13332_s24  ;;  %v5071_v19 = vmul.f32 %v13354_v8, %v12323_v22  ;;  %v13355_v47 = vld [vmem:[#allocation54_spill] sm:$0xff] }
 0x5c6   : > { %v5803_v13 = vsel %vm1645_vm8, %v5778_v16, %v8727_v15  ;;  %v5878_v21 = vsel %vm1645_vm8, %v5853_v2, %v8726_v41  ;;  %v4970_v0 = vmul.f32 %v13355_v47, %v4945_v49  ;;  %v4918_v15 = vld [vmem:[#allocation3 + $0xaa] sm:$0xff]  ;;  %v4873_v41 = vmul.f32 %v13266_v11, %v4848_v1 }
 0x5c7   : > { %v8730_v36 = vpop.permute.xlu0 %8729  ;;  %v8740_v10 = vpop.permute.xlu1 %8739  ;;  %v5903_v63 = vsel %vm1587_vm10, %v5878_v21, %v8721_v14  ;;  %v5828_v17 = vsel %vm1587_vm10, %v5803_v13, %v8722_v58  ;;  %v9028_v13 = vpack.i.bf16 %v4918_v15, %v5071_v19  ;;  %v5018_v1 = vmul.f32 %v13325_v40, %v4993_v7  ;;  %v4944_v21 = vld [vmem:[#allocation3 + $0xb3] sm:$0xff]  ;;  %v13357_v7 = vld [vmem:[#allocation69_spill] sm:$0xff] }
 0x5c8   : > { %v8732_v46 = vunpack.i.h.bf16 %v8730_v36  ;;  %v8731_v44 = vunpack.i.l.bf16 %v8730_v36  ;;  %6067 = vmatprep.mubr.f32.mxu1 %v5903_v63  ;;  %v8742_v16 = vunpack.i.h.bf16 %v8740_v10  ;;  %v8741_v2 = vunpack.i.l.bf16 %v8740_v10  ;;  %v5047_v63 = vld [vmem:[#allocation3 + $0xc1] sm:$0xff] }
 0x5c9   : > { %9024 = vrot.lane.b32.xlu0 %v9023_v59, %s13334_s19  ;;  %9019 = vrot.lane.b32.xlu1 %v9018_v48, %s9240_s26  ;;  %v4968_v36 = vmul.f32 %v13354_v8, %v4943_v39  ;;  %v9033_v11 = vpack.i.bf16 %v4970_v0, %v5123_v33  ;;  %v5121_v10 = vmul.f32 %v13325_v40, %v5096_v6  ;;  %v13356_v59 = vld [vmem:[#allocation52_spill] sm:$0xff] }
 0x5ca   : > { %6068 = vmatmul.mubr.f32.vlgmr.msra.gmra.mrb[50].mxu1 %v5828_v17  ;;  %v5854_v32 = vsel %vm333_vm7, %v5023_v29, %v8731_v44  ;;  %v5779_v58 = vsel %vm333_vm7, %v4873_v41, %v8732_v46  ;;  %v5097_v44 = vld [vmem:[#allocation3 + $0xcd] sm:$0xff]  ;;  %v4874_v46 = vmul.f32 %v13267_v5, %v12118_v25  ;;  %v4969_v6 = vmul.f32 %v13357_v7, %v4944_v21 }
 0x5cb   : > { %v8735_v14 = vpop.permute.xlu0 %8734  ;;  %v8745_v49 = vpop.permute.xlu1 %8744  ;;  %7940 = vmatpush3.bf16.msra.mxu1 %v13356_v59  ;;  %v5879_v33 = vsel %vm1645_vm8, %v5854_v32, %v8741_v2  ;;  %v5804_v0 = vsel %vm1645_vm8, %v5779_v58, %v8742_v16  ;;  %v5072_v5 = vmul.f32 %v13357_v7, %v5047_v63  ;;  %v4994_v59 = vld [vmem:[#allocation3 + $0xbf] sm:$0xff]  ;;  %v5048_v21 = vld [vmem:[#allocation3 + $0xc9] sm:$0xff] }
 0x5cc   : > { %v8737_v48 = vunpack.i.h.bf16 %v8735_v14  ;;  %v8736_v17 = vunpack.i.l.bf16 %v8735_v14  ;;  %7941 = vmatprep.subr.bf16.mxu1 %v13162_v3  ;;  %v8747_v39 = vunpack.i.h.bf16 %v8745_v49  ;;  %v8746_v19 = vunpack.i.l.bf16 %v8745_v49  ;;  %v13358_v2 = vld [vmem:[#allocation70_spill] sm:$0xff] }
 0x5cd   : > { %9029 = vrot.lane.b32.xlu0 %v9028_v13, %s13332_s24  ;;  %9034 = vrot.lane.b32.xlu1 %v9033_v11, %s13334_s19  ;;  %v9038_v14 = vpack.i.bf16 %v5018_v1, %v5146_v51  ;;  %v9043_v49 = vpack.i.bf16 %v4968_v36, %v5121_v10  ;;  %v5122_v13 = vmul.f32 %v13326_v61, %v5097_v44  ;;  %v4919_v11 = vld [vmem:[#allocation3 + $0xb2] sm:$0xff] }
 0x5ce   : > { %v5904_v15 = vsel %vm1587_vm10, %v5879_v33, %v8736_v17  ;;  %v5829_v41 = vsel %vm1587_vm10, %v5804_v0, %v8737_v48  ;;  %v5024_v48 = vld [vmem:[#allocation3 + $0x20] sm:$0xff]  ;;  %v5780_v36 = vsel %vm333_vm7, %v4874_v46, %v8747_v39  ;;  %v9048_v10 = vpack.i.bf16 %v4919_v11, %v5072_v5  ;;  %v5147_v46 = vld [vmem:[#allocation3 + $0xce] sm:$0xff] }
 0x5cf   : > { %v8755_v25 = vpop.permute.xlu0 %8754  ;;  %v8750_v29 = vpop.permute.xlu1 %8749  ;;  %6072 = vmatprep.mubr.f32.mxu1 %v5904_v15  ;;  %7943 = vmatpush3.bf16.msra.mxu1 %v13358_v2  ;;  %v5855_v51 = vsel %vm333_vm7, %v5024_v48, %v8746_v19  ;;  %v5019_v44 = vmul.f32 %v13326_v61, %v4994_v59  ;;  %v9132_v39 = vld [vmem:[#allocation3 + $0x19] sm:$0xff]  ;;  %v4995_v11 = vld [vmem:[#allocation3 + $0xc7] sm:$0xff]  ;;  %v5049_v2 = vld [vmem:[#allocation3 + $0xd1] sm:$0xf] }
 0x5d0   : > { %v8757_v16 = vunpack.i.h.bf16 %v8755_v25  ;;  %v8756_v32 = vunpack.i.l.bf16 %v8755_v25  ;;  %v8752_v58 = vunpack.i.h.bf16 %v8750_v29  ;;  %v8751_v17 = vunpack.i.l.bf16 %v8750_v29  ;;  %6073 = vmatmul.mubr.f32.gmra.mrb[52].mxu1 %v5829_v41  ;;  %7944 = vmatprep.subr.bf16.mxu1 %v13162_v3  ;;  %v4920_v29 = vld [vmem:[#allocation3 + $0xba] sm:$0xff] }
 0x5d1   : > { %9039 = vrot.lane.b32.xlu0 %v9038_v14, %s9240_s26  ;;  %9044 = vrot.lane.b32.xlu1 %v9043_v49, %s13334_s19  ;;  %v9058_v41 = vpack.i.bf16 %v4969_v6, %v5122_v13  ;;  %v5073_v14 = vmul.f32 %v13355_v47, %v5048_v21  ;;  %v4875_v5 = vmul.f32 %v9132_v39, %v9603_v42  ;;  %v5025_v6 = vld [vmem:[#allocation3 + $0x28] sm:$0xff] }
 0x5d2   : > { %v5880_v1 = vsel %vm1645_vm8, %v5855_v51, %v8756_v32  ;;  %v5805_v63 = vsel %vm1645_vm8, %v5780_v36, %v8757_v16  ;;  %v9053_v21 = vpack.i.bf16 %v5019_v44, %v5147_v46  ;;  %v5020_v42 = vmul.f32 %v13327_v60, %v4995_v11  ;;  %v5148_v51 = vld [vmem:[#allocation3 + $0xd6] sm:$0xff]  ;;  %v9133_v46 = vld [vmem:[#allocation3 + $0x21] sm:$0xff] }
 0x5d3   : > { %v8760_v33 = vpop.permute.xlu0 %8759  ;;  %v8770_v0 = vpop.permute.xlu1 %8769  ;;  %v5905_v15 = vsel %vm1587_vm10, %v5880_v1, %v8751_v17  ;;  %v5830_v25 = vsel %vm1587_vm10, %v5805_v63, %v8752_v58  ;;  %v9063_v48 = vpack.i.bf16 %v4920_v29, %v5073_v14  ;;  %v13359_v36 = vld [vmem:[#allocation56_spill] sm:$0xff]  ;;  %v5099_v63 = vld [vmem:[#allocation3 + $0xdd] sm:$0xf] }
 0x5d4   : > { %v8762_v19 = vunpack.i.h.bf16 %v8760_v33  ;;  %v8761_v49 = vunpack.i.l.bf16 %v8760_v33  ;;  %6077 = vmatprep.mubr.f32.mxu1 %v5905_v15  ;;  %v8772_v59 = vunpack.i.h.bf16 %v8770_v0  ;;  %v8771_v16 = vunpack.i.l.bf16 %v8770_v0  ;;  %v4921_v15 = vld [vmem:[#allocation3 + $0xc2] sm:$0xf] }
 0x5d5   : > { %9059 = vrot.lane.b32.xlu0 %v9058_v41, %s13334_s19  ;;  %9049 = vrot.lane.b32.xlu1 %v9048_v10, %s13332_s24  ;;  %v5074_v1 = vmul.f32 %v13359_v36, %v5049_v2  ;;  %v4946_v10 = vld [vmem:[#allocation3 + $0xc3] sm:$0xf]  ;;  %v4996_v41 = vld [vmem:[#allocation3 + $0xcf] sm:$0xf] }
 0x5d6   : > { %6078 = vmatmul.mubr.f32.gmra.mrb[54].mxu1 %v5830_v25  ;;  %v5856_v13 = vsel %vm333_vm7, %v5025_v6, %v8761_v49  ;;  %v5781_v32 = vsel %vm333_vm7, %v4875_v5, %v8762_v19  ;;  %v5124_v49 = vmul.f32 %v13161_v52, %v5099_v63  ;;  %v4876_v5 = vmul.f32 %v9133_v46, %v9562_v4 }
 0x5d7   : > { %v8765_v58 = vpop.permute.xlu0 %8764  ;;  %v8775_v17 = vpop.permute.xlu1 %8774  ;;  %v5881_v29 = vsel %vm1645_vm8, %v5856_v13, %v8771_v16  ;;  %v5806_v44 = vsel %vm1645_vm8, %v5781_v32, %v8772_v59  ;;  %v9068_v6 = vpack.i.bf16 %v5020_v42, %v5148_v51  ;;  %v5021_v16 = vmul.f32 %v13161_v52, %v4996_v41 }
 0x5d8   : > { %v8767_v33 = vunpack.i.h.bf16 %v8765_v58  ;;  %v8766_v0 = vunpack.i.l.bf16 %v8765_v58  ;;  %v8777_v25 = vunpack.i.h.bf16 %v8775_v17  ;;  %v8776_v39 = vunpack.i.l.bf16 %v8775_v17 }
 0x5d9   : > { %9064 = vrot.lane.b32.xlu0 %v9063_v48, %s13332_s24  ;;  %9054 = vrot.lane.b32.xlu1 %v9053_v21, %s9240_s26  ;;  %v9073_v58 = vpack.i.bf16 %v4921_v15, %v5074_v1  ;;  %v4971_v17 = vmul.f32 %v13359_v36, %v4946_v10  ;;  %v5026_v21 = vld [vmem:[#allocation3 + $0x30] sm:$0xff] }
 0x5da   : > { %v5906_v14 = vsel %vm1587_vm10, %v5881_v29, %v8766_v0  ;;  %v5831_v19 = vsel %vm1587_vm10, %v5806_v44, %v8767_v33  ;;  %v5149_v33 = vld [vmem:[#allocation3 + $0xde] sm:$0xf]  ;;  %v5857_v4 = vsel %vm333_vm7, %v5026_v21, %v8776_v39  ;;  %v5782_v42 = vsel %vm333_vm7, %v4876_v5, %v8777_v25 }
 0x5db   : > { %v8785_v11 = vpop.permute.xlu0 %8784  ;;  %v8780_v2 = vpop.permute.xlu1 %8779  ;;  %6082 = vmatprep.mubr.f32.mxu1 %v5906_v14  ;;  %v9078_v10 = vpack.i.bf16 %v4971_v17, %v5124_v49  ;;  %v9083_v41 = vpack.i.bf16 %v5021_v16, %v5149_v33  ;;  %v5027_v5 = vld [vmem:[#allocation3 + $0x38] sm:$0xff] }
 0x5dc   : > { %v8787_v13 = vunpack.i.h.bf16 %v8785_v11  ;;  %v8786_v59 = vunpack.i.l.bf16 %v8785_v11  ;;  %v8782_v32 = vunpack.i.h.bf16 %v8780_v2  ;;  %v8781_v48 = vunpack.i.l.bf16 %v8780_v2  ;;  %6083 = vmatmul.mubr.f32.gmra.mrb[56].mxu1 %v5831_v19  ;;  %v9134_v19 = vld [vmem:[#allocation3 + $0x29] sm:$0xff] }
 0x5dd   : > { %9069 = vrot.lane.b32.xlu0 %v9068_v6, %s9240_s26  ;;  %9074 = vrot.lane.b32.xlu1 %v9073_v58, %s13332_s24  ;;  %v4877_v39 = vmul.f32 %v9134_v19, %v9585_v27 }
 0x5de   : > { %v5882_v51 = vsel %vm1645_vm8, %v5857_v4, %v8786_v59  ;;  %v5807_v1 = vsel %vm1645_vm8, %v5782_v42, %v8787_v13  ;;  %v9135_v4 = vld [vmem:[#allocation3 + $0x31] sm:$0xff] }
 0x5df   : > { %v8790_v63 = vpop.permute.xlu0 %8789  ;;  %v8800_v0 = vpop.permute.xlu1 %8799  ;;  %v5907_v15 = vsel %vm1587_vm10, %v5882_v51, %v8781_v48  ;;  %v5832_v29 = vsel %vm1587_vm10, %v5807_v1, %v8782_v32  ;;  %v4878_v42 = vmul.f32 %v9135_v4, %v9642_v30 }
 0x5e0   : > { %v8792_v44 = vunpack.i.h.bf16 %v8790_v63  ;;  %v8791_v14 = vunpack.i.l.bf16 %v8790_v63  ;;  %6087 = vmatprep.mubr.f32.mxu1 %v5907_v15  ;;  %v8802_v46 = vunpack.i.h.bf16 %v8800_v0  ;;  %v8801_v25 = vunpack.i.l.bf16 %v8800_v0  ;;  %v5028_v15 = vld [vmem:[#allocation3 + $0x40] sm:$0xff] }
 0x5e1   : > { %9079 = vrot.lane.b32.xlu0 %v9078_v10, %s13334_s19  ;;  %9084 = vrot.lane.b32.xlu1 %v9083_v41, %s9240_s26  ;;  %s12845_s19 = scalar_lea.hbm %s12901_s8, %s7211_s18  ;;  %s9244_s26 = smov [#allocation4]  }
 0x5e2   : > { %6088 = vmatmul.mubr.f32.gmra.mrb[58].mxu1 %v5832_v29  ;;  %v5858_v11 = vsel %vm333_vm7, %v5027_v5, %v8791_v14  ;;  %v5783_v49 = vsel %vm333_vm7, %v4877_v39, %v8792_v44  ;;  %v9136_v5 = vld [vmem:[#allocation3 + $0x39] sm:$0xff]  ;;  %s9175_s20 = sshll.u32 %s9244_s26, 4  ;;  %s9176_s20 = int_to_ptr.vmem [resolvable:$false] %s9175_s20 }
 0x5e3   : > { %v8795_v2 = vpop.permute.xlu0 %8794  ;;  %v8805_v6 = vpop.permute.xlu1 %8804  ;;  %v5883_v27 = vsel %vm1645_vm8, %v5858_v11, %v8801_v25  ;;  %v5808_v59 = vsel %vm1645_vm8, %v5783_v49, %v8802_v46  ;;  %v4879_v11 = vmul.f32 %v9136_v5, %v9660_v55  ;;  %s9177_s10 = scalar_lea.vmem %s9176_s20, 64  ;;  %p9178_p0 = scmp.lt.s32.totalorder %s12837_s22, %s9176_s20 }
 0x5e4   : > { %v8797_v58 = vunpack.i.h.bf16 %v8795_v2  ;;  %v8796_v17 = vunpack.i.l.bf16 %v8795_v2  ;;  %v8807_v16 = vunpack.i.h.bf16 %v8805_v6  ;;  %v8806_v13 = vunpack.i.l.bf16 %v8805_v6  ;;  %v5029_v6 = vld [vmem:[#allocation3 + $0x48] sm:$0xff] }
 0x5e6   : > { %v5908_v32 = vsel %vm1587_vm10, %v5883_v27, %v8796_v17  ;;  %v5833_v48 = vsel %vm1587_vm10, %v5808_v59, %v8797_v58  ;;  %v5859_v10 = vsel %vm333_vm7, %v5028_v15, %v8806_v13  ;;  %v5784_v41 = vsel %vm333_vm7, %v4878_v42, %v8807_v16 }
 0x5e7   : > { %v8815_v21 = vpop.permute.xlu0 %8814  ;;  %v8810_v33 = vpop.permute.xlu1 %8809  ;;  %6092 = vmatprep.mubr.f32.mxu1 %v5908_v32 }
 0x5e8   : > { %v8817_v51 = vunpack.i.h.bf16 %v8815_v21  ;;  %v8816_v1 = vunpack.i.l.bf16 %v8815_v21  ;;  %v8812_v63 = vunpack.i.h.bf16 %v8810_v33  ;;  %v8811_v0 = vunpack.i.l.bf16 %v8810_v33  ;;  %6093 = vmatmul.mubr.f32.gmra.mrb[60].mxu1 %v5833_v48 }
 0x5ea   : > { %v5884_v29 = vsel %vm1645_vm8, %v5859_v10, %v8816_v1  ;;  %v5809_v44 = vsel %vm1645_vm8, %v5784_v41, %v8817_v51  ;;  %v9137_v1 = vld [vmem:[#allocation3 + $0x41] sm:$0xff] }
 0x5eb   : > { %v8820_v14 = vpop.permute.xlu0 %8819  ;;  %v8830_v19 = vpop.permute.xlu1 %8829  ;;  %v5909_v39 = vsel %vm1587_vm10, %v5884_v29, %v8811_v0  ;;  %v5834_v30 = vsel %vm1587_vm10, %v5809_v44, %v8812_v63  ;;  %v4880_v63 = vmul.f32 %v9137_v1, %v9668_v53  ;;  %v5030_v29 = vld [vmem:[#allocation3 + $0x50] sm:$0xff] }
 0x5ec   : > { %v8822_v46 = vunpack.i.h.bf16 %v8820_v14  ;;  %v8821_v25 = vunpack.i.l.bf16 %v8820_v14  ;;  %6097 = vmatprep.mubr.f32.mxu1 %v5909_v39  ;;  %v8832_v49 = vunpack.i.h.bf16 %v8830_v19  ;;  %v8831_v2 = vunpack.i.l.bf16 %v8830_v19 }
 0x5ed   : > { %6098 = vmatmul.mubr.f32.gmra.mrb[62].mxu1 %v5834_v30 }
 0x5ee   : > { %v5860_v58 = vsel %vm333_vm7, %v5029_v6, %v8821_v25  ;;  %v5785_v17 = vsel %vm333_vm7, %v4879_v11, %v8822_v46 }
 0x5ef   : > { %v8825_v16 = vpop.permute.xlu0 %8824  ;;  %v8835_v13 = vpop.permute.xlu1 %8834  ;;  %v5885_v21 = vsel %vm1645_vm8, %v5860_v58, %v8831_v2  ;;  %v5810_v33 = vsel %vm1645_vm8, %v5785_v17, %v8832_v49  ;;  %v9138_v49 = vld [vmem:[#allocation3 + $0x49] sm:$0xff]  ;;  %v5031_v17 = vld [vmem:[#allocation3 + $0x58] sm:$0xff] }
 0x5f0   : > { %v8827_v27 = vunpack.i.h.bf16 %v8825_v16  ;;  %v8826_v59 = vunpack.i.l.bf16 %v8825_v16  ;;  %v8837_v32 = vunpack.i.h.bf16 %v8835_v13  ;;  %v8836_v48 = vunpack.i.l.bf16 %v8835_v13 }
 0x5f1   : > { %v4881_v2 = vmul.f32 %v9138_v49, %v9707_v34  ;;  %v9140_v49 = vld [vmem:[#allocation3 + $0x59] sm:$0xff] }
 0x5f2   : > { %v5910_v55 = vsel %vm1587_vm10, %v5885_v21, %v8826_v59  ;;  %v5835_v4 = vsel %vm1587_vm10, %v5810_v33, %v8827_v27  ;;  %v5861_v44 = vsel %vm333_vm7, %v5030_v29, %v8836_v48  ;;  %v5786_v14 = vsel %vm333_vm7, %v4880_v63, %v8837_v32  ;;  %v9139_v63 = vld [vmem:[#allocation3 + $0x51] sm:$0xff] }
 0x5f3   : > { %v8845_v42 = vpop.permute.xlu0 %8844  ;;  %v8840_v51 = vpop.permute.xlu1 %8839  ;;  %6102 = vmatprep.mubr.f32.mxu1 %v5910_v55 }
 0x5f4   : > { %v8847_v0 = vunpack.i.h.bf16 %v8845_v42  ;;  %v8846_v15 = vunpack.i.l.bf16 %v8845_v42  ;;  %v8842_v10 = vunpack.i.h.bf16 %v8840_v51  ;;  %v8841_v41 = vunpack.i.l.bf16 %v8840_v51  ;;  %6103 = vmatmul.mubr.f32.gmra.mrb[64].mxu1 %v5835_v4 }
 0x5f6   : > { %v5886_v19 = vsel %vm1645_vm8, %v5861_v44, %v8846_v15  ;;  %v5811_v39 = vsel %vm1645_vm8, %v5786_v14, %v8847_v0  ;;  %v4882_v0 = vmul.f32 %v9139_v63, %v9804_v54  ;;  %v5032_v44 = vld [vmem:[#allocation3 + $0x60] sm:$0xff] }
 0x5f7   : > { %v8850_v30 = vpop.permute.xlu0 %8849  ;;  %v8860_v46 = vpop.permute.xlu1 %8859  ;;  %v5911_v25 = vsel %vm1587_vm10, %v5886_v19, %v8841_v41  ;;  %v5836_v53 = vsel %vm1587_vm10, %v5811_v39, %v8842_v10 }
 0x5f8   : > { %v8852_v5 = vunpack.i.h.bf16 %v8850_v30  ;;  %v8851_v11 = vunpack.i.l.bf16 %v8850_v30  ;;  %6107 = vmatprep.mubr.f32.mxu1 %v5911_v25  ;;  %v8862_v6 = vunpack.i.h.bf16 %v8860_v46  ;;  %v8861_v58 = vunpack.i.l.bf16 %v8860_v46 }
 0x5f9   : > { %6108 = vmatmul.mubr.f32.gmra.mrb[66].mxu1 %v5836_v53 }
 0x5fa   : > { %v5862_v16 = vsel %vm333_vm7, %v5031_v17, %v8851_v11  ;;  %v5787_v13 = vsel %vm333_vm7, %v4881_v2, %v8852_v5  ;;  %v4883_v2 = vmul.f32 %v9140_v49, %v9807_v12  ;;  %v5033_v17 = vld [vmem:[#allocation3 + $0x68] sm:$0xff] }
 0x5fb   : > { %v8855_v27 = vpop.permute.xlu0 %8854  ;;  %v8865_v59 = vpop.permute.xlu1 %8864  ;;  %v5887_v55 = vsel %vm1645_vm8, %v5862_v16, %v8861_v58  ;;  %v5812_v4 = vsel %vm1645_vm8, %v5787_v13, %v8862_v6 }
 0x5fc   : > { %v8857_v32 = vunpack.i.h.bf16 %v8855_v27  ;;  %v8856_v48 = vunpack.i.l.bf16 %v8855_v27  ;;  %v8867_v21 = vunpack.i.h.bf16 %v8865_v59  ;;  %v8866_v33 = vunpack.i.l.bf16 %v8865_v59 }
 0x5fe   : > { %v5912_v34 = vsel %vm1587_vm10, %v5887_v55, %v8856_v48  ;;  %v5837_v42 = vsel %vm1587_vm10, %v5812_v4, %v8857_v32  ;;  %v5863_v14 = vsel %vm333_vm7, %v5032_v44, %v8866_v33  ;;  %v5788_v19 = vsel %vm333_vm7, %v4882_v0, %v8867_v21 }
 0x5ff   : > { %v8875_v51 = vpop.permute.xlu0 %8874  ;;  %v8870_v1 = vpop.permute.xlu1 %8869  ;;  %6112 = vmatprep.mubr.f32.mxu1 %v5912_v34 }
 0x600   : > { %v8877_v15 = vunpack.i.h.bf16 %v8875_v51  ;;  %v8876_v10 = vunpack.i.l.bf16 %v8875_v51  ;;  %v8872_v41 = vunpack.i.h.bf16 %v8870_v1  ;;  %v8871_v29 = vunpack.i.l.bf16 %v8870_v1  ;;  %6113 = vmatmul.mubr.f32.gmra.mrb[68].mxu1 %v5837_v42  ;;  %v9141_v1 = vld [vmem:[#allocation3 + $0x61] sm:$0xff] }
 0x601   : > { %v4884_v63 = vmul.f32 %v9141_v1, %v9832_v28 }
 0x602   : > { %v5888_v39 = vsel %vm1645_vm8, %v5863_v14, %v8876_v10  ;;  %v5813_v30 = vsel %vm1645_vm8, %v5788_v19, %v8877_v15 }
 0x603   : > { %v8880_v46 = vpop.permute.xlu0 %8879  ;;  %v8890_v25 = vpop.permute.xlu1 %8889  ;;  %v5913_v53 = vsel %vm1587_vm10, %v5888_v39, %v8871_v29  ;;  %v5838_v54 = vsel %vm1587_vm10, %v5813_v30, %v8872_v41  ;;  %v5034_v29 = vld [vmem:[#allocation3 + $0x70] sm:$0xff] }
 0x604   : > { %v8882_v5 = vunpack.i.h.bf16 %v8880_v46  ;;  %v8881_v11 = vunpack.i.l.bf16 %v8880_v46  ;;  %6117 = vmatprep.mubr.f32.mxu1 %v5913_v53  ;;  %v8892_v6 = vunpack.i.h.bf16 %v8890_v25  ;;  %v8891_v58 = vunpack.i.l.bf16 %v8890_v25 }
 0x605   : > { %6118 = vmatmul.mubr.f32.gmra.mrb[70].mxu1 %v5838_v54 }
 0x606   : > { %v5864_v16 = vsel %vm333_vm7, %v5033_v17, %v8881_v11  ;;  %v5789_v13 = vsel %vm333_vm7, %v4883_v2, %v8882_v5  ;;  %v9142_v5 = vld [vmem:[#allocation3 + $0x69] sm:$0xff] }
 0x607   : > { %v8885_v27 = vpop.permute.xlu0 %8884  ;;  %v8895_v59 = vpop.permute.xlu1 %8894  ;;  %v5889_v55 = vsel %vm1645_vm8, %v5864_v16, %v8891_v58  ;;  %v5814_v4 = vsel %vm1645_vm8, %v5789_v13, %v8892_v6  ;;  %v4885_v11 = vmul.f32 %v9142_v5, %v9876_v9  ;;  %v5035_v6 = vld [vmem:[#allocation3 + $0x78] sm:$0xff] }
 0x608   : > { %v8887_v32 = vunpack.i.h.bf16 %v8885_v27  ;;  %v8886_v48 = vunpack.i.l.bf16 %v8885_v27  ;;  %v8897_v21 = vunpack.i.h.bf16 %v8895_v59  ;;  %v8896_v33 = vunpack.i.l.bf16 %v8895_v59 }
 0x60a   : > { %v5914_v12 = vsel %vm1587_vm10, %v5889_v55, %v8886_v48  ;;  %v5839_v34 = vsel %vm1587_vm10, %v5814_v4, %v8887_v32  ;;  %v5865_v44 = vsel %vm333_vm7, %v5034_v29, %v8896_v33  ;;  %v5790_v14 = vsel %vm333_vm7, %v4884_v63, %v8897_v21 }
 0x60b   : > { %v8905_v42 = vpop.permute.xlu0 %8904  ;;  %v8900_v51 = vpop.permute.xlu1 %8899  ;;  %6122 = vmatprep.mubr.f32.mxu1 %v5914_v12 }
 0x60c   : > { %v8907_v0 = vunpack.i.h.bf16 %v8905_v42  ;;  %v8906_v15 = vunpack.i.l.bf16 %v8905_v42  ;;  %v8902_v10 = vunpack.i.h.bf16 %v8900_v51  ;;  %v8901_v41 = vunpack.i.l.bf16 %v8900_v51  ;;  %6123 = vmatmul.mubr.f32.gmra.mrb[72].mxu1 %v5839_v34  ;;  %v9143_v34 = vld [vmem:[#allocation3 + $0x71] sm:$0xff] }
 0x60d   : > { %v4886_v42 = vmul.f32 %v9143_v34, %v9934_v43 }
 0x60e   : > { %v5890_v19 = vsel %vm1645_vm8, %v5865_v44, %v8906_v15  ;;  %v5815_v39 = vsel %vm1645_vm8, %v5790_v14, %v8907_v0  ;;  %v5036_v15 = vld [vmem:[#allocation3 + $0x80] sm:$0xff] }
 0x60f   : > { %v8910_v30 = vpop.permute.xlu0 %8909  ;;  %v8920_v46 = vpop.permute.xlu1 %8919  ;;  %v5915_v25 = vsel %vm1587_vm10, %v5890_v19, %v8901_v41  ;;  %v5840_v28 = vsel %vm1587_vm10, %v5815_v39, %v8902_v10 }
 0x610   : > { %v8912_v53 = vunpack.i.h.bf16 %v8910_v30  ;;  %v8911_v54 = vunpack.i.l.bf16 %v8910_v30  ;;  %6127 = vmatprep.mubr.f32.mxu1 %v5915_v25  ;;  %v8922_v49 = vunpack.i.h.bf16 %v8920_v46  ;;  %v8921_v2 = vunpack.i.l.bf16 %v8920_v46 }
 0x611   : > { %6128 = vmatmul.mubr.f32.gmra.mrb[74].mxu1 %v5840_v28  ;;  %v4887_v25 = vmul.f32 %v9978_v45, %v12245_v56 }
 0x612   : > { %v5866_v58 = vsel %vm333_vm7, %v5035_v6, %v8911_v54  ;;  %v5791_v17 = vsel %vm333_vm7, %v4885_v11, %v8912_v53  ;;  %v5037_v54 = vld [vmem:[#allocation3 + $0x88] sm:$0xff] }
 0x613   : > { %v8915_v16 = vpop.permute.xlu0 %8914  ;;  %v8925_v13 = vpop.permute.xlu1 %8924  ;;  %v5891_v21 = vsel %vm1645_vm8, %v5866_v58, %v8921_v2  ;;  %v5816_v33 = vsel %vm1645_vm8, %v5791_v17, %v8922_v49 }
 0x614   : > { %v8917_v27 = vunpack.i.h.bf16 %v8915_v16  ;;  %v8916_v59 = vunpack.i.l.bf16 %v8915_v16  ;;  %v8927_v32 = vunpack.i.h.bf16 %v8925_v13  ;;  %v8926_v48 = vunpack.i.l.bf16 %v8925_v13 }
 0x616   : > { %v5916_v9 = vsel %vm1587_vm10, %v5891_v21, %v8916_v59  ;;  %v5841_v55 = vsel %vm1587_vm10, %v5816_v33, %v8917_v27  ;;  %v5867_v10 = vsel %vm333_vm7, %v5036_v15, %v8926_v48  ;;  %v5792_v41 = vsel %vm333_vm7, %v4886_v42, %v8927_v32 }
 0x617   : > { %v8935_v4 = vpop.permute.xlu0 %8934  ;;  %v8930_v12 = vpop.permute.xlu1 %8929  ;;  %6132 = vmatprep.mubr.f32.mxu1 %v5916_v9  ;;  %v4888_v48 = vmul.f32 %v13320_v57, %v12255_v20 }
 0x618   : > { %v8937_v51 = vunpack.i.h.bf16 %v8935_v4  ;;  %v8936_v1 = vunpack.i.l.bf16 %v8935_v4  ;;  %v8932_v63 = vunpack.i.h.bf16 %v8930_v12  ;;  %v8931_v0 = vunpack.i.l.bf16 %v8930_v12  ;;  %6133 = vmatmul.mubr.f32.gmra.mrb[76].mxu1 %v5841_v55  ;;  %v5038_v4 = vld [vmem:[#allocation3 + $0x90] sm:$0xff] }
 0x61a   : > { %v5892_v29 = vsel %vm1645_vm8, %v5867_v10, %v8936_v1  ;;  %v5817_v44 = vsel %vm1645_vm8, %v5792_v41, %v8937_v51  ;;  %v4889_v10 = vmul.f32 %v13321_v24, %v12271_v38 }
 0x61b   : > { %v8940_v14 = vpop.permute.xlu0 %8939  ;;  %v8950_v19 = vpop.permute.xlu1 %8949  ;;  %v5917_v39 = vsel %vm1587_vm10, %v5892_v29, %v8931_v0  ;;  %v5842_v43 = vsel %vm1587_vm10, %v5817_v44, %v8932_v63  ;;  %v5039_v44 = vld [vmem:[#allocation3 + $0x98] sm:$0xff] }
 0x61c   : > { %v8942_v30 = vunpack.i.h.bf16 %v8940_v14  ;;  %v8941_v46 = vunpack.i.l.bf16 %v8940_v14  ;;  %6137 = vmatprep.mubr.f32.mxu1 %v5917_v39  ;;  %v8952_v28 = vunpack.i.h.bf16 %v8950_v19  ;;  %v8951_v53 = vunpack.i.l.bf16 %v8950_v19 }
 0x61d   : > { %6138 = vmatmul.mubr.f32.gmra.mrb[78].mxu1 %v5842_v43 }
 0x61e   : > { %v5868_v5 = vsel %vm333_vm7, %v5037_v54, %v8941_v46  ;;  %v5793_v11 = vsel %vm333_vm7, %v4887_v25, %v8942_v30 }
 0x61f   : > { %v8945_v49 = vpop.permute.xlu0 %8944  ;;  %v8955_v2 = vpop.permute.xlu1 %8954  ;;  %v5893_v13 = vsel %vm1645_vm8, %v5868_v5, %v8951_v53  ;;  %v5818_v27 = vsel %vm1645_vm8, %v5793_v11, %v8952_v28 }
 0x620   : > { %v8947_v6 = vunpack.i.h.bf16 %v8945_v49  ;;  %v8946_v58 = vunpack.i.l.bf16 %v8945_v49  ;;  %v8957_v17 = vunpack.i.h.bf16 %v8955_v2  ;;  %v8956_v16 = vunpack.i.l.bf16 %v8955_v2 }
 0x621   : > { %v4890_v49 = vmul.f32 %v13322_v23, %v12278_v62 }
 0x622   : > { %v5918_v45 = vsel %vm1587_vm10, %v5893_v13, %v8946_v58  ;;  %v5843_v56 = vsel %vm1587_vm10, %v5818_v27, %v8947_v6  ;;  %v5869_v12 = vsel %vm333_vm7, %v5038_v4, %v8956_v16  ;;  %v5794_v34 = vsel %vm333_vm7, %v4888_v48, %v8957_v17  ;;  %v5040_v16 = vld [vmem:[#allocation3 + $0xa0] sm:$0xff]  ;;  %v5041_v4 = vld [vmem:[#allocation3 + $0xa8] sm:$0xff] }
 0x623   : > { %v8965_v59 = vpop.permute.xlu0 %8964  ;;  %v8960_v32 = vpop.permute.xlu1 %8959  ;;  %6142 = vmatprep.mubr.f32.mxu1 %v5918_v45 }
 0x624   : > { %v8967_v21 = vunpack.i.h.bf16 %v8965_v59  ;;  %v8966_v33 = vunpack.i.l.bf16 %v8965_v59  ;;  %v8962_v9 = vunpack.i.h.bf16 %v8960_v32  ;;  %v8961_v55 = vunpack.i.l.bf16 %v8960_v32  ;;  %6143 = vmatmul.mubr.f32.gmra.mrb[80].mxu1 %v5843_v56 }
 0x626   : > { %v5894_v42 = vsel %vm1645_vm8, %v5869_v12, %v8966_v33  ;;  %v5819_v51 = vsel %vm1645_vm8, %v5794_v34, %v8967_v21  ;;  %v4891_v33 = vmul.f32 %v13323_v31, %v12291_v35 }
 0x627   : > { %v8970_v1 = vpop.permute.xlu0 %8969  ;;  %v8980_v63 = vpop.permute.xlu1 %8979  ;;  %v5919_v0 = vsel %vm1587_vm10, %v5894_v42, %v8961_v55  ;;  %v5844_v57 = vsel %vm1587_vm10, %v5819_v51, %v8962_v9 }
 0x628   : > { %v8972_v20 = vunpack.i.h.bf16 %v8970_v1  ;;  %v8971_v15 = vunpack.i.l.bf16 %v8970_v1  ;;  %6147 = vmatprep.mubr.f32.mxu1 %v5919_v0  ;;  %v8982_v41 = vunpack.i.h.bf16 %v8980_v63  ;;  %v8981_v29 = vunpack.i.l.bf16 %v8980_v63 }
 0x629   : > { %6148 = vmatmul.mubr.f32.gmra.mrb[82].mxu1 %v5844_v57 }
 0x62a   : > { %v5870_v14 = vsel %vm333_vm7, %v5039_v44, %v8971_v15  ;;  %v5795_v19 = vsel %vm333_vm7, %v4889_v10, %v8972_v20 }
 0x62b   : > { %v8975_v39 = vpop.permute.xlu0 %8974  ;;  %v8985_v43 = vpop.permute.xlu1 %8984  ;;  %v5895_v53 = vsel %vm1645_vm8, %v5870_v14, %v8981_v29  ;;  %v5820_v54 = vsel %vm1645_vm8, %v5795_v19, %v8982_v41  ;;  %v9144_v29 = vld [vmem:[#allocation3 + $0xa1] sm:$0xff] }
 0x62c   : > { %v8977_v30 = vunpack.i.h.bf16 %v8975_v39  ;;  %v8976_v46 = vunpack.i.l.bf16 %v8975_v39  ;;  %v8987_v25 = vunpack.i.h.bf16 %v8985_v43  ;;  %v8986_v28 = vunpack.i.l.bf16 %v8985_v43 }
 0x62d   : > { %v4892_v44 = vmul.f32 %v9144_v29, %v13324_v18 }
 0x62e   : > { %v5920_v24 = vsel %vm1587_vm10, %v5895_v53, %v8976_v46  ;;  %v5845_v38 = vsel %vm1587_vm10, %v5820_v54, %v8977_v30  ;;  %v5871_v13 = vsel %vm333_vm7, %v5040_v16, %v8986_v28  ;;  %v5796_v27 = vsel %vm333_vm7, %v4890_v49, %v8987_v25  ;;  %v5042_v30 = vld [vmem:[#allocation3 + $0xb0] sm:$0xff] }
 0x62f   : > { %v8995_v5 = vpop.permute.xlu0 %8994  ;;  %v8990_v11 = vpop.permute.xlu1 %8989  ;;  %6152 = vmatprep.mubr.f32.mxu1 %v5920_v24 }
 0x630   : > { %v8997_v2 = vunpack.i.h.bf16 %v8995_v5  ;;  %v8996_v6 = vunpack.i.l.bf16 %v8995_v5  ;;  %v8992_v58 = vunpack.i.h.bf16 %v8990_v11  ;;  %v8991_v17 = vunpack.i.l.bf16 %v8990_v11  ;;  %6153 = vmatmul.mubr.f32.gmra.mrb[84].mxu1 %v5845_v38 }
 0x632   : > { %v5896_v45 = vsel %vm1645_vm8, %v5871_v13, %v8996_v6  ;;  %v5821_v56 = vsel %vm1645_vm8, %v5796_v27, %v8997_v2  ;;  %v9145_v6 = vld [vmem:[#allocation3 + $0xa9] sm:$0xff] }
 0x633   : > { %v9000_v59 = vpop.permute.xlu0 %8999  ;;  %v9010_v32 = vpop.permute.xlu1 %9009  ;;  %v5921_v48 = vsel %vm1587_vm10, %v5896_v45, %v8991_v17  ;;  %v5846_v23 = vsel %vm1587_vm10, %v5821_v56, %v8992_v58  ;;  %v4893_v58 = vmul.f32 %v9145_v6, %v13325_v40  ;;  %v5043_v45 = vld [vmem:[#allocation3 + $0xb8] sm:$0xff] }
 0x634   : > { %v9002_v62 = vunpack.i.h.bf16 %v9000_v59  ;;  %v9001_v21 = vunpack.i.l.bf16 %v9000_v59  ;;  %6157 = vmatprep.mubr.f32.mxu1 %v5921_v48  ;;  %v9012_v9 = vunpack.i.h.bf16 %v9010_v32  ;;  %v9011_v55 = vunpack.i.l.bf16 %v9010_v32 }
 0x635   : > { %6158 = vmatmul.mubr.f32.gmra.mrb[86].mxu1 %v5846_v23 }
 0x636   : > { %v5872_v12 = vsel %vm333_vm7, %v5041_v4, %v9001_v21  ;;  %v5797_v34 = vsel %vm333_vm7, %v4891_v33, %v9002_v62 }
 0x637   : > { %v9005_v42 = vpop.permute.xlu0 %9004  ;;  %v9015_v51 = vpop.permute.xlu1 %9014  ;;  %v5897_v20 = vsel %vm1645_vm8, %v5872_v12, %v9011_v55  ;;  %v5822_v15 = vsel %vm1645_vm8, %v5797_v34, %v9012_v9  ;;  %v9146_v55 = vld [vmem:[#allocation3 + $0xb1] sm:$0xff] }
 0x638   : > { %v9007_v1 = vunpack.i.h.bf16 %v9005_v42  ;;  %v9006_v63 = vunpack.i.l.bf16 %v9005_v42  ;;  %v9017_v0 = vunpack.i.h.bf16 %v9015_v51  ;;  %v9016_v57 = vunpack.i.l.bf16 %v9015_v51  ;;  %v5044_v42 = vld [vmem:[#allocation3 + $0xc0] sm:$0xff] }
 0x639   : > { %v4894_v4 = vmul.f32 %v9146_v55, %v13326_v61  ;;  %v9150_v55 = vld [vmem:[#allocation3 + $0x37] sm:$0xff] }
 0x63a   : > { %v5922_v31 = vsel %vm1587_vm10, %v5897_v20, %v9006_v63  ;;  %v5847_v35 = vsel %vm1587_vm10, %v5822_v15, %v9007_v1  ;;  %v5873_v46 = vsel %vm333_vm7, %v5042_v30, %v9016_v57  ;;  %v5798_v25 = vsel %vm333_vm7, %v4892_v44, %v9017_v0 }
 0x63b   : > { %v9025_v10 = vpop.permute.xlu0 %9024  ;;  %v9020_v41 = vpop.permute.xlu1 %9019  ;;  %6162 = vmatprep.mubr.f32.mxu1 %v5922_v31  ;;  %v4895_v57 = vmul.f32 %v13327_v60, %v12323_v22 }
 0x63c   : > { %v9027_v14 = vunpack.i.h.bf16 %v9025_v10  ;;  %v9026_v19 = vunpack.i.l.bf16 %v9025_v10  ;;  %v9022_v39 = vunpack.i.h.bf16 %v9020_v41  ;;  %v9021_v43 = vunpack.i.l.bf16 %v9020_v41  ;;  %6163 = vmatmul.mubr.f32.gmra.mrb[88].mxu1 %v5847_v35  ;;  %v5045_v41 = vld [vmem:[#allocation3 + $0xc8] sm:$0xff] }
 0x63e   : > { %v5898_v28 = vsel %vm1645_vm8, %v5873_v46, %v9026_v19  ;;  %v5823_v53 = vsel %vm1645_vm8, %v5798_v25, %v9027_v14  ;;  %v4871_v25 = vld [vmem:[#allocation3 + $0xc1] sm:$0xf] }
 0x63f   : > { %v9030_v54 = vpop.permute.xlu0 %9029  ;;  %v12512_v24 = vpop.permute.xlu1 %9034  ;;  %v5923_v38 = vsel %vm1587_vm10, %v5898_v28, %v9021_v43  ;;  %v5848_v18 = vsel %vm1587_vm10, %v5823_v53, %v9022_v39 }
 0x640   : > { %6167 = vmatprep.mubr.f32.mxu1 %v5923_v38  ;;  %v9032_v5 = vunpack.i.h.bf16 %v9030_v54  ;;  %v9031_v11 = vunpack.i.l.bf16 %v9030_v54  ;;  %v9037_v39 = vunpack.i.h.bf16 %v12512_v24  ;;  %v9036_v60 = vunpack.i.l.bf16 %v12512_v24 }
 0x641   : > { %6168 = vmatmul.mubr.f32.gmra.mrb[90].mxu1 %v5848_v18  ;;  %v4896_v24 = vmul.f32 %v13161_v52, %v4871_v25  ;;  %v9147_v52 = vld [vmem:[#allocation3 + $0x1f] sm:$0xff] }
 0x642   : > { %v5874_v56 = vsel %vm333_vm7, %v5043_v45, %v9031_v11  ;;  %v5799_v59 = vsel %vm333_vm7, %v4893_v58, %v9032_v5  ;;  %v9159_v25 = vld [vmem:[#allocation3 + $0x7f] sm:$0xff] }
 0x643   : > { %v9040_v49 = vpop.permute.xlu0 %9039  ;;  %v9045_v2 = vpop.permute.xlu1 %9044 }
 0x644   : > { %v9042_v17 = vunpack.i.h.bf16 %v9040_v49  ;;  %v9041_v16 = vunpack.i.l.bf16 %v9040_v49  ;;  %v9047_v13 = vunpack.i.h.bf16 %v9045_v2  ;;  %v9046_v27 = vunpack.i.l.bf16 %v9045_v2 }
 0x646   : > { %v5899_v32 = vsel %vm1645_vm8, %v5874_v56, %v9046_v27  ;;  %v5824_v48 = vsel %vm1645_vm8, %v5799_v59, %v9047_v13 }
 0x647   : > { %v9060_v23 = vpop.permute.xlu0 %9059  ;;  %v9050_v62 = vpop.permute.xlu1 %9049  ;;  %v5924_v21 = vsel %vm1587_vm10, %v5899_v32, %v9041_v16  ;;  %v5849_v33 = vsel %vm1587_vm10, %v5824_v48, %v9042_v17  ;;  %v5046_v16 = vld [vmem:[#allocation3 + $0xd0] sm:$0xf]  ;;  %v5153_v48 = vmul.f32 %v9147_v52, %v13331_v37  ;;  %v9166_v52 = vld [vmem:[#allocation3 + $0xb7] sm:$0xff] }
 0x648   : > { %v9052_v40 = vunpack.i.h.bf16 %v9050_v62  ;;  %v9051_v9 = vunpack.i.l.bf16 %v9050_v62  ;;  %6172 = vmatprep.mubr.f32.mxu1 %v5924_v21  ;;  %v9062_v12 = vunpack.i.h.bf16 %v9060_v23  ;;  %v9061_v34 = vunpack.i.l.bf16 %v9060_v23  ;;  %v9148_v23 = vld [vmem:[#allocation3 + $0x27] sm:$0xff]  ;;  %v9149_v37 = vld [vmem:[#allocation3 + $0x2f] sm:$0xff] }
 0x649   : > { %6173 = vmatmul.mubr.f32.gmra.mrb[92].mxu1 %v5849_v33  ;;  %v13360_v62 = vld [vmem:[#allocation14_spill] sm:$0xff]  ;;  %v13361_v33 = vld [vmem:[#allocation44_spill] sm:$0xff] }
 0x64a   : > { %v5875_v51 = vsel %vm333_vm7, %v5044_v42, %v9051_v9  ;;  %v5800_v1 = vsel %vm333_vm7, %v4894_v4, %v9052_v40  ;;  %v5154_v21 = vmul.f32 %v9148_v23, %v13360_v62  ;;  %v13362_v40 = vld [vmem:[#allocation19_spill] sm:$0xff]  ;;  %v13364_v4 = vld [vmem:[#allocation22_spill] sm:$0xff] }
 0x64b   : > { %v9065_v63 = vpop.permute.xlu0 %9064  ;;  %v9055_v0 = vpop.permute.xlu1 %9054  ;;  %v5900_v10 = vsel %vm1645_vm8, %v5875_v51, %v9061_v34  ;;  %v5825_v61 = vsel %vm1645_vm8, %v5800_v1, %v9062_v12  ;;  %v5155_v9 = vmul.f32 %v9149_v37, %v13362_v40  ;;  %v5156_v12 = vmul.f32 %v9150_v55, %v13364_v4  ;;  %v13365_v34 = vld [vmem:[#allocation57_spill] sm:$0xff]  ;;  %v13366_v51 = vld [vmem:[#allocation16_spill] sm:$0xff]  ;;  %v9168_v37 = vld [vmem:[#allocation3 + $0xc7] sm:$0xff] }
 0x64c   : > { %v9067_v20 = vunpack.i.h.bf16 %v9065_v63  ;;  %v9066_v15 = vunpack.i.l.bf16 %v9065_v63  ;;  %v9057_v31 = vunpack.i.h.bf16 %v9055_v0  ;;  %v9056_v35 = vunpack.i.l.bf16 %v9055_v0  ;;  %v9151_v42 = vld [vmem:[#allocation3 + $0x3f] sm:$0xff]  ;;  %v9152_v63 = vld [vmem:[#allocation3 + $0x47] sm:$0xff] }
 0x64d   : > { %v5157_v1 = vmul.f32 %v9151_v42, %v13366_v51  ;;  %v13367_v0 = vld [vmem:[#allocation21_spill] sm:$0xff]  ;;  %v5174_v40 = vmul.f32 %v9168_v37, %v13354_v8 }
 0x64e   : > { %v5925_v29 = vsel %vm1587_vm10, %v5900_v10, %v9056_v35  ;;  %v5850_v44 = vsel %vm1587_vm10, %v5825_v61, %v9057_v31  ;;  %v5876_v14 = vsel %vm333_vm7, %v5045_v41, %v9066_v15  ;;  %v5801_v19 = vsel %vm333_vm7, %v4895_v57, %v9067_v20  ;;  %v13368_v20 = vld [vmem:[#allocation23_spill] sm:$0xff]  ;;  %v9154_v31 = vld [vmem:[#allocation3 + $0x57] sm:$0xff]  ;;  %v9155_v61 = vld [vmem:[#allocation3 + $0x5f] sm:$0xff] }
 0x64f   : > { %v9070_v22 = vpop.permute.xlu0 %9069  ;;  %v9075_v43 = vpop.permute.xlu1 %9074  ;;  %6177 = vmatprep.mubr.f32.mxu1 %v5925_v29  ;;  %v5901_v54 = vsel %vm1645_vm8, %v5876_v14, %v9036_v60  ;;  %v5826_v38 = vsel %vm1645_vm8, %v5801_v19, %v9037_v39  ;;  %v5158_v57 = vmul.f32 %v9152_v63, %v13367_v0  ;;  %v13369_v35 = vld [vmem:[#allocation24_spill] sm:$0xff]  ;;  %v13370_v41 = vld [vmem:[#allocation25_spill] sm:$0xff]  ;;  %v13371_v14 = vld [vmem:[#allocation26_spill] sm:$0xff] }
 0x650   : > { %v9072_v30 = vunpack.i.h.bf16 %v9070_v22  ;;  %v9071_v46 = vunpack.i.l.bf16 %v9070_v22  ;;  %6178 = vmatmul.mubr.f32.gmra.mrb[94].mxu1 %v5850_v44  ;;  %v9077_v28 = vunpack.i.h.bf16 %v9075_v43  ;;  %v9076_v53 = vunpack.i.l.bf16 %v9075_v43  ;;  %v9156_v44 = vld [vmem:[#allocation3 + $0x67] sm:$0xff]  ;;  %v9157_v39 = vld [vmem:[#allocation3 + $0x6f] sm:$0xff]  ;;  %v9158_v43 = vld [vmem:[#allocation3 + $0x77] sm:$0xff] }
 0x651   : > { %v5160_v10 = vmul.f32 %v9154_v31, %v13369_v35  ;;  %v5161_v29 = vmul.f32 %v9155_v61, %v13370_v41  ;;  %v5162_v19 = vmul.f32 %v9156_v44, %v13371_v14  ;;  %v13372_v60 = vld [vmem:[#allocation27_spill] sm:$0xff]  ;;  %v9167_v62 = vld [vmem:[#allocation3 + $0xbf] sm:$0xff] }
 0x652   : > { %v5926_v18 = vsel %vm1587_vm10, %v5901_v54, %v9071_v46  ;;  %v5851_v5 = vsel %vm1587_vm10, %v5826_v38, %v9072_v30  ;;  %v5877_v13 = vsel %vm333_vm7, %v5046_v16, %v9076_v53  ;;  %v5802_v27 = vsel %vm333_vm7, %v4896_v24, %v9077_v28  ;;  %v13373_v30 = vld [vmem:[#allocation29_spill] sm:$0xff]  ;;  %v13374_v28 = vld [vmem:[#allocation30_spill] sm:$0xff]  ;;  %v13375_v38 = vld [vmem:[#allocation32_spill] sm:$0xff] }
 0x653   : > { %v9080_v11 = vpop.permute.xlu0 %9079  ;;  %v9085_v49 = vpop.permute.xlu1 %9084  ;;  %6182 = vmatprep.mubr.f32.mxu1 %v5926_v18  ;;  %v5163_v22 = vmul.f32 %v9157_v39, %v13372_v60  ;;  %v5164_v46 = vmul.f32 %v9158_v43, %v13373_v30  ;;  %v5165_v53 = vmul.f32 %v9159_v25, %v13374_v28  ;;  %v9160_v54 = vld [vmem:[#allocation3 + $0x87] sm:$0xff]  ;;  %v9162_v24 = vld [vmem:[#allocation3 + $0x97] sm:$0xff] }
 0x654   : > { %v9082_v2 = vunpack.i.h.bf16 %v9080_v11  ;;  %v9081_v6 = vunpack.i.l.bf16 %v9080_v11  ;;  %v9087_v58 = vunpack.i.h.bf16 %v9085_v49  ;;  %v9086_v17 = vunpack.i.l.bf16 %v9085_v49  ;;  %6183 = vmatmul.mubr.f32.gmra.mrb[96].mxu1 %v5851_v5  ;;  %v9161_v5 = vld [vmem:[#allocation3 + $0x8f] sm:$0xff]  ;;  %v13376_v11 = vld [vmem:[#allocation33_spill] sm:$0xff] }
 0x655   : > { %v5166_v18 = vmul.f32 %v9160_v54, %v13375_v38  ;;  %v5167_v49 = vmul.f32 %v9161_v5, %v13376_v11 }
 0x656   : > { %v5902_v45 = vsel %vm1645_vm8, %v5877_v13, %v9081_v6  ;;  %v5827_v56 = vsel %vm1645_vm8, %v5802_v27, %v9082_v2  ;;  %v13377_v2 = vld [vmem:[#allocation34_spill] sm:$0xff]  ;;  %v13379_v27 = vld [vmem:[#allocation36_spill] sm:$0xff] }
 0x657   : > { %v5927_v59 = vsel %vm1587_vm10, %v5902_v45, %v9086_v17  ;;  %v5852_v32 = vsel %vm1587_vm10, %v5827_v56, %v9087_v58  ;;  %v5168_v6 = vmul.f32 %v9162_v24, %v13377_v2  ;;  %v9163_v58 = vld [vmem:[#allocation3 + $0x9f] sm:$0xff]  ;;  %v13378_v17 = vld [vmem:[#allocation35_spill] sm:$0xff] }
 0x658   : > { %6187 = vmatprep.mubr.f32.mxu1 %v5927_v59  ;;  %v5169_v16 = vmul.f32 %v9163_v58, %v13378_v17  ;;  %v9164_v13 = vld [vmem:[#allocation3 + $0xa7] sm:$0xff]  ;;  %v9165_v56 = vld [vmem:[#allocation3 + $0xaf] sm:$0xff] }
 0x659   : > { %6188 = vmatmul.mubr.f32.gmra.mrb[98].mxu1 %v5852_v32  ;;  %v5170_v45 = vmul.f32 %v9164_v13, %v13379_v27  ;;  %v13380_v59 = vld [vmem:[#allocation42_spill] sm:$0xff] }
 0x65a   : > { %7555 = vmatprep.mubr.msk.f32.mxu1 %vm9243_vm2, %v13176_v26  ;;  %v5171_v32 = vmul.f32 %v9165_v56, %v13380_v59 }
 0x65d   : > { %7556 = vmatmul.mubr.msk.f32.vlgmr.msra.gmra.mrb[50].mxu1 %vm333_vm7, %v5153_v48  ;;  %v13381_v48 = vld [vmem:[#allocation45_spill] sm:$0xff] }
 0x65e   : > { %7558 = vmatprep.mubr.msk.f32.mxu1 %vm9243_vm2, %v13176_v26  ;;  %7946 = vmatpush3.bf16.msra.mxu1 %v11239_v50  ;;  %v13363_v50 = vld [vmem:[#allocation53_spill] sm:$0xff]  ;;  %v5172_v23 = vmul.f32 %v9166_v52, %v13381_v48 }
 0x65f   : > { %7947 = vmatprep.subr.bf16.mxu1 %v13162_v3 }
 0x661   : > { %7559 = vmatmul.mubr.msk.f32.gmra.mrb[52].mxu1 %vm333_vm7, %v5154_v21  ;;  %v13382_v21 = vld [vmem:[#allocation47_spill] sm:$0xff] }
 0x662   : > { %7561 = vmatprep.mubr.msk.f32.mxu1 %vm9243_vm2, %v13176_v26  ;;  %7949 = vmatpush3.bf16.msra.mxu1 %v13361_v33  ;;  %v5173_v33 = vmul.f32 %v9167_v62, %v13382_v21 }
 0x663   : > { %7950 = vmatprep.subr.bf16.mxu1 %v13162_v3 }
 0x665   : > { %7562 = vmatmul.mubr.msk.f32.gmra.mrb[54].mxu1 %vm333_vm7, %v5155_v9  ;;  %v5150_v9 = vld [vmem:[#allocation3 + $0xcf] sm:$0xff] }
 0x666   : > { %7564 = vmatprep.mubr.msk.f32.mxu1 %vm9243_vm2, %v13176_v26  ;;  %7952 = vmatpush3.bf16.msra.mxu1 %v13363_v50  ;;  %v5151_v50 = vld [vmem:[#allocation3 + $0xd7] sm:$0xff]  ;;  %v5175_v55 = vmul.f32 %v13357_v7, %v5150_v9 }
 0x667   : > { %7953 = vmatprep.subr.bf16.mxu1 %v13162_v3  ;;  %v9153_v3 = vld [vmem:[#allocation3 + $0x4f] sm:$0xff]  ;;  %v5176_v4 = vmul.f32 %v13355_v47, %v5151_v50  ;;  %v12659_v47 = vld [vmem:[%s12897_s4] ss:$0 sm:$0xff] }
 0x668   : > { %v5159_v15 = vmul.f32 %v9153_v3, %v13368_v20 }
 0x669   : > { %7565 = vmatmul.mubr.msk.f32.gmra.mrb[56].mxu1 %vm333_vm7, %v5156_v12  ;;  %v5152_v12 = vld [vmem:[#allocation3 + $0xdf] sm:$0xf] }
 0x66a   : > { %7567 = vmatprep.mubr.msk.f32.mxu1 %vm9243_vm2, %v13176_v26  ;;  %7955 = vmatpush3.bf16.msra.mxu1 %v13365_v34  ;;  %v5177_v8 = vmul.f32 %v13359_v36, %v5152_v12 }
 0x66d   : > { %7568 = vmatmul.mubr.msk.f32.gmra.mrb[58].mxu1 %vm333_vm7, %v5157_v1 }
 0x66e   : > { %7570 = vmatprep.mubr.msk.f32.mxu1 %vm9243_vm2, %v13176_v26 }
 0x671   : > { %7571 = vmatmul.mubr.msk.f32.gmra.mrb[60].mxu1 %vm333_vm7, %v5158_v57 }
 0x672   : > { %7573 = vmatprep.mubr.msk.f32.mxu1 %vm9243_vm2, %v13176_v26 }
 0x675   : > { %7574 = vmatmul.mubr.msk.f32.gmra.mrb[62].mxu1 %vm333_vm7, %v5159_v15 }
 0x676   : > { %7576 = vmatprep.mubr.msk.f32.mxu1 %vm9243_vm2, %v13176_v26 }
 0x679   : > { %7577 = vmatmul.mubr.msk.f32.gmra.mrb[64].mxu1 %vm333_vm7, %v5160_v10 }
 0x67a   : > { %7579 = vmatprep.mubr.msk.f32.mxu1 %vm9243_vm2, %v13176_v26 }
 0x67d   : > { %7580 = vmatmul.mubr.msk.f32.gmra.mrb[66].mxu1 %vm333_vm7, %v5161_v29 }
 0x67e   : > { %7582 = vmatprep.mubr.msk.f32.mxu1 %vm9243_vm2, %v13176_v26 }
 0x681   : > { %7583 = vmatmul.mubr.msk.f32.gmra.mrb[68].mxu1 %vm333_vm7, %v5162_v19 }
 0x682   : > { %7585 = vmatprep.mubr.msk.f32.mxu1 %vm9243_vm2, %v13176_v26 }
 0x685   : > { %7586 = vmatmul.mubr.msk.f32.gmra.mrb[70].mxu1 %vm333_vm7, %v5163_v22 }
 0x686   : > { %7588 = vmatprep.mubr.msk.f32.mxu1 %vm9243_vm2, %v13176_v26 }
 0x689   : > { %7589 = vmatmul.mubr.msk.f32.gmra.mrb[72].mxu1 %vm333_vm7, %v5164_v46 }
 0x68a   : > { %7591 = vmatprep.mubr.msk.f32.mxu1 %vm9243_vm2, %v13176_v26 }
 0x68d   : > { %7592 = vmatmul.mubr.msk.f32.gmra.mrb[74].mxu1 %vm333_vm7, %v5165_v53 }
 0x68e   : > { %7594 = vmatprep.mubr.msk.f32.mxu1 %vm9243_vm2, %v13176_v26 }
 0x691   : > { %7595 = vmatmul.mubr.msk.f32.gmra.mrb[76].mxu1 %vm333_vm7, %v5166_v18 }
 0x692   : > { %7597 = vmatprep.mubr.msk.f32.mxu1 %vm9243_vm2, %v13176_v26 }
 0x695   : > { %7598 = vmatmul.mubr.msk.f32.gmra.mrb[78].mxu1 %vm333_vm7, %v5167_v49 }
 0x696   : > { %7600 = vmatprep.mubr.msk.f32.mxu1 %vm9243_vm2, %v13176_v26 }
 0x699   : > { %7601 = vmatmul.mubr.msk.f32.gmra.mrb[80].mxu1 %vm333_vm7, %v5168_v6 }
 0x69a   : > { %7603 = vmatprep.mubr.msk.f32.mxu1 %vm9243_vm2, %v13176_v26 }
 0x69d   : > { %7604 = vmatmul.mubr.msk.f32.gmra.mrb[82].mxu1 %vm333_vm7, %v5169_v16 }
 0x69e   : > { %7606 = vmatprep.mubr.msk.f32.mxu1 %vm9243_vm2, %v13176_v26 }
 0x6a1   : > { %7607 = vmatmul.mubr.msk.f32.gmra.mrb[84].mxu1 %vm333_vm7, %v5170_v45 }
 0x6a2   : > { %7609 = vmatprep.mubr.msk.f32.mxu1 %vm9243_vm2, %v13176_v26 }
 0x6a5   : > { %7610 = vmatmul.mubr.msk.f32.gmra.mrb[86].mxu1 %vm333_vm7, %v5171_v32 }
 0x6a6   : > { %7612 = vmatprep.mubr.msk.f32.mxu1 %vm9243_vm2, %v13176_v26 }
 0x6a9   : > { %7613 = vmatmul.mubr.msk.f32.gmra.mrb[88].mxu1 %vm333_vm7, %v5172_v23 }
 0x6aa   : > { %7615 = vmatprep.mubr.msk.f32.mxu1 %vm9243_vm2, %v13176_v26 }
 0x6ad   : > { %7616 = vmatmul.mubr.msk.f32.gmra.mrb[90].mxu1 %vm333_vm7, %v5173_v33 }
 0x6ae   : > { %7618 = vmatprep.mubr.msk.f32.mxu1 %vm9243_vm2, %v13176_v26 }
 0x6b1   : > { %7619 = vmatmul.mubr.msk.f32.gmra.mrb[92].mxu1 %vm333_vm7, %v5174_v40 }
 0x6b2   : > { %7621 = vmatprep.mubr.msk.f32.mxu1 %vm9243_vm2, %v13176_v26 }
 0x6b5   : > { %7622 = vmatmul.mubr.msk.f32.gmra.mrb[94].mxu1 %vm333_vm7, %v5175_v55 }
 0x6b6   : > { %7624 = vmatprep.mubr.msk.f32.mxu1 %vm9243_vm2, %v13176_v26 }
 0x6b9   : > { %7625 = vmatmul.mubr.msk.f32.gmra.mrb[96].mxu1 %vm333_vm7, %v5176_v4 }
 0x6ba   : > { %7627 = vmatprep.mubr.msk.f32.mxu1 %vm9243_vm2, %v13176_v26 }
 0x6bd   : > { %7628 = vmatmul.mubr.msk.f32.gmra.mrb[98].mxu1 %vm333_vm7, %v5177_v8 }
 0x6be   : > { %7646 = vmatprep.mubr.msk.f32.mxu1 %vm9243_vm2, %v13176_v26 }
 0x730   : > { %v6259_v7 = vpop.f32.mrb[50].mxu1 }
 0x731   : > { %v7993_v34 = vadd.f32 %v12659_v47, %v6259_v7  ;;  %v7557_v42 = vpop.f32.mrb[51].mxu1 }
 0x733   : > { %v6383_v51 = vmax.f32 %v7993_v34, 0.0 }
 0x734   : > { %v6264_v1 = vpop.f32.mrb[52].mxu1 }
 0x735   : > { %v7994_v36 = vadd.f32 %v12659_v47, %v6264_v1  ;;  %v7560_v63 = vpop.f32.mrb[53].mxu1  ;;  %7666 = vmatmul.mubr.msk.f32.vlgmr.msra.gmra.mrb[152].mxu0 %vm1645_vm8, %v6383_v51  ;;  %v6408_v3 = vsel %vm1645_vm8, %v6383_v51, 0.0 }
 0x736   : > { %7668 = vmatprep.mubr.msk.f32.mxu0 %vm9243_vm2, %v13176_v26 }
 0x737   : > { %v6384_v0 = vmax.f32 %v7994_v36, 0.0 }
 0x738   : > { %v6269_v57 = vpop.f32.mrb[54].mxu1 }
 0x739   : > { %v6409_v20 = vsel %vm1645_vm8, %v6384_v0, 0.0  ;;  %v7995_v15 = vadd.f32 %v12659_v47, %v6269_v57  ;;  %v7563_v31 = vpop.f32.mrb[55].mxu1  ;;  %7669 = vmatmul.mubr.msk.f32.gmra.mrb[154].mxu0 %vm1645_vm8, %v6384_v0 }
 0x73a   : > { %v6410_v35 = vadd.f32 %v6409_v20, %v6408_v3  ;;  %7671 = vmatprep.mubr.msk.f32.mxu0 %vm9243_vm2, %v13176_v26 }
 0x73b   : > { %v6385_v10 = vmax.f32 %v7995_v15, 0.0 }
 0x73c   : > { %v6274_v61 = vpop.f32.mrb[56].mxu1 }
 0x73d   : > { %v6411_v41 = vsel %vm1645_vm8, %v6385_v10, 0.0  ;;  %v7996_v29 = vadd.f32 %v12659_v47, %v6274_v61  ;;  %v7566_v44 = vpop.f32.mrb[57].mxu1  ;;  %7672 = vmatmul.mubr.msk.f32.gmra.mrb[156].mxu0 %vm1645_vm8, %v6385_v10 }
 0x73e   : > { %v6412_v14 = vadd.f32 %v6411_v41, %v6410_v35  ;;  %7674 = vmatprep.mubr.msk.f32.mxu0 %vm9243_vm2, %v13176_v26 }
 0x73f   : > { %v6386_v19 = vmax.f32 %v7996_v29, 0.0 }
 0x740   : > { %v6279_v39 = vpop.f32.mrb[58].mxu1 }
 0x741   : > { %v6413_v60 = vsel %vm1645_vm8, %v6386_v19, 0.0  ;;  %v7997_v22 = vadd.f32 %v12659_v47, %v6279_v39  ;;  %v7569_v43 = vpop.f32.mrb[59].mxu1  ;;  %7675 = vmatmul.mubr.msk.f32.gmra.mrb[158].mxu0 %vm1645_vm8, %v6386_v19 }
 0x742   : > { %v6414_v30 = vadd.f32 %v6413_v60, %v6412_v14  ;;  %7677 = vmatprep.mubr.msk.f32.mxu0 %vm9243_vm2, %v13176_v26 }
 0x743   : > { %v6387_v46 = vmax.f32 %v7997_v22, 0.0 }
 0x744   : > { %v6284_v25 = vpop.f32.mrb[60].mxu1 }
 0x745   : > { %v6415_v28 = vsel %vm1645_vm8, %v6387_v46, 0.0  ;;  %v7998_v53 = vadd.f32 %v12659_v47, %v6284_v25  ;;  %v7572_v54 = vpop.f32.mrb[61].mxu1  ;;  %7678 = vmatmul.mubr.msk.f32.gmra.mrb[160].mxu0 %vm1645_vm8, %v6387_v46 }
 0x746   : > { %v6416_v38 = vadd.f32 %v6415_v28, %v6414_v30  ;;  %7680 = vmatprep.mubr.msk.f32.mxu0 %vm9243_vm2, %v13176_v26 }
 0x747   : > { %v6388_v18 = vmax.f32 %v7998_v53, 0.0 }
 0x748   : > { %v6289_v5 = vpop.f32.mrb[62].mxu1 }
 0x749   : > { %v6417_v11 = vsel %vm1645_vm8, %v6388_v18, 0.0  ;;  %v7999_v49 = vadd.f32 %v12659_v47, %v6289_v5  ;;  %v7575_v24 = vpop.f32.mrb[63].mxu1  ;;  %7681 = vmatmul.mubr.msk.f32.gmra.mrb[162].mxu0 %vm1645_vm8, %v6388_v18 }
 0x74a   : > { %v6418_v2 = vadd.f32 %v6417_v11, %v6416_v38  ;;  %7683 = vmatprep.mubr.msk.f32.mxu0 %vm9243_vm2, %v13176_v26 }
 0x74b   : > { %v6389_v6 = vmax.f32 %v7999_v49, 0.0 }
 0x74c   : > { %v6294_v58 = vpop.f32.mrb[64].mxu1 }
 0x74d   : > { %v6419_v17 = vsel %vm1645_vm8, %v6389_v6, 0.0  ;;  %v8000_v16 = vadd.f32 %v12659_v47, %v6294_v58  ;;  %v7578_v13 = vpop.f32.mrb[65].mxu1  ;;  %7684 = vmatmul.mubr.msk.f32.gmra.mrb[164].mxu0 %vm1645_vm8, %v6389_v6 }
 0x74e   : > { %v6420_v27 = vadd.f32 %v6419_v17, %v6418_v2  ;;  %7686 = vmatprep.mubr.msk.f32.mxu0 %vm9243_vm2, %v13176_v26 }
 0x74f   : > { %v6390_v45 = vmax.f32 %v8000_v16, 0.0 }
 0x750   : > { %v6299_v56 = vpop.f32.mrb[66].mxu1 }
 0x751   : > { %v6421_v59 = vsel %vm1645_vm8, %v6390_v45, 0.0  ;;  %v8001_v32 = vadd.f32 %v12659_v47, %v6299_v56  ;;  %v7581_v52 = vpop.f32.mrb[67].mxu1  ;;  %7687 = vmatmul.mubr.msk.f32.gmra.mrb[166].mxu0 %vm1645_vm8, %v6390_v45 }
 0x752   : > { %v6422_v48 = vadd.f32 %v6421_v59, %v6420_v27  ;;  %7689 = vmatprep.mubr.msk.f32.mxu0 %vm9243_vm2, %v13176_v26 }
 0x753   : > { %v6391_v23 = vmax.f32 %v8001_v32, 0.0 }
 0x754   : > { %v6304_v62 = vpop.f32.mrb[68].mxu1 }
 0x755   : > { %v6423_v21 = vsel %vm1645_vm8, %v6391_v23, 0.0  ;;  %v8002_v33 = vadd.f32 %v12659_v47, %v6304_v62  ;;  %v7584_v37 = vpop.f32.mrb[69].mxu1  ;;  %7690 = vmatmul.mubr.msk.f32.gmra.mrb[168].mxu0 %vm1645_vm8, %v6391_v23 }
 0x756   : > { %v6424_v40 = vadd.f32 %v6423_v21, %v6422_v48  ;;  %7692 = vmatprep.mubr.msk.f32.mxu0 %vm9243_vm2, %v13176_v26 }
 0x757   : > { %v6392_v9 = vmax.f32 %v8002_v33, 0.0 }
 0x758   : > { %v6309_v50 = vpop.f32.mrb[70].mxu1 }
 0x759   : > { %v6425_v55 = vsel %vm1645_vm8, %v6392_v9, 0.0  ;;  %v8003_v4 = vadd.f32 %v12659_v47, %v6309_v50  ;;  %v7587_v12 = vpop.f32.mrb[71].mxu1  ;;  %7693 = vmatmul.mubr.msk.f32.gmra.mrb[170].mxu0 %vm1645_vm8, %v6392_v9 }
 0x75a   : > { %v6426_v8 = vadd.f32 %v6425_v55, %v6424_v40  ;;  %7695 = vmatprep.mubr.msk.f32.mxu0 %vm9243_vm2, %v13176_v26 }
 0x75b   : > { %v6393_v7 = vmax.f32 %v8003_v4, 0.0 }
 0x75c   : > { %v6314_v34 = vpop.f32.mrb[72].mxu1 }
 0x75d   : > { %v6427_v42 = vsel %vm1645_vm8, %v6393_v7, 0.0  ;;  %v8004_v51 = vadd.f32 %v12659_v47, %v6314_v34  ;;  %v7590_v1 = vpop.f32.mrb[73].mxu1  ;;  %7696 = vmatmul.mubr.msk.f32.gmra.mrb[172].mxu0 %vm1645_vm8, %v6393_v7 }
 0x75e   : > { %v6428_v36 = vadd.f32 %v6427_v42, %v6426_v8  ;;  %7698 = vmatprep.mubr.msk.f32.mxu0 %vm9243_vm2, %v13176_v26 }
 0x75f   : > { %v6394_v63 = vmax.f32 %v8004_v51, 0.0 }
 0x760   : > { %v6319_v0 = vpop.f32.mrb[74].mxu1 }
 0x761   : > { %v6429_v57 = vsel %vm1645_vm8, %v6394_v63, 0.0  ;;  %v8005_v3 = vadd.f32 %v12659_v47, %v6319_v0  ;;  %v7593_v20 = vpop.f32.mrb[75].mxu1  ;;  %7699 = vmatmul.mubr.msk.f32.gmra.mrb[174].mxu0 %vm1645_vm8, %v6394_v63 }
 0x762   : > { %v6430_v15 = vadd.f32 %v6429_v57, %v6428_v36  ;;  %7701 = vmatprep.mubr.msk.f32.mxu0 %vm9243_vm2, %v13176_v26 }
 0x763   : > { %v6395_v31 = vmax.f32 %v8005_v3, 0.0 }
 0x764   : > { %v6324_v35 = vpop.f32.mrb[76].mxu1 }
 0x765   : > { %v6431_v10 = vsel %vm1645_vm8, %v6395_v31, 0.0  ;;  %v8006_v61 = vadd.f32 %v12659_v47, %v6324_v35  ;;  %v7596_v41 = vpop.f32.mrb[77].mxu1  ;;  %7702 = vmatmul.mubr.msk.f32.gmra.mrb[176].mxu0 %vm1645_vm8, %v6395_v31 }
 0x766   : > { %v6432_v29 = vadd.f32 %v6431_v10, %v6430_v15  ;;  %7704 = vmatprep.mubr.msk.f32.mxu0 %vm9243_vm2, %v13176_v26 }
 0x767   : > { %v6396_v44 = vmax.f32 %v8006_v61, 0.0 }
 0x768   : > { %v6329_v14 = vpop.f32.mrb[78].mxu1 }
 0x769   : > { %v6433_v19 = vsel %vm1645_vm8, %v6396_v44, 0.0  ;;  %v8007_v39 = vadd.f32 %v12659_v47, %v6329_v14  ;;  %v7599_v60 = vpop.f32.mrb[79].mxu1  ;;  %7705 = vmatmul.mubr.msk.f32.gmra.mrb[178].mxu0 %vm1645_vm8, %v6396_v44 }
 0x76a   : > { %v6434_v22 = vadd.f32 %v6433_v19, %v6432_v29  ;;  %7707 = vmatprep.mubr.msk.f32.mxu0 %vm9243_vm2, %v13176_v26 }
 0x76b   : > { %v6397_v43 = vmax.f32 %v8007_v39, 0.0 }
 0x76c   : > { %v6334_v30 = vpop.f32.mrb[80].mxu1 }
 0x76d   : > { %v6435_v46 = vsel %vm1645_vm8, %v6397_v43, 0.0  ;;  %v8008_v25 = vadd.f32 %v12659_v47, %v6334_v30  ;;  %v7602_v28 = vpop.f32.mrb[81].mxu1  ;;  %7708 = vmatmul.mubr.msk.f32.gmra.mrb[180].mxu0 %vm1645_vm8, %v6397_v43 }
 0x76e   : > { %v6436_v53 = vadd.f32 %v6435_v46, %v6434_v22  ;;  %7710 = vmatprep.mubr.msk.f32.mxu0 %vm9243_vm2, %v13176_v26 }
 0x76f   : > { %v6398_v54 = vmax.f32 %v8008_v25, 0.0 }
 0x770   : > { %v6339_v38 = vpop.f32.mrb[82].mxu1 }
 0x771   : > { %v6437_v18 = vsel %vm1645_vm8, %v6398_v54, 0.0  ;;  %v8009_v5 = vadd.f32 %v12659_v47, %v6339_v38  ;;  %v7605_v11 = vpop.f32.mrb[83].mxu1  ;;  %7711 = vmatmul.mubr.msk.f32.gmra.mrb[182].mxu0 %vm1645_vm8, %v6398_v54  ;;  %v13383_v38 = vld [vmem:[#allocation59_spill] sm:$0xff] }
 0x772   : > { %v6438_v49 = vadd.f32 %v6437_v18, %v6436_v53  ;;  %7713 = vmatprep.mubr.msk.f32.mxu0 %vm9243_vm2, %v13176_v26 }
 0x773   : > { %v6399_v24 = vmax.f32 %v8009_v5, 0.0 }
 0x774   : > { %v6344_v2 = vpop.f32.mrb[84].mxu1 }
 0x775   : > { %v6439_v6 = vsel %vm1645_vm8, %v6399_v24, 0.0  ;;  %v8010_v58 = vadd.f32 %v12659_v47, %v6344_v2  ;;  %v7608_v17 = vpop.f32.mrb[85].mxu1  ;;  %7714 = vmatmul.mubr.msk.f32.gmra.mrb[184].mxu0 %vm1645_vm8, %v6399_v24 }
 0x776   : > { %v6440_v16 = vadd.f32 %v6439_v6, %v6438_v49  ;;  %7716 = vmatprep.mubr.msk.f32.mxu0 %vm9243_vm2, %v13176_v26 }
 0x777   : > { %v6400_v13 = vmax.f32 %v8010_v58, 0.0 }
 0x778   : > { %v6349_v27 = vpop.f32.mrb[86].mxu1 }
 0x779   : > { %v6441_v45 = vsel %vm1645_vm8, %v6400_v13, 0.0  ;;  %v8011_v56 = vadd.f32 %v12659_v47, %v6349_v27  ;;  %v7611_v59 = vpop.f32.mrb[87].mxu1  ;;  %7717 = vmatmul.mubr.msk.f32.gmra.mrb[186].mxu0 %vm1645_vm8, %v6400_v13 }
 0x77a   : > { %v6442_v32 = vadd.f32 %v6441_v45, %v6440_v16  ;;  %7719 = vmatprep.mubr.msk.f32.mxu0 %vm9243_vm2, %v13176_v26 }
 0x77b   : > { %v6401_v52 = vmax.f32 %v8011_v56, 0.0 }
 0x77c   : > { %v6354_v48 = vpop.f32.mrb[88].mxu1 }
 0x77d   : > { %v6443_v23 = vsel %vm1645_vm8, %v6401_v52, 0.0  ;;  %v8012_v62 = vadd.f32 %v12659_v47, %v6354_v48  ;;  %v7614_v21 = vpop.f32.mrb[89].mxu1  ;;  %7720 = vmatmul.mubr.msk.f32.gmra.mrb[188].mxu0 %vm1645_vm8, %v6401_v52 }
 0x77e   : > { %v6444_v33 = vadd.f32 %v6443_v23, %v6442_v32  ;;  %7722 = vmatprep.mubr.msk.f32.mxu0 %vm9243_vm2, %v13176_v26 }
 0x77f   : > { %v6402_v37 = vmax.f32 %v8012_v62, 0.0 }
 0x780   : > { %v6359_v40 = vpop.f32.mrb[90].mxu1 }
 0x781   : > { %v6445_v9 = vsel %vm1645_vm8, %v6402_v37, 0.0  ;;  %v8013_v50 = vadd.f32 %v12659_v47, %v6359_v40  ;;  %v7617_v55 = vpop.f32.mrb[91].mxu1  ;;  %7723 = vmatmul.mubr.msk.f32.gmra.mrb[190].mxu0 %vm1645_vm8, %v6402_v37 }
 0x782   : > { %v6446_v4 = vadd.f32 %v6445_v9, %v6444_v33  ;;  %7725 = vmatprep.mubr.msk.f32.mxu0 %vm9243_vm2, %v13176_v26 }
 0x783   : > { %v6403_v12 = vmax.f32 %v8013_v50, 0.0 }
 0x784   : > { %v6364_v8 = vpop.f32.mrb[92].mxu1 }
 0x785   : > { %v6447_v7 = vsel %vm1645_vm8, %v6403_v12, 0.0  ;;  %v8014_v34 = vadd.f32 %v12659_v47, %v6364_v8  ;;  %v7620_v42 = vpop.f32.mrb[93].mxu1  ;;  %7726 = vmatmul.mubr.msk.f32.gmra.mrb[192].mxu0 %vm1645_vm8, %v6403_v12 }
 0x786   : > { %v6448_v51 = vadd.f32 %v6447_v7, %v6446_v4  ;;  %7728 = vmatprep.mubr.msk.f32.mxu0 %vm9243_vm2, %v13176_v26 }
 0x787   : > { %v6404_v1 = vmax.f32 %v8014_v34, 0.0 }
 0x788   : > { %v6369_v36 = vpop.f32.mrb[94].mxu1 }
 0x789   : > { %v6449_v63 = vsel %vm1645_vm8, %v6404_v1, 0.0  ;;  %v8015_v0 = vadd.f32 %v12659_v47, %v6369_v36  ;;  %v7623_v57 = vpop.f32.mrb[95].mxu1  ;;  %7729 = vmatmul.mubr.msk.f32.gmra.mrb[194].mxu0 %vm1645_vm8, %v6404_v1 }
 0x78a   : > { %v6450_v3 = vadd.f32 %v6449_v63, %v6448_v51  ;;  %7731 = vmatprep.mubr.msk.f32.mxu0 %vm9243_vm2, %v13176_v26 }
 0x78b   : > { %v6405_v20 = vmax.f32 %v8015_v0, 0.0 }
 0x78c   : > { %v6374_v15 = vpop.f32.mrb[96].mxu1 }
 0x78d   : > { %v6451_v31 = vsel %vm1645_vm8, %v6405_v20, 0.0  ;;  %v8016_v35 = vadd.f32 %v12659_v47, %v6374_v15  ;;  %v7626_v10 = vpop.f32.mrb[97].mxu1  ;;  %7732 = vmatmul.mubr.msk.f32.gmra.mrb[196].mxu0 %vm1645_vm8, %v6405_v20 }
 0x78e   : > { %v6452_v61 = vadd.f32 %v6451_v31, %v6450_v3  ;;  %7734 = vmatprep.mubr.msk.f32.mxu0 %vm9243_vm2, %v13176_v26 }
 0x78f   : > { %v6406_v41 = vmax.f32 %v8016_v35, 0.0 }
 0x790   : > { %v6379_v29 = vpop.f32.mrb[98].mxu1 }
 0x791   : > { %v6453_v44 = vsel %vm1645_vm8, %v6406_v41, 0.0  ;;  %v8017_v14 = vadd.f32 %v12659_v47, %v6379_v29  ;;  %v7629_v19 = vpop.f32.mrb[99].mxu1  ;;  %7735 = vmatmul.mubr.msk.f32.gmra.mrb[198].mxu0 %vm1645_vm8, %v6406_v41 }
 0x792   : > { %v6454_v39 = vadd.f32 %v6453_v44, %v6452_v61  ;;  %7737 = vmatprep.mubr.msk.f32.mxu0 %vm9243_vm2, %v13176_v26 }
 0x793   : > { %v6407_v60 = vmax.f32 %v8017_v14, 0.0 }
 0x795   : > { %v6455_v22 = vsel %vm3575_vm3, %v6407_v60, 0.0  ;;  %7738 = vmatmul.mubr.msk.f32.gmra.mrb[200].mxu0 %vm1645_vm8, %v6407_v60 }
 0x796   : > { %v6456_v43 = vadd.f32 %v6455_v22, %v6454_v39 }
 0x798   : > { %v6457_v30 = vrot.slane %v6456_v43, 4 }
 0x79a   : > { %v6458_v46 = vadd.f32 %v6457_v30, %v6456_v43 }
 0x79c   : > { %v6459_v25 = vrot.slane %v6458_v46, 2 }
 0x79e   : > { %v6460_v28 = vadd.f32 %v6459_v25, %v6458_v46 }
 0x7a0   : > { %v6461_v47 = vrot.slane %v6460_v28, 1 }
 0x7a2   : > { %v6462_v53 = vadd.f32 %v6461_v47, %v6460_v28 }
 0x7a4   : > { %v6463_v54 = vmul.f32 0.0051020407, %v6462_v53 }
 0x7a6   : > { %7647 = vmatmul.mubr.msk.f32.vlgmr.msra.gmra.mrb[100].mxu1 %vm1645_vm8, %v6463_v54 }
 0x808   : > { %v6680_v26 = vpop.f32.mrb[152].mxu0 }
 0x809   : > { %v6681_v18 = vadd.f32 %v6680_v26, %v13383_v38  ;;  %v7667_v5 = vpop.f32.mrb[153].mxu0 }
 0x80b   : > { %7181 = vst [vmem:[%s12054_s12 + $0xc8] sm:$0xff] %v6681_v18 }
 0x80c   : > { %v6685_v11 = vpop.f32.mrb[154].mxu0 }
 0x80d   : > { %v6686_v49 = vadd.f32 %v6685_v11, %v13383_v38  ;;  %v7670_v24 = vpop.f32.mrb[155].mxu0 }
 0x80f   : > { %7182 = vst [vmem:[%s12054_s12 + $0xd0] sm:$0xff] %v6686_v49 }
 0x810   : > { %v6690_v2 = vpop.f32.mrb[156].mxu0 }
 0x811   : > { %v6691_v6 = vadd.f32 %v6690_v2, %v13383_v38  ;;  %v7673_v58 = vpop.f32.mrb[157].mxu0 }
 0x813   : > { %7183 = vst [vmem:[%s12054_s12 + $0xd8] sm:$0xff] %v6691_v6 }
 0x814   : > { %v6695_v17 = vpop.f32.mrb[158].mxu0 }
 0x815   : > { %v6696_v16 = vadd.f32 %v6695_v17, %v13383_v38  ;;  %v7676_v13 = vpop.f32.mrb[159].mxu0 }
 0x817   : > { %7184 = vst [vmem:[%s12054_s12 + $0xe0] sm:$0xff] %v6696_v16 }
 0x818   : > { %v6700_v27 = vpop.f32.mrb[160].mxu0 }
 0x819   : > { %v6701_v45 = vadd.f32 %v6700_v27, %v13383_v38  ;;  %v7679_v56 = vpop.f32.mrb[161].mxu0 }
 0x81b   : > { %7185 = vst [vmem:[%s12054_s12 + $0xe8] sm:$0xff] %v6701_v45  ;;  %v9170_v45 = vld [vmem:[%s12899_s6] sm:$0x1] }
 0x81c   : > { %v6705_v59 = vpop.f32.mrb[162].mxu0 }
 0x81d   : > { %v6706_v32 = vadd.f32 %v6705_v59, %v13383_v38  ;;  %v7682_v52 = vpop.f32.mrb[163].mxu0 }
 0x81f   : > { %7186 = vst [vmem:[%s12054_s12 + $0xf0] sm:$0xff] %v6706_v32 }
 0x820   : > { %v6710_v48 = vpop.f32.mrb[164].mxu0 }
 0x821   : > { %v6711_v23 = vadd.f32 %v6710_v48, %v13383_v38  ;;  %v7685_v62 = vpop.f32.mrb[165].mxu0 }
 0x823   : > { %7187 = vst [vmem:[%s12054_s12 + $0xf8] sm:$0xff] %v6711_v23 }
 0x824   : > { %v6715_v21 = vpop.f32.mrb[166].mxu0 }
 0x825   : > { %v6716_v33 = vadd.f32 %v6715_v21, %v13383_v38  ;;  %v7688_v37 = vpop.f32.mrb[167].mxu0 }
 0x827   : > { %7188 = vst [vmem:[%s12054_s12 + $0x100] sm:$0xff] %v6716_v33 }
 0x828   : > { %v6720_v40 = vpop.f32.mrb[168].mxu0 }
 0x829   : > { %v6721_v9 = vadd.f32 %v6720_v40, %v13383_v38  ;;  %v7691_v50 = vpop.f32.mrb[169].mxu0 }
 0x82b   : > { %7189 = vst [vmem:[%s12054_s12 + $0x108] sm:$0xff] %v6721_v9 }
 0x82c   : > { %v6725_v55 = vpop.f32.mrb[170].mxu0 }
 0x82d   : > { %v6726_v4 = vadd.f32 %v6725_v55, %v13383_v38  ;;  %v7694_v12 = vpop.f32.mrb[171].mxu0 }
 0x82f   : > { %7190 = vst [vmem:[%s12054_s12 + $0x110] sm:$0xff] %v6726_v4 }
 0x830   : > { %v6730_v8 = vpop.f32.mrb[172].mxu0 }
 0x831   : > { %v6731_v7 = vadd.f32 %v6730_v8, %v13383_v38  ;;  %v7697_v34 = vpop.f32.mrb[173].mxu0 }
 0x833   : > { %7191 = vst [vmem:[%s12054_s12 + $0x118] sm:$0xff] %v6731_v7 }
 0x834   : > { %v6735_v42 = vpop.f32.mrb[174].mxu0 }
 0x835   : > { %v6736_v51 = vadd.f32 %v6735_v42, %v13383_v38  ;;  %v7700_v1 = vpop.f32.mrb[175].mxu0 }
 0x837   : > { %7192 = vst [vmem:[%s12054_s12 + $0x120] sm:$0xff] %v6736_v51 }
 0x838   : > { %v6740_v36 = vpop.f32.mrb[176].mxu0 }
 0x839   : > { %v6741_v63 = vadd.f32 %v6740_v36, %v13383_v38  ;;  %v7703_v0 = vpop.f32.mrb[177].mxu0 }
 0x83b   : > { %7193 = vst [vmem:[%s12054_s12 + $0x128] sm:$0xff] %v6741_v63 }
 0x83c   : > { %v6745_v57 = vpop.f32.mrb[178].mxu0 }
 0x83d   : > { %v6746_v3 = vadd.f32 %v6745_v57, %v13383_v38  ;;  %v7706_v20 = vpop.f32.mrb[179].mxu0 }
 0x83f   : > { %7194 = vst [vmem:[%s12054_s12 + $0x130] sm:$0xff] %v6746_v3 }
 0x840   : > { %v6750_v15 = vpop.f32.mrb[180].mxu0 }
 0x841   : > { %v6751_v31 = vadd.f32 %v6750_v15, %v13383_v38  ;;  %v7709_v35 = vpop.f32.mrb[181].mxu0 }
 0x843   : > { %7195 = vst [vmem:[%s12054_s12 + $0x138] sm:$0xff] %v6751_v31 }
 0x844   : > { %v6755_v10 = vpop.f32.mrb[182].mxu0 }
 0x845   : > { %v6756_v61 = vadd.f32 %v6755_v10, %v13383_v38  ;;  %v7712_v41 = vpop.f32.mrb[183].mxu0 }
 0x847   : > { %7196 = vst [vmem:[%s12054_s12 + $0x140] sm:$0xff] %v6756_v61 }
 0x848   : > { %v6760_v29 = vpop.f32.mrb[184].mxu0 }
 0x849   : > { %v6761_v44 = vadd.f32 %v6760_v29, %v13383_v38  ;;  %v7715_v14 = vpop.f32.mrb[185].mxu0 }
 0x84b   : > { %7197 = vst [vmem:[%s12054_s12 + $0x148] sm:$0xff] %v6761_v44 }
 0x84c   : > { %v6765_v19 = vpop.f32.mrb[186].mxu0 }
 0x84d   : > { %v6766_v39 = vadd.f32 %v6765_v19, %v13383_v38  ;;  %v7718_v60 = vpop.f32.mrb[187].mxu0 }
 0x84f   : > { %7198 = vst [vmem:[%s12054_s12 + $0x150] sm:$0xff] %v6766_v39 }
 0x850   : > { %v6770_v22 = vpop.f32.mrb[188].mxu0 }
 0x851   : > { %v6771_v43 = vadd.f32 %v6770_v22, %v13383_v38  ;;  %v7721_v30 = vpop.f32.mrb[189].mxu0 }
 0x853   : > { %7199 = vst [vmem:[%s12054_s12 + $0x158] sm:$0xff] %v6771_v43 }
 0x854   : > { %v6775_v46 = vpop.f32.mrb[190].mxu0 }
 0x855   : > { %v6776_v25 = vadd.f32 %v6775_v46, %v13383_v38  ;;  %v7724_v28 = vpop.f32.mrb[191].mxu0 }
 0x857   : > { %7200 = vst [vmem:[%s12054_s12 + $0x160] sm:$0xff] %v6776_v25 }
 0x858   : > { %v6780_v47 = vpop.f32.mrb[192].mxu0 }
 0x859   : > { %v6781_v53 = vadd.f32 %v6780_v47, %v13383_v38  ;;  %v7727_v54 = vpop.f32.mrb[193].mxu0 }
 0x85b   : > { %7201 = vst [vmem:[%s12054_s12 + $0x168] sm:$0xff] %v6781_v53 }
 0x85c   : > { %v6785_v26 = vpop.f32.mrb[194].mxu0 }
 0x85d   : > { %v6786_v18 = vadd.f32 %v6785_v26, %v13383_v38  ;;  %v7730_v5 = vpop.f32.mrb[195].mxu0 }
 0x85f   : > { %7202 = vst [vmem:[%s12054_s12 + $0x170] sm:$0xff] %v6786_v18 }
 0x860   : > { %v6790_v11 = vpop.f32.mrb[196].mxu0 }
 0x861   : > { %v6791_v49 = vadd.f32 %v6790_v11, %v13383_v38  ;;  %v7733_v24 = vpop.f32.mrb[197].mxu0 }
 0x863   : > { %7203 = vst [vmem:[%s12054_s12 + $0x178] sm:$0xff] %v6791_v49 }
 0x864   : > { %v6795_v2 = vpop.f32.mrb[198].mxu0 }
 0x865   : > { %v6796_v6 = vadd.f32 %v6795_v2, %v13383_v38  ;;  %v7736_v58 = vpop.f32.mrb[199].mxu0 }
 0x867   : > { %7204 = vst [vmem:[%s12054_s12 + $0x180] sm:$0xff] %v6796_v6 }
 0x868   : > { %v6800_v17 = vpop.f32.mrb[200].mxu0 }
 0x869   : > { %v6801_v16 = vadd.f32 %v6800_v17, %v13383_v38  ;;  %v7739_v13 = vpop.f32.mrb[201].mxu0 }
 0x86b   : > { %7205 = vst [vmem:[%s12054_s12 + $0x188] sm:$0xf] %v6801_v16  ;;  %s9171_s12 = scalar_lea.vmem %s12837_s22, 32 }
 0x86c   : > { %p9172_p11 = scmp.ne.s32.totalorder %s12837_s22, %s9171_s12  ;;  %p9179_p1 = scmp.lt.s32.totalorder %s9177_s10, %s9171_s12 }
 0x86e   : > { %p9173_p12 = pnand %p9172_p11, %p9329_p5  ;;  %p9180_p2 = por %p9179_p1, %p9178_p0 }
 0x870   : > { %p9174_p13 = pneg %p9173_p12 }
 0x872   : > { %p9181_p3 = pnand %p9180_p2, %p9174_p13 }
 0x879   : > { %v6533_v27 = vpop.f32.mrb[100].mxu1 }
 0x87a   : > { %v6534_v56 = vadd.f32 %v9170_v45, %v6533_v27  ;;  %v7648_v59 = vpop.f32.mrb[101].mxu1 }
 0x87c   : > { %7155 = vst [vmem:[%s12043_s21 + $0x1] sm:$0x1] %v6534_v56 }
 0x87d   : > { %9184 = shalt.err (!%p9181_p3)
}
 0x87e   : > { %s9185_s25 = scalar_lea.hbm %s12845_s19, 32  ;;  %s9189_s17 = scalar_lea.hbm %s12901_s8, 64 }
 0x87f   : > { %p9186_p4 = scmp.ne.s32.totalorder %s12845_s19, %s9185_s25  ;;  %p9190_p9 = scmp.lt.u32.totalorder %s12845_s19, %s12901_s8 }
 0x880   : > { %p9191_p10 = scmp.lt.u32.totalorder %s9189_s17, %s9185_s25  ;;  %p9193_p12 = scmp.lt.u32.totalorder %s9185_s25, %s12845_s19 }
 0x881   : > { %p9187_p7 = pnand %p9186_p4, %p9329_p5 }
 0x882   : > { %p9192_p11 = por %p9191_p10, %p9190_p9 }
 0x883   : > { %p9188_p8 = pneg %p9187_p7 }
 0x884   : > { %p9194_p13 = por %p9193_p12, %p9192_p11 }
 0x886   : > { %p9195_p0 = pnand %p9194_p13, %p9188_p8 }
 0x888   : > { %9198 = shalt.err (!%p9195_p0)
}
 0x889   : > { %s9245_s12 = smov 1  }
 0x88a   : > { %8169 = dma.vmem_to_hbm [thread:$0]  (%p9329_p5), %s12837_s22, 32, %s12845_s19, %s12850_s9, %s9238_s23, %s9238_s23, %s9245_s12  }
 0x88b PF: > { %p8175_p1 = scmp.ge.s32.totalorder %s9233_s30, 2  ;;  %s6878_s26 = sand.u32 1, %s9221_s27  }
 0x88c   : > { %s6879_s20 = scalar_lea.sflag [#allocation5], %s6878_s26 }
 0x88d   : > { %p8172_p2 = pnand %p8175_p1, %p9333_p6 }
 0x88f   : > { %9216 = dma.done.wait (!%p8172_p2), %s6879_s20, 32  }
 0x890   : > { %9218 = vsyncadd (!%p8172_p2), %s6879_s20, 4294967264  ;;  %p19_p3 = scmp.ge.s32.totalorder %s9316_s11, 4   ;;  %s13384_s27 = smov %s9225_s28 }
 0x891   : > { %s13385_s28 = smov %s9229_s29  ;;  %s13386_s29 = smov %s9327_s14 }
 0x892   : > { %s13387_s30 = smov %s9316_s11  ;;  %21 = sbr.rel (!%p19_p3) target bundleno = 3 (0x3), region = 98 }
 0x899   :  { %6884 = vsyncpa [#allocation5], 1 }
 0x89a   :  { %6886 = vsyncpa [#allocation5 + $0x1], 1 }

</bundles_post_ra>
